<compile_context>
chip_gen: v5e
topology: v5e:2x2
jax: 0.10.0
libtpu: 0.0.40
codegen_flags: <defaults>
</compile_context>

<pallas_src>
import numpy as np

import jax
import jax.numpy as jnp
from jax import lax
from jax.experimental import pallas as pl
from jax.experimental.pallas import tpu as pltpu

EPS = 1e-5                     # PyTorch BatchNorm2d default eps
NUM_CLASSES = 10

# Static per-layer configuration: (cin, cout, ksize, pad, relu_first, pool_after)
LAYERS = (
    (1,  10, 3, 1, True,  False),   # convblock1: Conv-ReLU-BN-Dropout
    (10, 14, 3, 1, True,  True),    # convblock2 -> MaxPool(2,2)
    (14, 10, 1, 0, True,  False),   # convblock3 (1x1)
    (10, 14, 3, 0, False, False),   # convblock4: Conv-BN-ReLU
    (14, 18, 3, 0, True,  True),    # convblock5 -> MaxPool(2,2)
    (18, 10, 1, 0, True,  False),   # convblock6 (1x1)
    (10, 14, 3, 1, True,  False),   # convblock7
    (14, 10, 3, 1, True,  False),   # convblock8
)

# ---------------------------------------------------------------------------
# Flat single-image layout (one grid step == one image):
#   a 30x30 padded image is flattened to 900 lanes, position (h, w) -> 30*h+w.
# After each 2x2 pool the valid data stays in place on a stride-2 (then
# stride-4) lattice; the following convs simply use dilated tap offsets.
# ---------------------------------------------------------------------------
RS  = 30                       # row stride of the flat layout (28 + 2*pad)
IMG = RS * RS                  # 900 lanes per image
SPAN1 = 27 * RS + 28           # 838 : 28x28 valid outputs, stride-1 lattice
SPAN3 = 2 * (13 * RS + 13) + 1  # 807 : 14x14 pooled map, stride-2 lattice
SPAN4 = 2 * (11 * RS + 11) + 1  # 683 : 12x12 map, stride-2 lattice
SPAN5 = 2 * (9 * RS + 9) + 1    # 559 : 10x10 map, stride-2 lattice
SPAN6 = 4 * (4 * RS + 4) + 1    # 497 : 5x5 map, stride-4 lattice
SHIFT_P1 = RS + 1              # +31  : re-centre 28x28 into a 30x30 zero ring
SHIFT_P4 = 4 * (RS + 1)        # +124 : same shift on the stride-4 lattice


# ---------------------------------------------------------------------------
# The fused Pallas kernel (runs once per image; grid=(batch,), "parallel")
# ---------------------------------------------------------------------------
def _net5_kernel(x_ref,
                 w1, s1, b1, w2, s2, b2, w3, s3, b3, w4, s4, b4,
                 w5, s5, b5, w6, s6, b6, w7, s7, b7, w8, s8, b8,
                 mA, mB, o_ref,
                 pz1, gen1, gen2, pz2, pz3):
    f32 = jnp.float32

    def relu_bn(z, s, b):                 # Conv -> ReLU -> BN (eval-mode BN)
        return jnp.maximum(z, 0.0) * s[...] + b[...]

    def bn_relu(z, b):                    # Conv -> BN -> ReLU (scale folded into W)
        return jnp.maximum(z + b[...], 0.0)

    def conv3x3(src, w, span, dil):
        # Direct conv as 9 tap-level slab matmuls (no im2col, no row loops).
        acc = None
        for dh in range(3):
            for dw in range(3):
                off = dil * (RS * dh + dw)          # static lane offset
                t = jnp.dot(w[dh * 3 + dw], src[:, off:off + span],
                            preferred_element_type=f32)
                acc = t if acc is None else acc + t
        return acc

    # Only the three zero-ring buffers need deterministic zeros (16 vregs each).
    pz1[...] = jnp.zeros(pz1.shape, f32)
    pz2[...] = jnp.zeros(pz2.shape, f32)
    pz3[...] = jnp.zeros(pz3.shape, f32)

    # ---- convblock1 (cin == 1): tap-level broadcast MAC on the VPU ---------
    xrow = x_ref[0]                                           # (1, 900)
    acc = None
    for dh in range(3):
        for dw in range(3):
            off = RS * dh + dw
            t = w1[dh * 3 + dw] * xrow[:, off:off + SPAN1]    # (10,1)*(1,S)
            acc = t if acc is None else acc + t
    z1 = relu_bn(acc, s1, b1)
    # shifted + masked slab store -> 28x28 data inside a 30x30 zero ring
    pz1[:, SHIFT_P1:SHIFT_P1 + SPAN1] = z1 * mA[...]

    # ---- convblock2 + pool1 (2x2 max, kept on the stride-2 lattice) --------
    z2 = relu_bn(conv3x3(pz1, w2, SPAN1, 1), s2, b2)
    v = jnp.maximum(z2[:, 0:SPAN3 + 1], z2[:, RS:RS + SPAN3 + 1])
    p1 = jnp.maximum(v[:, 0:SPAN3], v[:, 1:SPAN3 + 1])

    # ---- convblock3 (1x1): single matmul on the pooled slab -----------------
    z3 = relu_bn(jnp.dot(w3[0], p1, preferred_element_type=f32), s3, b3)
    gen1[:, 0:SPAN3] = z3

    # ---- convblock4 (Conv->BN->ReLU), stride-2 (dilated) taps ---------------
    z4 = bn_relu(conv3x3(gen1, w4, SPAN4, 2), b4)
    gen2[:, 0:SPAN4] = z4

    # ---- convblock5 + pool2 (result lives on the stride-4 lattice) ----------
    z5 = relu_bn(conv3x3(gen2, w5, SPAN5, 2), s5, b5)
    v = jnp.maximum(z5[:, 0:SPAN6 + 2], z5[:, 2 * RS:2 * RS + SPAN6 + 2])
    p2 = jnp.maximum(v[:, 0:SPAN6], v[:, 2:SPAN6 + 2])

    # ---- convblock6 (1x1) ----------------------------------------------------
    z6 = relu_bn(jnp.dot(w6[0], p2, preferred_element_type=f32), s6, b6)
    pz2[:, SHIFT_P4:SHIFT_P4 + SPAN6] = z6 * mB[...]          # 5x5 inside zero ring

    # ---- convblock7 (pad 1 via the pre-zeroed ring), stride-4 taps -----------
    z7 = relu_bn(conv3x3(pz2, w7, SPAN6, 4), s7, b7)
    pz3[:, SHIFT_P4:SHIFT_P4 + SPAN6] = z7 * mB[...]

    # ---- convblock8 ----------------------------------------------------------
    z8 = relu_bn(conv3x3(pz3, w8, SPAN6, 4), s8, b8)

    # ---- GAP(5x5) + log_softmax ----------------------------------------------
    g = jnp.sum(z8 * mB[...], axis=1, keepdims=True) * (1.0 / 25.0)   # (10, 1)
    g = g - jnp.max(g, axis=0, keepdims=True)
    lse = jnp.log(jnp.sum(jnp.exp(g), axis=0, keepdims=True))
    o_ref[0, :, :] = g - lse


# ---------------------------------------------------------------------------
# Host-side wrapper
# ---------------------------------------------------------------------------
def _fold_params(params):
    """Per-tap (cout, cin) weight slabs; BN folded to per-channel scale/bias."""
    flat = []
    for (cin, cout, k, _pad, relu_first, _pool), p in zip(LAYERS, params):
        w = jnp.transpose(p["w"], (2, 3, 0, 1)).reshape(k * k, cout, cin)
        scale = p["gamma"] / jnp.sqrt(p["var"] + EPS)
        bias = p["beta"] - p["mean"] * scale
        if not relu_first:
            # Conv -> BN -> ReLU: legal to fold the BN scale into the weights.
            w = w * scale[None, :, None]
        flat += [w.astype(jnp.float32),
                 scale.reshape(cout, 1).astype(jnp.float32),
                 bias.reshape(cout, 1).astype(jnp.float32)]
    return flat


def _build_masks():
    """Host-precomputed lane-validity masks (avoids in-kernel div/mod)."""
    r = np.arange(SPAN1)
    mask_a = ((r // RS < 28) & (r % RS < 28)).astype(np.float32)[None, :]
    r = np.arange(SPAN6)
    q = r // 4
    mask_b = ((r % 4 == 0) & (q % RS < 5) & (q // RS < 5)).astype(np.float32)[None, :]
    return jnp.asarray(mask_a), jnp.asarray(mask_b)


def net5_forward(params, x_nchw):
    n = x_nchw.shape[0]
    x = jnp.pad(x_nchw.astype(jnp.float32), ((0, 0), (0, 0), (1, 1), (1, 1)))
    x = x.reshape(n, 1, IMG)                                  # (N, 1, 900)

    flat = _fold_params(params)
    mask_a, mask_b = _build_masks()
    inputs = [x] + flat + [mask_a, mask_b]

    def const_spec(shape):
        nd = len(shape)
        return pl.BlockSpec(shape, lambda i, _nd=nd: (0,) * _nd)

    in_specs = [pl.BlockSpec((1, 1, IMG), lambda i: (i, 0, 0))]
    in_specs += [const_spec(a.shape) for a in flat + [mask_a, mask_b]]

    grid_spec = pltpu.PrefetchScalarGridSpec(
        num_scalar_prefetch=0,
        grid=(n,),                                            # one image per step
        in_specs=in_specs,
        out_specs=pl.BlockSpec((1, NUM_CLASSES, 1), lambda i: (i, 0, 0)),
        scratch_shapes=[
            pltpu.VMEM((10, IMG), jnp.float32),   # pz1 : convblock2 input (zero ring)
            pltpu.VMEM((10, IMG), jnp.float32),   # gen1: convblock4 input
            pltpu.VMEM((14, IMG), jnp.float32),   # gen2: convblock5 input
            pltpu.VMEM((10, IMG), jnp.float32),   # pz2 : convblock7 input (zero ring)
            pltpu.VMEM((14, IMG), jnp.float32),   # pz3 : convblock8 input (zero ring)
        ])

    out = pl.pallas_call(
        _net5_kernel,
        out_shape=jax.ShapeDtypeStruct((n, NUM_CLASSES, 1), jnp.float32),
        grid_spec=grid_spec,
        compiler_params=pltpu.CompilerParams(
            dimension_semantics=("parallel",)),               # v7x: 2 TCs share batch
    )(*inputs)
    return out.reshape(n, NUM_CLASSES)


# ---------------------------------------------------------------------------
# Deterministic synthetic parameters + pure-JAX reference
# ---------------------------------------------------------------------------
def make_params(key):
    params = []
    for (cin, cout, k, _pad, _rf, _pool) in LAYERS:
        key, kw, kg, kb, km, kv = jax.random.split(key, 6)
        fan_in = cin * k * k
        w = jax.random.normal(kw, (cout, cin, k, k), jnp.float32) / jnp.sqrt(
            jnp.float32(fan_in))
        params.append(dict(
            w=w,
            gamma=1.0 + 0.1 * jax.random.normal(kg, (cout,), jnp.float32),
            beta=0.1 * jax.random.normal(kb, (cout,), jnp.float32),
            mean=0.1 * jax.random.normal(km, (cout,), jnp.float32),
            var=1.0 + 0.1 * jax.random.uniform(kv, (cout,), jnp.float32),
        ))
    return params


def net5_reference(params, x_nchw):
    x = jnp.transpose(x_nchw, (0, 2, 3, 1)).astype(jnp.float32)
    for cfg, p in zip(LAYERS, params):
        _cin, _cout, _k, pad, relu_first, pool = cfg
        w = jnp.transpose(p["w"], (2, 3, 1, 0))               # HWIO
        y = lax.conv_general_dilated(
            x, w, window_strides=(1, 1),
            padding=((pad, pad), (pad, pad)),
            dimension_numbers=("NHWC", "HWIO", "NHWC"),
            precision=lax.Precision.HIGHEST)
        scale = p["gamma"] / jnp.sqrt(p["var"] + EPS)
        bias = p["beta"] - p["mean"] * scale
        if relu_first:
            y = jnp.maximum(y, 0.0) * scale + bias
        else:
            y = jnp.maximum(y * scale + bias, 0.0)
        if pool:
            y = lax.reduce_window(y, -jnp.inf, lax.max,
                                  (1, 2, 2, 1), (1, 2, 2, 1), "VALID")
        x = y
    g = jnp.mean(x, axis=(1, 2))
    return jax.nn.log_softmax(g, axis=-1)


if __name__ == "__main__":
    key = jax.random.PRNGKey(0)
    kp, kx = jax.random.split(key)
    params = make_params(kp)
    x = jax.random.normal(kx, (2, 1, 28, 28), jnp.float32)    # NCHW like PyTorch

    out = jax.block_until_ready(jax.jit(net5_forward)(params, x))
    ref = jax.block_until_ready(jax.jit(net5_reference)(params, x))

    assert out.shape == (2, NUM_CLASSES), out.shape
    assert bool(jnp.all(jnp.isfinite(out)))
    err = float(jnp.max(jnp.abs(out - ref)))
    assert err < 1e-3, f"mismatch vs reference: max|diff|={err}"
    print("KERNEL_OK")
</pallas_src>

<mosaic_0001>
module attributes {stable_mosaic.version = 11 : i64} {
  func.func @_net5_kernel(%arg0: i32, %arg1: memref<1x1x900xf32, #tpu.memory_space<vmem>>, %arg2: memref<9x10x1xf32, #tpu.memory_space<vmem>>, %arg3: memref<10x1xf32, #tpu.memory_space<vmem>>, %arg4: memref<10x1xf32, #tpu.memory_space<vmem>>, %arg5: memref<9x14x10xf32, #tpu.memory_space<vmem>>, %arg6: memref<14x1xf32, #tpu.memory_space<vmem>>, %arg7: memref<14x1xf32, #tpu.memory_space<vmem>>, %arg8: memref<1x10x14xf32, #tpu.memory_space<vmem>>, %arg9: memref<10x1xf32, #tpu.memory_space<vmem>>, %arg10: memref<10x1xf32, #tpu.memory_space<vmem>>, %arg11: memref<9x14x10xf32, #tpu.memory_space<vmem>>, %arg12: memref<14x1xf32, #tpu.memory_space<vmem>>, %arg13: memref<14x1xf32, #tpu.memory_space<vmem>>, %arg14: memref<9x18x14xf32, #tpu.memory_space<vmem>>, %arg15: memref<18x1xf32, #tpu.memory_space<vmem>>, %arg16: memref<18x1xf32, #tpu.memory_space<vmem>>, %arg17: memref<1x10x18xf32, #tpu.memory_space<vmem>>, %arg18: memref<10x1xf32, #tpu.memory_space<vmem>>, %arg19: memref<10x1xf32, #tpu.memory_space<vmem>>, %arg20: memref<9x14x10xf32, #tpu.memory_space<vmem>>, %arg21: memref<14x1xf32, #tpu.memory_space<vmem>>, %arg22: memref<14x1xf32, #tpu.memory_space<vmem>>, %arg23: memref<9x10x14xf32, #tpu.memory_space<vmem>>, %arg24: memref<10x1xf32, #tpu.memory_space<vmem>>, %arg25: memref<10x1xf32, #tpu.memory_space<vmem>>, %arg26: memref<1x838xf32, #tpu.memory_space<vmem>>, %arg27: memref<1x497xf32, #tpu.memory_space<vmem>>, %arg28: memref<1x10x1xf32, #tpu.memory_space<vmem>>, %arg29: memref<10x900xf32, #tpu.memory_space<vmem>>, %arg30: memref<10x900xf32, #tpu.memory_space<vmem>>, %arg31: memref<14x900xf32, #tpu.memory_space<vmem>>, %arg32: memref<10x900xf32, #tpu.memory_space<vmem>>, %arg33: memref<14x900xf32, #tpu.memory_space<vmem>>) attributes {dimension_semantics = [#tpu.dimension_semantics<parallel>], iteration_bounds = array<i64: 2>, scalar_prefetch = 0 : i64, scratch_operands = 5 : i64, tpu.core_type = #tpu.core_type<tc>, window_params = [{transform_indices = @transform_0, window_bounds = array<i64: 1, 1, 900>}, {pipeline_mode = #tpu.pipeline_mode<synchronous>, transform_indices = @transform_1, window_bounds = array<i64: 9, 10, 1>}, {pipeline_mode = #tpu.pipeline_mode<synchronous>, transform_indices = @transform_2, window_bounds = array<i64: 10, 1>}, {pipeline_mode = #tpu.pipeline_mode<synchronous>, transform_indices = @transform_3, window_bounds = array<i64: 10, 1>}, {pipeline_mode = #tpu.pipeline_mode<synchronous>, transform_indices = @transform_4, window_bounds = array<i64: 9, 14, 10>}, {pipeline_mode = #tpu.pipeline_mode<synchronous>, transform_indices = @transform_5, window_bounds = array<i64: 14, 1>}, {pipeline_mode = #tpu.pipeline_mode<synchronous>, transform_indices = @transform_6, window_bounds = array<i64: 14, 1>}, {pipeline_mode = #tpu.pipeline_mode<synchronous>, transform_indices = @transform_7, window_bounds = array<i64: 1, 10, 14>}, {pipeline_mode = #tpu.pipeline_mode<synchronous>, transform_indices = @transform_8, window_bounds = array<i64: 10, 1>}, {pipeline_mode = #tpu.pipeline_mode<synchronous>, transform_indices = @transform_9, window_bounds = array<i64: 10, 1>}, {pipeline_mode = #tpu.pipeline_mode<synchronous>, transform_indices = @transform_10, window_bounds = array<i64: 9, 14, 10>}, {pipeline_mode = #tpu.pipeline_mode<synchronous>, transform_indices = @transform_11, window_bounds = array<i64: 14, 1>}, {pipeline_mode = #tpu.pipeline_mode<synchronous>, transform_indices = @transform_12, window_bounds = array<i64: 14, 1>}, {pipeline_mode = #tpu.pipeline_mode<synchronous>, transform_indices = @transform_13, window_bounds = array<i64: 9, 18, 14>}, {pipeline_mode = #tpu.pipeline_mode<synchronous>, transform_indices = @transform_14, window_bounds = array<i64: 18, 1>}, {pipeline_mode = #tpu.pipeline_mode<synchronous>, transform_indices = @transform_15, window_bounds = array<i64: 18, 1>}, {pipeline_mode = #tpu.pipeline_mode<synchronous>, transform_indices = @transform_16, window_bounds = array<i64: 1, 10, 18>}, {pipeline_mode = #tpu.pipeline_mode<synchronous>, transform_indices = @transform_17, window_bounds = array<i64: 10, 1>}, {pipeline_mode = #tpu.pipeline_mode<synchronous>, transform_indices = @transform_18, window_bounds = array<i64: 10, 1>}, {pipeline_mode = #tpu.pipeline_mode<synchronous>, transform_indices = @transform_19, window_bounds = array<i64: 9, 14, 10>}, {pipeline_mode = #tpu.pipeline_mode<synchronous>, transform_indices = @transform_20, window_bounds = array<i64: 14, 1>}, {pipeline_mode = #tpu.pipeline_mode<synchronous>, transform_indices = @transform_21, window_bounds = array<i64: 14, 1>}, {pipeline_mode = #tpu.pipeline_mode<synchronous>, transform_indices = @transform_22, window_bounds = array<i64: 9, 10, 14>}, {pipeline_mode = #tpu.pipeline_mode<synchronous>, transform_indices = @transform_23, window_bounds = array<i64: 10, 1>}, {pipeline_mode = #tpu.pipeline_mode<synchronous>, transform_indices = @transform_24, window_bounds = array<i64: 10, 1>}, {pipeline_mode = #tpu.pipeline_mode<synchronous>, transform_indices = @transform_25, window_bounds = array<i64: 1, 838>}, {pipeline_mode = #tpu.pipeline_mode<synchronous>, transform_indices = @transform_26, window_bounds = array<i64: 1, 497>}, {transform_indices = @transform_27, window_bounds = array<i64: 1, 10, 1>}]} {
    %cst = arith.constant 0.000000e+00 : f32
    %0 = vector.broadcast %cst : f32 to vector<10x900xf32>
    %c0 = arith.constant 0 : index
    %c0_0 = arith.constant 0 : index
    %1 = vector.load %arg29[%c0, %c0_0] : memref<10x900xf32, #tpu.memory_space<vmem>>, vector<10x900xf32>
    tpu.vector_store %arg29[%c0, %c0_0], %0 {strides = array<i32>} : memref<10x900xf32, #tpu.memory_space<vmem>>, vector<10x900xf32>,
    %cst_1 = arith.constant 0.000000e+00 : f32
    %2 = vector.broadcast %cst_1 : f32 to vector<10x900xf32>
    %c0_2 = arith.constant 0 : index
    %c0_3 = arith.constant 0 : index
    %3 = vector.load %arg32[%c0_2, %c0_3] : memref<10x900xf32, #tpu.memory_space<vmem>>, vector<10x900xf32>
    tpu.vector_store %arg32[%c0_2, %c0_3], %2 {strides = array<i32>} : memref<10x900xf32, #tpu.memory_space<vmem>>, vector<10x900xf32>,
    %cst_4 = arith.constant 0.000000e+00 : f32
    %4 = vector.broadcast %cst_4 : f32 to vector<14x900xf32>
    %c0_5 = arith.constant 0 : index
    %c0_6 = arith.constant 0 : index
    %5 = vector.load %arg33[%c0_5, %c0_6] : memref<14x900xf32, #tpu.memory_space<vmem>>, vector<14x900xf32>
    tpu.vector_store %arg33[%c0_5, %c0_6], %4 {strides = array<i32>} : memref<14x900xf32, #tpu.memory_space<vmem>>, vector<14x900xf32>,
    %c0_7 = arith.constant 0 : index
    %c0_8 = arith.constant 0 : index
    %c0_9 = arith.constant 0 : index
    %6 = vector.load %arg1[%c0_7, %c0_8, %c0_9] : memref<1x1x900xf32, #tpu.memory_space<vmem>>, vector<1x1x900xf32>
    %7 = vector.shape_cast %6 : vector<1x1x900xf32> to vector<1x900xf32>
    %c0_10 = arith.constant 0 : index
    %c0_11 = arith.constant 0 : index
    %c0_12 = arith.constant 0 : index
    %8 = vector.load %arg2[%c0_10, %c0_11, %c0_12] : memref<9x10x1xf32, #tpu.memory_space<vmem>>, vector<1x10x1xf32>
    %9 = vector.shape_cast %8 : vector<1x10x1xf32> to vector<10x1xf32>
    %10 = vector.extract_strided_slice %7 {offsets = [0, 0], sizes = [1, 838], strides = [1, 1]} : vector<1x900xf32> to vector<1x838xf32>
    %11 = vector.broadcast %9 : vector<10x1xf32> to vector<10x838xf32>
    %12 = vector.broadcast %10 : vector<1x838xf32> to vector<10x838xf32>
    %13 = arith.mulf %11, %12 : vector<10x838xf32>
    %c1 = arith.constant 1 : index
    %c0_13 = arith.constant 0 : index
    %c0_14 = arith.constant 0 : index
    %14 = vector.load %arg2[%c1, %c0_13, %c0_14] : memref<9x10x1xf32, #tpu.memory_space<vmem>>, vector<1x10x1xf32>
    %15 = vector.shape_cast %14 : vector<1x10x1xf32> to vector<10x1xf32>
    %16 = vector.extract_strided_slice %7 {offsets = [0, 1], sizes = [1, 838], strides = [1, 1]} : vector<1x900xf32> to vector<1x838xf32>
    %17 = vector.broadcast %15 : vector<10x1xf32> to vector<10x838xf32>
    %18 = vector.broadcast %16 : vector<1x838xf32> to vector<10x838xf32>
    %19 = arith.mulf %17, %18 : vector<10x838xf32>
    %20 = arith.addf %13, %19 : vector<10x838xf32>
    %c2 = arith.constant 2 : index
    %c0_15 = arith.constant 0 : index
    %c0_16 = arith.constant 0 : index
    %21 = vector.load %arg2[%c2, %c0_15, %c0_16] : memref<9x10x1xf32, #tpu.memory_space<vmem>>, vector<1x10x1xf32>
    %22 = vector.shape_cast %21 : vector<1x10x1xf32> to vector<10x1xf32>
    %23 = vector.extract_strided_slice %7 {offsets = [0, 2], sizes = [1, 838], strides = [1, 1]} : vector<1x900xf32> to vector<1x838xf32>
    %24 = vector.broadcast %22 : vector<10x1xf32> to vector<10x838xf32>
    %25 = vector.broadcast %23 : vector<1x838xf32> to vector<10x838xf32>
    %26 = arith.mulf %24, %25 : vector<10x838xf32>
    %27 = arith.addf %20, %26 : vector<10x838xf32>
    %c3 = arith.constant 3 : index
    %c0_17 = arith.constant 0 : index
    %c0_18 = arith.constant 0 : index
    %28 = vector.load %arg2[%c3, %c0_17, %c0_18] : memref<9x10x1xf32, #tpu.memory_space<vmem>>, vector<1x10x1xf32>
    %29 = vector.shape_cast %28 : vector<1x10x1xf32> to vector<10x1xf32>
    %30 = vector.extract_strided_slice %7 {offsets = [0, 30], sizes = [1, 838], strides = [1, 1]} : vector<1x900xf32> to vector<1x838xf32>
    %31 = vector.broadcast %29 : vector<10x1xf32> to vector<10x838xf32>
    %32 = vector.broadcast %30 : vector<1x838xf32> to vector<10x838xf32>
    %33 = arith.mulf %31, %32 : vector<10x838xf32>
    %34 = arith.addf %27, %33 : vector<10x838xf32>
    %c4 = arith.constant 4 : index
    %c0_19 = arith.constant 0 : index
    %c0_20 = arith.constant 0 : index
    %35 = vector.load %arg2[%c4, %c0_19, %c0_20] : memref<9x10x1xf32, #tpu.memory_space<vmem>>, vector<1x10x1xf32>
    %36 = vector.shape_cast %35 : vector<1x10x1xf32> to vector<10x1xf32>
    %37 = vector.extract_strided_slice %7 {offsets = [0, 31], sizes = [1, 838], strides = [1, 1]} : vector<1x900xf32> to vector<1x838xf32>
    %38 = vector.broadcast %36 : vector<10x1xf32> to vector<10x838xf32>
    %39 = vector.broadcast %37 : vector<1x838xf32> to vector<10x838xf32>
    %40 = arith.mulf %38, %39 : vector<10x838xf32>
    %41 = arith.addf %34, %40 : vector<10x838xf32>
    %c5 = arith.constant 5 : index
    %c0_21 = arith.constant 0 : index
    %c0_22 = arith.constant 0 : index
    %42 = vector.load %arg2[%c5, %c0_21, %c0_22] : memref<9x10x1xf32, #tpu.memory_space<vmem>>, vector<1x10x1xf32>
    %43 = vector.shape_cast %42 : vector<1x10x1xf32> to vector<10x1xf32>
    %44 = vector.extract_strided_slice %7 {offsets = [0, 32], sizes = [1, 838], strides = [1, 1]} : vector<1x900xf32> to vector<1x838xf32>
    %45 = vector.broadcast %43 : vector<10x1xf32> to vector<10x838xf32>
    %46 = vector.broadcast %44 : vector<1x838xf32> to vector<10x838xf32>
    %47 = arith.mulf %45, %46 : vector<10x838xf32>
    %48 = arith.addf %41, %47 : vector<10x838xf32>
    %c6 = arith.constant 6 : index
    %c0_23 = arith.constant 0 : index
    %c0_24 = arith.constant 0 : index
    %49 = vector.load %arg2[%c6, %c0_23, %c0_24] : memref<9x10x1xf32, #tpu.memory_space<vmem>>, vector<1x10x1xf32>
    %50 = vector.shape_cast %49 : vector<1x10x1xf32> to vector<10x1xf32>
    %51 = vector.extract_strided_slice %7 {offsets = [0, 60], sizes = [1, 838], strides = [1, 1]} : vector<1x900xf32> to vector<1x838xf32>
    %52 = vector.broadcast %50 : vector<10x1xf32> to vector<10x838xf32>
    %53 = vector.broadcast %51 : vector<1x838xf32> to vector<10x838xf32>
    %54 = arith.mulf %52, %53 : vector<10x838xf32>
    %55 = arith.addf %48, %54 : vector<10x838xf32>
    %c7 = arith.constant 7 : index
    %c0_25 = arith.constant 0 : index
    %c0_26 = arith.constant 0 : index
    %56 = vector.load %arg2[%c7, %c0_25, %c0_26] : memref<9x10x1xf32, #tpu.memory_space<vmem>>, vector<1x10x1xf32>
    %57 = vector.shape_cast %56 : vector<1x10x1xf32> to vector<10x1xf32>
    %58 = vector.extract_strided_slice %7 {offsets = [0, 61], sizes = [1, 838], strides = [1, 1]} : vector<1x900xf32> to vector<1x838xf32>
    %59 = vector.broadcast %57 : vector<10x1xf32> to vector<10x838xf32>
    %60 = vector.broadcast %58 : vector<1x838xf32> to vector<10x838xf32>
    %61 = arith.mulf %59, %60 : vector<10x838xf32>
    %62 = arith.addf %55, %61 : vector<10x838xf32>
    %c8 = arith.constant 8 : index
    %c0_27 = arith.constant 0 : index
    %c0_28 = arith.constant 0 : index
    %63 = vector.load %arg2[%c8, %c0_27, %c0_28] : memref<9x10x1xf32, #tpu.memory_space<vmem>>, vector<1x10x1xf32>
    %64 = vector.shape_cast %63 : vector<1x10x1xf32> to vector<10x1xf32>
    %65 = vector.extract_strided_slice %7 {offsets = [0, 62], sizes = [1, 838], strides = [1, 1]} : vector<1x900xf32> to vector<1x838xf32>
    %66 = vector.broadcast %64 : vector<10x1xf32> to vector<10x838xf32>
    %67 = vector.broadcast %65 : vector<1x838xf32> to vector<10x838xf32>
    %68 = arith.mulf %66, %67 : vector<10x838xf32>
    %69 = arith.addf %62, %68 : vector<10x838xf32>
    %cst_29 = arith.constant 0.000000e+00 : f32
    %70 = vector.broadcast %cst_29 : f32 to vector<10x838xf32>
    %71 = arith.maximumf %69, %70 : vector<10x838xf32>
    %c0_30 = arith.constant 0 : index
    %c0_31 = arith.constant 0 : index
    %72 = vector.load %arg3[%c0_30, %c0_31] : memref<10x1xf32, #tpu.memory_space<vmem>>, vector<10x1xf32>
    %73 = vector.broadcast %72 : vector<10x1xf32> to vector<10x838xf32>
    %74 = arith.mulf %71, %73 : vector<10x838xf32>
    %c0_32 = arith.constant 0 : index
    %c0_33 = arith.constant 0 : index
    %75 = vector.load %arg4[%c0_32, %c0_33] : memref<10x1xf32, #tpu.memory_space<vmem>>, vector<10x1xf32>
    %76 = vector.broadcast %75 : vector<10x1xf32> to vector<10x838xf32>
    %77 = arith.addf %74, %76 : vector<10x838xf32>
    %c0_34 = arith.constant 0 : index
    %c0_35 = arith.constant 0 : index
    %78 = vector.load %arg26[%c0_34, %c0_35] : memref<1x838xf32, #tpu.memory_space<vmem>>, vector<1x838xf32>
    %79 = vector.broadcast %78 : vector<1x838xf32> to vector<10x838xf32>
    %80 = arith.mulf %77, %79 : vector<10x838xf32>
    %c0_36 = arith.constant 0 : index
    %c31 = arith.constant 31 : index
    %81 = vector.load %arg29[%c0_36, %c31] : memref<10x900xf32, #tpu.memory_space<vmem>>, vector<10x838xf32>
    tpu.vector_store %arg29[%c0_36, %c31], %80 {strides = array<i32>} : memref<10x900xf32, #tpu.memory_space<vmem>>, vector<10x838xf32>,
    %c0_37 = arith.constant 0 : index
    %c0_38 = arith.constant 0 : index
    %c0_39 = arith.constant 0 : index
    %82 = vector.load %arg5[%c0_37, %c0_38, %c0_39] : memref<9x14x10xf32, #tpu.memory_space<vmem>>, vector<1x14x10xf32>
    %83 = vector.shape_cast %82 : vector<1x14x10xf32> to vector<14x10xf32>
    %c0_40 = arith.constant 0 : index
    %c0_41 = arith.constant 0 : index
    %84 = vector.load %arg29[%c0_40, %c0_41] : memref<10x900xf32, #tpu.memory_space<vmem>>, vector<10x838xf32>
    %cst_42 = arith.constant dense<0.000000e+00> : vector<14x838xf32>
    %85 = tpu.matmul %83, %84, %cst_42 {dimension_numbers = #tpu.dot_dimension_numbers<[1], [0], [0], [1], [0, 0, 1, 1], [], []>} : vector<14x10xf32>, vector<10x838xf32>, vector<14x838xf32> -> vector<14x838xf32>
    %c1_43 = arith.constant 1 : index
    %c0_44 = arith.constant 0 : index
    %c0_45 = arith.constant 0 : index
    %86 = vector.load %arg5[%c1_43, %c0_44, %c0_45] : memref<9x14x10xf32, #tpu.memory_space<vmem>>, vector<1x14x10xf32>
    %87 = vector.shape_cast %86 : vector<1x14x10xf32> to vector<14x10xf32>
    %c0_46 = arith.constant 0 : index
    %c1_47 = arith.constant 1 : index
    %88 = vector.load %arg29[%c0_46, %c1_47] : memref<10x900xf32, #tpu.memory_space<vmem>>, vector<10x838xf32>
    %cst_48 = arith.constant dense<0.000000e+00> : vector<14x838xf32>
    %89 = tpu.matmul %87, %88, %cst_48 {dimension_numbers = #tpu.dot_dimension_numbers<[1], [0], [0], [1], [0, 0, 1, 1], [], []>} : vector<14x10xf32>, vector<10x838xf32>, vector<14x838xf32> -> vector<14x838xf32>
    %90 = arith.addf %85, %89 : vector<14x838xf32>
    %c2_49 = arith.constant 2 : index
    %c0_50 = arith.constant 0 : index
    %c0_51 = arith.constant 0 : index
    %91 = vector.load %arg5[%c2_49, %c0_50, %c0_51] : memref<9x14x10xf32, #tpu.memory_space<vmem>>, vector<1x14x10xf32>
    %92 = vector.shape_cast %91 : vector<1x14x10xf32> to vector<14x10xf32>
    %c0_52 = arith.constant 0 : index
    %c2_53 = arith.constant 2 : index
    %93 = vector.load %arg29[%c0_52, %c2_53] : memref<10x900xf32, #tpu.memory_space<vmem>>, vector<10x838xf32>
    %cst_54 = arith.constant dense<0.000000e+00> : vector<14x838xf32>
    %94 = tpu.matmul %92, %93, %cst_54 {dimension_numbers = #tpu.dot_dimension_numbers<[1], [0], [0], [1], [0, 0, 1, 1], [], []>} : vector<14x10xf32>, vector<10x838xf32>, vector<14x838xf32> -> vector<14x838xf32>
    %95 = arith.addf %90, %94 : vector<14x838xf32>
    %c3_55 = arith.constant 3 : index
    %c0_56 = arith.constant 0 : index
    %c0_57 = arith.constant 0 : index
    %96 = vector.load %arg5[%c3_55, %c0_56, %c0_57] : memref<9x14x10xf32, #tpu.memory_space<vmem>>, vector<1x14x10xf32>
    %97 = vector.shape_cast %96 : vector<1x14x10xf32> to vector<14x10xf32>
    %c0_58 = arith.constant 0 : index
    %c30 = arith.constant 30 : index
    %98 = vector.load %arg29[%c0_58, %c30] : memref<10x900xf32, #tpu.memory_space<vmem>>, vector<10x838xf32>
    %cst_59 = arith.constant dense<0.000000e+00> : vector<14x838xf32>
    %99 = tpu.matmul %97, %98, %cst_59 {dimension_numbers = #tpu.dot_dimension_numbers<[1], [0], [0], [1], [0, 0, 1, 1], [], []>} : vector<14x10xf32>, vector<10x838xf32>, vector<14x838xf32> -> vector<14x838xf32>
    %100 = arith.addf %95, %99 : vector<14x838xf32>
    %c4_60 = arith.constant 4 : index
    %c0_61 = arith.constant 0 : index
    %c0_62 = arith.constant 0 : index
    %101 = vector.load %arg5[%c4_60, %c0_61, %c0_62] : memref<9x14x10xf32, #tpu.memory_space<vmem>>, vector<1x14x10xf32>
    %102 = vector.shape_cast %101 : vector<1x14x10xf32> to vector<14x10xf32>
    %c0_63 = arith.constant 0 : index
    %c31_64 = arith.constant 31 : index
    %103 = vector.load %arg29[%c0_63, %c31_64] : memref<10x900xf32, #tpu.memory_space<vmem>>, vector<10x838xf32>
    %cst_65 = arith.constant dense<0.000000e+00> : vector<14x838xf32>
    %104 = tpu.matmul %102, %103, %cst_65 {dimension_numbers = #tpu.dot_dimension_numbers<[1], [0], [0], [1], [0, 0, 1, 1], [], []>} : vector<14x10xf32>, vector<10x838xf32>, vector<14x838xf32> -> vector<14x838xf32>
    %105 = arith.addf %100, %104 : vector<14x838xf32>
    %c5_66 = arith.constant 5 : index
    %c0_67 = arith.constant 0 : index
    %c0_68 = arith.constant 0 : index
    %106 = vector.load %arg5[%c5_66, %c0_67, %c0_68] : memref<9x14x10xf32, #tpu.memory_space<vmem>>, vector<1x14x10xf32>
    %107 = vector.shape_cast %106 : vector<1x14x10xf32> to vector<14x10xf32>
    %c0_69 = arith.constant 0 : index
    %c32 = arith.constant 32 : index
    %108 = vector.load %arg29[%c0_69, %c32] : memref<10x900xf32, #tpu.memory_space<vmem>>, vector<10x838xf32>
    %cst_70 = arith.constant dense<0.000000e+00> : vector<14x838xf32>
    %109 = tpu.matmul %107, %108, %cst_70 {dimension_numbers = #tpu.dot_dimension_numbers<[1], [0], [0], [1], [0, 0, 1, 1], [], []>} : vector<14x10xf32>, vector<10x838xf32>, vector<14x838xf32> -> vector<14x838xf32>
    %110 = arith.addf %105, %109 : vector<14x838xf32>
    %c6_71 = arith.constant 6 : index
    %c0_72 = arith.constant 0 : index
    %c0_73 = arith.constant 0 : index
    %111 = vector.load %arg5[%c6_71, %c0_72, %c0_73] : memref<9x14x10xf32, #tpu.memory_space<vmem>>, vector<1x14x10xf32>
    %112 = vector.shape_cast %111 : vector<1x14x10xf32> to vector<14x10xf32>
    %c0_74 = arith.constant 0 : index
    %c60 = arith.constant 60 : index
    %113 = vector.load %arg29[%c0_74, %c60] : memref<10x900xf32, #tpu.memory_space<vmem>>, vector<10x838xf32>
    %cst_75 = arith.constant dense<0.000000e+00> : vector<14x838xf32>
    %114 = tpu.matmul %112, %113, %cst_75 {dimension_numbers = #tpu.dot_dimension_numbers<[1], [0], [0], [1], [0, 0, 1, 1], [], []>} : vector<14x10xf32>, vector<10x838xf32>, vector<14x838xf32> -> vector<14x838xf32>
    %115 = arith.addf %110, %114 : vector<14x838xf32>
    %c7_76 = arith.constant 7 : index
    %c0_77 = arith.constant 0 : index
    %c0_78 = arith.constant 0 : index
    %116 = vector.load %arg5[%c7_76, %c0_77, %c0_78] : memref<9x14x10xf32, #tpu.memory_space<vmem>>, vector<1x14x10xf32>
    %117 = vector.shape_cast %116 : vector<1x14x10xf32> to vector<14x10xf32>
    %c0_79 = arith.constant 0 : index
    %c61 = arith.constant 61 : index
    %118 = vector.load %arg29[%c0_79, %c61] : memref<10x900xf32, #tpu.memory_space<vmem>>, vector<10x838xf32>
    %cst_80 = arith.constant dense<0.000000e+00> : vector<14x838xf32>
    %119 = tpu.matmul %117, %118, %cst_80 {dimension_numbers = #tpu.dot_dimension_numbers<[1], [0], [0], [1], [0, 0, 1, 1], [], []>} : vector<14x10xf32>, vector<10x838xf32>, vector<14x838xf32> -> vector<14x838xf32>
    %120 = arith.addf %115, %119 : vector<14x838xf32>
    %c8_81 = arith.constant 8 : index
    %c0_82 = arith.constant 0 : index
    %c0_83 = arith.constant 0 : index
    %121 = vector.load %arg5[%c8_81, %c0_82, %c0_83] : memref<9x14x10xf32, #tpu.memory_space<vmem>>, vector<1x14x10xf32>
    %122 = vector.shape_cast %121 : vector<1x14x10xf32> to vector<14x10xf32>
    %c0_84 = arith.constant 0 : index
    %c62 = arith.constant 62 : index
    %123 = vector.load %arg29[%c0_84, %c62] : memref<10x900xf32, #tpu.memory_space<vmem>>, vector<10x838xf32>
    %cst_85 = arith.constant dense<0.000000e+00> : vector<14x838xf32>
    %124 = tpu.matmul %122, %123, %cst_85 {dimension_numbers = #tpu.dot_dimension_numbers<[1], [0], [0], [1], [0, 0, 1, 1], [], []>} : vector<14x10xf32>, vector<10x838xf32>, vector<14x838xf32> -> vector<14x838xf32>
    %125 = arith.addf %120, %124 : vector<14x838xf32>
    %cst_86 = arith.constant 0.000000e+00 : f32
    %126 = vector.broadcast %cst_86 : f32 to vector<14x838xf32>
    %127 = arith.maximumf %125, %126 : vector<14x838xf32>
    %c0_87 = arith.constant 0 : index
    %c0_88 = arith.constant 0 : index
    %128 = vector.load %arg6[%c0_87, %c0_88] : memref<14x1xf32, #tpu.memory_space<vmem>>, vector<14x1xf32>
    %129 = vector.broadcast %128 : vector<14x1xf32> to vector<14x838xf32>
    %130 = arith.mulf %127, %129 : vector<14x838xf32>
    %c0_89 = arith.constant 0 : index
    %c0_90 = arith.constant 0 : index
    %131 = vector.load %arg7[%c0_89, %c0_90] : memref<14x1xf32, #tpu.memory_space<vmem>>, vector<14x1xf32>
    %132 = vector.broadcast %131 : vector<14x1xf32> to vector<14x838xf32>
    %133 = arith.addf %130, %132 : vector<14x838xf32>
    %134 = vector.extract_strided_slice %133 {offsets = [0, 0], sizes = [14, 808], strides = [1, 1]} : vector<14x838xf32> to vector<14x808xf32>
    %135 = vector.extract_strided_slice %133 {offsets = [0, 30], sizes = [14, 808], strides = [1, 1]} : vector<14x838xf32> to vector<14x808xf32>
    %136 = arith.maximumf %134, %135 : vector<14x808xf32>
    %137 = vector.extract_strided_slice %136 {offsets = [0, 0], sizes = [14, 807], strides = [1, 1]} : vector<14x808xf32> to vector<14x807xf32>
    %138 = vector.extract_strided_slice %136 {offsets = [0, 1], sizes = [14, 807], strides = [1, 1]} : vector<14x808xf32> to vector<14x807xf32>
    %139 = arith.maximumf %137, %138 : vector<14x807xf32>
    %c0_91 = arith.constant 0 : index
    %c0_92 = arith.constant 0 : index
    %c0_93 = arith.constant 0 : index
    %140 = vector.load %arg8[%c0_91, %c0_92, %c0_93] : memref<1x10x14xf32, #tpu.memory_space<vmem>>, vector<1x10x14xf32>
    %141 = vector.shape_cast %140 : vector<1x10x14xf32> to vector<10x14xf32>
    %cst_94 = arith.constant dense<0.000000e+00> : vector<10x807xf32>
    %142 = tpu.matmul %141, %139, %cst_94 {dimension_numbers = #tpu.dot_dimension_numbers<[1], [0], [0], [1], [0, 0, 1, 1], [], []>} : vector<10x14xf32>, vector<14x807xf32>, vector<10x807xf32> -> vector<10x807xf32>
    %cst_95 = arith.constant 0.000000e+00 : f32
    %143 = vector.broadcast %cst_95 : f32 to vector<10x807xf32>
    %144 = arith.maximumf %142, %143 : vector<10x807xf32>
    %c0_96 = arith.constant 0 : index
    %c0_97 = arith.constant 0 : index
    %145 = vector.load %arg9[%c0_96, %c0_97] : memref<10x1xf32, #tpu.memory_space<vmem>>, vector<10x1xf32>
    %146 = vector.broadcast %145 : vector<10x1xf32> to vector<10x807xf32>
    %147 = arith.mulf %144, %146 : vector<10x807xf32>
    %c0_98 = arith.constant 0 : index
    %c0_99 = arith.constant 0 : index
    %148 = vector.load %arg10[%c0_98, %c0_99] : memref<10x1xf32, #tpu.memory_space<vmem>>, vector<10x1xf32>
    %149 = vector.broadcast %148 : vector<10x1xf32> to vector<10x807xf32>
    %150 = arith.addf %147, %149 : vector<10x807xf32>
    %c0_100 = arith.constant 0 : index
    %c0_101 = arith.constant 0 : index
    %151 = vector.load %arg30[%c0_100, %c0_101] : memref<10x900xf32, #tpu.memory_space<vmem>>, vector<10x807xf32>
    tpu.vector_store %arg30[%c0_100, %c0_101], %150 {strides = array<i32>} : memref<10x900xf32, #tpu.memory_space<vmem>>, vector<10x807xf32>,
    %c0_102 = arith.constant 0 : index
    %c0_103 = arith.constant 0 : index
    %c0_104 = arith.constant 0 : index
    %152 = vector.load %arg11[%c0_102, %c0_103, %c0_104] : memref<9x14x10xf32, #tpu.memory_space<vmem>>, vector<1x14x10xf32>
    %153 = vector.shape_cast %152 : vector<1x14x10xf32> to vector<14x10xf32>
    %c0_105 = arith.constant 0 : index
    %c0_106 = arith.constant 0 : index
    %154 = vector.load %arg30[%c0_105, %c0_106] : memref<10x900xf32, #tpu.memory_space<vmem>>, vector<10x683xf32>
    %cst_107 = arith.constant dense<0.000000e+00> : vector<14x683xf32>
    %155 = tpu.matmul %153, %154, %cst_107 {dimension_numbers = #tpu.dot_dimension_numbers<[1], [0], [0], [1], [0, 0, 1, 1], [], []>} : vector<14x10xf32>, vector<10x683xf32>, vector<14x683xf32> -> vector<14x683xf32>
    %c1_108 = arith.constant 1 : index
    %c0_109 = arith.constant 0 : index
    %c0_110 = arith.constant 0 : index
    %156 = vector.load %arg11[%c1_108, %c0_109, %c0_110] : memref<9x14x10xf32, #tpu.memory_space<vmem>>, vector<1x14x10xf32>
    %157 = vector.shape_cast %156 : vector<1x14x10xf32> to vector<14x10xf32>
    %c0_111 = arith.constant 0 : index
    %c2_112 = arith.constant 2 : index
    %158 = vector.load %arg30[%c0_111, %c2_112] : memref<10x900xf32, #tpu.memory_space<vmem>>, vector<10x683xf32>
    %cst_113 = arith.constant dense<0.000000e+00> : vector<14x683xf32>
    %159 = tpu.matmul %157, %158, %cst_113 {dimension_numbers = #tpu.dot_dimension_numbers<[1], [0], [0], [1], [0, 0, 1, 1], [], []>} : vector<14x10xf32>, vector<10x683xf32>, vector<14x683xf32> -> vector<14x683xf32>
    %160 = arith.addf %155, %159 : vector<14x683xf32>
    %c2_114 = arith.constant 2 : index
    %c0_115 = arith.constant 0 : index
    %c0_116 = arith.constant 0 : index
    %161 = vector.load %arg11[%c2_114, %c0_115, %c0_116] : memref<9x14x10xf32, #tpu.memory_space<vmem>>, vector<1x14x10xf32>
    %162 = vector.shape_cast %161 : vector<1x14x10xf32> to vector<14x10xf32>
    %c0_117 = arith.constant 0 : index
    %c4_118 = arith.constant 4 : index
    %163 = vector.load %arg30[%c0_117, %c4_118] : memref<10x900xf32, #tpu.memory_space<vmem>>, vector<10x683xf32>
    %cst_119 = arith.constant dense<0.000000e+00> : vector<14x683xf32>
    %164 = tpu.matmul %162, %163, %cst_119 {dimension_numbers = #tpu.dot_dimension_numbers<[1], [0], [0], [1], [0, 0, 1, 1], [], []>} : vector<14x10xf32>, vector<10x683xf32>, vector<14x683xf32> -> vector<14x683xf32>
    %165 = arith.addf %160, %164 : vector<14x683xf32>
    %c3_120 = arith.constant 3 : index
    %c0_121 = arith.constant 0 : index
    %c0_122 = arith.constant 0 : index
    %166 = vector.load %arg11[%c3_120, %c0_121, %c0_122] : memref<9x14x10xf32, #tpu.memory_space<vmem>>, vector<1x14x10xf32>
    %167 = vector.shape_cast %166 : vector<1x14x10xf32> to vector<14x10xf32>
    %c0_123 = arith.constant 0 : index
    %c60_124 = arith.constant 60 : index
    %168 = vector.load %arg30[%c0_123, %c60_124] : memref<10x900xf32, #tpu.memory_space<vmem>>, vector<10x683xf32>
    %cst_125 = arith.constant dense<0.000000e+00> : vector<14x683xf32>
    %169 = tpu.matmul %167, %168, %cst_125 {dimension_numbers = #tpu.dot_dimension_numbers<[1], [0], [0], [1], [0, 0, 1, 1], [], []>} : vector<14x10xf32>, vector<10x683xf32>, vector<14x683xf32> -> vector<14x683xf32>
    %170 = arith.addf %165, %169 : vector<14x683xf32>
    %c4_126 = arith.constant 4 : index
    %c0_127 = arith.constant 0 : index
    %c0_128 = arith.constant 0 : index
    %171 = vector.load %arg11[%c4_126, %c0_127, %c0_128] : memref<9x14x10xf32, #tpu.memory_space<vmem>>, vector<1x14x10xf32>
    %172 = vector.shape_cast %171 : vector<1x14x10xf32> to vector<14x10xf32>
    %c0_129 = arith.constant 0 : index
    %c62_130 = arith.constant 62 : index
    %173 = vector.load %arg30[%c0_129, %c62_130] : memref<10x900xf32, #tpu.memory_space<vmem>>, vector<10x683xf32>
    %cst_131 = arith.constant dense<0.000000e+00> : vector<14x683xf32>
    %174 = tpu.matmul %172, %173, %cst_131 {dimension_numbers = #tpu.dot_dimension_numbers<[1], [0], [0], [1], [0, 0, 1, 1], [], []>} : vector<14x10xf32>, vector<10x683xf32>, vector<14x683xf32> -> vector<14x683xf32>
    %175 = arith.addf %170, %174 : vector<14x683xf32>
    %c5_132 = arith.constant 5 : index
    %c0_133 = arith.constant 0 : index
    %c0_134 = arith.constant 0 : index
    %176 = vector.load %arg11[%c5_132, %c0_133, %c0_134] : memref<9x14x10xf32, #tpu.memory_space<vmem>>, vector<1x14x10xf32>
    %177 = vector.shape_cast %176 : vector<1x14x10xf32> to vector<14x10xf32>
    %c0_135 = arith.constant 0 : index
    %c64 = arith.constant 64 : index
    %178 = vector.load %arg30[%c0_135, %c64] : memref<10x900xf32, #tpu.memory_space<vmem>>, vector<10x683xf32>
    %cst_136 = arith.constant dense<0.000000e+00> : vector<14x683xf32>
    %179 = tpu.matmul %177, %178, %cst_136 {dimension_numbers = #tpu.dot_dimension_numbers<[1], [0], [0], [1], [0, 0, 1, 1], [], []>} : vector<14x10xf32>, vector<10x683xf32>, vector<14x683xf32> -> vector<14x683xf32>
    %180 = arith.addf %175, %179 : vector<14x683xf32>
    %c6_137 = arith.constant 6 : index
    %c0_138 = arith.constant 0 : index
    %c0_139 = arith.constant 0 : index
    %181 = vector.load %arg11[%c6_137, %c0_138, %c0_139] : memref<9x14x10xf32, #tpu.memory_space<vmem>>, vector<1x14x10xf32>
    %182 = vector.shape_cast %181 : vector<1x14x10xf32> to vector<14x10xf32>
    %c0_140 = arith.constant 0 : index
    %c120 = arith.constant 120 : index
    %183 = vector.load %arg30[%c0_140, %c120] : memref<10x900xf32, #tpu.memory_space<vmem>>, vector<10x683xf32>
    %cst_141 = arith.constant dense<0.000000e+00> : vector<14x683xf32>
    %184 = tpu.matmul %182, %183, %cst_141 {dimension_numbers = #tpu.dot_dimension_numbers<[1], [0], [0], [1], [0, 0, 1, 1], [], []>} : vector<14x10xf32>, vector<10x683xf32>, vector<14x683xf32> -> vector<14x683xf32>
    %185 = arith.addf %180, %184 : vector<14x683xf32>
    %c7_142 = arith.constant 7 : index
    %c0_143 = arith.constant 0 : index
    %c0_144 = arith.constant 0 : index
    %186 = vector.load %arg11[%c7_142, %c0_143, %c0_144] : memref<9x14x10xf32, #tpu.memory_space<vmem>>, vector<1x14x10xf32>
    %187 = vector.shape_cast %186 : vector<1x14x10xf32> to vector<14x10xf32>
    %c0_145 = arith.constant 0 : index
    %c122 = arith.constant 122 : index
    %188 = vector.load %arg30[%c0_145, %c122] : memref<10x900xf32, #tpu.memory_space<vmem>>, vector<10x683xf32>
    %cst_146 = arith.constant dense<0.000000e+00> : vector<14x683xf32>
    %189 = tpu.matmul %187, %188, %cst_146 {dimension_numbers = #tpu.dot_dimension_numbers<[1], [0], [0], [1], [0, 0, 1, 1], [], []>} : vector<14x10xf32>, vector<10x683xf32>, vector<14x683xf32> -> vector<14x683xf32>
    %190 = arith.addf %185, %189 : vector<14x683xf32>
    %c8_147 = arith.constant 8 : index
    %c0_148 = arith.constant 0 : index
    %c0_149 = arith.constant 0 : index
    %191 = vector.load %arg11[%c8_147, %c0_148, %c0_149] : memref<9x14x10xf32, #tpu.memory_space<vmem>>, vector<1x14x10xf32>
    %192 = vector.shape_cast %191 : vector<1x14x10xf32> to vector<14x10xf32>
    %c0_150 = arith.constant 0 : index
    %c124 = arith.constant 124 : index
    %193 = vector.load %arg30[%c0_150, %c124] : memref<10x900xf32, #tpu.memory_space<vmem>>, vector<10x683xf32>
    %cst_151 = arith.constant dense<0.000000e+00> : vector<14x683xf32>
    %194 = tpu.matmul %192, %193, %cst_151 {dimension_numbers = #tpu.dot_dimension_numbers<[1], [0], [0], [1], [0, 0, 1, 1], [], []>} : vector<14x10xf32>, vector<10x683xf32>, vector<14x683xf32> -> vector<14x683xf32>
    %195 = arith.addf %190, %194 : vector<14x683xf32>
    %c0_152 = arith.constant 0 : index
    %c0_153 = arith.constant 0 : index
    %196 = vector.load %arg13[%c0_152, %c0_153] : memref<14x1xf32, #tpu.memory_space<vmem>>, vector<14x1xf32>
    %197 = vector.broadcast %196 : vector<14x1xf32> to vector<14x683xf32>
    %198 = arith.addf %195, %197 : vector<14x683xf32>
    %cst_154 = arith.constant 0.000000e+00 : f32
    %199 = vector.broadcast %cst_154 : f32 to vector<14x683xf32>
    %200 = arith.maximumf %198, %199 : vector<14x683xf32>
    %c0_155 = arith.constant 0 : index
    %c0_156 = arith.constant 0 : index
    %201 = vector.load %arg31[%c0_155, %c0_156] : memref<14x900xf32, #tpu.memory_space<vmem>>, vector<14x683xf32>
    tpu.vector_store %arg31[%c0_155, %c0_156], %200 {strides = array<i32>} : memref<14x900xf32, #tpu.memory_space<vmem>>, vector<14x683xf32>,
    %c0_157 = arith.constant 0 : index
    %c0_158 = arith.constant 0 : index
    %c0_159 = arith.constant 0 : index
    %202 = vector.load %arg14[%c0_157, %c0_158, %c0_159] : memref<9x18x14xf32, #tpu.memory_space<vmem>>, vector<1x18x14xf32>
    %203 = vector.shape_cast %202 : vector<1x18x14xf32> to vector<18x14xf32>
    %c0_160 = arith.constant 0 : index
    %c0_161 = arith.constant 0 : index
    %204 = vector.load %arg31[%c0_160, %c0_161] : memref<14x900xf32, #tpu.memory_space<vmem>>, vector<14x559xf32>
    %cst_162 = arith.constant dense<0.000000e+00> : vector<18x559xf32>
    %205 = tpu.matmul %203, %204, %cst_162 {dimension_numbers = #tpu.dot_dimension_numbers<[1], [0], [0], [1], [0, 0, 1, 1], [], []>} : vector<18x14xf32>, vector<14x559xf32>, vector<18x559xf32> -> vector<18x559xf32>
    %c1_163 = arith.constant 1 : index
    %c0_164 = arith.constant 0 : index
    %c0_165 = arith.constant 0 : index
    %206 = vector.load %arg14[%c1_163, %c0_164, %c0_165] : memref<9x18x14xf32, #tpu.memory_space<vmem>>, vector<1x18x14xf32>
    %207 = vector.shape_cast %206 : vector<1x18x14xf32> to vector<18x14xf32>
    %c0_166 = arith.constant 0 : index
    %c2_167 = arith.constant 2 : index
    %208 = vector.load %arg31[%c0_166, %c2_167] : memref<14x900xf32, #tpu.memory_space<vmem>>, vector<14x559xf32>
    %cst_168 = arith.constant dense<0.000000e+00> : vector<18x559xf32>
    %209 = tpu.matmul %207, %208, %cst_168 {dimension_numbers = #tpu.dot_dimension_numbers<[1], [0], [0], [1], [0, 0, 1, 1], [], []>} : vector<18x14xf32>, vector<14x559xf32>, vector<18x559xf32> -> vector<18x559xf32>
    %210 = arith.addf %205, %209 : vector<18x559xf32>
    %c2_169 = arith.constant 2 : index
    %c0_170 = arith.constant 0 : index
    %c0_171 = arith.constant 0 : index
    %211 = vector.load %arg14[%c2_169, %c0_170, %c0_171] : memref<9x18x14xf32, #tpu.memory_space<vmem>>, vector<1x18x14xf32>
    %212 = vector.shape_cast %211 : vector<1x18x14xf32> to vector<18x14xf32>
    %c0_172 = arith.constant 0 : index
    %c4_173 = arith.constant 4 : index
    %213 = vector.load %arg31[%c0_172, %c4_173] : memref<14x900xf32, #tpu.memory_space<vmem>>, vector<14x559xf32>
    %cst_174 = arith.constant dense<0.000000e+00> : vector<18x559xf32>
    %214 = tpu.matmul %212, %213, %cst_174 {dimension_numbers = #tpu.dot_dimension_numbers<[1], [0], [0], [1], [0, 0, 1, 1], [], []>} : vector<18x14xf32>, vector<14x559xf32>, vector<18x559xf32> -> vector<18x559xf32>
    %215 = arith.addf %210, %214 : vector<18x559xf32>
    %c3_175 = arith.constant 3 : index
    %c0_176 = arith.constant 0 : index
    %c0_177 = arith.constant 0 : index
    %216 = vector.load %arg14[%c3_175, %c0_176, %c0_177] : memref<9x18x14xf32, #tpu.memory_space<vmem>>, vector<1x18x14xf32>
    %217 = vector.shape_cast %216 : vector<1x18x14xf32> to vector<18x14xf32>
    %c0_178 = arith.constant 0 : index
    %c60_179 = arith.constant 60 : index
    %218 = vector.load %arg31[%c0_178, %c60_179] : memref<14x900xf32, #tpu.memory_space<vmem>>, vector<14x559xf32>
    %cst_180 = arith.constant dense<0.000000e+00> : vector<18x559xf32>
    %219 = tpu.matmul %217, %218, %cst_180 {dimension_numbers = #tpu.dot_dimension_numbers<[1], [0], [0], [1], [0, 0, 1, 1], [], []>} : vector<18x14xf32>, vector<14x559xf32>, vector<18x559xf32> -> vector<18x559xf32>
    %220 = arith.addf %215, %219 : vector<18x559xf32>
    %c4_181 = arith.constant 4 : index
    %c0_182 = arith.constant 0 : index
    %c0_183 = arith.constant 0 : index
    %221 = vector.load %arg14[%c4_181, %c0_182, %c0_183] : memref<9x18x14xf32, #tpu.memory_space<vmem>>, vector<1x18x14xf32>
    %222 = vector.shape_cast %221 : vector<1x18x14xf32> to vector<18x14xf32>
    %c0_184 = arith.constant 0 : index
    %c62_185 = arith.constant 62 : index
    %223 = vector.load %arg31[%c0_184, %c62_185] : memref<14x900xf32, #tpu.memory_space<vmem>>, vector<14x559xf32>
    %cst_186 = arith.constant dense<0.000000e+00> : vector<18x559xf32>
    %224 = tpu.matmul %222, %223, %cst_186 {dimension_numbers = #tpu.dot_dimension_numbers<[1], [0], [0], [1], [0, 0, 1, 1], [], []>} : vector<18x14xf32>, vector<14x559xf32>, vector<18x559xf32> -> vector<18x559xf32>
    %225 = arith.addf %220, %224 : vector<18x559xf32>
    %c5_187 = arith.constant 5 : index
    %c0_188 = arith.constant 0 : index
    %c0_189 = arith.constant 0 : index
    %226 = vector.load %arg14[%c5_187, %c0_188, %c0_189] : memref<9x18x14xf32, #tpu.memory_space<vmem>>, vector<1x18x14xf32>
    %227 = vector.shape_cast %226 : vector<1x18x14xf32> to vector<18x14xf32>
    %c0_190 = arith.constant 0 : index
    %c64_191 = arith.constant 64 : index
    %228 = vector.load %arg31[%c0_190, %c64_191] : memref<14x900xf32, #tpu.memory_space<vmem>>, vector<14x559xf32>
    %cst_192 = arith.constant dense<0.000000e+00> : vector<18x559xf32>
    %229 = tpu.matmul %227, %228, %cst_192 {dimension_numbers = #tpu.dot_dimension_numbers<[1], [0], [0], [1], [0, 0, 1, 1], [], []>} : vector<18x14xf32>, vector<14x559xf32>, vector<18x559xf32> -> vector<18x559xf32>
    %230 = arith.addf %225, %229 : vector<18x559xf32>
    %c6_193 = arith.constant 6 : index
    %c0_194 = arith.constant 0 : index
    %c0_195 = arith.constant 0 : index
    %231 = vector.load %arg14[%c6_193, %c0_194, %c0_195] : memref<9x18x14xf32, #tpu.memory_space<vmem>>, vector<1x18x14xf32>
    %232 = vector.shape_cast %231 : vector<1x18x14xf32> to vector<18x14xf32>
    %c0_196 = arith.constant 0 : index
    %c120_197 = arith.constant 120 : index
    %233 = vector.load %arg31[%c0_196, %c120_197] : memref<14x900xf32, #tpu.memory_space<vmem>>, vector<14x559xf32>
    %cst_198 = arith.constant dense<0.000000e+00> : vector<18x559xf32>
    %234 = tpu.matmul %232, %233, %cst_198 {dimension_numbers = #tpu.dot_dimension_numbers<[1], [0], [0], [1], [0, 0, 1, 1], [], []>} : vector<18x14xf32>, vector<14x559xf32>, vector<18x559xf32> -> vector<18x559xf32>
    %235 = arith.addf %230, %234 : vector<18x559xf32>
    %c7_199 = arith.constant 7 : index
    %c0_200 = arith.constant 0 : index
    %c0_201 = arith.constant 0 : index
    %236 = vector.load %arg14[%c7_199, %c0_200, %c0_201] : memref<9x18x14xf32, #tpu.memory_space<vmem>>, vector<1x18x14xf32>
    %237 = vector.shape_cast %236 : vector<1x18x14xf32> to vector<18x14xf32>
    %c0_202 = arith.constant 0 : index
    %c122_203 = arith.constant 122 : index
    %238 = vector.load %arg31[%c0_202, %c122_203] : memref<14x900xf32, #tpu.memory_space<vmem>>, vector<14x559xf32>
    %cst_204 = arith.constant dense<0.000000e+00> : vector<18x559xf32>
    %239 = tpu.matmul %237, %238, %cst_204 {dimension_numbers = #tpu.dot_dimension_numbers<[1], [0], [0], [1], [0, 0, 1, 1], [], []>} : vector<18x14xf32>, vector<14x559xf32>, vector<18x559xf32> -> vector<18x559xf32>
    %240 = arith.addf %235, %239 : vector<18x559xf32>
    %c8_205 = arith.constant 8 : index
    %c0_206 = arith.constant 0 : index
    %c0_207 = arith.constant 0 : index
    %241 = vector.load %arg14[%c8_205, %c0_206, %c0_207] : memref<9x18x14xf32, #tpu.memory_space<vmem>>, vector<1x18x14xf32>
    %242 = vector.shape_cast %241 : vector<1x18x14xf32> to vector<18x14xf32>
    %c0_208 = arith.constant 0 : index
    %c124_209 = arith.constant 124 : index
    %243 = vector.load %arg31[%c0_208, %c124_209] : memref<14x900xf32, #tpu.memory_space<vmem>>, vector<14x559xf32>
    %cst_210 = arith.constant dense<0.000000e+00> : vector<18x559xf32>
    %244 = tpu.matmul %242, %243, %cst_210 {dimension_numbers = #tpu.dot_dimension_numbers<[1], [0], [0], [1], [0, 0, 1, 1], [], []>} : vector<18x14xf32>, vector<14x559xf32>, vector<18x559xf32> -> vector<18x559xf32>
    %245 = arith.addf %240, %244 : vector<18x559xf32>
    %cst_211 = arith.constant 0.000000e+00 : f32
    %246 = vector.broadcast %cst_211 : f32 to vector<18x559xf32>
    %247 = arith.maximumf %245, %246 : vector<18x559xf32>
    %c0_212 = arith.constant 0 : index
    %c0_213 = arith.constant 0 : index
    %248 = vector.load %arg15[%c0_212, %c0_213] : memref<18x1xf32, #tpu.memory_space<vmem>>, vector<18x1xf32>
    %249 = vector.broadcast %248 : vector<18x1xf32> to vector<18x559xf32>
    %250 = arith.mulf %247, %249 : vector<18x559xf32>
    %c0_214 = arith.constant 0 : index
    %c0_215 = arith.constant 0 : index
    %251 = vector.load %arg16[%c0_214, %c0_215] : memref<18x1xf32, #tpu.memory_space<vmem>>, vector<18x1xf32>
    %252 = vector.broadcast %251 : vector<18x1xf32> to vector<18x559xf32>
    %253 = arith.addf %250, %252 : vector<18x559xf32>
    %254 = vector.extract_strided_slice %253 {offsets = [0, 0], sizes = [18, 499], strides = [1, 1]} : vector<18x559xf32> to vector<18x499xf32>
    %255 = vector.extract_strided_slice %253 {offsets = [0, 60], sizes = [18, 499], strides = [1, 1]} : vector<18x559xf32> to vector<18x499xf32>
    %256 = arith.maximumf %254, %255 : vector<18x499xf32>
    %257 = vector.extract_strided_slice %256 {offsets = [0, 0], sizes = [18, 497], strides = [1, 1]} : vector<18x499xf32> to vector<18x497xf32>
    %258 = vector.extract_strided_slice %256 {offsets = [0, 2], sizes = [18, 497], strides = [1, 1]} : vector<18x499xf32> to vector<18x497xf32>
    %259 = arith.maximumf %257, %258 : vector<18x497xf32>
    %c0_216 = arith.constant 0 : index
    %c0_217 = arith.constant 0 : index
    %c0_218 = arith.constant 0 : index
    %260 = vector.load %arg17[%c0_216, %c0_217, %c0_218] : memref<1x10x18xf32, #tpu.memory_space<vmem>>, vector<1x10x18xf32>
    %261 = vector.shape_cast %260 : vector<1x10x18xf32> to vector<10x18xf32>
    %cst_219 = arith.constant dense<0.000000e+00> : vector<10x497xf32>
    %262 = tpu.matmul %261, %259, %cst_219 {dimension_numbers = #tpu.dot_dimension_numbers<[1], [0], [0], [1], [0, 0, 1, 1], [], []>} : vector<10x18xf32>, vector<18x497xf32>, vector<10x497xf32> -> vector<10x497xf32>
    %cst_220 = arith.constant 0.000000e+00 : f32
    %263 = vector.broadcast %cst_220 : f32 to vector<10x497xf32>
    %264 = arith.maximumf %262, %263 : vector<10x497xf32>
    %c0_221 = arith.constant 0 : index
    %c0_222 = arith.constant 0 : index
    %265 = vector.load %arg18[%c0_221, %c0_222] : memref<10x1xf32, #tpu.memory_space<vmem>>, vector<10x1xf32>
    %266 = vector.broadcast %265 : vector<10x1xf32> to vector<10x497xf32>
    %267 = arith.mulf %264, %266 : vector<10x497xf32>
    %c0_223 = arith.constant 0 : index
    %c0_224 = arith.constant 0 : index
    %268 = vector.load %arg19[%c0_223, %c0_224] : memref<10x1xf32, #tpu.memory_space<vmem>>, vector<10x1xf32>
    %269 = vector.broadcast %268 : vector<10x1xf32> to vector<10x497xf32>
    %270 = arith.addf %267, %269 : vector<10x497xf32>
    %c0_225 = arith.constant 0 : index
    %c0_226 = arith.constant 0 : index
    %271 = vector.load %arg27[%c0_225, %c0_226] : memref<1x497xf32, #tpu.memory_space<vmem>>, vector<1x497xf32>
    %272 = vector.broadcast %271 : vector<1x497xf32> to vector<10x497xf32>
    %273 = arith.mulf %270, %272 : vector<10x497xf32>
    %c0_227 = arith.constant 0 : index
    %c124_228 = arith.constant 124 : index
    %274 = vector.load %arg32[%c0_227, %c124_228] : memref<10x900xf32, #tpu.memory_space<vmem>>, vector<10x497xf32>
    tpu.vector_store %arg32[%c0_227, %c124_228], %273 {strides = array<i32>} : memref<10x900xf32, #tpu.memory_space<vmem>>, vector<10x497xf32>,
    %c0_229 = arith.constant 0 : index
    %c0_230 = arith.constant 0 : index
    %c0_231 = arith.constant 0 : index
    %275 = vector.load %arg20[%c0_229, %c0_230, %c0_231] : memref<9x14x10xf32, #tpu.memory_space<vmem>>, vector<1x14x10xf32>
    %276 = vector.shape_cast %275 : vector<1x14x10xf32> to vector<14x10xf32>
    %c0_232 = arith.constant 0 : index
    %c0_233 = arith.constant 0 : index
    %277 = vector.load %arg32[%c0_232, %c0_233] : memref<10x900xf32, #tpu.memory_space<vmem>>, vector<10x497xf32>
    %cst_234 = arith.constant dense<0.000000e+00> : vector<14x497xf32>
    %278 = tpu.matmul %276, %277, %cst_234 {dimension_numbers = #tpu.dot_dimension_numbers<[1], [0], [0], [1], [0, 0, 1, 1], [], []>} : vector<14x10xf32>, vector<10x497xf32>, vector<14x497xf32> -> vector<14x497xf32>
    %c1_235 = arith.constant 1 : index
    %c0_236 = arith.constant 0 : index
    %c0_237 = arith.constant 0 : index
    %279 = vector.load %arg20[%c1_235, %c0_236, %c0_237] : memref<9x14x10xf32, #tpu.memory_space<vmem>>, vector<1x14x10xf32>
    %280 = vector.shape_cast %279 : vector<1x14x10xf32> to vector<14x10xf32>
    %c0_238 = arith.constant 0 : index
    %c4_239 = arith.constant 4 : index
    %281 = vector.load %arg32[%c0_238, %c4_239] : memref<10x900xf32, #tpu.memory_space<vmem>>, vector<10x497xf32>
    %cst_240 = arith.constant dense<0.000000e+00> : vector<14x497xf32>
    %282 = tpu.matmul %280, %281, %cst_240 {dimension_numbers = #tpu.dot_dimension_numbers<[1], [0], [0], [1], [0, 0, 1, 1], [], []>} : vector<14x10xf32>, vector<10x497xf32>, vector<14x497xf32> -> vector<14x497xf32>
    %283 = arith.addf %278, %282 : vector<14x497xf32>
    %c2_241 = arith.constant 2 : index
    %c0_242 = arith.constant 0 : index
    %c0_243 = arith.constant 0 : index
    %284 = vector.load %arg20[%c2_241, %c0_242, %c0_243] : memref<9x14x10xf32, #tpu.memory_space<vmem>>, vector<1x14x10xf32>
    %285 = vector.shape_cast %284 : vector<1x14x10xf32> to vector<14x10xf32>
    %c0_244 = arith.constant 0 : index
    %c8_245 = arith.constant 8 : index
    %286 = vector.load %arg32[%c0_244, %c8_245] : memref<10x900xf32, #tpu.memory_space<vmem>>, vector<10x497xf32>
    %cst_246 = arith.constant dense<0.000000e+00> : vector<14x497xf32>
    %287 = tpu.matmul %285, %286, %cst_246 {dimension_numbers = #tpu.dot_dimension_numbers<[1], [0], [0], [1], [0, 0, 1, 1], [], []>} : vector<14x10xf32>, vector<10x497xf32>, vector<14x497xf32> -> vector<14x497xf32>
    %288 = arith.addf %283, %287 : vector<14x497xf32>
    %c3_247 = arith.constant 3 : index
    %c0_248 = arith.constant 0 : index
    %c0_249 = arith.constant 0 : index
    %289 = vector.load %arg20[%c3_247, %c0_248, %c0_249] : memref<9x14x10xf32, #tpu.memory_space<vmem>>, vector<1x14x10xf32>
    %290 = vector.shape_cast %289 : vector<1x14x10xf32> to vector<14x10xf32>
    %c0_250 = arith.constant 0 : index
    %c120_251 = arith.constant 120 : index
    %291 = vector.load %arg32[%c0_250, %c120_251] : memref<10x900xf32, #tpu.memory_space<vmem>>, vector<10x497xf32>
    %cst_252 = arith.constant dense<0.000000e+00> : vector<14x497xf32>
    %292 = tpu.matmul %290, %291, %cst_252 {dimension_numbers = #tpu.dot_dimension_numbers<[1], [0], [0], [1], [0, 0, 1, 1], [], []>} : vector<14x10xf32>, vector<10x497xf32>, vector<14x497xf32> -> vector<14x497xf32>
    %293 = arith.addf %288, %292 : vector<14x497xf32>
    %c4_253 = arith.constant 4 : index
    %c0_254 = arith.constant 0 : index
    %c0_255 = arith.constant 0 : index
    %294 = vector.load %arg20[%c4_253, %c0_254, %c0_255] : memref<9x14x10xf32, #tpu.memory_space<vmem>>, vector<1x14x10xf32>
    %295 = vector.shape_cast %294 : vector<1x14x10xf32> to vector<14x10xf32>
    %c0_256 = arith.constant 0 : index
    %c124_257 = arith.constant 124 : index
    %296 = vector.load %arg32[%c0_256, %c124_257] : memref<10x900xf32, #tpu.memory_space<vmem>>, vector<10x497xf32>
    %cst_258 = arith.constant dense<0.000000e+00> : vector<14x497xf32>
    %297 = tpu.matmul %295, %296, %cst_258 {dimension_numbers = #tpu.dot_dimension_numbers<[1], [0], [0], [1], [0, 0, 1, 1], [], []>} : vector<14x10xf32>, vector<10x497xf32>, vector<14x497xf32> -> vector<14x497xf32>
    %298 = arith.addf %293, %297 : vector<14x497xf32>
    %c5_259 = arith.constant 5 : index
    %c0_260 = arith.constant 0 : index
    %c0_261 = arith.constant 0 : index
    %299 = vector.load %arg20[%c5_259, %c0_260, %c0_261] : memref<9x14x10xf32, #tpu.memory_space<vmem>>, vector<1x14x10xf32>
    %300 = vector.shape_cast %299 : vector<1x14x10xf32> to vector<14x10xf32>
    %c0_262 = arith.constant 0 : index
    %c128 = arith.constant 128 : index
    %301 = vector.load %arg32[%c0_262, %c128] : memref<10x900xf32, #tpu.memory_space<vmem>>, vector<10x497xf32>
    %cst_263 = arith.constant dense<0.000000e+00> : vector<14x497xf32>
    %302 = tpu.matmul %300, %301, %cst_263 {dimension_numbers = #tpu.dot_dimension_numbers<[1], [0], [0], [1], [0, 0, 1, 1], [], []>} : vector<14x10xf32>, vector<10x497xf32>, vector<14x497xf32> -> vector<14x497xf32>
    %303 = arith.addf %298, %302 : vector<14x497xf32>
    %c6_264 = arith.constant 6 : index
    %c0_265 = arith.constant 0 : index
    %c0_266 = arith.constant 0 : index
    %304 = vector.load %arg20[%c6_264, %c0_265, %c0_266] : memref<9x14x10xf32, #tpu.memory_space<vmem>>, vector<1x14x10xf32>
    %305 = vector.shape_cast %304 : vector<1x14x10xf32> to vector<14x10xf32>
    %c0_267 = arith.constant 0 : index
    %c240 = arith.constant 240 : index
    %306 = vector.load %arg32[%c0_267, %c240] : memref<10x900xf32, #tpu.memory_space<vmem>>, vector<10x497xf32>
    %cst_268 = arith.constant dense<0.000000e+00> : vector<14x497xf32>
    %307 = tpu.matmul %305, %306, %cst_268 {dimension_numbers = #tpu.dot_dimension_numbers<[1], [0], [0], [1], [0, 0, 1, 1], [], []>} : vector<14x10xf32>, vector<10x497xf32>, vector<14x497xf32> -> vector<14x497xf32>
    %308 = arith.addf %303, %307 : vector<14x497xf32>
    %c7_269 = arith.constant 7 : index
    %c0_270 = arith.constant 0 : index
    %c0_271 = arith.constant 0 : index
    %309 = vector.load %arg20[%c7_269, %c0_270, %c0_271] : memref<9x14x10xf32, #tpu.memory_space<vmem>>, vector<1x14x10xf32>
    %310 = vector.shape_cast %309 : vector<1x14x10xf32> to vector<14x10xf32>
    %c0_272 = arith.constant 0 : index
    %c244 = arith.constant 244 : index
    %311 = vector.load %arg32[%c0_272, %c244] : memref<10x900xf32, #tpu.memory_space<vmem>>, vector<10x497xf32>
    %cst_273 = arith.constant dense<0.000000e+00> : vector<14x497xf32>
    %312 = tpu.matmul %310, %311, %cst_273 {dimension_numbers = #tpu.dot_dimension_numbers<[1], [0], [0], [1], [0, 0, 1, 1], [], []>} : vector<14x10xf32>, vector<10x497xf32>, vector<14x497xf32> -> vector<14x497xf32>
    %313 = arith.addf %308, %312 : vector<14x497xf32>
    %c8_274 = arith.constant 8 : index
    %c0_275 = arith.constant 0 : index
    %c0_276 = arith.constant 0 : index
    %314 = vector.load %arg20[%c8_274, %c0_275, %c0_276] : memref<9x14x10xf32, #tpu.memory_space<vmem>>, vector<1x14x10xf32>
    %315 = vector.shape_cast %314 : vector<1x14x10xf32> to vector<14x10xf32>
    %c0_277 = arith.constant 0 : index
    %c248 = arith.constant 248 : index
    %316 = vector.load %arg32[%c0_277, %c248] : memref<10x900xf32, #tpu.memory_space<vmem>>, vector<10x497xf32>
    %cst_278 = arith.constant dense<0.000000e+00> : vector<14x497xf32>
    %317 = tpu.matmul %315, %316, %cst_278 {dimension_numbers = #tpu.dot_dimension_numbers<[1], [0], [0], [1], [0, 0, 1, 1], [], []>} : vector<14x10xf32>, vector<10x497xf32>, vector<14x497xf32> -> vector<14x497xf32>
    %318 = arith.addf %313, %317 : vector<14x497xf32>
    %cst_279 = arith.constant 0.000000e+00 : f32
    %319 = vector.broadcast %cst_279 : f32 to vector<14x497xf32>
    %320 = arith.maximumf %318, %319 : vector<14x497xf32>
    %c0_280 = arith.constant 0 : index
    %c0_281 = arith.constant 0 : index
    %321 = vector.load %arg21[%c0_280, %c0_281] : memref<14x1xf32, #tpu.memory_space<vmem>>, vector<14x1xf32>
    %322 = vector.broadcast %321 : vector<14x1xf32> to vector<14x497xf32>
    %323 = arith.mulf %320, %322 : vector<14x497xf32>
    %c0_282 = arith.constant 0 : index
    %c0_283 = arith.constant 0 : index
    %324 = vector.load %arg22[%c0_282, %c0_283] : memref<14x1xf32, #tpu.memory_space<vmem>>, vector<14x1xf32>
    %325 = vector.broadcast %324 : vector<14x1xf32> to vector<14x497xf32>
    %326 = arith.addf %323, %325 : vector<14x497xf32>
    %c0_284 = arith.constant 0 : index
    %c0_285 = arith.constant 0 : index
    %327 = vector.load %arg27[%c0_284, %c0_285] : memref<1x497xf32, #tpu.memory_space<vmem>>, vector<1x497xf32>
    %328 = vector.broadcast %327 : vector<1x497xf32> to vector<14x497xf32>
    %329 = arith.mulf %326, %328 : vector<14x497xf32>
    %c0_286 = arith.constant 0 : index
    %c124_287 = arith.constant 124 : index
    %330 = vector.load %arg33[%c0_286, %c124_287] : memref<14x900xf32, #tpu.memory_space<vmem>>, vector<14x497xf32>
    tpu.vector_store %arg33[%c0_286, %c124_287], %329 {strides = array<i32>} : memref<14x900xf32, #tpu.memory_space<vmem>>, vector<14x497xf32>,
    %c0_288 = arith.constant 0 : index
    %c0_289 = arith.constant 0 : index
    %c0_290 = arith.constant 0 : index
    %331 = vector.load %arg23[%c0_288, %c0_289, %c0_290] : memref<9x10x14xf32, #tpu.memory_space<vmem>>, vector<1x10x14xf32>
    %332 = vector.shape_cast %331 : vector<1x10x14xf32> to vector<10x14xf32>
    %c0_291 = arith.constant 0 : index
    %c0_292 = arith.constant 0 : index
    %333 = vector.load %arg33[%c0_291, %c0_292] : memref<14x900xf32, #tpu.memory_space<vmem>>, vector<14x497xf32>
    %cst_293 = arith.constant dense<0.000000e+00> : vector<10x497xf32>
    %334 = tpu.matmul %332, %333, %cst_293 {dimension_numbers = #tpu.dot_dimension_numbers<[1], [0], [0], [1], [0, 0, 1, 1], [], []>} : vector<10x14xf32>, vector<14x497xf32>, vector<10x497xf32> -> vector<10x497xf32>
    %c1_294 = arith.constant 1 : index
    %c0_295 = arith.constant 0 : index
    %c0_296 = arith.constant 0 : index
    %335 = vector.load %arg23[%c1_294, %c0_295, %c0_296] : memref<9x10x14xf32, #tpu.memory_space<vmem>>, vector<1x10x14xf32>
    %336 = vector.shape_cast %335 : vector<1x10x14xf32> to vector<10x14xf32>
    %c0_297 = arith.constant 0 : index
    %c4_298 = arith.constant 4 : index
    %337 = vector.load %arg33[%c0_297, %c4_298] : memref<14x900xf32, #tpu.memory_space<vmem>>, vector<14x497xf32>
    %cst_299 = arith.constant dense<0.000000e+00> : vector<10x497xf32>
    %338 = tpu.matmul %336, %337, %cst_299 {dimension_numbers = #tpu.dot_dimension_numbers<[1], [0], [0], [1], [0, 0, 1, 1], [], []>} : vector<10x14xf32>, vector<14x497xf32>, vector<10x497xf32> -> vector<10x497xf32>
    %339 = arith.addf %334, %338 : vector<10x497xf32>
    %c2_300 = arith.constant 2 : index
    %c0_301 = arith.constant 0 : index
    %c0_302 = arith.constant 0 : index
    %340 = vector.load %arg23[%c2_300, %c0_301, %c0_302] : memref<9x10x14xf32, #tpu.memory_space<vmem>>, vector<1x10x14xf32>
    %341 = vector.shape_cast %340 : vector<1x10x14xf32> to vector<10x14xf32>
    %c0_303 = arith.constant 0 : index
    %c8_304 = arith.constant 8 : index
    %342 = vector.load %arg33[%c0_303, %c8_304] : memref<14x900xf32, #tpu.memory_space<vmem>>, vector<14x497xf32>
    %cst_305 = arith.constant dense<0.000000e+00> : vector<10x497xf32>
    %343 = tpu.matmul %341, %342, %cst_305 {dimension_numbers = #tpu.dot_dimension_numbers<[1], [0], [0], [1], [0, 0, 1, 1], [], []>} : vector<10x14xf32>, vector<14x497xf32>, vector<10x497xf32> -> vector<10x497xf32>
    %344 = arith.addf %339, %343 : vector<10x497xf32>
    %c3_306 = arith.constant 3 : index
    %c0_307 = arith.constant 0 : index
    %c0_308 = arith.constant 0 : index
    %345 = vector.load %arg23[%c3_306, %c0_307, %c0_308] : memref<9x10x14xf32, #tpu.memory_space<vmem>>, vector<1x10x14xf32>
    %346 = vector.shape_cast %345 : vector<1x10x14xf32> to vector<10x14xf32>
    %c0_309 = arith.constant 0 : index
    %c120_310 = arith.constant 120 : index
    %347 = vector.load %arg33[%c0_309, %c120_310] : memref<14x900xf32, #tpu.memory_space<vmem>>, vector<14x497xf32>
    %cst_311 = arith.constant dense<0.000000e+00> : vector<10x497xf32>
    %348 = tpu.matmul %346, %347, %cst_311 {dimension_numbers = #tpu.dot_dimension_numbers<[1], [0], [0], [1], [0, 0, 1, 1], [], []>} : vector<10x14xf32>, vector<14x497xf32>, vector<10x497xf32> -> vector<10x497xf32>
    %349 = arith.addf %344, %348 : vector<10x497xf32>
    %c4_312 = arith.constant 4 : index
    %c0_313 = arith.constant 0 : index
    %c0_314 = arith.constant 0 : index
    %350 = vector.load %arg23[%c4_312, %c0_313, %c0_314] : memref<9x10x14xf32, #tpu.memory_space<vmem>>, vector<1x10x14xf32>
    %351 = vector.shape_cast %350 : vector<1x10x14xf32> to vector<10x14xf32>
    %c0_315 = arith.constant 0 : index
    %c124_316 = arith.constant 124 : index
    %352 = vector.load %arg33[%c0_315, %c124_316] : memref<14x900xf32, #tpu.memory_space<vmem>>, vector<14x497xf32>
    %cst_317 = arith.constant dense<0.000000e+00> : vector<10x497xf32>
    %353 = tpu.matmul %351, %352, %cst_317 {dimension_numbers = #tpu.dot_dimension_numbers<[1], [0], [0], [1], [0, 0, 1, 1], [], []>} : vector<10x14xf32>, vector<14x497xf32>, vector<10x497xf32> -> vector<10x497xf32>
    %354 = arith.addf %349, %353 : vector<10x497xf32>
    %c5_318 = arith.constant 5 : index
    %c0_319 = arith.constant 0 : index
    %c0_320 = arith.constant 0 : index
    %355 = vector.load %arg23[%c5_318, %c0_319, %c0_320] : memref<9x10x14xf32, #tpu.memory_space<vmem>>, vector<1x10x14xf32>
    %356 = vector.shape_cast %355 : vector<1x10x14xf32> to vector<10x14xf32>
    %c0_321 = arith.constant 0 : index
    %c128_322 = arith.constant 128 : index
    %357 = vector.load %arg33[%c0_321, %c128_322] : memref<14x900xf32, #tpu.memory_space<vmem>>, vector<14x497xf32>
    %cst_323 = arith.constant dense<0.000000e+00> : vector<10x497xf32>
    %358 = tpu.matmul %356, %357, %cst_323 {dimension_numbers = #tpu.dot_dimension_numbers<[1], [0], [0], [1], [0, 0, 1, 1], [], []>} : vector<10x14xf32>, vector<14x497xf32>, vector<10x497xf32> -> vector<10x497xf32>
    %359 = arith.addf %354, %358 : vector<10x497xf32>
    %c6_324 = arith.constant 6 : index
    %c0_325 = arith.constant 0 : index
    %c0_326 = arith.constant 0 : index
    %360 = vector.load %arg23[%c6_324, %c0_325, %c0_326] : memref<9x10x14xf32, #tpu.memory_space<vmem>>, vector<1x10x14xf32>
    %361 = vector.shape_cast %360 : vector<1x10x14xf32> to vector<10x14xf32>
    %c0_327 = arith.constant 0 : index
    %c240_328 = arith.constant 240 : index
    %362 = vector.load %arg33[%c0_327, %c240_328] : memref<14x900xf32, #tpu.memory_space<vmem>>, vector<14x497xf32>
    %cst_329 = arith.constant dense<0.000000e+00> : vector<10x497xf32>
    %363 = tpu.matmul %361, %362, %cst_329 {dimension_numbers = #tpu.dot_dimension_numbers<[1], [0], [0], [1], [0, 0, 1, 1], [], []>} : vector<10x14xf32>, vector<14x497xf32>, vector<10x497xf32> -> vector<10x497xf32>
    %364 = arith.addf %359, %363 : vector<10x497xf32>
    %c7_330 = arith.constant 7 : index
    %c0_331 = arith.constant 0 : index
    %c0_332 = arith.constant 0 : index
    %365 = vector.load %arg23[%c7_330, %c0_331, %c0_332] : memref<9x10x14xf32, #tpu.memory_space<vmem>>, vector<1x10x14xf32>
    %366 = vector.shape_cast %365 : vector<1x10x14xf32> to vector<10x14xf32>
    %c0_333 = arith.constant 0 : index
    %c244_334 = arith.constant 244 : index
    %367 = vector.load %arg33[%c0_333, %c244_334] : memref<14x900xf32, #tpu.memory_space<vmem>>, vector<14x497xf32>
    %cst_335 = arith.constant dense<0.000000e+00> : vector<10x497xf32>
    %368 = tpu.matmul %366, %367, %cst_335 {dimension_numbers = #tpu.dot_dimension_numbers<[1], [0], [0], [1], [0, 0, 1, 1], [], []>} : vector<10x14xf32>, vector<14x497xf32>, vector<10x497xf32> -> vector<10x497xf32>
    %369 = arith.addf %364, %368 : vector<10x497xf32>
    %c8_336 = arith.constant 8 : index
    %c0_337 = arith.constant 0 : index
    %c0_338 = arith.constant 0 : index
    %370 = vector.load %arg23[%c8_336, %c0_337, %c0_338] : memref<9x10x14xf32, #tpu.memory_space<vmem>>, vector<1x10x14xf32>
    %371 = vector.shape_cast %370 : vector<1x10x14xf32> to vector<10x14xf32>
    %c0_339 = arith.constant 0 : index
    %c248_340 = arith.constant 248 : index
    %372 = vector.load %arg33[%c0_339, %c248_340] : memref<14x900xf32, #tpu.memory_space<vmem>>, vector<14x497xf32>
    %cst_341 = arith.constant dense<0.000000e+00> : vector<10x497xf32>
    %373 = tpu.matmul %371, %372, %cst_341 {dimension_numbers = #tpu.dot_dimension_numbers<[1], [0], [0], [1], [0, 0, 1, 1], [], []>} : vector<10x14xf32>, vector<14x497xf32>, vector<10x497xf32> -> vector<10x497xf32>
    %374 = arith.addf %369, %373 : vector<10x497xf32>
    %cst_342 = arith.constant 0.000000e+00 : f32
    %375 = vector.broadcast %cst_342 : f32 to vector<10x497xf32>
    %376 = arith.maximumf %374, %375 : vector<10x497xf32>
    %c0_343 = arith.constant 0 : index
    %c0_344 = arith.constant 0 : index
    %377 = vector.load %arg24[%c0_343, %c0_344] : memref<10x1xf32, #tpu.memory_space<vmem>>, vector<10x1xf32>
    %378 = vector.broadcast %377 : vector<10x1xf32> to vector<10x497xf32>
    %379 = arith.mulf %376, %378 : vector<10x497xf32>
    %c0_345 = arith.constant 0 : index
    %c0_346 = arith.constant 0 : index
    %380 = vector.load %arg25[%c0_345, %c0_346] : memref<10x1xf32, #tpu.memory_space<vmem>>, vector<10x1xf32>
    %381 = vector.broadcast %380 : vector<10x1xf32> to vector<10x497xf32>
    %382 = arith.addf %379, %381 : vector<10x497xf32>
    %c0_347 = arith.constant 0 : index
    %c0_348 = arith.constant 0 : index
    %383 = vector.load %arg27[%c0_347, %c0_348] : memref<1x497xf32, #tpu.memory_space<vmem>>, vector<1x497xf32>
    %384 = vector.broadcast %383 : vector<1x497xf32> to vector<10x497xf32>
    %385 = arith.mulf %382, %384 : vector<10x497xf32>
    %cst_349 = arith.constant dense<0.000000e+00> : vector<10xf32>
    %386 = vector.multi_reduction <add>, %385, %cst_349 [1] : vector<10x497xf32> to vector<10xf32>
    %387 = vector.shape_cast %386 : vector<10xf32> to vector<10x1xf32>
    %cst_350 = arith.constant 4.000000e-02 : f32
    %388 = vector.broadcast %cst_350 : f32 to vector<10x1xf32>
    %389 = arith.mulf %387, %388 : vector<10x1xf32>
    %cst_351 = arith.constant dense<0xFF800000> : vector<1xf32>
    %390 = vector.multi_reduction <maximumf>, %389, %cst_351 [0] : vector<10x1xf32> to vector<1xf32>
    %391 = vector.shape_cast %390 : vector<1xf32> to vector<1x1xf32>
    %392 = vector.broadcast %391 : vector<1x1xf32> to vector<10x1xf32>
    %393 = arith.subf %389, %392 : vector<10x1xf32>
    %394 = math.exp %393 : vector<10x1xf32>
    %cst_352 = arith.constant dense<0.000000e+00> : vector<1xf32>
    %395 = vector.multi_reduction <add>, %394, %cst_352 [0] : vector<10x1xf32> to vector<1xf32>
    %396 = vector.shape_cast %395 : vector<1xf32> to vector<1x1xf32>
    %397 = math.log %396 : vector<1x1xf32>
    %398 = vector.broadcast %397 : vector<1x1xf32> to vector<10x1xf32>
    %399 = arith.subf %393, %398 : vector<10x1xf32>
    %c0_353 = arith.constant 0 : index
    %c0_354 = arith.constant 0 : index
    %c0_355 = arith.constant 0 : index
    %400 = vector.load %arg28[%c0_353, %c0_354, %c0_355] : memref<1x10x1xf32, #tpu.memory_space<vmem>>, vector<1x10x1xf32>
    %401 = vector.shape_cast %400 : vector<1x10x1xf32> to vector<10x1xf32>
    %402 = vector.shape_cast %399 : vector<10x1xf32> to vector<1x10x1xf32>
    tpu.vector_store %arg28[%c0_353, %c0_354, %c0_355], %402 {strides = array<i32>} : memref<1x10x1xf32, #tpu.memory_space<vmem>>, vector<1x10x1xf32>,
    return
  }
  func.func @transform_0(%arg0: i32) -> (i32, i32, i32) {
    %c0_i32 = arith.constant 0 : i32
    %c0_i32_0 = arith.constant 0 : i32
    %c0_i32_1 = arith.constant 0 : i32
    return %arg0, %c0_i32, %c0_i32_0 : i32, i32, i32
  }
  func.func @transform_1(%arg0: i32) -> (i32, i32, i32) {
    %c0_i32 = arith.constant 0 : i32
    %c0_i32_0 = arith.constant 0 : i32
    %c0_i32_1 = arith.constant 0 : i32
    %c0_i32_2 = arith.constant 0 : i32
    return %c0_i32, %c0_i32_0, %c0_i32_1 : i32, i32, i32
  }
  func.func @transform_2(%arg0: i32) -> (i32, i32) {
    %c0_i32 = arith.constant 0 : i32
    %c0_i32_0 = arith.constant 0 : i32
    %c0_i32_1 = arith.constant 0 : i32
    return %c0_i32, %c0_i32_0 : i32, i32
  }
  func.func @transform_3(%arg0: i32) -> (i32, i32) {
    %c0_i32 = arith.constant 0 : i32
    %c0_i32_0 = arith.constant 0 : i32
    %c0_i32_1 = arith.constant 0 : i32
    return %c0_i32, %c0_i32_0 : i32, i32
  }
  func.func @transform_4(%arg0: i32) -> (i32, i32, i32) {
    %c0_i32 = arith.constant 0 : i32
    %c0_i32_0 = arith.constant 0 : i32
    %c0_i32_1 = arith.constant 0 : i32
    %c0_i32_2 = arith.constant 0 : i32
    return %c0_i32, %c0_i32_0, %c0_i32_1 : i32, i32, i32
  }
  func.func @transform_5(%arg0: i32) -> (i32, i32) {
    %c0_i32 = arith.constant 0 : i32
    %c0_i32_0 = arith.constant 0 : i32
    %c0_i32_1 = arith.constant 0 : i32
    return %c0_i32, %c0_i32_0 : i32, i32
  }
  func.func @transform_6(%arg0: i32) -> (i32, i32) {
    %c0_i32 = arith.constant 0 : i32
    %c0_i32_0 = arith.constant 0 : i32
    %c0_i32_1 = arith.constant 0 : i32
    return %c0_i32, %c0_i32_0 : i32, i32
  }
  func.func @transform_7(%arg0: i32) -> (i32, i32, i32) {
    %c0_i32 = arith.constant 0 : i32
    %c0_i32_0 = arith.constant 0 : i32
    %c0_i32_1 = arith.constant 0 : i32
    %c0_i32_2 = arith.constant 0 : i32
    return %c0_i32, %c0_i32_0, %c0_i32_1 : i32, i32, i32
  }
  func.func @transform_8(%arg0: i32) -> (i32, i32) {
    %c0_i32 = arith.constant 0 : i32
    %c0_i32_0 = arith.constant 0 : i32
    %c0_i32_1 = arith.constant 0 : i32
    return %c0_i32, %c0_i32_0 : i32, i32
  }
  func.func @transform_9(%arg0: i32) -> (i32, i32) {
    %c0_i32 = arith.constant 0 : i32
    %c0_i32_0 = arith.constant 0 : i32
    %c0_i32_1 = arith.constant 0 : i32
    return %c0_i32, %c0_i32_0 : i32, i32
  }
  func.func @transform_10(%arg0: i32) -> (i32, i32, i32) {
    %c0_i32 = arith.constant 0 : i32
    %c0_i32_0 = arith.constant 0 : i32
    %c0_i32_1 = arith.constant 0 : i32
    %c0_i32_2 = arith.constant 0 : i32
    return %c0_i32, %c0_i32_0, %c0_i32_1 : i32, i32, i32
  }
  func.func @transform_11(%arg0: i32) -> (i32, i32) {
    %c0_i32 = arith.constant 0 : i32
    %c0_i32_0 = arith.constant 0 : i32
    %c0_i32_1 = arith.constant 0 : i32
    return %c0_i32, %c0_i32_0 : i32, i32
  }
  func.func @transform_12(%arg0: i32) -> (i32, i32) {
    %c0_i32 = arith.constant 0 : i32
    %c0_i32_0 = arith.constant 0 : i32
    %c0_i32_1 = arith.constant 0 : i32
    return %c0_i32, %c0_i32_0 : i32, i32
  }
  func.func @transform_13(%arg0: i32) -> (i32, i32, i32) {
    %c0_i32 = arith.constant 0 : i32
    %c0_i32_0 = arith.constant 0 : i32
    %c0_i32_1 = arith.constant 0 : i32
    %c0_i32_2 = arith.constant 0 : i32
    return %c0_i32, %c0_i32_0, %c0_i32_1 : i32, i32, i32
  }
  func.func @transform_14(%arg0: i32) -> (i32, i32) {
    %c0_i32 = arith.constant 0 : i32
    %c0_i32_0 = arith.constant 0 : i32
    %c0_i32_1 = arith.constant 0 : i32
    return %c0_i32, %c0_i32_0 : i32, i32
  }
  func.func @transform_15(%arg0: i32) -> (i32, i32) {
    %c0_i32 = arith.constant 0 : i32
    %c0_i32_0 = arith.constant 0 : i32
    %c0_i32_1 = arith.constant 0 : i32
    return %c0_i32, %c0_i32_0 : i32, i32
  }
  func.func @transform_16(%arg0: i32) -> (i32, i32, i32) {
    %c0_i32 = arith.constant 0 : i32
    %c0_i32_0 = arith.constant 0 : i32
    %c0_i32_1 = arith.constant 0 : i32
    %c0_i32_2 = arith.constant 0 : i32
    return %c0_i32, %c0_i32_0, %c0_i32_1 : i32, i32, i32
  }
  func.func @transform_17(%arg0: i32) -> (i32, i32) {
    %c0_i32 = arith.constant 0 : i32
    %c0_i32_0 = arith.constant 0 : i32
    %c0_i32_1 = arith.constant 0 : i32
    return %c0_i32, %c0_i32_0 : i32, i32
  }
  func.func @transform_18(%arg0: i32) -> (i32, i32) {
    %c0_i32 = arith.constant 0 : i32
    %c0_i32_0 = arith.constant 0 : i32
    %c0_i32_1 = arith.constant 0 : i32
    return %c0_i32, %c0_i32_0 : i32, i32
  }
  func.func @transform_19(%arg0: i32) -> (i32, i32, i32) {
    %c0_i32 = arith.constant 0 : i32
    %c0_i32_0 = arith.constant 0 : i32
    %c0_i32_1 = arith.constant 0 : i32
    %c0_i32_2 = arith.constant 0 : i32
    return %c0_i32, %c0_i32_0, %c0_i32_1 : i32, i32, i32
  }
  func.func @transform_20(%arg0: i32) -> (i32, i32) {
    %c0_i32 = arith.constant 0 : i32
    %c0_i32_0 = arith.constant 0 : i32
    %c0_i32_1 = arith.constant 0 : i32
    return %c0_i32, %c0_i32_0 : i32, i32
  }
  func.func @transform_21(%arg0: i32) -> (i32, i32) {
    %c0_i32 = arith.constant 0 : i32
    %c0_i32_0 = arith.constant 0 : i32
    %c0_i32_1 = arith.constant 0 : i32
    return %c0_i32, %c0_i32_0 : i32, i32
  }
  func.func @transform_22(%arg0: i32) -> (i32, i32, i32) {
    %c0_i32 = arith.constant 0 : i32
    %c0_i32_0 = arith.constant 0 : i32
    %c0_i32_1 = arith.constant 0 : i32
    %c0_i32_2 = arith.constant 0 : i32
    return %c0_i32, %c0_i32_0, %c0_i32_1 : i32, i32, i32
  }
  func.func @transform_23(%arg0: i32) -> (i32, i32) {
    %c0_i32 = arith.constant 0 : i32
    %c0_i32_0 = arith.constant 0 : i32
    %c0_i32_1 = arith.constant 0 : i32
    return %c0_i32, %c0_i32_0 : i32, i32
  }
  func.func @transform_24(%arg0: i32) -> (i32, i32) {
    %c0_i32 = arith.constant 0 : i32
    %c0_i32_0 = arith.constant 0 : i32
    %c0_i32_1 = arith.constant 0 : i32
    return %c0_i32, %c0_i32_0 : i32, i32
  }
  func.func @transform_25(%arg0: i32) -> (i32, i32) {
    %c0_i32 = arith.constant 0 : i32
    %c0_i32_0 = arith.constant 0 : i32
    %c0_i32_1 = arith.constant 0 : i32
    return %c0_i32, %c0_i32_0 : i32, i32
  }
  func.func @transform_26(%arg0: i32) -> (i32, i32) {
    %c0_i32 = arith.constant 0 : i32
    %c0_i32_0 = arith.constant 0 : i32
    %c0_i32_1 = arith.constant 0 : i32
    return %c0_i32, %c0_i32_0 : i32, i32
  }
  func.func @transform_27(%arg0: i32) -> (i32, i32, i32) {
    %c0_i32 = arith.constant 0 : i32
    %c0_i32_0 = arith.constant 0 : i32
    %c0_i32_1 = arith.constant 0 : i32
    return %arg0, %c0_i32, %c0_i32_0 : i32, i32, i32
  }
}

</mosaic_0001>

<bundles_post_ra>
// kernel: net5_forward.1
= control target key start
LH: loop header
LB: loop body
LE: loop exit
PB: predicated region body
PF: predicated region fallthrough
CT: control target
= control target key end

     0   :  { %s18963_s0 = inlined_call_operand.vmem [shape: f32[2,1,900], index: 0, kind: input, shape index: {}]   ;;  %s18964_s1 = inlined_call_operand.vmem [shape: f32[9,10,1], index: 1, kind: input, shape index: {}]   ;;  %s18965_s2 = inlined_call_operand.vmem [shape: f32[10,1], index: 2, kind: input, shape index: {}]   ;;  %s18966_s3 = inlined_call_operand.vmem [shape: f32[10,1], index: 3, kind: input, shape index: {}]   ;;  %s18967_s4 = inlined_call_operand.vmem [shape: f32[9,14,10], index: 4, kind: input, shape index: {}]   ;;  %s18968_s5 = inlined_call_operand.vmem [shape: f32[14,1], index: 5, kind: input, shape index: {}]   ;;  %s18969_s6 = inlined_call_operand.vmem [shape: f32[14,1], index: 6, kind: input, shape index: {}]   ;;  %s18970_s7 = inlined_call_operand.vmem [shape: f32[1,10,14], index: 7, kind: input, shape index: {}]   ;;  %s18971_s8 = inlined_call_operand.vmem [shape: f32[10,1], index: 8, kind: input, shape index: {}]   ;;  %s18972_s9 = inlined_call_operand.vmem [shape: f32[10,1], index: 9, kind: input, shape index: {}]   ;;  %s18973_s10 = inlined_call_operand.vmem [shape: f32[9,14,10], index: 10, kind: input, shape index: {}]   ;;  %s18974_s11 = inlined_call_operand.vmem [shape: f32[14,1], index: 11, kind: input, shape index: {}]   ;;  %s18975_s12 = inlined_call_operand.vmem [shape: f32[14,1], index: 12, kind: input, shape index: {}]   ;;  %s18976_s13 = inlined_call_operand.vmem [shape: f32[9,18,14], index: 13, kind: input, shape index: {}]   ;;  %s18977_s14 = inlined_call_operand.vmem [shape: f32[18,1], index: 14, kind: input, shape index: {}]   ;;  %s18978_s15 = inlined_call_operand.vmem [shape: f32[18,1], index: 15, kind: input, shape index: {}]   ;;  %s18979_s16 = inlined_call_operand.vmem [shape: f32[1,10,18], index: 16, kind: input, shape index: {}]   ;;  %s18980_s17 = inlined_call_operand.vmem [shape: f32[10,1], index: 17, kind: input, shape index: {}]   ;;  %s18981_s18 = inlined_call_operand.vmem [shape: f32[10,1], index: 18, kind: input, shape index: {}]   ;;  %s18982_s19 = inlined_call_operand.vmem [shape: f32[9,14,10], index: 19, kind: input, shape index: {}]   ;;  %s18983_s20 = inlined_call_operand.vmem [shape: f32[14,1], index: 20, kind: input, shape index: {}]   ;;  %s18984_s21 = inlined_call_operand.vmem [shape: f32[14,1], index: 21, kind: input, shape index: {}]   ;;  %s18985_s22 = inlined_call_operand.vmem [shape: f32[9,10,14], index: 22, kind: input, shape index: {}]   ;;  %s18986_s23 = inlined_call_operand.vmem [shape: f32[10,1], index: 23, kind: input, shape index: {}]   ;;  %s18987_s24 = inlined_call_operand.vmem [shape: f32[10,1], index: 24, kind: input, shape index: {}]   ;;  %s18988_s25 = inlined_call_operand.vmem [shape: f32[1,838], index: 25, kind: input, shape index: {}]   ;;  %s18989_s26 = inlined_call_operand.vmem [shape: f32[1,497], index: 26, kind: input, shape index: {}]   ;;  %s18990_s27 = inlined_call_operand.vmem [shape: f32[2,10,1], index: 27, kind: output, shape index: {}]  }
   0x1   :  { %19074 = sst [smem:[#allocation66_spill]] %s18963_s0 }
   0x2   :  { %19075 = sst [smem:[#allocation67_spill]] %s18964_s1 }
   0x3   :  { %19076 = sst [smem:[#allocation68_spill]] %s18965_s2 }
   0x4   :  { %19077 = sst [smem:[#allocation69_spill]] %s18966_s3 }
   0x5   :  { %19078 = sst [smem:[#allocation70_spill]] %s18967_s4 }
   0x6   :  { %19079 = sst [smem:[#allocation71_spill]] %s18968_s5 }
   0x7   :  { %19080 = sst [smem:[#allocation72_spill]] %s18969_s6 }
   0x8   :  { %19081 = sst [smem:[#allocation73_spill]] %s18970_s7  ;;  %s13518_s7 = smov 0  }
   0x9   :  { %19082 = sst [smem:[#allocation74_spill]] %s18971_s8 }
   0xa   :  { %19083 = sst [smem:[#allocation75_spill]] %s18972_s9 }
   0xb   :  { %19084 = sst [smem:[#allocation76_spill]] %s18973_s10 }
   0xc   :  { %19085 = sst [smem:[#allocation77_spill]] %s18975_s12 }
   0xd   :  { %19086 = sst [smem:[#allocation78_spill]] %s18988_s25 }
   0xe LB: > { %s11845_s4 = sadd.s32 4294967295, %s13357_s7   ;;  %p11849_p0 = scmp.ge.s32.totalorder %s13357_s7, 1  ;;  %s13357_s7 = sphi %s13518_s7, %s37_s7  }
   0xf   : > { %p736_p1 = scmp.lt.s32.totalorder %s13357_s7, 3 }
  0x11   : > { %p737_p2 = pnand %p11849_p0, %p736_p1 }
  0x13   : > { %740 = sbr.rel (%p737_p2) target bundleno = 4299 (0x10cb), region = 128 }
  0x18   : > { %s19087_s9 = sld [smem:[#allocation67_spill]]  ;;  %v13359_v2 = vmov 0   ;;  %p807_p3 = scmp.lt.s32.totalorder %s11845_s4, 1  ;;  %vm978_vm0 = vcmask 1039360   ;;  %vm1088_vm1 = vcmask 1031168   ;;  %vm1198_vm2 = vcmask 801792  }
  0x19   : > { %12770 = vset.pattern.permute.xlu1 %v13359_v2  ;;  %12769 = vset.pattern.permute.xlu0 %v13359_v2  ;;  %s19088_s28 = sld [smem:[#allocation66_spill]]  ;;  %s19043_s10 = smov 127   ;;  %vm1308_vm3 = vcmask 793600   ;;  %vm1418_vm4 = vcmask 785408   ;;  %vm1538_vm5 = vcmask 556032   ;;  %vm1658_vm6 = vcmask 547840  }
  0x1a   : > { %12771 = vset.pattern.permute.xlu2 %v13359_v2  ;;  %s19506_s4 = smov (!%p807_p3, %s11845_s4), 1  ;;  %s19008_s29 = smov 126   ;;  %vm1778_vm7 = vcmask 539648   ;;  %vm1995_vm8 = vcmask 1041656   ;;  %vm1959_vm9 = vcmask 252928   ;;  %vm1986_vm10 = vcmask 1047800  }
  0x1b   : > { %s11850_s8 = sshll.u32 %s19506_s4, 3  ;;  %s19051_s1 = smov 98   ;;  %vm2002_vm11 = vcmask 820224   ;;  %vm823_vm12 = vcmask 31744   ;;  %vm1993_vm13 = vcmask 826368   ;;  %vm2091_vm14 = vcmask 1041408  }
  0x1c   : > { %s13363_s6 = smov 97   ;;  %s19010_s11 = smov 96   ;;  %vm2084_vm15 = vcmask 80896  }
  0x1d   : > { %s19049_s2 = smov 68   ;;  %s19047_s3 = smov 67  }
  0x1e   : > { %v11856_v0 = vld [vmem:[%s19087_s9 + $0x28] sm:$0x3]  ;;  %v11854_v1 = vld [vmem:[%s19087_s9 + $0x18] sm:$0x3]  ;;  %v11855_v4 = vld [vmem:[%s19087_s9 + $0x20] sm:$0xff]  ;;  %s19113_s5 = smov 96  }
  0x1f   : > { %1029 = vperm.xlu1 %12770, %v11856_v0   ;;  %919 = vperm.xlu0 %12769, %v11854_v1   ;;  %v11858_v3 = vld [vmem:[%s19087_s9 + $0x38] sm:$0x3]  ;;  %v11853_v5 = vld [vmem:[%s19087_s9 + $0x10] sm:$0xff]  ;;  %v11859_v7 = vld [vmem:[%s19087_s9 + $0x40] sm:$0xff]  ;;  %s810_s0 = scalar_lea.vmem %s19088_s28, %s11850_s8  ;;  %s19045_s8 = smov 66  }
  0x20   : > { %1139 = vperm.xlu2 %12771, %v11858_v3   ;;  %v11857_v6 = vld [vmem:[%s19087_s9 + $0x30] sm:$0xff]  ;;  %v11860_v8 = vld [vmem:[%s19087_s9 + $0x48] sm:$0x3]  ;;  %v11862_v9 = vld [vmem:[%s19087_s9 + $0x58] sm:$0x3]  ;;  %s19106_s28 = sld [smem:[#allocation68_spill]] }
  0x21   : > { %v11864_v10 = vld [vmem:[%s19087_s9 + $0x68] sm:$0x3]  ;;  %v11861_v11 = vld [vmem:[%s19087_s9 + $0x50] sm:$0xff]  ;;  %v11863_v12 = vld [vmem:[%s19087_s9 + $0x60] sm:$0xff]  ;;  %s19135_s25 = sld [smem:[#allocation78_spill]] }
  0x22   : > { %v11865_v13 = vld [vmem:[%s19087_s9 + $0x70] sm:$0xff]  ;;  %v11866_v14 = vld [vmem:[%s19087_s9 + $0x78] sm:$0x3]  ;;  %v11868_v15 = vld [vmem:[%s19087_s9 + $0x88] sm:$0x3]  ;;  %s19281_s30 = sld [smem:[#allocation74_spill]] }
  0x23   : > { %v11867_v16 = vld [vmem:[%s19087_s9 + $0x80] sm:$0xff]  ;;  %v869_v17 = vld [vmem:[%s19087_s9 + $0x8] sm:$0x3]  ;;  %s19286_s12 = sld [smem:[#allocation77_spill]] }
  0x24   : > { %v868_v18 = vld [vmem:[%s19087_s9] sm:$0xff]  ;;  %s19182_s9 = sld [smem:[#allocation72_spill]] }
  0x25   : > { %v13590_v19 = vld [vmem:[%s810_s0] sm:$0xff]  ;;  %s19114_s0 = smov 126  }
  0x26   : > { %v13593_v20 = vperm.slane %v13590_v19, 2  ;;  %v13596_v21 = vperm.slane %v13590_v19, 1  ;;  %v13599_v22 = vperm.slane %v13590_v19, 0  ;;  %v13613_v27 = vperm.slane %v13590_v19, 3 }
  0x27   : > { %1024 = vperm.xlu1 %12770, %v11855_v4   ;;  %914 = vperm.xlu0 %12769, %v11853_v5   ;;  %v13702_v59 = vperm.slane %v13590_v19, 4 }
  0x28   : > { %1134 = vperm.xlu2 %12771, %v11857_v6  }
  0x29   : > { %19089 = vst [vmem:[#allocation7_spill] sm:$0xff] %v13702_v59 }
  0x2f   : > { %1244 = vperm.xlu1 %12770, %v11859_v7   ;;  %1249 = vperm.xlu0 %12769, %v11860_v8  }
  0x30   : > { %1359 = vperm.xlu2 %12771, %v11862_v9  }
  0x37   : > { %1469 = vperm.xlu1 %12770, %v11864_v10   ;;  %1354 = vperm.xlu0 %12769, %v11861_v11  }
  0x38   : > { %1464 = vperm.xlu2 %12771, %v11863_v12  }
  0x3f   : > { %1586 = vperm.xlu1 %12770, %v11865_v13   ;;  %1591 = vperm.xlu0 %12769, %v11866_v14  }
  0x40   : > { %1711 = vperm.xlu2 %12771, %v11868_v15  }
  0x47   : > { %1706 = vperm.xlu0 %12769, %v11867_v16   ;;  %877 = vperm.xlu1 %12770, %v869_v17  }
  0x4f   : > { %872 = vperm.xlu0 %12769, %v868_v18  }
  0x7a   : > { %v13657_v43 = vpop.permute.xlu2 %1139 }
  0x7b   : > { %v1151_v44 = vmul.f32 %v13657_v43, %v13593_v20  ;;  %v1149_v45 = vmul.f32 %v13657_v43, %v13599_v22  ;;  %v1152_v49 = vmul.f32 %v13657_v43, %v13613_v27  ;;  %v1150_v50 = vmul.f32 %v13657_v43, %v13596_v21 }
  0x82   : > { %v13668_v47 = vpop.permute.xlu2 %1134 }
  0x83   : > { %v1143_v48 = vmul.f32 %v13668_v47, %v13596_v21  ;;  %v1144_v53 = vmul.f32 %v13668_v47, %v13593_v20  ;;  %v1142_v54 = vmul.f32 %v13668_v47, %v13599_v22  ;;  %v1145_v58 = vmul.f32 %v13668_v47, %v13613_v27 }
  0x8a   : > { %v13694_v57 = vpop.permute.xlu2 %1359 }
  0x8b   : > { %v1369_v2 = vmul.f32 %v13694_v57, %v13599_v22  ;;  %v1372_v8 = vmul.f32 %v13694_v57, %v13613_v27  ;;  %v1370_v9 = vmul.f32 %v13694_v57, %v13596_v21  ;;  %v1371_v14 = vmul.f32 %v13694_v57, %v13593_v20 }
  0x91   : > { %v13601_v23 = vpop.permute.xlu0 %919  ;;  %v13626_v32 = vpop.permute.xlu1 %1029 }
  0x92   : > { %v931_v24 = vmul.f32 %v13601_v23, %v13593_v20  ;;  %v930_v25 = vmul.f32 %v13601_v23, %v13596_v21  ;;  %v929_v26 = vmul.f32 %v13601_v23, %v13599_v22  ;;  %v932_v31 = vmul.f32 %v13601_v23, %v13613_v27  ;;  %v13714_v0 = vpop.permute.xlu2 %1464 }
  0x93   : > { %v1040_v33 = vmul.f32 %v13626_v32, %v13596_v21  ;;  %v1041_v38 = vmul.f32 %v13626_v32, %v13593_v20  ;;  %v1039_v39 = vmul.f32 %v13626_v32, %v13599_v22  ;;  %v1042_v42 = vmul.f32 %v13626_v32, %v13613_v27 }
  0x94   : > { %968 = vrot.lane.b32.xlu1 %v931_v24, %s19043_s10  ;;  %966 = vrot.lane.b32.xlu0 %v930_v25, %s19043_s10  ;;  %v933_v62 = vmul.f32 %v13601_v23, %v13702_v59  ;;  %v1043_v25 = vmul.f32 %v13626_v32, %v13702_v59 }
  0x95   : > { %964 = vrot.lane.b32.xlu2 %v929_v26, %s19043_s10 }
  0x99   : > { %v13615_v28 = vpop.permute.xlu0 %914  ;;  %v13637_v36 = vpop.permute.xlu1 %1024 }
  0x9a   : > { %v924_v29 = vmul.f32 %v13615_v28, %v13593_v20  ;;  %v922_v30 = vmul.f32 %v13615_v28, %v13599_v22  ;;  %v925_v34 = vmul.f32 %v13615_v28, %v13613_v27  ;;  %v923_v35 = vmul.f32 %v13615_v28, %v13596_v21  ;;  %v13728_v5 = vpop.permute.xlu2 %1711 }
  0x9b   : > { %v1032_v37 = vmul.f32 %v13637_v36, %v13599_v22  ;;  %v1035_v40 = vmul.f32 %v13637_v36, %v13613_v27  ;;  %v1033_v41 = vmul.f32 %v13637_v36, %v13596_v21  ;;  %v1034_v46 = vmul.f32 %v13637_v36, %v13593_v20 }
  0x9c   : > { %954 = vrot.lane.b32.xlu0 %v924_v29, %s19043_s10  ;;  %950 = vrot.lane.b32.xlu1 %v922_v30, %s19043_s10  ;;  %v926_v13 = vmul.f32 %v13615_v28, %v13702_v59 }
  0x9d   : > { %970 = vrot.lane.b32.xlu2 %v932_v31, %s19043_s10 }
  0xa1   : > { %v13679_v51 = vpop.permute.xlu0 %1249  ;;  %v13704_v60 = vpop.permute.xlu1 %1244 }
  0xa2   : > { %v1259_v52 = vmul.f32 %v13679_v51, %v13599_v22  ;;  %v1262_v55 = vmul.f32 %v13679_v51, %v13613_v27  ;;  %v1260_v56 = vmul.f32 %v13679_v51, %v13596_v21  ;;  %v1253_v61 = vmul.f32 %v13704_v60, %v13596_v21 }
  0xa3   : > { %v1261_v63 = vmul.f32 %v13679_v51, %v13593_v20  ;;  %v1254_v3 = vmul.f32 %v13704_v60, %v13593_v20  ;;  %v1252_v4 = vmul.f32 %v13704_v60, %v13599_v22  ;;  %v1255_v10 = vmul.f32 %v13704_v60, %v13613_v27 }
  0xa4   : > { %1076 = vrot.lane.b32.xlu0 %v1040_v33, %s19008_s29  ;;  %956 = vrot.lane.b32.xlu1 %v925_v34, %s19043_s10 }
  0xa5   : > { %952 = vrot.lane.b32.xlu2 %v923_v35, %s19043_s10 }
  0xa9   : > { %v13717_v1 = vpop.permute.xlu0 %1354  ;;  %v13730_v6 = vpop.permute.xlu1 %1469 }
  0xaa   : > { %v1362_v12 = vmul.f32 %v13717_v1, %v13599_v22  ;;  %v1365_v18 = vmul.f32 %v13717_v1, %v13613_v27  ;;  %v1363_v24 = vmul.f32 %v13717_v1, %v13596_v21  ;;  %v1484_v31 = vmul.f32 %v13730_v6, %v13593_v20 }
  0xab   : > { %v1482_v33 = vmul.f32 %v13730_v6, %v13599_v22  ;;  %v1364_v34 = vmul.f32 %v13717_v1, %v13593_v20 }
  0xac   : > { %1060 = vrot.lane.b32.xlu0 %v1032_v37, %s19008_s29  ;;  %1078 = vrot.lane.b32.xlu1 %v1041_v38, %s19008_s29 }
  0xad   : > { %1074 = vrot.lane.b32.xlu2 %v1039_v39, %s19008_s29  ;;  %v1153_v39 = vmul.f32 %v13657_v43, %v13702_v59 }
  0xb1   : > { %v13732_v7 = vpop.permute.xlu0 %1591  ;;  %v13751_v15 = vpop.permute.xlu1 %1586 }
  0xb4   : > { %1066 = vrot.lane.b32.xlu0 %v1035_v40, %s19008_s29  ;;  %1062 = vrot.lane.b32.xlu1 %v1033_v41, %s19008_s29  ;;  %v1485_v40 = vmul.f32 %v13730_v6, %v13613_v27  ;;  %v1483_v41 = vmul.f32 %v13730_v6, %v13596_v21 }
  0xb5   : > { %1080 = vrot.lane.b32.xlu2 %v1042_v42, %s19008_s29 }
  0xb9   : > { %v13753_v16 = vpop.permute.xlu0 %1706  ;;  %v13769_v26 = vpop.permute.xlu1 %877 }
  0xbc   : > { %1188 = vrot.lane.b32.xlu0 %v1151_v44, %s19051_s1  ;;  %1184 = vrot.lane.b32.xlu1 %v1149_v45, %s19051_s1 }
  0xbd   : > { %1064 = vrot.lane.b32.xlu2 %v1034_v46, %s19008_s29  ;;  %v1476_v46 = vmul.f32 %v13714_v0, %v13593_v20 }
  0xc1   : > { %v13771_v29 = vpop.permute.xlu0 %872 }
  0xc4   : > { %1172 = vrot.lane.b32.xlu0 %v1143_v48, %s19051_s1  ;;  %1190 = vrot.lane.b32.xlu1 %v1152_v49, %s19051_s1  ;;  %v1474_v48 = vmul.f32 %v13714_v0, %v13599_v22  ;;  %v1036_v49 = vmul.f32 %v13637_v36, %v13702_v59 }
  0xc5   : > { %1186 = vrot.lane.b32.xlu2 %v1150_v50, %s19051_s1 }
  0xcc   : > { %1294 = vrot.lane.b32.xlu0 %v1259_v52, %s13363_s6  ;;  %1174 = vrot.lane.b32.xlu1 %v1144_v53, %s19051_s1 }
  0xcd   : > { %1170 = vrot.lane.b32.xlu2 %v1142_v54, %s19051_s1  ;;  %v1603_v54 = vmul.f32 %v13732_v7, %v13596_v21 }
  0xd4   : > { %1300 = vrot.lane.b32.xlu0 %v1262_v55, %s13363_s6  ;;  %1296 = vrot.lane.b32.xlu1 %v1260_v56, %s13363_s6  ;;  %v1477_v55 = vmul.f32 %v13714_v0, %v13613_v27  ;;  %v1475_v56 = vmul.f32 %v13714_v0, %v13596_v21 }
  0xd5   : > { %1176 = vrot.lane.b32.xlu2 %v1145_v58, %s19051_s1 }
  0xdc   : > { %1282 = vrot.lane.b32.xlu0 %v1253_v61, %s13363_s6  ;;  %972 = vrot.lane.b32.xlu1 %v933_v62, %s19043_s10  ;;  %v13834_v62 = vperm.slane %v13590_v19, 5 }
  0xdd   : > { %1298 = vrot.lane.b32.xlu2 %v1261_v63, %s13363_s6 }
  0xde   : > { %19091 = vst [vmem:[#allocation9_spill] sm:$0xff] %v13834_v62 }
  0xe4   : > { %1404 = vrot.lane.b32.xlu0 %v1369_v2, %s19010_s11  ;;  %1284 = vrot.lane.b32.xlu1 %v1254_v3, %s13363_s6  ;;  %v934_v2 = vmul.f32 %v13601_v23, %v13834_v62  ;;  %v1604_v3 = vmul.f32 %v13732_v7, %v13593_v20 }
  0xe5   : > { %1280 = vrot.lane.b32.xlu2 %v1252_v4, %s13363_s6  ;;  %v1602_v4 = vmul.f32 %v13732_v7, %v13599_v22 }
  0xec   : > { %1410 = vrot.lane.b32.xlu0 %v1372_v8, %s19010_s11  ;;  %1406 = vrot.lane.b32.xlu1 %v1370_v9, %s19010_s11 }
  0xed   : > { %1286 = vrot.lane.b32.xlu2 %v1255_v10, %s13363_s6 }
  0xef   : > { %v13743_v11 = vpop.permute.xlu2 %964 }
  0xf4   : > { %1390 = vrot.lane.b32.xlu0 %v1362_v12, %s19010_s11  ;;  %958 = vrot.lane.b32.xlu1 %v926_v13, %s19043_s10  ;;  %v1594_v12 = vmul.f32 %v13751_v15, %v13599_v22  ;;  %v1146_v13 = vmul.f32 %v13668_v47, %v13702_v59 }
  0xf5   : > { %1408 = vrot.lane.b32.xlu2 %v1371_v14, %s19010_s11  ;;  %v1605_v14 = vmul.f32 %v13732_v7, %v13613_v27 }
  0xf7   : > { %v13758_v17 = vpop.permute.xlu2 %970 }
  0xfc   : > { %1396 = vrot.lane.b32.xlu0 %v1365_v18, %s19010_s11  ;;  %1392 = vrot.lane.b32.xlu1 %v1363_v24, %s19010_s11 }
  0xfd   : > { %1082 = vrot.lane.b32.xlu2 %v1043_v25, %s19008_s29 }
  0xff   : > { %v13773_v30 = vpop.permute.xlu2 %952 }
 0x104   : > { %1526 = vrot.lane.b32.xlu0 %v1484_v31, %s19049_s2  ;;  %1522 = vrot.lane.b32.xlu1 %v1482_v33, %s19049_s2  ;;  %v1597_v31 = vmul.f32 %v13751_v15, %v13613_v27  ;;  %v1595_v33 = vmul.f32 %v13751_v15, %v13596_v21 }
 0x105   : > { %1394 = vrot.lane.b32.xlu2 %v1364_v34, %s19010_s11  ;;  %v1263_v34 = vmul.f32 %v13679_v51, %v13702_v59 }
 0x106   : > { %v13784_v35 = vpop.permute.xlu1 %968  ;;  %v13786_v37 = vpop.permute.xlu0 %966 }
 0x107   : > { %v13788_v38 = vpop.permute.xlu2 %1074 }
 0x10c   : > { %1192 = vrot.lane.b32.xlu0 %v1153_v39, %s19051_s1  ;;  %1528 = vrot.lane.b32.xlu1 %v1485_v40, %s19049_s2 }
 0x10d   : > { %1524 = vrot.lane.b32.xlu2 %v1483_v41, %s19049_s2 }
 0x10e   : > { %v13799_v42 = vpop.permute.xlu0 %954  ;;  %v13801_v44 = vpop.permute.xlu1 %950 }
 0x10f   : > { %v13803_v45 = vpop.permute.xlu2 %1080 }
 0x114   : > { %1510 = vrot.lane.b32.xlu0 %v1476_v46, %s19049_s2  ;;  %1506 = vrot.lane.b32.xlu1 %v1474_v48, %s19049_s2  ;;  %v1724_v46 = vmul.f32 %v13728_v5, %v13593_v20  ;;  %v1722_v48 = vmul.f32 %v13728_v5, %v13599_v22 }
 0x115   : > { %1068 = vrot.lane.b32.xlu2 %v1036_v49, %s19008_s29  ;;  %v1596_v49 = vmul.f32 %v13751_v15, %v13593_v20 }
 0x116   : > { %v13814_v50 = vpop.permute.xlu0 %1076  ;;  %v13816_v52 = vpop.permute.xlu1 %956 }
 0x117   : > { %v13818_v53 = vpop.permute.xlu2 %1064 }
 0x11c   : > { %1644 = vrot.lane.b32.xlu0 %v1603_v54, %s19047_s3  ;;  %1512 = vrot.lane.b32.xlu1 %v1477_v55, %s19049_s2 }
 0x11d   : > { %1508 = vrot.lane.b32.xlu2 %v1475_v56, %s19049_s2 }
 0x11e   : > { %v13829_v58 = vpop.permute.xlu0 %1060  ;;  %v13831_v61 = vpop.permute.xlu1 %1078 }
 0x11f   : > { %19090 = vst [vmem:[#allocation8_spill] sm:$0xff] %v13829_v58  ;;  %v13836_v63 = vpop.permute.xlu2 %1186 }
 0x124   : > { %974 = vrot.lane.b32.xlu0 %v934_v2, %s19043_s10  ;;  %1646 = vrot.lane.b32.xlu1 %v1604_v3, %s19047_s3  ;;  %v1044_v2 = vmul.f32 %v13626_v32, %v13834_v62  ;;  %v1725_v3 = vmul.f32 %v13728_v5, %v13613_v27 }
 0x125   : > { %1642 = vrot.lane.b32.xlu2 %v1602_v4, %s19047_s3  ;;  %v1723_v4 = vmul.f32 %v13728_v5, %v13596_v21 }
 0x126   : > { %v13847_v8 = vpop.permute.xlu0 %1066  ;;  %v13849_v9 = vpop.permute.xlu1 %1062 }
 0x127   : > { %v13851_v10 = vpop.permute.xlu2 %1170 }
 0x128   : > { %19092 = vst [vmem:[#allocation10_spill] sm:$0xff] %v13851_v10  ;;  %v1486_v10 = vmul.f32 %v13730_v6, %v13702_v59 }
 0x12c   : > { %1626 = vrot.lane.b32.xlu0 %v1594_v12, %s19047_s3  ;;  %1178 = vrot.lane.b32.xlu1 %v1146_v13, %s19051_s1 }
 0x12d   : > { %1648 = vrot.lane.b32.xlu2 %v1605_v14, %s19047_s3 }
 0x12e   : > { %v13862_v18 = vpop.permute.xlu0 %1188  ;;  %v13864_v24 = vpop.permute.xlu1 %1184 }
 0x12f   : > { %v13866_v25 = vpop.permute.xlu2 %1176 }
 0x130   : > { %19093 = vst [vmem:[#allocation11_spill] sm:$0xff] %v13866_v25  ;;  %v1836_v25 = vld [vmem:[%s19106_s28 + $0x8] sm:$0x3] }
 0x134   : > { %1632 = vrot.lane.b32.xlu0 %v1597_v31, %s19047_s3  ;;  %1628 = vrot.lane.b32.xlu1 %v1595_v33, %s19047_s3  ;;  %v1714_v31 = vmul.f32 %v13753_v16, %v13599_v22  ;;  %v1256_v33 = vmul.f32 %v13704_v60, %v13702_v59 }
 0x135   : > { %1302 = vrot.lane.b32.xlu2 %v1263_v34, %s13363_s6  ;;  %v927_v34 = vmul.f32 %v13615_v28, %v13834_v62 }
 0x136   : > { %v13877_v39 = vpop.permute.xlu0 %1172  ;;  %v13879_v40 = vpop.permute.xlu1 %1190 }
 0x137   : > { %19094 = vst [vmem:[#allocation12_spill] sm:$0xff] %v13877_v39  ;;  %v13881_v41 = vpop.permute.xlu2 %1298  ;;  %v1606_v39 = vmul.f32 %v13732_v7, %v13702_v59 }
 0x13c   : > { %1766 = vrot.lane.b32.xlu0 %v1724_v46, %s19045_s8  ;;  %1762 = vrot.lane.b32.xlu1 %v1722_v48, %s19045_s8 }
 0x13d   : > { %1630 = vrot.lane.b32.xlu2 %v1596_v49, %s19047_s3 }
 0x13e   : > { %v13892_v54 = vpop.permute.xlu0 %1294  ;;  %v13894_v55 = vpop.permute.xlu1 %1174 }
 0x13f   : > { %19095 = vst [vmem:[#allocation13_spill] sm:$0xff] %v13894_v55  ;;  %v13896_v56 = vpop.permute.xlu2 %1280  ;;  %v1264_v55 = vmul.f32 %v13679_v51, %v13834_v62 }
 0x140   : > { %19096 = vst [vmem:[#allocation14_spill] sm:$0xff] %v13896_v56  ;;  %v1366_v56 = vmul.f32 %v13717_v1, %v13702_v59 }
 0x144   : > { %1084 = vrot.lane.b32.xlu0 %v1044_v2, %s19008_s29  ;;  %1768 = vrot.lane.b32.xlu1 %v1725_v3, %s19045_s8  ;;  %v1717_v2 = vmul.f32 %v13753_v16, %v13613_v27  ;;  %v1715_v3 = vmul.f32 %v13753_v16, %v13596_v21 }
 0x145   : > { %1764 = vrot.lane.b32.xlu2 %v1723_v4, %s19045_s8  ;;  %v1373_v4 = vmul.f32 %v13694_v57, %v13702_v59 }
 0x146   : > { %v13907_v12 = vpop.permute.xlu0 %1300  ;;  %v13909_v13 = vpop.permute.xlu1 %1296 }
 0x147   : > { %v13911_v14 = vpop.permute.xlu2 %1286 }
 0x148   : > { %19097 = vst [vmem:[#allocation15_spill] sm:$0xff] %v13911_v14  ;;  %v1037_v14 = vmul.f32 %v13637_v36, %v13834_v62 }
 0x14c   : > { %1746 = vrot.lane.b32.xlu0 %v1714_v31, %s19045_s8  ;;  %1288 = vrot.lane.b32.xlu1 %v1256_v33, %s13363_s6 }
 0x14d   : > { %960 = vrot.lane.b32.xlu2 %v927_v34, %s19043_s10 }
 0x14e   : > { %v13922_v46 = vpop.permute.xlu0 %1282  ;;  %v13924_v48 = vpop.permute.xlu1 %972 }
 0x14f   : > { %19098 = vst [vmem:[#allocation16_spill] sm:$0xff] %v13922_v46  ;;  %v13926_v49 = vpop.permute.xlu2 %1408  ;;  %v1716_v46 = vmul.f32 %v13753_v16, %v13593_v20 }
 0x150   : > { %19099 = vst [vmem:[#allocation17_spill] sm:$0xff] %v13924_v48  ;;  %v1374_v48 = vmul.f32 %v13694_v57, %v13834_v62 }
 0x154   : > { %1752 = vrot.lane.b32.xlu0 %v1717_v2, %s19045_s8  ;;  %1748 = vrot.lane.b32.xlu1 %v1715_v3, %s19045_s8 }
 0x155   : > { %1412 = vrot.lane.b32.xlu2 %v1373_v4, %s19010_s11  ;;  %v13957_v4 = vperm.slane %v13590_v19, 6 }
 0x156   : > { %v13937_v31 = vpop.permute.xlu0 %1404  ;;  %v13939_v33 = vpop.permute.xlu1 %1284 }
 0x157   : > { %19100 = vst [vmem:[#allocation18_spill] sm:$0xff] %v13939_v33  ;;  %v13941_v34 = vpop.permute.xlu2 %1082  ;;  %v1155_v58 = vmul.f32 %v13657_v43, %v13957_v4 }
 0x158   : > { %19101 = vst [vmem:[#allocation19_spill] sm:$0xff] %v13941_v34  ;;  %v935_v34 = vmul.f32 %v13601_v23, %v13957_v4  ;;  %v1478_v23 = vmul.f32 %v13714_v0, %v13702_v59 }
 0x159   : > { %19102 = vst [vmem:[#allocation20_spill] sm:$0xff] %v13957_v4 }
 0x15c   : > { %1398 = vrot.lane.b32.xlu0 %v1366_v56, %s19010_s11  ;;  %1070 = vrot.lane.b32.xlu1 %v1037_v14, %s19008_s29  ;;  %v1154_v56 = vmul.f32 %v13657_v43, %v13834_v62  ;;  %s19110_s11 = sld [smem:[#allocation69_spill]]  ;;  %v1367_v43 = vmul.f32 %v13717_v1, %v13834_v62  ;;  %s13368_s29 = smov 31  }
 0x15d   : > { %1750 = vrot.lane.b32.xlu2 %v1716_v46, %s19045_s8 }
 0x15e   : > { %v13952_v2 = vpop.permute.xlu0 %1410  ;;  %v13954_v3 = vpop.permute.xlu1 %1406 }
 0x15f   : > { %v13959_v33 = vpop.permute.xlu2 %1394 }
 0x160   : > { %19103 = vst [vmem:[#allocation21_spill] sm:$0xff] %v13959_v33 }
 0x164   : > { %976 = vrot.lane.b32.xlu0 %v935_v34, %s19043_s10  ;;  %1530 = vrot.lane.b32.xlu1 %v1486_v10, %s19049_s2  ;;  %v1147_v34 = vmul.f32 %v13668_v47, %v13834_v62 }
 0x165   : > { %1194 = vrot.lane.b32.xlu2 %v1154_v56, %s19051_s1 }
 0x166   : > { %v13970_v14 = vpop.permute.xlu0 %1390  ;;  %v13972_v46 = vpop.permute.xlu1 %958 }
 0x167   : > { %19104 = vst [vmem:[#allocation22_spill] sm:$0xff] %v13970_v14  ;;  %v13974_v33 = vpop.permute.xlu2 %1524  ;;  %v1862_v14 = vld [vmem:[%s19110_s11 + $0x8] sm:$0x3] }
 0x168   : > { %19105 = vst [vmem:[#allocation23_spill] sm:$0xff] %v13972_v46 }
 0x16c   : > { %1514 = vrot.lane.b32.xlu0 %v1478_v23, %s19049_s2  ;;  %1180 = vrot.lane.b32.xlu1 %v1147_v34, %s19051_s1 }
 0x16d   : > { %1844 = vperm.xlu2 %12771, %v1836_v25  }
 0x16e   : > { %v13985_v10 = vpop.permute.xlu0 %1396  ;;  %v13987_v56 = vpop.permute.xlu1 %1392 }
 0x16f   : > { %19107 = vst [vmem:[#allocation24_spill] sm:$0xff] %v13985_v10  ;;  %v13989_v46 = vpop.permute.xlu2 %1068  ;;  %v1726_v10 = vmul.f32 %v13728_v5, %v13702_v59 }
 0x170   : > { %19108 = vst [vmem:[#allocation25_spill] sm:$0xff] %v13987_v56  ;;  %v1835_v56 = vld [vmem:[%s19106_s28] sm:$0xff]  ;;  %s19285_s28 = sld [smem:[#allocation76_spill]] }
 0x171   : > { %19109 = vst [vmem:[#allocation26_spill] sm:$0xff] %v13989_v46  ;;  %v1257_v46 = vmul.f32 %v13704_v60, %v13834_v62 }
 0x174   : > { %1870 = vperm.xlu0 %12769, %v1862_v14   ;;  %1650 = vrot.lane.b32.xlu1 %v1606_v39, %s19047_s3  ;;  %v928_v14 = vmul.f32 %v13615_v28, %v13957_v4  ;;  %v1045_v28 = vmul.f32 %v13626_v32, %v13957_v4  ;;  %v1598_v32 = vmul.f32 %v13751_v15, %v13702_v59 }
 0x175   : > { %1304 = vrot.lane.b32.xlu2 %v1264_v55, %s13363_s6 }
 0x176   : > { %v14000_v25 = vpop.permute.xlu0 %1526  ;;  %v14002_v23 = vpop.permute.xlu1 %1522 }
 0x177   : > { %v14004_v34 = vpop.permute.xlu2 %1508 }
 0x178   : > { %19111 = vst [vmem:[#allocation27_spill] sm:$0xff] %v14004_v34 }
 0x17c   : > { %1290 = vrot.lane.b32.xlu0 %v1257_v46, %s13363_s6  ;;  %962 = vrot.lane.b32.xlu1 %v928_v14, %s19043_s10 }
 0x17d   : > { %1839 = vperm.xlu2 %12771, %v1835_v56  }
 0x17e   : > { %v14015_v39 = vpop.permute.xlu0 %1192  ;;  %v14017_v55 = vpop.permute.xlu1 %1528 }
 0x17f   : > { %19112 = vst [vmem:[#allocation28_spill] sm:$0xff] %v14015_v39  ;;  %v14019_v34 = vpop.permute.xlu2 %1642  ;;  %v1861_v39 = vld [vmem:[%s19110_s11] sm:$0xff]  ;;  %s19282_s11 = sld [smem:[#allocation75_spill]] }
 0x184   : > { %1770 = vrot.lane.b32.xlu0 %v1726_v10, %s19045_s8  ;;  %1414 = vrot.lane.b32.xlu1 %v1374_v48, %s19113_s5 }
 0x185   : > { %1086 = vrot.lane.b32.xlu2 %v1045_v28, %s19114_s0 }
 0x186   : > { %v14030_v46 = vpop.permute.xlu0 %1510  ;;  %v14032_v56 = vpop.permute.xlu1 %1506 }
 0x187   : > { %19115 = vst [vmem:[#allocation29_spill] sm:$0xff] %v14030_v46  ;;  %v14034_v14 = vpop.permute.xlu2 %1648  ;;  %v1038_v46 = vmul.f32 %v13637_v36, %v13957_v4  ;;  %v1487_v36 = vmul.f32 %v13730_v6, %v13834_v62 }
 0x188   : > { %19116 = vst [vmem:[#allocation30_spill] sm:$0xff] %v14032_v56  ;;  %v1718_v56 = vmul.f32 %v13753_v16, %v13702_v59  ;;  %v1479_v59 = vmul.f32 %v13714_v0, %v13834_v62 }
 0x18c   : > { %1196 = vrot.lane.b32.xlu0 %v1155_v58, %s19051_s1  ;;  %1865 = vperm.xlu1 %12770, %v1861_v39  }
 0x18d   : > { %1634 = vrot.lane.b32.xlu2 %v1598_v32, %s19047_s3 }
 0x18e   : > { %v14045_v48 = vpop.permute.xlu0 %1644  ;;  %v14047_v10 = vpop.permute.xlu1 %1512 }
 0x18f   : > { %19117 = vst [vmem:[#allocation31_spill] sm:$0xff] %v14047_v10  ;;  %v14049_v28 = vpop.permute.xlu2 %1302  ;;  %v1148_v10 = vmul.f32 %v13668_v47, %v13957_v4  ;;  %v1607_v47 = vmul.f32 %v13732_v7, %v13834_v62 }
 0x194   : > { %1754 = vrot.lane.b32.xlu0 %v1718_v56, %s19045_s8  ;;  %1400 = vrot.lane.b32.xlu1 %v1367_v43, %s19113_s5 }
 0x195   : > { %1072 = vrot.lane.b32.xlu2 %v1038_v46, %s19114_s0 }
 0x196   : > { %v14060_v58 = vpop.permute.xlu0 %974  ;;  %v14062_v39 = vpop.permute.xlu1 %1646 }
 0x197   : > { %19118 = vst [vmem:[#allocation32_spill] sm:$0xff] %v14060_v58  ;;  %v14064_v32 = vpop.permute.xlu2 %1630  ;;  %v1375_v58 = vmul.f32 %v13694_v57, %v13957_v4  ;;  %v1368_v57 = vmul.f32 %v13717_v1, %v13957_v4  ;;  %v1480_v1 = vmul.f32 %v13714_v0, %v13957_v4 }
 0x198   : > { %19119 = vst [vmem:[#allocation33_spill] sm:$0xff] %v14064_v32  ;;  %v1265_v32 = vmul.f32 %v13679_v51, %v13957_v4  ;;  %v1258_v51 = vmul.f32 %v13704_v60, %v13957_v4  ;;  %v1727_v60 = vmul.f32 %v13728_v5, %v13834_v62 }
 0x19c   : > { %1516 = vrot.lane.b32.xlu0 %v1479_v59, %s19049_s2  ;;  %1182 = vrot.lane.b32.xlu1 %v1148_v10, %s19051_s1 }
 0x19d   : > { %1532 = vrot.lane.b32.xlu2 %v1487_v36, %s19049_s2 }
 0x19e   : > { %v14075_v46 = vpop.permute.xlu0 %1626  ;;  %v14077_v56 = vpop.permute.xlu1 %1178 }
 0x19f   : > { %19120 = vst [vmem:[#allocation34_spill] sm:$0xff] %v14075_v46  ;;  %v14079_v43 = vpop.permute.xlu2 %1764  ;;  %v1728_v46 = vmul.f32 %v13728_v5, %v13957_v4 }
 0x1a0   : > { %19121 = vst [vmem:[#allocation35_spill] sm:$0xff] %v14077_v56  ;;  %v1599_v56 = vmul.f32 %v13751_v15, %v13834_v62 }
 0x1a4   : > { %1416 = vrot.lane.b32.xlu0 %v1375_v58, %s19113_s5  ;;  %1652 = vrot.lane.b32.xlu1 %v1607_v47, %s19047_s3 }
 0x1a5   : > { %1306 = vrot.lane.b32.xlu2 %v1265_v32, %s13363_s6 }
 0x1a6   : > { %v14090_v59 = vpop.permute.xlu0 %1632  ;;  %v14092_v10 = vpop.permute.xlu1 %1628 }
 0x1a7   : > { %19122 = vst [vmem:[#allocation36_spill] sm:$0xff] %v14090_v59  ;;  %v14094_v36 = vpop.permute.xlu2 %960  ;;  %v1719_v59 = vmul.f32 %v13753_v16, %v13834_v62  ;;  %v1600_v62 = vmul.f32 %v13751_v15, %v13957_v4 }
 0x1a8   : > { %19123 = vst [vmem:[#allocation37_spill] sm:$0xff] %v14092_v10  ;;  %v1608_v10 = vmul.f32 %v13732_v7, %v13957_v4 }
 0x1a9   : > { %19124 = vst [vmem:[#allocation38_spill] sm:$0xff] %v14094_v36  ;;  %v1488_v36 = vmul.f32 %v13730_v6, %v13957_v4 }
 0x1ac   : > { %1402 = vrot.lane.b32.xlu0 %v1368_v57, %s19113_s5  ;;  %1636 = vrot.lane.b32.xlu1 %v1599_v56, %s19047_s3 }
 0x1ad   : > { %1292 = vrot.lane.b32.xlu2 %v1258_v51, %s13363_s6 }
 0x1ae   : > { %v14105_v58 = vpop.permute.xlu0 %1766  ;;  %v14107_v32 = vpop.permute.xlu1 %1762 }
 0x1af   : > { %v14109_v47 = vpop.permute.xlu2 %1412 }
 0x1b0   : > { %19125 = vst [vmem:[#allocation39_spill] sm:$0xff] %v14109_v47 }
 0x1b4   : > { %1518 = vrot.lane.b32.xlu0 %v1480_v1, %s19049_s2  ;;  %1534 = vrot.lane.b32.xlu1 %v1488_v36, %s19049_s2 }
 0x1b5   : > { %1772 = vrot.lane.b32.xlu2 %v1727_v60, %s19045_s8  ;;  %v1472_v60 = vperm.slane %v13590_v19, 7 }
 0x1b6   : > { %v14120_v56 = vpop.permute.xlu0 %1084  ;;  %v14122_v57 = vpop.permute.xlu1 %1768 }
 0x1b7   : > { %19126 = vst [vmem:[#allocation40_spill] sm:$0xff] %v14120_v56  ;;  %v14124_v51 = vpop.permute.xlu2 %1750  ;;  %v1489_v47 = vmul.f32 %v1472_v60, %v13730_v6  ;;  %v1609_v6 = vmul.f32 %v13732_v7, %v1472_v60  ;;  %v903_v7 = vmul.f32 %v13596_v21, %v13769_v26 }
 0x1b8   : > { %19127 = vst [vmem:[#allocation41_spill] sm:$0xff] %v14124_v51  ;;  %v1481_v51 = vmul.f32 %v1472_v60, %v13714_v0  ;;  %v1729_v0 = vmul.f32 %v13728_v5, %v1472_v60  ;;  %v904_v5 = vmul.f32 %v13593_v20, %v13769_v26 }
 0x1bc   : > { %1774 = vrot.lane.b32.xlu0 %v1728_v46, %s19045_s8  ;;  %1654 = vrot.lane.b32.xlu1 %v1608_v10, %s19047_s3  ;;  %v1720_v10 = vmul.f32 %v13753_v16, %v13957_v4  ;;  %v1097_v4 = vsel %vm1088_vm1, %v13831_v61, %v13803_v45 }
 0x1bd   : > { %1756 = vrot.lane.b32.xlu2 %v1719_v59, %s19045_s8 }
 0x1be   : > { %v14135_v36 = vpop.permute.xlu0 %1746  ;;  %v14137_v1 = vpop.permute.xlu1 %1288 }
 0x1bf   : > { %19128 = vst [vmem:[#allocation42_spill] sm:$0xff] %v14135_v36  ;;  %v14140_v56 = vpop.permute.xlu2 %1194  ;;  %v1207_v36 = vsel %vm1198_vm2, %v13862_v18, %v13879_v40 }
 0x1c0   : > { %19129 = vst [vmem:[#allocation43_spill] sm:$0xff] %v14137_v1 }
 0x1c1   : > { %19130 = vst [vmem:[#allocation44_spill] sm:$0xff] %v14140_v56 }
 0x1c4   : > { %1520 = vrot.lane.b32.xlu0 %v1481_v51, %s19049_s2  ;;  %1536 = vrot.lane.b32.xlu1 %v1489_v47, %s19049_s2  ;;  %v986_v47 = vsel %vm978_vm0, %v13786_v37, %v13784_v35  ;;  %v985_v51 = vsel %vm978_vm0, %v13743_v11, %v13786_v37  ;;  %v1095_v37 = vsel %vm1088_vm1, %v13788_v38, %v13814_v50 }
 0x1c5   : > { %1638 = vrot.lane.b32.xlu2 %v1600_v62, %s19047_s3  ;;  %v987_v62 = vsel %vm978_vm0, %v13784_v35, %v13758_v17  ;;  %v902_v35 = vmul.f32 %v13599_v22, %v13769_v26  ;;  %v1013_v11 = vadd.f32 %v986_v47, %v903_v7  ;;  %v1316_v47 = vsel %vm1308_vm3, %v13909_v13, %v13881_v41 }
 0x1c6   : > { %v14149_v46 = vpop.permute.xlu0 %1752  ;;  %v14151_v59 = vpop.permute.xlu1 %1748  ;;  %v1014_v1 = vadd.f32 %v987_v62, %v904_v5  ;;  %v1205_v62 = vsel %vm1198_vm2, %v13864_v24, %v13836_v63  ;;  %v1427_v24 = vsel %vm1418_vm4, %v13926_v49, %v13952_v2 }
 0x1c7   : > { %19131 = vst [vmem:[#allocation45_spill] sm:$0xff] %v14151_v59  ;;  %v14153_v19 = vpop.permute.xlu2 %1844 }
 0x1cc   : > { %1776 = vrot.lane.b32.xlu0 %v1729_v0, %s19045_s8  ;;  %1656 = vrot.lane.b32.xlu1 %v1609_v6, %s19047_s3 }
 0x1cd   : > { %1758 = vrot.lane.b32.xlu2 %v1720_v10, %s19045_s8  ;;  %v1096_v10 = vsel %vm1088_vm1, %v13814_v50, %v13831_v61  ;;  %v1721_v61 = vmul.f32 %v13753_v16, %v1472_v60  ;;  %v1317_v50 = vsel %vm1308_vm3, %v13881_v41, %v13907_v12  ;;  %v1426_v41 = vsel %vm1418_vm4, %v13954_v3, %v13926_v49 }
 0x1ce   : > { %v14175_v0 = vpop.permute.xlu0 %1398  ;;  %v14177_v6 = vpop.permute.xlu1 %1070  ;;  %v1123_v59 = vadd.f32 %v1096_v10, %v1013_v11  ;;  %v1548_v49 = vsel %vm1538_vm5, %v14000_v25, %v14017_v55  ;;  %v1666_v10 = vsel %vm1658_vm6, %v14019_v34, %v14045_v48 }
 0x1cf   : > { %19132 = vst [vmem:[#allocation46_spill] sm:$0xff] %v14175_v0  ;;  %v14187_v56 = vpop.permute.xlu2 %1304  ;;  %v1206_v0 = vsel %vm1198_vm2, %v13836_v63, %v13862_v18  ;;  %v1601_v18 = vmul.f32 %v13751_v15, %v1472_v60  ;;  %v1547_v60 = vsel %vm1538_vm5, %v13974_v33, %v14000_v25 }
 0x1d0   : > { %19133 = vst [vmem:[#allocation47_spill] sm:$0xff] %v14177_v6  ;;  %v1012_v6 = vadd.f32 %v985_v51, %v902_v35  ;;  %v1233_v5 = vadd.f32 %v1206_v0, %v1123_v59  ;;  %v1667_v0 = vsel %vm1658_vm6, %v14045_v48, %v14062_v39 }
 0x1d1   : > { %19134 = vst [vmem:[#allocation48_spill] sm:$0xff] %v14187_v56  ;;  %v1124_v56 = vadd.f32 %v1097_v4, %v1014_v1  ;;  %v1315_v4 = vsel %vm1308_vm3, %v13892_v54, %v13909_v13  ;;  %v1425_v54 = vsel %vm1418_vm4, %v13937_v31, %v13954_v3  ;;  %v1546_v31 = vsel %vm1538_vm5, %v14002_v23, %v13974_v33 }
 0x1d2   : > { %v1122_v38 = vadd.f32 %v1095_v37, %v1012_v6  ;;  %v1668_v6 = vsel %vm1658_vm6, %v14062_v39, %v14034_v14  ;;  %v1787_v33 = vsel %vm1778_vm7, %v14079_v43, %v14105_v58  ;;  %v1788_v23 = vsel %vm1778_vm7, %v14105_v58, %v14122_v57  ;;  %v14265_v58 = vld [vmem:[%s19135_s25] sm:$0x7f]  ;;  %s13375_s25 = smov 120  }
 0x1d3   : > { %v1234_v16 = vadd.f32 %v1207_v36, %v1124_v56  ;;  %v1343_v56 = vadd.f32 %v1316_v47, %v1233_v5  ;;  %v1786_v39 = vsel %vm1778_vm7, %v14107_v32, %v14079_v43  ;;  %v905_v43 = vmul.f32 %v13613_v27, %v13769_v26 }
 0x1d4   : > { %1760 = vrot.lane.b32.xlu1 %v1721_v61, %s19045_s8  ;;  %v1232_v63 = vadd.f32 %v1205_v62, %v1122_v38  ;;  %s19180_s8 = smov 66  }
 0x1d5   : > { %1640 = vrot.lane.b32.xlu2 %v1601_v18, %s19047_s3  ;;  %v1344_v15 = vadd.f32 %v1317_v50, %v1234_v16  ;;  %v1453_v51 = vadd.f32 %v1426_v41, %v1343_v56  ;;  %v1891_v56 = vperm.slane %v14265_v58, 2  ;;  %s19064_s3 = smov 124  }
 0x1d6   : > { %v14223_v13 = vpop.permute.xlu0 %976  ;;  %v14225_v36 = vpop.permute.xlu1 %1530  ;;  %v1342_v1 = vadd.f32 %v1315_v4, %v1232_v63  ;;  %v980_v4 = vsel %vm978_vm0, %v13773_v30, %v13799_v42  ;;  %v981_v63 = vsel %vm978_vm0, %v13799_v42, %v13816_v52  ;;  %v979_v42 = vsel %vm978_vm0, %v13801_v44, %v13773_v30 }
 0x1d7   : > { %v14233_v59 = vpop.permute.xlu2 %1839  ;;  %v1454_v7 = vadd.f32 %v1427_v24, %v1344_v15  ;;  %v1575_v25 = vadd.f32 %v1547_v60, %v1453_v51  ;;  %v1890_v15 = vperm.slane %v14265_v58, 1  ;;  %v896_v60 = vmul.f32 %v13596_v21, %v13771_v29 }
 0x1d8   : > { %v1452_v3 = vadd.f32 %v1425_v54, %v1342_v1  ;;  %v1889_v1 = vperm.slane %v14265_v58, 0 }
 0x1d9   : > { %v1576_v35 = vadd.f32 %v1548_v49, %v1454_v7  ;;  %v1695_v37 = vadd.f32 %v1667_v0, %v1575_v25  ;;  %v895_v49 = vmul.f32 %v13599_v22, %v13771_v29  ;;  %v897_v7 = vmul.f32 %v13593_v20, %v13771_v29  ;;  %v19136_v20 = vld [vmem:[#allocation8_spill] sm:$0xff] }
 0x1da   : > { %v1574_v11 = vadd.f32 %v1546_v31, %v1452_v3  ;;  %v1091_v3 = vsel %vm1088_vm1, %v13818_v53, %v13847_v8  ;;  %v1006_v30 = vadd.f32 %v980_v4, %v896_v60  ;;  %v1089_v25 = vsel %vm1088_vm1, %v19136_v20, %v13849_v9  ;;  %v19145_v60 = vld [vmem:[#allocation15_spill] sm:$0xff] }
 0x1db   : > { %v1696_v61 = vadd.f32 %v1668_v6, %v1576_v35  ;;  %v1815_v38 = vadd.f32 %v1787_v33, %v1695_v37  ;;  %v1007_v44 = vadd.f32 %v981_v63, %v897_v7  ;;  %v1090_v35 = vsel %vm1088_vm1, %v13849_v9, %v13818_v53  ;;  %v19140_v53 = vld [vmem:[#allocation11_spill] sm:$0xff] }
 0x1dc   : > { %v1694_v62 = vadd.f32 %v1666_v10, %v1574_v11  ;;  %v19137_v10 = vld [vmem:[#allocation17_spill] sm:$0xff] }
 0x1dd   : > { %v1816_v50 = vadd.f32 %v1788_v23, %v1696_v61  ;;  %v1829_v5 = vmax.f32 %v1815_v38, 0.0  ;;  %v988_v11 = vsel %vm978_vm0, %v13758_v17, %v19137_v10  ;;  %v1005_v61 = vadd.f32 %v979_v42, %v895_v49  ;;  %v19139_v38 = vld [vmem:[#allocation12_spill] sm:$0xff] }
 0x1de   : > { %v14256_v47 = vpop.permute.xlu0 %1514  ;;  %v14258_v34 = vpop.permute.xlu1 %1180  ;;  %v1814_v48 = vadd.f32 %v1786_v39, %v1694_v62  ;;  %v1117_v39 = vadd.f32 %v1091_v3, %v1007_v44  ;;  %v19138_v62 = vld [vmem:[#allocation13_spill] sm:$0xff]  ;;  %v1116_v17 = vadd.f32 %v1090_v35, %v1006_v30  ;;  %v1015_v63 = vadd.f32 %v988_v11, %v905_v43  ;;  %v19148_v30 = vld [vmem:[#allocation24_spill] sm:$0xff] }
 0x1df   : > { %v14260_v18 = vpop.permute.xlu2 %1086  ;;  %v1830_v16 = vmax.f32 %v1816_v50, 0.0  ;;  %v1855_v24 = vmul.f32 %v14153_v19, %v1829_v5  ;;  %v1200_v50 = vsel %vm1198_vm2, %v19139_v38, %v19138_v62  ;;  %v1201_v9 = vsel %vm1198_vm2, %v19138_v62, %v19140_v53  ;;  %v19149_v44 = vld [vmem:[#allocation21_spill] sm:$0xff] }
 0x1e0   : > { %v1828_v32 = vmax.f32 %v1814_v48, 0.0  ;;  %v19141_v48 = vld [vmem:[#allocation10_spill] sm:$0xff]  ;;  %v1115_v4 = vadd.f32 %v1089_v25, %v1005_v61  ;;  %v1226_v42 = vadd.f32 %v1200_v50, %v1116_v17  ;;  %v1227_v7 = vadd.f32 %v1201_v9, %v1117_v39  ;;  %v19150_v25 = vld [vmem:[#allocation25_spill] sm:$0xff]  ;;  %v19153_v17 = vld [vmem:[#allocation27_spill] sm:$0xff] }
 0x1e1   : > { %v1856_v41 = vmul.f32 %v14153_v19, %v1830_v16  ;;  %v1199_v5 = vsel %vm1198_vm2, %v19141_v48, %v19139_v38  ;;  %v19142_v16 = vld [vmem:[#allocation19_spill] sm:$0xff]  ;;  %v1421_v20 = vsel %vm1418_vm4, %v19149_v44, %v19148_v30  ;;  %v1420_v35 = vsel %vm1418_vm4, %v19150_v25, %v19149_v44  ;;  %v19151_v61 = vld [vmem:[#allocation22_spill] sm:$0xff]  ;;  %v19152_v9 = vld [vmem:[#allocation29_spill] sm:$0xff] }
 0x1e2   : > { %v1854_v54 = vmul.f32 %v14153_v19, %v1828_v32  ;;  %v1098_v32 = vsel %vm1088_vm1, %v13803_v45, %v19142_v16  ;;  %v19146_v45 = vld [vmem:[#allocation14_spill] sm:$0xff]  ;;  %v1318_v39 = vsel %vm1308_vm3, %v13907_v12, %v14049_v28  ;;  %v1540_v48 = vsel %vm1538_vm5, %v19153_v17, %v19152_v9 }
 0x1e6   : > { %v14290_v51 = vpop.permute.xlu0 %1870  ;;  %v14292_v31 = vpop.permute.xlu1 %1650 }
 0x1e7   : > { %v14297_v0 = vpop.permute.xlu2 %1634  ;;  %v1881_v21 = vadd.f32 %v14290_v51, %v1855_v24  ;;  %v1882_v22 = vadd.f32 %v14290_v51, %v1856_v41  ;;  %v1880_v6 = vadd.f32 %v14290_v51, %v1854_v54  ;;  %v19143_v24 = vld [vmem:[#allocation18_spill] sm:$0xff]  ;;  %v19144_v41 = vld [vmem:[#allocation16_spill] sm:$0xff] }
 0x1e8   : > { %v1310_v54 = vsel %vm1308_vm3, %v19144_v41, %v19143_v24  ;;  %v1311_v49 = vsel %vm1308_vm3, %v19143_v24, %v19145_v60  ;;  %v1309_v3 = vsel %vm1308_vm3, %v19146_v45, %v19144_v41  ;;  %v19155_v24 = vld [vmem:[#allocation30_spill] sm:$0xff]  ;;  %v19158_v45 = vld [vmem:[#allocation33_spill] sm:$0xff] }
 0x1e9   : > { %v1911_v33 = vmul.f32 %v1890_v15, %v1881_v21  ;;  %v1912_v23 = vmul.f32 %v1891_v56, %v1882_v22  ;;  %v1910_v37 = vmul.f32 %v1889_v1, %v1880_v6  ;;  %v19147_v21 = vld [vmem:[#allocation28_spill] sm:$0xff]  ;;  %v1225_v22 = vadd.f32 %v1199_v5, %v1115_v4  ;;  %v19154_v5 = vld [vmem:[#allocation31_spill] sm:$0xff] }
 0x1ea   : > { %v1208_v43 = vsel %vm1198_vm2, %v13879_v40, %v19147_v21  ;;  %v1125_v6 = vadd.f32 %v1098_v32, %v1015_v63  ;;  %v1419_v40 = vsel %vm1418_vm4, %v19151_v61, %v19150_v25  ;;  %v1541_v32 = vsel %vm1538_vm5, %v19152_v9, %v19154_v5  ;;  %v19163_v9 = vld [vmem:[#allocation42_spill] sm:$0xff] }
 0x1eb   : > { %1947 = vrot.lane.b32.xlu0 %v1911_v33, %s13368_s29  ;;  %1949 = vrot.lane.b32.xlu1 %v1912_v23, %s13368_s29  ;;  %v1336_v23 = vadd.f32 %v1310_v54, %v1226_v42  ;;  %v1335_v38 = vadd.f32 %v1309_v3, %v1225_v22  ;;  %v1539_v41 = vsel %vm1538_vm5, %v19155_v24, %v19153_v17  ;;  %v19156_v54 = vld [vmem:[#allocation39_spill] sm:$0xff] }
 0x1ec   : > { %1945 = vrot.lane.b32.xlu2 %v1910_v37, %s13368_s29  ;;  %v1337_v37 = vadd.f32 %v1311_v49, %v1227_v7  ;;  %v1235_v50 = vadd.f32 %v1208_v43, %v1125_v6  ;;  %v1428_v12 = vsel %vm1418_vm4, %v13952_v2, %v19156_v54  ;;  %v19157_v7 = vld [vmem:[#allocation36_spill] sm:$0xff]  ;;  %v19159_v43 = vld [vmem:[#allocation37_spill] sm:$0xff]  ;;  %v1549_v2 = vsel %vm1538_vm5, %v14017_v55, %v14225_v36  ;;  %v19164_v24 = vld [vmem:[#allocation23_spill] sm:$0xff] }
 0x1ed   : > { %v1446_v63 = vadd.f32 %v1420_v35, %v1336_v23  ;;  %v1445_v49 = vadd.f32 %v1419_v40, %v1335_v38  ;;  %v1661_v3 = vsel %vm1658_vm6, %v19158_v45, %v19157_v7  ;;  %v1660_v22 = vsel %vm1658_vm6, %v19159_v43, %v19158_v45  ;;  %v19162_v40 = vld [vmem:[#allocation45_spill] sm:$0xff] }
 0x1ee   : > { %v14350_v11 = vpop.permute.xlu0 %1290  ;;  %v14352_v33 = vpop.permute.xlu1 %962  ;;  %v1447_v4 = vadd.f32 %v1421_v20, %v1337_v37  ;;  %v1345_v42 = vadd.f32 %v1318_v39, %v1235_v50  ;;  %v19160_v20 = vld [vmem:[#allocation34_spill] sm:$0xff]  ;;  %v19161_v37 = vld [vmem:[#allocation41_spill] sm:$0xff]  ;;  %v1779_v17 = vsel %vm1778_vm7, %v19163_v9, %v19162_v40  ;;  %v1669_v55 = vsel %vm1658_vm6, %v14034_v14, %v14292_v31 }
 0x1ef   : > { %v14360_v62 = vpop.permute.xlu2 %1072  ;;  %v1568_v6 = vadd.f32 %v1540_v48, %v1446_v63  ;;  %v1659_v25 = vsel %vm1658_vm6, %v19160_v20, %v19159_v43  ;;  %v1567_v35 = vadd.f32 %v1539_v41, %v1445_v49  ;;  %v1781_v61 = vsel %vm1778_vm7, %v19161_v37, %v14149_v46  ;;  %v19168_v9 = vld [vmem:[#allocation46_spill] sm:$0xff] }
 0x1f0   : > { %v1569_v44 = vadd.f32 %v1541_v32, %v1447_v4  ;;  %v1455_v23 = vadd.f32 %v1428_v12, %v1345_v42  ;;  %v1780_v39 = vsel %vm1778_vm7, %v19162_v40, %v19161_v37  ;;  %v982_v41 = vsel %vm978_vm0, %v13816_v52, %v19164_v24  ;;  %v19166_v52 = vld [vmem:[#allocation35_spill] sm:$0xff] }
 0x1f1   : > { %v1688_v50 = vadd.f32 %v1660_v22, %v1568_v6  ;;  %v1687_v48 = vadd.f32 %v1659_v25, %v1567_v35  ;;  %v898_v14 = vmul.f32 %v13613_v27, %v13771_v29  ;;  %v19165_v22 = vld [vmem:[#allocation26_spill] sm:$0xff]  ;;  %v1202_v25 = vsel %vm1198_vm2, %v19140_v53, %v19166_v52  ;;  %v19167_v37 = vld [vmem:[#allocation43_spill] sm:$0xff] }
 0x1f2   : > { %v1689_v38 = vadd.f32 %v1661_v3, %v1569_v44  ;;  %v1577_v32 = vadd.f32 %v1549_v2, %v1455_v23  ;;  %v1092_v6 = vsel %vm1088_vm1, %v13847_v8, %v19165_v22  ;;  %v1312_v27 = vsel %vm1308_vm3, %v19145_v60, %v19167_v37 }
 0x1f3   : > { %v1808_v49 = vadd.f32 %v1780_v39, %v1688_v50  ;;  %v1807_v3 = vadd.f32 %v1779_v17, %v1687_v48  ;;  %v1008_v44 = vadd.f32 %v982_v41, %v898_v14  ;;  %v1422_v17 = vsel %vm1418_vm4, %v19148_v30, %v19168_v9 }
 0x1f4   : > { %v1809_v12 = vadd.f32 %v1781_v61, %v1689_v38  ;;  %v1697_v43 = vadd.f32 %v1669_v55, %v1577_v32 }
 0x1f5   : > { %v1822_v35 = vmax.f32 %v1808_v49, 0.0  ;;  %v1821_v23 = vmax.f32 %v1807_v3, 0.0 }
 0x1f6   : > { %v14398_v4 = vpop.permute.xlu0 %1770  ;;  %v14400_v63 = vpop.permute.xlu1 %1414  ;;  %v1823_v2 = vmax.f32 %v1809_v12, 0.0  ;;  %v1542_v12 = vsel %vm1538_vm5, %v19154_v5, %v14256_v47 }
 0x1f7   : > { %v1789_v42 = vsel %vm1778_vm7, %v14122_v57, %v14398_v4  ;;  %v14408_v45 = vpop.permute.xlu2 %1532  ;;  %v1118_v57 = vadd.f32 %v1092_v6, %v1008_v44  ;;  %v1848_v40 = vmul.f32 %v14233_v59, %v1822_v35  ;;  %v1847_v53 = vmul.f32 %v14233_v59, %v1821_v23  ;;  %v19170_v35 = vld [vmem:[#allocation7_spill] sm:$0xff] }
 0x1f8   : > { %v1817_v20 = vadd.f32 %v1789_v42, %v1697_v43  ;;  %v1849_v61 = vmul.f32 %v14233_v59, %v1823_v2  ;;  %v1662_v43 = vsel %vm1658_vm6, %v19157_v7, %v14297_v0 }
 0x1f9   : > { %v1228_v39 = vadd.f32 %v1202_v25, %v1118_v57  ;;  %v906_v57 = vmul.f32 %v19170_v35, %v13769_v26 }
 0x1fa   : > { %v1831_v8 = vmax.f32 %v1817_v20, 0.0  ;;  %v19169_v20 = vld [vmem:[#allocation32_spill] sm:$0xff] }
 0x1fb   : > { %v1338_v32 = vadd.f32 %v1312_v27, %v1228_v39  ;;  %v989_v7 = vsel %vm978_vm0, %v19137_v10, %v19169_v20  ;;  %v19171_v27 = vld [vmem:[#allocation40_spill] sm:$0xff] }
 0x1fc   : > { %v1857_v14 = vmul.f32 %v14153_v19, %v1831_v8 }
 0x1fd   : > { %v1448_v30 = vadd.f32 %v1422_v17, %v1338_v32 }
 0x1fe   : > { %v14423_v38 = vpop.permute.xlu0 %1196  ;;  %v14425_v50 = vpop.permute.xlu1 %1865  ;;  %v1883_v44 = vadd.f32 %v14290_v51, %v1857_v14  ;;  %v19174_v14 = vld [vmem:[#allocation38_spill] sm:$0xff] }
 0x1ff   : > { %v14431_v55 = vpop.permute.xlu2 %1306  ;;  %v1875_v60 = vadd.f32 %v14425_v50, %v1849_v61  ;;  %v1874_v48 = vadd.f32 %v14425_v50, %v1848_v40  ;;  %v1873_v41 = vadd.f32 %v14425_v50, %v1847_v53  ;;  %v1570_v5 = vadd.f32 %v1542_v12, %v1448_v30  ;;  %v19172_v53 = vld [vmem:[#allocation44_spill] sm:$0xff] }
 0x200   : > { %v1099_v61 = vsel %vm1088_vm1, %v19142_v16, %v19171_v27  ;;  %v1016_v40 = vadd.f32 %v989_v7, %v906_v57  ;;  %v1209_v10 = vsel %vm1198_vm2, %v19147_v21, %v19172_v53  ;;  %v1429_v21 = vsel %vm1418_vm4, %v19156_v54, %v14400_v63 }
 0x201   : > { %v1905_v49 = vmul.f32 %v1891_v56, %v1875_v60  ;;  %v1904_v42 = vmul.f32 %v1890_v15, %v1874_v48  ;;  %v1903_v3 = vmul.f32 %v1889_v1, %v1873_v41  ;;  %v1690_v56 = vadd.f32 %v1662_v43, %v1570_v5  ;;  %v19173_v60 = vld [vmem:[#allocation48_spill] sm:$0xff]  ;;  %v19175_v5 = vld [vmem:[#allocation47_spill] sm:$0xff] }
 0x202   : > { %v1892_v1 = vperm.slane %v14265_v58, 3  ;;  %v1126_v17 = vadd.f32 %v1099_v61, %v1016_v40  ;;  %v1319_v48 = vsel %vm1308_vm3, %v14049_v28, %v19173_v60  ;;  %v899_v28 = vmul.f32 %v19170_v35, %v13771_v29  ;;  %v19176_v61 = vld [vmem:[#allocation9_spill] sm:$0xff] }
 0x203   : > { %1935 = vrot.lane.b32.xlu1 %v1905_v49, %s13368_s29  ;;  %1933 = vrot.lane.b32.xlu0 %v1904_v42, %s13368_s29  ;;  %v1203_v54 = vsel %vm1198_vm2, %v19166_v52, %v14258_v34  ;;  %v1313_v57 = vsel %vm1308_vm3, %v19167_v37, %v14350_v11  ;;  %v900_v40 = vmul.f32 %v19176_v61, %v13771_v29 }
 0x204   : > { %1931 = vrot.lane.b32.xlu2 %v1903_v3, %s13368_s29  ;;  %v1913_v8 = vmul.f32 %v1892_v1, %v1883_v44  ;;  %v1236_v32 = vadd.f32 %v1209_v10, %v1126_v17  ;;  %v983_v3 = vsel %vm978_vm0, %v19164_v24, %v19174_v14 }
 0x205   : > { %v1009_v44 = vadd.f32 %v983_v3, %v899_v28  ;;  %v1893_v3 = vperm.slane %v14265_v58, 4 }
 0x206   : > { %v14452_v6 = vpop.permute.xlu0 %1754  ;;  %v14454_v15 = vpop.permute.xlu1 %1400  ;;  %v1346_v42 = vadd.f32 %v1319_v48, %v1236_v32 }
 0x207   : > { %v1782_v25 = vsel %vm1778_vm7, %v14149_v46, %v14452_v6  ;;  %v14464_v2 = vpop.permute.xlu2 %1292 }
 0x208   : > { %v1810_v23 = vadd.f32 %v1782_v25, %v1690_v56  ;;  %v1456_v43 = vadd.f32 %v1429_v21, %v1346_v42  ;;  %v1093_v56 = vsel %vm1088_vm1, %v19165_v22, %v19175_v5  ;;  %v984_v22 = vsel %vm978_vm0, %v19174_v14, %v14352_v33 }
 0x209   : > { %v1119_v24 = vadd.f32 %v1093_v56, %v1009_v44  ;;  %v1010_v17 = vadd.f32 %v984_v22, %v900_v40 }
 0x20a   : > { %v1824_v39 = vmax.f32 %v1810_v23, 0.0 }
 0x20c   : > { %v1850_v46 = vmul.f32 %v14233_v59, %v1824_v39  ;;  %1951 = vrot.lane.b32.xlu2 %v1913_v8, %s13368_s29  ;;  %v1423_v8 = vsel %vm1418_vm4, %v19168_v9, %v14454_v15 }
 0x20e   : > { %v1876_v41 = vadd.f32 %v14425_v50, %v1850_v46  ;;  %v14480_v16 = vpop.permute.xlu0 %1516  ;;  %v14482_v12 = vpop.permute.xlu1 %1182 }
 0x20f   : > { %v14487_v49 = vpop.permute.xlu2 %1772  ;;  %v1204_v9 = vsel %vm1198_vm2, %v14258_v34, %v14482_v12  ;;  %v907_v34 = vmul.f32 %v19176_v61, %v13769_v26 }
 0x210   : > { %v1906_v30 = vmul.f32 %v1892_v1, %v1876_v41  ;;  %v1550_v1 = vsel %vm1538_vm5, %v14225_v36, %v14408_v45  ;;  %v1229_v36 = vadd.f32 %v1203_v54, %v1119_v24  ;;  %v1790_v37 = vsel %vm1778_vm7, %v14398_v4, %v14487_v49 }
 0x211   : > { %v1578_v25 = vadd.f32 %v1550_v1, %v1456_v43  ;;  %v1094_v41 = vsel %vm1088_vm1, %v19175_v5, %v14360_v62  ;;  %v1100_v54 = vsel %vm1088_vm1, %v19171_v27, %v14260_v18 }
 0x212   : > { %1937 = vrot.lane.b32.xlu0 %v1906_v30, %s13368_s29  ;;  %v1339_v10 = vadd.f32 %v1313_v57, %v1229_v36  ;;  %v1120_v42 = vadd.f32 %v1094_v41, %v1010_v17  ;;  %v1314_v57 = vsel %vm1308_vm3, %v14350_v11, %v14464_v2 }
 0x214   : > { %v1449_v48 = vadd.f32 %v1423_v8, %v1339_v10  ;;  %v1230_v5 = vadd.f32 %v1204_v9, %v1120_v42  ;;  %v1320_v10 = vsel %vm1308_vm3, %v19173_v60, %v14431_v55 }
 0x216   : > { %v14504_v7 = vpop.permute.xlu0 %1416  ;;  %v14506_v35 = vpop.permute.xlu1 %1652  ;;  %v1340_v27 = vadd.f32 %v1314_v57, %v1230_v5 }
 0x217   : > { %v1757_v23 = vpop.permute.xlu2 %1756  ;;  %v1670_v52 = vsel %vm1658_vm6, %v14292_v31, %v14506_v35  ;;  %v1543_v31 = vsel %vm1538_vm5, %v14256_v47, %v14480_v16  ;;  %v990_v47 = vsel %vm978_vm0, %v19169_v20, %v14223_v13  ;;  %v1430_v17 = vsel %vm1418_vm4, %v14400_v63, %v14504_v7 }
 0x218   : > { %v1698_v39 = vadd.f32 %v1670_v52, %v1578_v25  ;;  %v1571_v21 = vadd.f32 %v1543_v31, %v1449_v48  ;;  %v1783_v1 = vsel %vm1778_vm7, %v14452_v6, %v1757_v23  ;;  %v1017_v20 = vadd.f32 %v990_v47, %v907_v34 }
 0x219   : > { %v1894_v34 = vperm.slane %v14265_v58, 5 }
 0x21a   : > { %v1818_v46 = vadd.f32 %v1790_v37, %v1698_v39  ;;  %v1127_v52 = vadd.f32 %v1100_v54, %v1017_v20 }
 0x21c   : > { %v1832_v32 = vmax.f32 %v1818_v46, 0.0 }
 0x21e   : > { %v1858_v4 = vmul.f32 %v14153_v19, %v1832_v32  ;;  %v14535_v30 = vpop.permute.xlu0 %1402  ;;  %v1637_v14 = vpop.permute.xlu1 %1636 }
 0x21f   : > { %v14541_v28 = vpop.permute.xlu2 %1638  ;;  %v1663_v43 = vsel %vm1658_vm6, %v14297_v0, %v1637_v14  ;;  %v1210_v0 = vsel %vm1198_vm2, %v19172_v53, %v14423_v38  ;;  %v1424_v22 = vsel %vm1418_vm4, %v14454_v15, %v14535_v30 }
 0x220   : > { %v1691_v56 = vadd.f32 %v1663_v43, %v1571_v21  ;;  %v1884_v44 = vadd.f32 %v14290_v51, %v1858_v4  ;;  %v1237_v6 = vadd.f32 %v1210_v0, %v1127_v52  ;;  %v1450_v61 = vadd.f32 %v1424_v22, %v1340_v27 }
 0x221   : > { %v1664_v46 = vsel %vm1658_vm6, %v1637_v14, %v14541_v28 }
 0x222   : > { %v1811_v24 = vadd.f32 %v1783_v1, %v1691_v56  ;;  %v1914_v25 = vmul.f32 %v1893_v3, %v1884_v44  ;;  %v1347_v31 = vadd.f32 %v1320_v10, %v1237_v6 }
 0x224   : > { %v1825_v36 = vmax.f32 %v1811_v24, 0.0  ;;  %1953 = vrot.lane.b32.xlu1 %v1914_v25, %s13368_s29  ;;  %v1457_v60 = vadd.f32 %v1430_v17, %v1347_v31 }
 0x226   : > { %v1851_v40 = vmul.f32 %v14233_v59, %v1825_v36  ;;  %v14564_v39 = vpop.permute.xlu0 %1518  ;;  %v1535_v53 = vpop.permute.xlu1 %1534 }
 0x227   : > { %v1544_v11 = vsel %vm1538_vm5, %v14480_v16, %v14564_v39  ;;  %v14569_v37 = vpop.permute.xlu2 %1758  ;;  %v13369_v16 = vmov 0.0   ;;  %v1551_v9 = vsel %vm1538_vm5, %v14408_v45, %v1535_v53  ;;  %v19177_v45 = vld [vmem:[#allocation20_spill] sm:$0xff] }
 0x228   : > { %v1572_v8 = vadd.f32 %v1544_v11, %v1450_v61  ;;  %v1877_v15 = vadd.f32 %v14425_v50, %v1851_v40  ;;  %825 = vst [vmem:[#allocation2 + $0x40] sm:$0x3] %v13369_v16  ;;  %v1784_v41 = vsel %vm1778_vm7, %v1757_v23, %v14569_v37  ;;  %v1579_v42 = vadd.f32 %v1551_v9, %v1457_v60 }
 0x229   : > { %816 = vst [vmem:[#allocation2] sm:$0xff] %v13369_v16 }
 0x22a   : > { %v1692_v48 = vadd.f32 %v1664_v46, %v1572_v8  ;;  %v1907_v32 = vmul.f32 %v1893_v3, %v1877_v15  ;;  %822 = vst [vmem:[#allocation2 + $0x30] sm:$0xff] %v13369_v16  ;;  %v908_v3 = vmul.f32 %v19177_v45, %v13769_v26  ;;  %v1895_v46 = vperm.slane %v14265_v58, 6 }
 0x22b   : > { %826 = vst [vmem:[#allocation2 + $0x48] sm:$0x3] %v13369_v16 }
 0x22c   : > { %v1812_v21 = vadd.f32 %v1784_v41, %v1692_v48  ;;  %1939 = vrot.lane.b32.xlu2 %v1907_v32, %s13368_s29  ;;  %827 = vst [vmem:[#allocation2 + $0x50] sm:$0x3] %v13369_v16  ;;  %v1018_v56 = vadd.f32 %v14223_v13, %v908_v3 }
 0x22d   : > { %828 = vst [vmem:[#allocation2 + $0x58] sm:$0x3] %v13369_v16 }
 0x22e   : > { %v1826_v63 = vmax.f32 %v1812_v21, 0.0  ;;  %v1775_v4 = vpop.permute.xlu0 %1774  ;;  %v1655_v14 = vpop.permute.xlu1 %1654  ;;  %829 = vst [vmem:[#allocation2 + $0x60] sm:$0x3] %v13369_v16  ;;  %v1128_v54 = vadd.f32 %v14260_v18, %v1018_v56 }
 0x22f   : > { %v1671_v23 = vsel %vm1658_vm6, %v14506_v35, %v1655_v14  ;;  %v1791_v5 = vsel %vm1778_vm7, %v14487_v49, %v1775_v4  ;;  %830 = vst [vmem:[#allocation2 + $0x68] sm:$0x3] %v13369_v16  ;;  %v901_v35 = vmul.f32 %v19177_v45, %v13771_v29 }
 0x230   : > { %v1852_v47 = vmul.f32 %v14233_v59, %v1826_v63  ;;  %v1699_v43 = vadd.f32 %v1671_v23, %v1579_v42  ;;  %831 = vst [vmem:[#allocation2 + $0x70] sm:$0x3] %v13369_v16  ;;  %v1238_v13 = vadd.f32 %v14423_v38, %v1128_v54 }
 0x231   : > { %834 = vst [vmem:[#allocation5] sm:$0xff] %v13369_v16  ;;  %v1011_v1 = vadd.f32 %v14352_v33, %v901_v35 }
 0x232   : > { %v1878_v44 = vadd.f32 %v14425_v50, %v1852_v47  ;;  %v1819_v26 = vadd.f32 %v1791_v5, %v1699_v43  ;;  %838 = vst [vmem:[#allocation5 + $0x20] sm:$0xff] %v13369_v16  ;;  %v1348_v0 = vadd.f32 %v14431_v55, %v1238_v13 }
 0x233   : > { %839 = vst [vmem:[#allocation5 + $0x28] sm:$0xff] %v13369_v16  ;;  %v1121_v18 = vadd.f32 %v14360_v62, %v1011_v1  ;;  %v1641_v62 = vpop.permute.xlu2 %1640 }
 0x234   : > { %v1833_v20 = vmax.f32 %v1819_v26, 0.0  ;;  %v1908_v49 = vmul.f32 %v1894_v34, %v1878_v44  ;;  %842 = vst [vmem:[#allocation5 + $0x40] sm:$0x3] %v13369_v16  ;;  %v1458_v52 = vadd.f32 %v14504_v7, %v1348_v0 }
 0x235   : > { %843 = vst [vmem:[#allocation5 + $0x48] sm:$0x3] %v13369_v16  ;;  %v1231_v38 = vadd.f32 %v14482_v12, %v1121_v18 }
 0x236   : > { %v1859_v29 = vmul.f32 %v14153_v19, %v1833_v20  ;;  %v1521_v24 = vpop.permute.xlu0 %1520  ;;  %1941 = vrot.lane.b32.xlu1 %v1908_v49, %s13368_s29  ;;  %v1537_v25 = vpop.permute.xlu1 %1536  ;;  %844 = vst [vmem:[#allocation5 + $0x50] sm:$0x3] %v13369_v16 }
 0x237   : > { %845 = vst [vmem:[#allocation5 + $0x58] sm:$0x3] %v13369_v16  ;;  %v1552_v22 = vsel %vm1538_vm5, %v1535_v53, %v1537_v25  ;;  %v1341_v27 = vadd.f32 %v14464_v2, %v1231_v38  ;;  %v1545_v12 = vsel %vm1538_vm5, %v14564_v39, %v1521_v24  ;;  %v1665_v39 = vsel %vm1658_vm6, %v14541_v28, %v1641_v62 }
 0x238   : > { %v1885_v33 = vadd.f32 %v14290_v51, %v1859_v29  ;;  %846 = vst [vmem:[#allocation5 + $0x60] sm:$0x3] %v13369_v16  ;;  %v1580_v36 = vadd.f32 %v1552_v22, %v1458_v52 }
 0x239   : > { %847 = vst [vmem:[#allocation5 + $0x68] sm:$0x3] %v13369_v16  ;;  %v1451_v7 = vadd.f32 %v14535_v30, %v1341_v27 }
 0x23a   : > { %v1915_v57 = vmul.f32 %v1894_v34, %v1885_v33  ;;  %850 = vst [vmem:[#allocation6] sm:$0xff] %v13369_v16 }
 0x23b   : > { %854 = vst [vmem:[#allocation6 + $0x20] sm:$0xff] %v13369_v16  ;;  %v1573_v11 = vadd.f32 %v1545_v12, %v1451_v7 }
 0x23c   : > { %1955 = vrot.lane.b32.xlu0 %v1915_v57, %s13368_s29  ;;  %858 = vst [vmem:[#allocation6 + $0x40] sm:$0x3f] %v13369_v16 }
 0x23d   : > { %859 = vst [vmem:[#allocation6 + $0x48] sm:$0x3f] %v13369_v16  ;;  %v1693_v10 = vadd.f32 %v1665_v39, %v1573_v11 }
 0x23e   : > { %v1777_v55 = vpop.permute.xlu0 %1776  ;;  %v1657_v6 = vpop.permute.xlu1 %1656  ;;  %860 = vst [vmem:[#allocation6 + $0x50] sm:$0x3f] %v13369_v16 }
 0x23f   : > { %v1672_v61 = vsel %vm1658_vm6, %v1655_v14, %v1657_v6  ;;  %v1792_v53 = vsel %vm1778_vm7, %v1775_v4, %v1777_v55  ;;  %861 = vst [vmem:[#allocation6 + $0x58] sm:$0x3f] %v13369_v16 }
 0x240   : > { %v1700_v40 = vadd.f32 %v1672_v61, %v1580_v36  ;;  %862 = vst [vmem:[#allocation6 + $0x60] sm:$0x3f] %v13369_v16 }
 0x241   : > { %863 = vst [vmem:[#allocation6 + $0x68] sm:$0x3f] %v13369_v16 }
 0x242   : > { %v1820_v8 = vadd.f32 %v1792_v53, %v1700_v40  ;;  %824 = vst.msk [vmem:[#allocation2 + $0x38] sm:$0xff] %vm823_vm12, %v13369_v16 }
 0x244   : > { %v1834_v2 = vmax.f32 %v1820_v8, 0.0 }
 0x246   : > { %v1860_v30 = vmul.f32 %v14153_v19, %v1834_v2  ;;  %v1946_v15 = vpop.permute.xlu2 %1945  ;;  %v1761_v17 = vpop.permute.xlu1 %1760 }
 0x247   : > { %1996 = vst.msk [vmem:[#allocation2 + $0x40] sm:$0x3] %vm1995_vm8, %v1946_v15  ;;  %v1785_v31 = vsel %vm1778_vm7, %v14569_v37, %v1761_v17  ;;  %vm832_vm8 = vcmask 25600  }
 0x248   : > { %v1886_v48 = vadd.f32 %v14290_v51, %v1860_v30  ;;  %v1813_v28 = vadd.f32 %v1785_v31, %v1693_v10  ;;  %833 = vst.msk [vmem:[#allocation2 + $0x78] sm:$0x3] %vm832_vm8, %v13369_v16  ;;  %vm8939_vm8 = vcmask 1042400  }
 0x24a   : > { %v1827_v32 = vmax.f32 %v1813_v28, 0.0  ;;  %v1916_v41 = vmul.f32 %v1895_v46, %v1886_v48 }
 0x24c   : > { %v1853_v19 = vmul.f32 %v14233_v59, %v1827_v32  ;;  %1957 = vrot.lane.b32.xlu2 %v1916_v41, %s13368_s29 }
 0x24e   : > { %v1879_v9 = vadd.f32 %v14425_v50, %v1853_v19  ;;  %v14663_v14 = vld [vmem:[#allocation2 + $0x40] sm:$0x3] }
 0x250   : > { %v1909_v60 = vmul.f32 %v1895_v46, %v1879_v9 }
 0x252   : > { %1943 = vrot.lane.b32.xlu0 %v1909_v60, %s13368_s29  ;;  %s19181_s29 = sld [smem:[#allocation71_spill]] }
 0x25d   : > { %v1948_v58 = vpop.permute.xlu0 %1947  ;;  %v1950_v21 = vpop.permute.xlu1 %1949 }
 0x25e   : > { %v1966_v37 = vsel %vm1959_vm9, %v1946_v15, %v1948_v58  ;;  %v1967_v51 = vsel %vm1959_vm9, %v1948_v58, %v1950_v21  ;;  %v1932_v63 = vpop.permute.xlu2 %1931 }
 0x25f   : > { %1997 = vst [vmem:[#allocation2 + $0x48] sm:$0x3] %v1966_v37 }
 0x260   : > { %1998 = vst [vmem:[#allocation2 + $0x50] sm:$0x3] %v1967_v51 }
 0x261   : > { %1987 = vst.msk [vmem:[#allocation2] sm:$0xff] %vm1986_vm10, %v1932_v63  ;;  %vm6003_vm10 = vcmask 64512  }
 0x266   : > { %v1952_v59 = vpop.permute.xlu2 %1951  ;;  %v14654_v42 = vld [vmem:[#allocation2 + $0x48] sm:$0x3] }
 0x267   : > { %v1968_v50 = vsel %vm1959_vm9, %v1950_v21, %v1952_v59  ;;  %2053 = vrot.lane.b32.xlu1 %v14654_v42, %s19043_s10  ;;  %v14659_v4 = vld [vmem:[#allocation2 + $0x50] sm:$0x3] }
 0x268   : > { %1999 = vst [vmem:[#allocation2 + $0x58] sm:$0x3] %v1968_v50  ;;  %2055 = vrot.lane.b32.xlu2 %v14659_v4, %s19043_s10  ;;  %v14686_v35 = vld [vmem:[#allocation2] sm:$0xff] }
 0x26f   : > { %2051 = vrot.lane.b32.xlu1 %v14663_v14, %s19043_s10  ;;  %v14679_v34 = vld [vmem:[#allocation2 + $0x58] sm:$0x3] }
 0x275   : > { %v1934_v23 = vpop.permute.xlu0 %1933  ;;  %v1936_v45 = vpop.permute.xlu1 %1935 }
 0x276   : > { %v14668_v3 = vsel %vm1959_vm9, %v1932_v63, %v1934_v23  ;;  %v14671_v47 = vsel %vm1959_vm9, %v1934_v23, %v1936_v45 }
 0x277   : > { %v14675_v43 = vpack.i.bf16 %v14671_v47, %v14668_v3  ;;  %v14746_v36 = vpack.i.bf16 %v14668_v3, %v14686_v35 }
 0x279   : > { %12773 = vrot.lane.b32.xlu0 %v14675_v43, %s19043_s10 }
 0x281   : > { %2057 = vrot.lane.b32.xlu0 %v14679_v34, %s19043_s10 }
 0x284   : > { %v1938_v5 = vpop.permute.xlu0 %1937 }
 0x285   : > { %v14684_v56 = vsel %vm1959_vm9, %v1936_v45, %v1938_v5 }
 0x286   : > { %v1940_v44 = vpop.permute.xlu2 %1939  ;;  %v14690_v26 = vpack.i.bf16 %v14684_v56, %v14686_v35  ;;  %v14730_v62 = vpack.i.bf16 %v14684_v56, %v14671_v47 }
 0x287   : > { %v14693_v54 = vsel %vm1959_vm9, %v1938_v5, %v1940_v44 }
 0x288   : > { %12778 = vrot.lane.b32.xlu2 %v14690_v26, %s19043_s10 }
 0x296   : > { %v1954_v1 = vpop.permute.xlu1 %1953 }
 0x297   : > { %v1969_v20 = vsel %vm1959_vm9, %v1952_v59, %v1954_v1 }
 0x298   : > { %2000 = vst [vmem:[#allocation2 + $0x60] sm:$0x3] %v1969_v20 }
 0x29f   : > { %v14698_v49 = vld [vmem:[#allocation2 + $0x60] sm:$0x3] }
 0x2a0   : > { %2059 = vrot.lane.b32.xlu1 %v14698_v49, %s19043_s10 }
 0x2a6   : > { %v1958_v25 = vpop.permute.xlu2 %1957 }
 0x2a8   : > { %v1942_v13 = vpop.permute.xlu1 %1941 }
 0x2a9   : > { %v14703_v29 = vsel %vm1959_vm9, %v1940_v44, %v1942_v13 }
 0x2aa   : > { %v14707_v24 = vpack.i.bf16 %v14703_v29, %v14693_v54 }
 0x2ac   : > { %12783 = vrot.lane.b32.xlu2 %v14707_v24, %s19043_s10 }
 0x2ae   : > { %v1956_v18 = vpop.permute.xlu0 %1955 }
 0x2af   : > { %v1970_v33 = vsel %vm1959_vm9, %v1954_v1, %v1956_v18  ;;  %v1971_v0 = vsel %vm1959_vm9, %v1956_v18, %v1958_v25 }
 0x2b0   : > { %2001 = vst [vmem:[#allocation2 + $0x68] sm:$0x3] %v1970_v33  ;;  %v14944_v33 = vld [vmem:[#allocation2 + $0x58] sm:$0x3] }
 0x2b1   : > { %2003 = vst.msk [vmem:[#allocation2 + $0x70] sm:$0x3] %vm2002_vm11, %v1971_v0  ;;  %vm6221_vm11 = vcmask 48128  }
 0x2b7   : > { %v14715_v38 = vld [vmem:[#allocation2 + $0x68] sm:$0x3] }
 0x2b8   : > { %2061 = vrot.lane.b32.xlu0 %v14715_v38, %s19043_s10  ;;  %v14719_v57 = vld [vmem:[#allocation2 + $0x70] sm:$0x3] }
 0x2b9   : > { %2063 = vrot.lane.b32.xlu1 %v14719_v57, %s19043_s10 }
 0x2c0   : > { %2465 = vrot.lane.b32.xlu0 %v14663_v14, %s19114_s0 }
 0x2c1   : > { %2467 = vrot.lane.b32.xlu1 %v14654_v42, %s19114_s0 }
 0x2c2   : > { %v2056_v55 = vpop.permute.xlu2 %2055 }
 0x2c4   : > { %v1944_v22 = vpop.permute.xlu0 %1943 }
 0x2c5   : > { %v1965_v52 = vsel %vm1959_vm9, %v1942_v13, %v1944_v22  ;;  %vm5759_vm9 = vcmask 523264  }
 0x2c6   : > { %1994 = vst.msk [vmem:[#allocation2 + $0x30] sm:$0xff] %vm1993_vm13, %v1965_v52  ;;  %vm6673_vm13 = vcmask 349184  }
 0x2c8   : > { %2469 = vrot.lane.b32.xlu0 %v14659_v4, %s19114_s0 }
 0x2c9   : > { %12793 = vrot.lane.b32.xlu1 %v14730_v62, %s19114_s0 }
 0x2cd   : > { %v14736_v27 = vld [vmem:[#allocation2 + $0x30] sm:$0xff] }
 0x2ce   : > { %2049 = vrot.lane.b32.xlu2 %v14736_v27, %s19043_s10  ;;  %s19178_s10 = sld [smem:[#allocation70_spill]] }
 0x2d0   : > { %2473 = vrot.lane.b32.xlu0 %v14698_v49, %s19114_s0 }
 0x2d1   : > { %2475 = vrot.lane.b32.xlu1 %v14715_v38, %s19114_s0 }
 0x2d4   : > { %v14787_v31 = vld [vmem:[%s19178_s10 + $0x18] sm:$0x3f]  ;;  %v14792_v48 = vld [vmem:[%s19178_s10 + $0x10] sm:$0xff]  ;;  %v14856_v60 = vld [vmem:[%s19178_s10] sm:$0xff] }
 0x2d5   : > { %v14878_v23 = vld [vmem:[%s19178_s10 + $0x8] sm:$0x3f] }
 0x2d6   : > { %12788 = vrot.lane.b32.xlu2 %v14746_v36, %s19114_s0 }
 0x2d8   : > { %2477 = vrot.lane.b32.xlu0 %v14719_v57, %s19114_s0 }
 0x2d9   : > { %2463 = vrot.lane.b32.xlu1 %v14736_v27, %s19114_s0  ;;  %v2054_v6 = vpop.permute.xlu1 %2053 }
 0x2da   : > { %v2072_v12 = vsel %vm978_vm0, %v2054_v6, %v2056_v55 }
 0x2db   : > { %11874 = vmatpush.msk.msra.mxu1 %vm2091_vm14, %v2072_v12  ;;  %12740 = vmatpush.msk.msra.mxu2 %vm2091_vm14, %v2072_v12 }
 0x2de   : > { %2471 = vrot.lane.b32.xlu2 %v14679_v34, %s19114_s0 }
 0x2e0   : > { %2714 = vrot.lane.b32.xlu0 %v14659_v4, %s19051_s1 }
 0x2e1   : > { %12803 = vrot.lane.b32.xlu1 %v14675_v43, %s19051_s1  ;;  %v2052_v61 = vpop.permute.xlu1 %2051 }
 0x2e2   : > { %v2071_v7 = vsel %vm978_vm0, %v2052_v61, %v2054_v6  ;;  %v12779_v40 = vpop.permute.xlu2 %12778  ;;  %v14962_v61 = vld [vmem:[%s19178_s10 + $0x20] sm:$0xff] }
 0x2e3   : > { %11871 = vmatpush.msk.msra.mxu0 %vm2091_vm14, %v2071_v7  ;;  %v12780_v11 = vunpack.i.l.bf16 %v12779_v40  ;;  %v12781_v10 = vunpack.i.h.bf16 %v12779_v40  ;;  %v14970_v40 = vld [vmem:[#allocation2 + $0x68] sm:$0x3] }
 0x2e6   : > { %12798 = vrot.lane.b32.xlu2 %v14707_v24, %s19114_s0 }
 0x2e8   : > { %2716 = vrot.lane.b32.xlu0 %v14679_v34, %s19051_s1 }
 0x2e9   : > { %12808 = vrot.lane.b32.xlu1 %v14690_v26, %s19051_s1 }
 0x2eb   : > { %v12774_v53 = vpop.permute.xlu0 %12773 }
 0x2ec   : > { %v12776_v8 = vunpack.i.h.bf16 %v12774_v53  ;;  %v12775_v2 = vunpack.i.l.bf16 %v12774_v53 }
 0x2ee   : > { %2712 = vrot.lane.b32.xlu2 %v14654_v42, %s19051_s1  ;;  %v2065_v39 = vsel %vm978_vm0, %v12780_v11, %v12775_v2  ;;  %v2066_v30 = vsel %vm978_vm0, %v12775_v2, %v12776_v8  ;;  %v2067_v46 = vsel %vm978_vm0, %v12776_v8, %v12781_v10 }
 0x2ef   : > { %2121 = vmatpush.msra.mxu0 %v2065_v39  ;;  %2144 = vmatpush.msra.mxu1 %v2066_v30  ;;  %v14981_v39 = vld [vmem:[#allocation2 + $0x50] sm:$0x3] }
 0x2f0   : > { %12813 = vrot.lane.b32.xlu0 %v14707_v24, %s19051_s1  ;;  %12741 = vmatpush.msra.mxu2 %v2066_v30  ;;  %v3438_v30 = vld [vmem:[#allocation2 + $0x38] sm:$0xff] }
 0x2f1   : > { %2720 = vrot.lane.b32.xlu1 %v14715_v38, %s19051_s1  ;;  %11872 = vmatmul.msk.f32.vlgmr.msra.gmra.mxu0 %vm2084_vm15, %v14792_v48 }
 0x2f2   : > { %11876 = vmatmul.msk.f32.vlgmr.msra.gmra.mxu2 %vm2084_vm15, %v14787_v31  ;;  %11875 = vmatmul.msk.f32.vlgmr.msra.gmra.mxu1 %vm2084_vm15, %v14792_v48 }
 0x2f3   : > { %v2058_v15 = vpop.permute.xlu0 %2057 }
 0x2f4   : > { %v2073_v17 = vsel %vm978_vm0, %v2056_v55, %v2058_v15  ;;  %v14953_v55 = vld [vmem:[#allocation2 + $0x40] sm:$0x3] }
 0x2f5   : > { %11877 = vmatpush.msk.msrb.mxu2 %vm2091_vm14, %v2073_v17  ;;  %v14995_v17 = vpack.i.bf16 %v3438_v30, %v14736_v27 }
 0x2f6   : > { %2710 = vrot.lane.b32.xlu2 %v14663_v14, %s19051_s1 }
 0x2f7   : > { %2167 = vmatpush.msrb.mxu2 %v2067_v46  ;;  %v14997_v46 = vld [vmem:[#allocation2 + $0x78] sm:$0x3] }
 0x2f8   : > { %2708 = vrot.lane.b32.xlu0 %v14736_v27, %s19051_s1 }
 0x2f9   : > { %2955 = vrot.lane.b32.xlu1 %v14663_v14, %s13363_s6  ;;  %11873 = vmatmul.msk.f32.gmra.mxu0 %vm2084_vm15, %v14787_v31 }
 0x2fa   : > { %11878 = vmatmul.msk.f32.vlgmr.msrb.gmra.mxu2 %vm2084_vm15, %v14792_v48 }
 0x2fe   : > { %2718 = vrot.lane.b32.xlu2 %v14698_v49, %s19051_s1 }
 0x300   : > { %12818 = vrot.lane.b32.xlu0 %v14746_v36, %s13363_s6 }
 0x301   : > { %2959 = vrot.lane.b32.xlu1 %v14659_v4, %s13363_s6 }
 0x302   : > { %11879 = vmatmul.msk.f32.gmra.mxu2 %vm2084_vm15, %v14787_v31 }
 0x306   : > { %2722 = vrot.lane.b32.xlu2 %v14719_v57, %s19051_s1  ;;  %v12784_v28 = vpop.permute.xlu2 %12783  ;;  %s19257_s1 = smov 98  }
 0x307   : > { %v12785_v32 = vunpack.i.l.bf16 %v12784_v28  ;;  %v12786_v21 = vunpack.i.h.bf16 %v12784_v28 }
 0x308   : > { %12823 = vrot.lane.b32.xlu0 %v14730_v62, %s13363_s6 }
 0x309   : > { %2963 = vrot.lane.b32.xlu1 %v14698_v49, %s13363_s6  ;;  %v2068_v9 = vsel %vm978_vm0, %v12781_v10, %v12785_v32  ;;  %v2069_v50 = vsel %vm978_vm0, %v12785_v32, %v12786_v21 }
 0x30e   : > { %2957 = vrot.lane.b32.xlu2 %v14654_v42, %s13363_s6 }
 0x310   : > { %2965 = vrot.lane.b32.xlu0 %v14715_v38, %s13363_s6 }
 0x311   : > { %2967 = vrot.lane.b32.xlu1 %v14719_v57, %s13363_s6 }
 0x312   : > { %v2060_v41 = vpop.permute.xlu1 %2059 }
 0x313   : > { %v2074_v19 = vsel %vm978_vm0, %v2058_v15, %v2060_v41  ;;  %v14988_v15 = vld [vmem:[%s19178_s10 + $0x28] sm:$0x3f] }
 0x314   : > { %11880 = vmatpush.msk.msra.mxu3 %vm2091_vm14, %v2074_v19  ;;  %v15012_v19 = vld [vmem:[#allocation2 + $0x60] sm:$0x3] }
 0x316   : > { %2961 = vrot.lane.b32.xlu2 %v14679_v34, %s13363_s6  ;;  %2190 = vmatpush.msra.mxu3 %v2068_v9 }
 0x317   : > { %11881 = vmatmul.msk.f32.vlgmr.msra.gmra.mxu3 %vm2084_vm15, %v14792_v48 }
 0x318   : > { %11892 = vmatpush.msk.msrb.mxu3 %vm2091_vm14, %v14663_v14  ;;  %3200 = vrot.lane.b32.xlu0 %v14663_v14, %s19113_s5 }
 0x319   : > { %3202 = vrot.lane.b32.xlu1 %v14654_v42, %s19113_s5 }
 0x31a   : > { %2302 = vmatpush.msrb.mxu3 %v14686_v35 }
 0x31c   : > { %11904 = vmatpush.msk.msra.mxu3 %vm2091_vm14, %v14698_v49 }
 0x31e   : > { %2394 = vmatpush.msra.mxu3 %v14693_v54  ;;  %12828 = vrot.lane.b32.xlu2 %v14707_v24, %s13363_s6 }
 0x31f   : > { %11882 = vmatmul.msk.f32.gmra.mxu3 %vm2084_vm15, %v14787_v31 }
 0x320   : > { %3204 = vrot.lane.b32.xlu0 %v14659_v4, %s19113_s5 }
 0x321   : > { %12838 = vrot.lane.b32.xlu1 %v14730_v62, %s19113_s5 }
 0x326   : > { %2953 = vrot.lane.b32.xlu2 %v14736_v27, %s13363_s6  ;;  %s19179_s6 = smov 67  }
 0x327   : > { %11893 = vmatmul.msk.f32.vlgmr.msrb.gmra.mxu3 %vm2084_vm15, %v14856_v60 }
 0x328   : > { %3208 = vrot.lane.b32.xlu0 %v14698_v49, %s19113_s5  ;;  %v2050_v58 = vpop.permute.xlu2 %2049 }
 0x329   : > { %12843 = vrot.lane.b32.xlu1 %v14707_v24, %s19113_s5  ;;  %v2070_v14 = vsel %vm978_vm0, %v12786_v21, %v2050_v58 }
 0x32a   : > { %v2062_v37 = vpop.permute.xlu0 %2061 }
 0x32b   : > { %v2064_v51 = vpop.permute.xlu1 %2063  ;;  %v2075_v63 = vsel %vm978_vm0, %v2060_v41, %v2062_v37 }
 0x32c   : > { %11889 = vmatpush.msk.msra.mxu2 %vm2091_vm14, %v2064_v51  ;;  %11883 = vmatpush.msk.msrb.mxu0 %vm2091_vm14, %v2075_v63  ;;  %v2076_v59 = vsel %vm978_vm0, %v2062_v37, %v2064_v51 }
 0x32d   : > { %11886 = vmatpush.msk.msrb.mxu1 %vm2091_vm14, %v2076_v59  ;;  %v15031_v59 = vld [vmem:[#allocation2 + $0x70] sm:$0x3] }
 0x32e   : > { %2259 = vmatpush.msra.mxu2 %v2050_v58  ;;  %12833 = vrot.lane.b32.xlu2 %v14746_v36, %s19113_s5 }
 0x32f   : > { %2213 = vmatpush.msrb.mxu0 %v2069_v50  ;;  %2236 = vmatpush.msrb.mxu1 %v2070_v14 }
 0x330   : > { %11890 = vmatmul.msk.f32.vlgmr.msra.gmra.mxu2 %vm2084_vm15, %v14792_v48  ;;  %11884 = vmatmul.msk.f32.vlgmr.msrb.gmra.mxu0 %vm2084_vm15, %v14792_v48  ;;  %v12789_v45 = vpop.permute.xlu2 %12788 }
 0x331   : > { %11901 = vmatpush.msk.msrb.mxu2 %vm2091_vm14, %v14679_v34  ;;  %11887 = vmatmul.msk.f32.vlgmr.msrb.gmra.mxu1 %vm2084_vm15, %v14792_v48  ;;  %v12791_v54 = vunpack.i.h.bf16 %v12789_v45 }
 0x332   : > { %11894 = vmatmul.msk.f32.gmra.mxu3 %vm2084_vm15, %v14878_v23  ;;  %11895 = vmatpush.msk.msra.mxu0 %vm2091_vm14, %v14654_v42  ;;  %v2466_v5 = vpop.permute.xlu0 %2465  ;;  %v12790_v42 = vunpack.i.l.bf16 %v12789_v45 }
 0x333   : > { %11898 = vmatpush.msk.msra.mxu1 %vm2091_vm14, %v14659_v4  ;;  %3212 = vrot.lane.b32.xlu0 %v14719_v57, %s19113_s5  ;;  %v2468_v35 = vpop.permute.xlu1 %2467 }
 0x334   : > { %3198 = vrot.lane.b32.xlu1 %v14736_v27, %s19113_s5  ;;  %2371 = vmatpush.msrb.mxu2 %v14684_v56  ;;  %v2485_v44 = vsel %vm1088_vm1, %v2466_v5, %v2468_v35  ;;  %v2479_v4 = vsel %vm1088_vm1, %v12790_v42, %v12791_v54 }
 0x335   : > { %2325 = vmatpush.msra.mxu0 %v14668_v3  ;;  %2348 = vmatpush.msra.mxu1 %v14671_v47  ;;  %v14919_v3 = vld [vmem:[#allocation2 + $0x48] sm:$0x3] }
 0x336   : > { %11915 = vmatpush.msk.msra.mxu2 %vm2091_vm14, %v2485_v44  ;;  %3206 = vrot.lane.b32.xlu2 %v14679_v34, %s19113_s5 }
 0x337   : > { %11907 = vmatpush.msk.msrb.mxu0 %vm2091_vm14, %v14715_v38  ;;  %11910 = vmatpush.msk.msrb.mxu1 %vm2091_vm14, %v14719_v57 }
 0x338   : > { %v2472_v16 = vpop.permute.xlu2 %2471  ;;  %11891 = vmatmul.msk.f32.gmra.mxu2 %vm2084_vm15, %v14787_v31  ;;  %11885 = vmatmul.msk.f32.gmra.mxu0 %vm2084_vm15, %v14787_v31 }
 0x339   : > { %2417 = vmatpush.msrb.mxu0 %v14703_v29  ;;  %2440 = vmatpush.msrb.mxu1 %v14736_v27 }
 0x33a   : > { %2533 = vmatpush.msra.mxu2 %v2479_v4  ;;  %11888 = vmatmul.msk.f32.gmra.mxu1 %vm2084_vm15, %v14787_v31  ;;  %v2470_v47 = vpop.permute.xlu0 %2469 }
 0x33b   : > { %11905 = vmatmul.msk.f32.vlgmr.msra.gmra.mxu3 %vm2084_vm15, %v14856_v60  ;;  %3481 = vrot.lane.b32.xlu0 %v14919_v3, %s19049_s2  ;;  %v2486_v34 = vsel %vm1088_vm1, %v2468_v35, %v2470_v47  ;;  %v12794_v56 = vpop.permute.xlu1 %12793  ;;  %v2487_v29 = vsel %vm1088_vm1, %v2470_v47, %v2472_v16 }
 0x33c   : > { %12848 = vrot.lane.b32.xlu1 %v14746_v36, %s19049_s2  ;;  %v12795_v1 = vunpack.i.l.bf16 %v12794_v56  ;;  %11918 = vmatpush.msk.msrb.mxu3 %vm2091_vm14, %v2486_v34  ;;  %v12796_v49 = vunpack.i.h.bf16 %v12794_v56 }
 0x33e   : > { %v2480_v20 = vsel %vm1088_vm1, %v12791_v54, %v12795_v1  ;;  %3210 = vrot.lane.b32.xlu2 %v14715_v38, %s19113_s5  ;;  %v2481_v38 = vsel %vm1088_vm1, %v12795_v1, %v12796_v49  ;;  %s19062_s5 = smov 64  }
 0x33f   : > { %2556 = vmatpush.msrb.mxu3 %v2480_v20  ;;  %v15080_v20 = vld [vmem:[%s19178_s10 + $0x38] sm:$0x3f] }
 0x340   : > { %v12799_v13 = vpop.permute.xlu2 %12798  ;;  %11902 = vmatmul.msk.f32.vlgmr.msrb.gmra.mxu2 %vm2084_vm15, %v14856_v60  ;;  %11896 = vmatmul.msk.f32.vlgmr.msra.gmra.mxu0 %vm2084_vm15, %v14856_v60 }
 0x341   : > { %11921 = vmatpush.msk.msra.mxu0 %vm2091_vm14, %v2487_v29  ;;  %v12800_v25 = vunpack.i.l.bf16 %v12799_v13  ;;  %v12801_v0 = vunpack.i.h.bf16 %v12799_v13 }
 0x342   : > { %11899 = vmatmul.msk.f32.vlgmr.msra.gmra.mxu1 %vm2084_vm15, %v14856_v60  ;;  %v2474_v18 = vpop.permute.xlu0 %2473 }
 0x343   : > { %11906 = vmatmul.msk.f32.gmra.mxu3 %vm2084_vm15, %v14878_v23  ;;  %12853 = vrot.lane.b32.xlu0 %v14730_v62, %s19049_s2  ;;  %v2488_v57 = vsel %vm1088_vm1, %v2472_v16, %v2474_v18  ;;  %v2476_v22 = vpop.permute.xlu1 %2475  ;;  %v2482_v6 = vsel %vm1088_vm1, %v12796_v49, %v12800_v25  ;;  %v2483_v12 = vsel %vm1088_vm1, %v12800_v25, %v12801_v0 }
 0x344   : > { %3485 = vrot.lane.b32.xlu1 %v14944_v33, %s19049_s2  ;;  %2579 = vmatpush.msra.mxu0 %v2481_v38  ;;  %v2489_v52 = vsel %vm1088_vm1, %v2474_v18, %v2476_v22 }
 0x345   : > { %11924 = vmatpush.msk.msra.mxu1 %vm2091_vm14, %v2488_v57  ;;  %11927 = vmatpush.msk.msrb.mxu2 %vm2091_vm14, %v2489_v52 }
 0x346   : > { %3479 = vrot.lane.b32.xlu2 %v14953_v55, %s19049_s2 }
 0x347   : > { %2602 = vmatpush.msra.mxu1 %v2482_v6  ;;  %2625 = vmatpush.msrb.mxu2 %v2483_v12 }
 0x348   : > { %v2713_v7 = vpop.permute.xlu2 %2712  ;;  %11903 = vmatmul.msk.f32.gmra.mxu2 %vm2084_vm15, %v14878_v23  ;;  %11897 = vmatmul.msk.f32.gmra.mxu0 %vm2084_vm15, %v14878_v23 }
 0x34a   : > { %11900 = vmatmul.msk.f32.gmra.mxu1 %vm2084_vm15, %v14878_v23  ;;  %v2478_v53 = vpop.permute.xlu0 %2477 }
 0x34b   : > { %11919 = vmatmul.msk.f32.vlgmr.msrb.gmra.mxu3 %vm2084_vm15, %v14962_v61  ;;  %3489 = vrot.lane.b32.xlu0 %v14970_v40, %s19049_s2  ;;  %v2490_v11 = vsel %vm1088_vm1, %v2476_v22, %v2478_v53  ;;  %v2464_v8 = vpop.permute.xlu1 %2463 }
 0x34c   : > { %12858 = vrot.lane.b32.xlu1 %v14707_v24, %s19049_s2  ;;  %11930 = vmatpush.msk.msra.mxu3 %vm2091_vm14, %v2490_v11  ;;  %v2484_v2 = vsel %vm1088_vm1, %v12801_v0, %v2464_v8 }
 0x34e   : > { %2648 = vmatpush.msra.mxu3 %v2484_v2  ;;  %3483 = vrot.lane.b32.xlu2 %v14981_v39, %s19049_s2 }
 0x350   : > { %v2711_v10 = vpop.permute.xlu2 %2710  ;;  %11916 = vmatmul.msk.f32.vlgmr.msra.gmra.mxu2 %vm2084_vm15, %v14962_v61  ;;  %11908 = vmatmul.msk.f32.vlgmr.msrb.gmra.mxu0 %vm2084_vm15, %v14856_v60 }
 0x351   : > { %11933 = vmatpush.msk.msrb.mxu0 %vm2091_vm14, %v2478_v53  ;;  %v2730_v31 = vsel %vm1198_vm2, %v2711_v10, %v2713_v7 }
 0x352   : > { %11911 = vmatmul.msk.f32.vlgmr.msrb.gmra.mxu1 %vm2084_vm15, %v14856_v60  ;;  %v2715_v48 = vpop.permute.xlu0 %2714 }
 0x353   : > { %11920 = vmatmul.msk.f32.gmra.mxu3 %vm2084_vm15, %v14988_v15  ;;  %12863 = vrot.lane.b32.xlu0 %v14995_v17, %s19049_s2  ;;  %v2731_v28 = vsel %vm1198_vm2, %v2713_v7, %v2715_v48  ;;  %v12804_v27 = vpop.permute.xlu1 %12803 }
 0x354   : > { %3493 = vrot.lane.b32.xlu1 %v14997_v46, %s19049_s2  ;;  %2671 = vmatpush.msrb.mxu0 %v2464_v8  ;;  %v12806_v32 = vunpack.i.h.bf16 %v12804_v27  ;;  %v12805_v41 = vunpack.i.l.bf16 %v12804_v27 }
 0x355   : > { %11938 = vmatpush.msk.msrb.mxu1 %vm2091_vm14, %v2730_v31  ;;  %11941 = vmatpush.msk.msra.mxu2 %vm2091_vm14, %v2731_v28 }
 0x356   : > { %v2725_v9 = vsel %vm1198_vm2, %v12805_v41, %v12806_v32  ;;  %3487 = vrot.lane.b32.xlu2 %v15012_v19, %s19049_s2 }
 0x357   : > { %2801 = vmatpush.msra.mxu2 %v2725_v9 }
 0x358   : > { %v2719_v60 = vpop.permute.xlu2 %2718  ;;  %11917 = vmatmul.msk.f32.gmra.mxu2 %vm2084_vm15, %v14988_v15  ;;  %11909 = vmatmul.msk.f32.gmra.mxu0 %vm2084_vm15, %v14878_v23 }
 0x35a   : > { %11912 = vmatmul.msk.f32.gmra.mxu1 %vm2084_vm15, %v14878_v23  ;;  %v2717_v58 = vpop.permute.xlu0 %2716 }
 0x35b   : > { %11931 = vmatmul.msk.f32.vlgmr.msra.gmra.mxu3 %vm2084_vm15, %v14962_v61  ;;  %3734 = vrot.lane.b32.xlu0 %v14981_v39, %s19179_s6  ;;  %v2732_v21 = vsel %vm1198_vm2, %v2715_v48, %v2717_v58  ;;  %v12809_v37 = vpop.permute.xlu1 %12808  ;;  %v2733_v45 = vsel %vm1198_vm2, %v2717_v58, %v2719_v60 }
 0x35c   : > { %12868 = vrot.lane.b32.xlu1 %v14675_v43, %s19179_s6  ;;  %v12811_v51 = vunpack.i.h.bf16 %v12809_v37  ;;  %v12810_v63 = vunpack.i.l.bf16 %v12809_v37  ;;  %11944 = vmatpush.msk.msrb.mxu3 %vm2091_vm14, %v2732_v21  ;;  %v15162_v21 = vld [vmem:[%s19178_s10 + $0x48] sm:$0x3f] }
 0x35e   : > { %v2724_v50 = vsel %vm1198_vm2, %v12810_v63, %v12805_v41  ;;  %v2726_v14 = vsel %vm1198_vm2, %v12806_v32, %v12811_v51  ;;  %3491 = vrot.lane.b32.xlu2 %v15031_v59, %s19049_s2  ;;  %s19280_s2 = smov 127  }
 0x35f   : > { %2778 = vmatpush.msrb.mxu1 %v2724_v50  ;;  %2824 = vmatpush.msrb.mxu3 %v2726_v14 }
 0x360   : > { %v2723_v23 = vpop.permute.xlu2 %2722  ;;  %11928 = vmatmul.msk.f32.vlgmr.msrb.gmra.mxu2 %vm2084_vm15, %v14962_v61  ;;  %11922 = vmatmul.msk.f32.vlgmr.msra.gmra.mxu0 %vm2084_vm15, %v14962_v61 }
 0x361   : > { %11947 = vmatpush.msk.msra.mxu0 %vm2091_vm14, %v2733_v45  ;;  %11956 = vmatpush.msk.msra.mxu3 %vm2091_vm14, %v2723_v23  ;;  %v4227_v45 = vld [vmem:[%s19181_s29] sm:$0xff] }
 0x362   : > { %11925 = vmatmul.msk.f32.vlgmr.msra.gmra.mxu1 %vm2084_vm15, %v14962_v61  ;;  %v12814_v43 = vpop.permute.xlu0 %12813 }
 0x363   : > { %11932 = vmatmul.msk.f32.gmra.mxu3 %vm2084_vm15, %v14988_v15  ;;  %3736 = vrot.lane.b32.xlu0 %v14944_v33, %s19179_s6  ;;  %v12816_v5 = vunpack.i.h.bf16 %v12814_v43  ;;  %v12815_v35 = vunpack.i.l.bf16 %v12814_v43  ;;  %v2721_v44 = vpop.permute.xlu1 %2720 }
 0x364   : > { %12873 = vrot.lane.b32.xlu1 %v14690_v26, %s19179_s6  ;;  %v2734_v54 = vsel %vm1198_vm2, %v2719_v60, %v2721_v44  ;;  %v2735_v42 = vsel %vm1198_vm2, %v2721_v44, %v2723_v23  ;;  %v11936_v26 = vld [vmem:[%s19178_s10 + $0x30] sm:$0xff] }
 0x365   : > { %11950 = vmatpush.msk.msra.mxu1 %vm2091_vm14, %v2734_v54  ;;  %11953 = vmatpush.msk.msrb.mxu2 %vm2091_vm14, %v2735_v42  ;;  %v2727_v16 = vsel %vm1198_vm2, %v12811_v51, %v12815_v35  ;;  %v2728_v4 = vsel %vm1198_vm2, %v12815_v35, %v12816_v5 }
 0x366   : > { %2847 = vmatpush.msra.mxu0 %v2727_v16  ;;  %3732 = vrot.lane.b32.xlu2 %v14919_v3, %s19179_s6 }
 0x367   : > { %2870 = vmatpush.msra.mxu1 %v2728_v4 }
 0x368   : > { %v2958_v47 = vpop.permute.xlu2 %2957  ;;  %11929 = vmatmul.msk.f32.gmra.mxu2 %vm2084_vm15, %v14988_v15  ;;  %11923 = vmatmul.msk.f32.gmra.mxu0 %vm2084_vm15, %v14988_v15 }
 0x36a   : > { %11926 = vmatmul.msk.f32.gmra.mxu1 %vm2084_vm15, %v14988_v15  ;;  %v2709_v34 = vpop.permute.xlu0 %2708 }
 0x36b   : > { %11945 = vmatmul.msk.f32.vlgmr.msrb.gmra.mxu3 %vm2084_vm15, %v11936_v26  ;;  %12878 = vrot.lane.b32.xlu0 %v14707_v24, %s19179_s6  ;;  %v2956_v56 = vpop.permute.xlu1 %2955  ;;  %v2729_v1 = vsel %vm1198_vm2, %v12816_v5, %v2709_v34 }
 0x36c   : > { %3740 = vrot.lane.b32.xlu1 %v14970_v40, %s19179_s6  ;;  %2916 = vmatpush.msra.mxu3 %v2709_v34  ;;  %v2975_v13 = vsel %vm1308_vm3, %v2956_v56, %v2958_v47 }
 0x36d   : > { %2893 = vmatpush.msrb.mxu2 %v2729_v1  ;;  %v15222_v1 = vld [vmem:[%s19178_s10 + $0x58] sm:$0x3f] }
 0x36e   : > { %3730 = vrot.lane.b32.xlu2 %v14953_v55, %s19179_s6  ;;  %v15201_v5 = vpop.f32.mrf.mxu0 }
 0x370   : > { %v2962_v49 = vpop.permute.xlu2 %2961  ;;  %11942 = vmatmul.msk.f32.vlgmr.msra.gmra.mxu2 %vm2084_vm15, %v11936_v26  ;;  %11934 = vmatmul.msk.f32.vlgmr.msrb.gmra.mxu0 %vm2084_vm15, %v14962_v61 }
 0x371   : > { %11961 = vmatpush.msk.msrb.mxu0 %vm2091_vm14, %v2975_v13  ;;  %v15234_v13 = vpop.f32.mrf.mxu1 }
 0x372   : > { %11939 = vmatmul.msk.f32.vlgmr.msrb.gmra.mxu1 %vm2084_vm15, %v11936_v26  ;;  %v12819_v29 = vpop.permute.xlu0 %12818 }
 0x373   : > { %11946 = vmatmul.msk.f32.gmra.mxu3 %vm2084_vm15, %v15080_v20  ;;  %12883 = vrot.lane.b32.xlu0 %v14995_v17, %s19179_s6  ;;  %v12821_v25 = vunpack.i.h.bf16 %v12819_v29  ;;  %v12820_v18 = vunpack.i.l.bf16 %v12819_v29  ;;  %v2960_v0 = vpop.permute.xlu1 %2959  ;;  %v4228_v29 = vld [vmem:[%s19181_s29 + $0x8] sm:$0x3f] }
 0x374   : > { %3744 = vrot.lane.b32.xlu1 %v14997_v46, %s19179_s6  ;;  %v2976_v38 = vsel %vm1308_vm3, %v2958_v47, %v2960_v0  ;;  %v2977_v57 = vsel %vm1308_vm3, %v2960_v0, %v2962_v49 }
 0x375   : > { %11964 = vmatpush.msk.msrb.mxu1 %vm2091_vm14, %v2976_v38  ;;  %11967 = vmatpush.msk.msra.mxu2 %vm2091_vm14, %v2977_v57  ;;  %v2969_v22 = vsel %vm1308_vm3, %v12820_v18, %v12821_v25  ;;  %v15180_v14 = vpop.f32.mrf.mxu2 }
 0x376   : > { %3023 = vmatpush.msrb.mxu0 %v2969_v22  ;;  %3738 = vrot.lane.b32.xlu2 %v15012_v19, %s19179_s6 }
 0x378   : > { %v12829_v52 = vpop.permute.xlu2 %12828  ;;  %11943 = vmatmul.msk.f32.gmra.mxu2 %vm2084_vm15, %v15080_v20  ;;  %11935 = vmatmul.msk.f32.gmra.mxu0 %vm2084_vm15, %v14988_v15 }
 0x379   : > { %v12830_v12 = vunpack.i.l.bf16 %v12829_v52 }
 0x37a   : > { %11940 = vmatmul.msk.f32.gmra.mxu1 %vm2084_vm15, %v15080_v20  ;;  %v12824_v6 = vpop.permute.xlu0 %12823 }
 0x37b   : > { %11957 = vmatmul.msk.f32.vlgmr.msra.gmra.mxu3 %vm2084_vm15, %v11936_v26  ;;  %3983 = vrot.lane.b32.xlu0 %v14919_v3, %s19180_s8  ;;  %v12826_v61 = vunpack.i.h.bf16 %v12824_v6  ;;  %v12825_v7 = vunpack.i.l.bf16 %v12824_v6  ;;  %v2964_v53 = vpop.permute.xlu1 %2963 }
 0x37c   : > { %12888 = vrot.lane.b32.xlu1 %v14746_v36, %s19180_s8  ;;  %v2978_v11 = vsel %vm1308_vm3, %v2962_v49, %v2964_v53  ;;  %v12831_v36 = vunpack.i.h.bf16 %v12829_v52  ;;  %v2126_v49 = vpop.f32.mrf.mxu0 }
 0x37d   : > { %11970 = vmatpush.msk.msrb.mxu3 %vm2091_vm14, %v2978_v11  ;;  %v2970_v8 = vsel %vm1308_vm3, %v12821_v25, %v12825_v7  ;;  %v2971_v2 = vsel %vm1308_vm3, %v12825_v7, %v12826_v61  ;;  %v2972_v30 = vsel %vm1308_vm3, %v12826_v61, %v12830_v12  ;;  %v15217_v56 = vpop.f32.mrf.mxu2  ;;  %v4253_v61 = vld [vmem:[%s19182_s9] sm:$0xff] }
 0x37e   : > { %3046 = vmatpush.msrb.mxu1 %v2970_v8  ;;  %3069 = vmatpush.msra.mxu2 %v2971_v2  ;;  %v2973_v28 = vsel %vm1308_vm3, %v12830_v12, %v12831_v36 }
 0x37f   : > { %3742 = vrot.lane.b32.xlu2 %v15031_v59, %s19179_s6  ;;  %3092 = vmatpush.msrb.mxu3 %v2972_v30  ;;  %s19284_s6 = smov 68  }
 0x380   : > { %v2954_v3 = vpop.permute.xlu2 %2953  ;;  %11954 = vmatmul.msk.f32.vlgmr.msrb.gmra.mxu2 %vm2084_vm15, %v11936_v26  ;;  %11948 = vmatmul.msk.f32.vlgmr.msra.gmra.mxu0 %vm2084_vm15, %v11936_v26 }
 0x382   : > { %11951 = vmatmul.msk.f32.vlgmr.msra.gmra.mxu1 %vm2084_vm15, %v11936_v26  ;;  %v2966_v15 = vpop.permute.xlu0 %2965 }
 0x383   : > { %11958 = vmatmul.msk.f32.gmra.mxu3 %vm2084_vm15, %v15080_v20  ;;  %3987 = vrot.lane.b32.xlu0 %v14944_v33, %s19180_s8  ;;  %v2979_v10 = vsel %vm1308_vm3, %v2964_v53, %v2966_v15  ;;  %v2968_v31 = vpop.permute.xlu1 %2967  ;;  %v2974_v33 = vsel %vm1308_vm3, %v12831_v36, %v2954_v3 }
 0x384   : > { %12893 = vrot.lane.b32.xlu1 %v14730_v62, %s19180_s8  ;;  %v2980_v48 = vsel %vm1308_vm3, %v2966_v15, %v2968_v31  ;;  %11979 = vmatpush.msk.msrb.mxu2 %vm2091_vm14, %v2968_v31  ;;  %v15140_v62 = vld [vmem:[%s19178_s10 + $0x40] sm:$0xff]  ;;  %vm4445_vm3 = vcmask 113664  }
 0x385   : > { %11973 = vmatpush.msk.msra.mxu0 %vm2091_vm14, %v2979_v10  ;;  %11976 = vmatpush.msk.msra.mxu1 %vm2091_vm14, %v2980_v48  ;;  %v15245_v22 = vpop.f32.mrf.mxu2 }
 0x386   : > { %3161 = vmatpush.msrb.mxu2 %v2954_v3 }
 0x387   : > { %3981 = vrot.lane.b32.xlu2 %v14953_v55, %s19180_s8  ;;  %3115 = vmatpush.msra.mxu0 %v2973_v28 }
 0x388   : > { %3138 = vmatpush.msra.mxu1 %v2974_v33  ;;  %v12834_v27 = vpop.permute.xlu2 %12833  ;;  %11955 = vmatmul.msk.f32.gmra.mxu2 %vm2084_vm15, %v15080_v20 }
 0x389   : > { %11949 = vmatmul.msk.f32.gmra.mxu0 %vm2084_vm15, %v15080_v20  ;;  %v12836_v55 = vunpack.i.h.bf16 %v12834_v27  ;;  %v12835_v32 = vunpack.i.l.bf16 %v12834_v27 }
 0x38a   : > { %11952 = vmatmul.msk.f32.gmra.mxu1 %vm2084_vm15, %v15080_v20  ;;  %v3201_v41 = vpop.permute.xlu0 %3200 }
 0x38b   : > { %11971 = vmatmul.msk.f32.vlgmr.msrb.gmra.mxu3 %vm2084_vm15, %v15140_v62  ;;  %12898 = vrot.lane.b32.xlu0 %v14707_v24, %s19180_s8  ;;  %v3203_v9 = vpop.permute.xlu1 %3202  ;;  %v3214_v58 = vsel %vm1418_vm4, %v12835_v32, %v12836_v55 }
 0x38c   : > { %3991 = vrot.lane.b32.xlu1 %v14970_v40, %s19180_s8  ;;  %v3220_v60 = vsel %vm1418_vm4, %v3201_v41, %v3203_v9 }
 0x38d   : > { %11984 = vmatpush.msk.msra.mxu3 %vm2091_vm14, %v3220_v60 }
 0x38f   : > { %3985 = vrot.lane.b32.xlu2 %v14981_v39, %s19180_s8  ;;  %3268 = vmatpush.msra.mxu3 %v3214_v58  ;;  %v15294_v58 = vld [vmem:[%s19178_s10 + $0x60] sm:$0xff] }
 0x390   : > { %11968 = vmatmul.msk.f32.vlgmr.msra.gmra.mxu2 %vm2084_vm15, %v15140_v62  ;;  %v3207_v24 = vpop.permute.xlu2 %3206 }
 0x391   : > { %11962 = vmatmul.msk.f32.vlgmr.msrb.gmra.mxu0 %vm2084_vm15, %v15140_v62 }
 0x392   : > { %11965 = vmatmul.msk.f32.vlgmr.msrb.gmra.mxu1 %vm2084_vm15, %v15140_v62  ;;  %v3205_v40 = vpop.permute.xlu0 %3204 }
 0x393   : > { %11972 = vmatmul.msk.f32.gmra.mxu3 %vm2084_vm15, %v15162_v21  ;;  %3995 = vrot.lane.b32.xlu0 %v14997_v46, %s19180_s8  ;;  %v3221_v39 = vsel %vm1418_vm4, %v3203_v9, %v3205_v40  ;;  %v3222_v37 = vsel %vm1418_vm4, %v3205_v40, %v3207_v24  ;;  %v12839_v51 = vpop.permute.xlu1 %12838 }
 0x394   : > { %12903 = vrot.lane.b32.xlu1 %v14995_v17, %s19180_s8  ;;  %v12841_v63 = vunpack.i.h.bf16 %v12839_v51  ;;  %v12840_v50 = vunpack.i.l.bf16 %v12839_v51  ;;  %11987 = vmatpush.msk.msrb.mxu0 %vm2091_vm14, %v3221_v39  ;;  %v15189_v17 = vld [vmem:[%s19178_s10 + $0x50] sm:$0xff] }
 0x395   : > { %11990 = vmatpush.msk.msrb.mxu1 %vm2091_vm14, %v3222_v37 }
 0x396   : > { %v3215_v23 = vsel %vm1418_vm4, %v12836_v55, %v12840_v50  ;;  %v3216_v46 = vsel %vm1418_vm4, %v12840_v50, %v12841_v63 }
 0x397   : > { %3989 = vrot.lane.b32.xlu2 %v15012_v19, %s19180_s8  ;;  %3291 = vmatpush.msrb.mxu0 %v3215_v23  ;;  %v4254_v19 = vld [vmem:[%s19182_s9 + $0x8] sm:$0x3f]  ;;  %s19060_s9 = smov 6  }
 0x398   : > { %3314 = vmatpush.msrb.mxu1 %v3216_v46  ;;  %11969 = vmatmul.msk.f32.gmra.mxu2 %vm2084_vm15, %v15162_v21  ;;  %v3211_v43 = vpop.permute.xlu2 %3210 }
 0x399   : > { %11963 = vmatmul.msk.f32.gmra.mxu0 %vm2084_vm15, %v15162_v21 }
 0x39a   : > { %11966 = vmatmul.msk.f32.gmra.mxu1 %vm2084_vm15, %v15162_v21  ;;  %v3209_v35 = vpop.permute.xlu0 %3208  ;;  %v15205_v44 = vpop.f32.mrf.mxu3 }
 0x39b   : > { %11985 = vmatmul.msk.f32.vlgmr.msra.gmra.mxu3 %vm2084_vm15, %v15189_v17  ;;  %4231 = vperm.xlu0 %12769, %v4227_v45   ;;  %v3223_v54 = vsel %vm1418_vm4, %v3207_v24, %v3209_v35  ;;  %v3224_v42 = vsel %vm1418_vm4, %v3209_v35, %v3211_v43  ;;  %v12844_v16 = vpop.permute.xlu1 %12843  ;;  %v15321_v35 = vld [vmem:[%s19178_s10 + $0x68] sm:$0x3f] }
 0x39c   : > { %4262 = vperm.xlu1 %12770, %v4254_v19   ;;  %v12846_v4 = vunpack.i.h.bf16 %v12844_v16  ;;  %v12845_v26 = vunpack.i.l.bf16 %v12844_v16  ;;  %11993 = vmatpush.msk.msra.mxu2 %vm2091_vm14, %v3223_v54 }
 0x39d   : > { %11996 = vmatpush.msk.msrb.mxu3 %vm2091_vm14, %v3224_v42 }
 0x39e   : > { %v3217_v47 = vsel %vm1418_vm4, %v12841_v63, %v12845_v26  ;;  %v3218_v34 = vsel %vm1418_vm4, %v12845_v26, %v12846_v4 }
 0x39f   : > { %3993 = vrot.lane.b32.xlu2 %v15031_v59, %s19180_s8  ;;  %3337 = vmatpush.msra.mxu2 %v3217_v47 }
 0x3a0   : > { %3360 = vmatpush.msrb.mxu3 %v3218_v34  ;;  %11980 = vmatmul.msk.f32.vlgmr.msrb.gmra.mxu2 %vm2084_vm15, %v15140_v62  ;;  %v3480_v20 = vpop.permute.xlu2 %3479 }
 0x3a1   : > { %11974 = vmatmul.msk.f32.vlgmr.msra.gmra.mxu0 %vm2084_vm15, %v15140_v62 }
 0x3a2   : > { %11977 = vmatmul.msk.f32.vlgmr.msra.gmra.mxu1 %vm2084_vm15, %v15140_v62  ;;  %v15230_v59 = vpop.f32.mrf.mxu3 }
 0x3a3   : > { %11986 = vmatmul.msk.f32.gmra.mxu3 %vm2084_vm15, %v15222_v1 }
 0x3a5   : > { %v3213_v25 = vpop.permute.xlu0 %3212 }
 0x3a6   : > { %v3225_v18 = vsel %vm1418_vm4, %v3211_v43, %v3213_v25  ;;  %v3199_v0 = vpop.permute.xlu1 %3198  ;;  %12002 = vmatpush.msk.msra.mxu1 %vm2091_vm14, %v3213_v25 }
 0x3a7   : > { %11999 = vmatpush.msk.msra.mxu0 %vm2091_vm14, %v3225_v18  ;;  %4236 = vperm.xlu2 %12771, %v4228_v29   ;;  %v3219_v38 = vsel %vm1418_vm4, %v12846_v4, %v3199_v0  ;;  %vm4715_vm4 = vcmask 312320  }
 0x3a8   : > { %3406 = vmatpush.msra.mxu1 %v3199_v0  ;;  %11981 = vmatmul.msk.f32.gmra.mxu2 %vm2084_vm15, %v15162_v21  ;;  %v3484_v57 = vpop.permute.xlu2 %3483 }
 0x3a9   : > { %3383 = vmatpush.msra.mxu0 %v3219_v38 }
 0x3aa   : > { %11975 = vmatmul.msk.f32.gmra.mxu0 %vm2084_vm15, %v15162_v21  ;;  %11978 = vmatmul.msk.f32.gmra.mxu1 %vm2084_vm15, %v15162_v21  ;;  %v15253_v52 = vpop.f32.mrf.mxu3 }
 0x3ab   : > { %11997 = vmatmul.msk.f32.vlgmr.msrb.gmra.mxu3 %vm2084_vm15, %v15189_v17 }
 0x3ad   : > { %v3482_v6 = vpop.permute.xlu0 %3481  ;;  %v15255_v12 = vpop.f32.mrf.mxu0 }
 0x3ae   : > { %v3502_v7 = vsel %vm1538_vm5, %v3480_v20, %v3482_v6  ;;  %v3503_v53 = vsel %vm1538_vm5, %v3482_v6, %v3484_v57  ;;  %v12849_v11 = vpop.permute.xlu1 %12848  ;;  %v15262_v8 = vpop.f32.mrf.mxu1 }
 0x3af   : > { %v12851_v2 = vunpack.i.h.bf16 %v12849_v11  ;;  %v12850_v30 = vunpack.i.l.bf16 %v12849_v11  ;;  %12007 = vmatpush.msk.msrb.mxu2 %vm2091_vm14, %v3502_v7  ;;  %12010 = vmatpush.msk.msra.mxu3 %vm2091_vm14, %v3503_v53 }
 0x3b0   : > { %4257 = vperm.xlu2 %12771, %v4253_v61   ;;  %11994 = vmatmul.msk.f32.vlgmr.msra.gmra.mxu2 %vm2084_vm15, %v15189_v17  ;;  %v3488_v36 = vpop.permute.xlu2 %3487 }
 0x3b1   : > { %v3495_v3 = vsel %vm1538_vm5, %v12850_v30, %v12851_v2 }
 0x3b2   : > { %3551 = vmatpush.msrb.mxu2 %v3495_v3  ;;  %11988 = vmatmul.msk.f32.vlgmr.msrb.gmra.mxu0 %vm2084_vm15, %v15189_v17 }
 0x3b3   : > { %11991 = vmatmul.msk.f32.vlgmr.msrb.gmra.mxu1 %vm2084_vm15, %v15189_v17  ;;  %11998 = vmatmul.msk.f32.gmra.mxu3 %vm2084_vm15, %v15222_v1  ;;  %v15275_v15 = vpop.f32.mrf.mxu2 }
 0x3b5   : > { %v12854_v10 = vpop.permute.xlu0 %12853  ;;  %v2307_v31 = vpop.f32.mrf.mxu3 }
 0x3b6   : > { %v12856_v48 = vunpack.i.h.bf16 %v12854_v10  ;;  %v12855_v28 = vunpack.i.l.bf16 %v12854_v10  ;;  %v3486_v33 = vpop.permute.xlu1 %3485  ;;  %v15277_v62 = vadd.f32 %v2307_v31, %v2126_v49  ;;  %v15279_v27 = vpop.f32.mrf.mxu0 }
 0x3b7   : > { %v3504_v55 = vsel %vm1538_vm5, %v3484_v57, %v3486_v33  ;;  %v3505_v32 = vsel %vm1538_vm5, %v3486_v33, %v3488_v36  ;;  %v15283_v41 = vpop.f32.mrf.mxu1 }
 0x3b8   : > { %12013 = vmatpush.msk.msrb.mxu0 %vm2091_vm14, %v3504_v55  ;;  %12016 = vmatpush.msk.msrb.mxu1 %vm2091_vm14, %v3505_v32  ;;  %v3496_v9 = vsel %vm1538_vm5, %v12851_v2, %v12855_v28  ;;  %v3497_v60 = vsel %vm1538_vm5, %v12855_v28, %v12856_v48  ;;  %v3492_v21 = vpop.permute.xlu2 %3491 }
 0x3b9   : > { %11995 = vmatmul.msk.f32.gmra.mxu2 %vm2084_vm15, %v15222_v1  ;;  %3574 = vmatpush.msra.mxu3 %v3496_v9 }
 0x3ba   : > { %3597 = vmatpush.msrb.mxu0 %v3497_v60 }
 0x3bb   : > { %11989 = vmatmul.msk.f32.gmra.mxu0 %vm2084_vm15, %v15222_v1  ;;  %11992 = vmatmul.msk.f32.gmra.mxu1 %vm2084_vm15, %v15222_v1  ;;  %v15302_v24 = vpop.f32.mrf.mxu2 }
 0x3bc   : > { %12011 = vmatmul.msk.f32.vlgmr.msra.gmra.mxu3 %vm2084_vm15, %v15294_v58 }
 0x3bd   : > { %v3490_v40 = vpop.permute.xlu0 %3489 }
 0x3be   : > { %v3506_v39 = vsel %vm1538_vm5, %v3488_v36, %v3490_v40  ;;  %v3507_v37 = vsel %vm1538_vm5, %v3490_v40, %v3492_v21  ;;  %v12859_v51 = vpop.permute.xlu1 %12858  ;;  %v15306_v63 = vpop.f32.mrf.mxu3 }
 0x3bf   : > { %v12861_v50 = vunpack.i.h.bf16 %v12859_v51  ;;  %v12860_v23 = vunpack.i.l.bf16 %v12859_v51  ;;  %v15308_v46 = vpop.f32.mrf.mxu0  ;;  %v15310_v45 = vpop.f32.mrf.mxu1  ;;  %12019 = vmatpush.msk.msra.mxu2 %vm2091_vm14, %v3506_v39  ;;  %12022 = vmatpush.msk.msrb.mxu3 %vm2091_vm14, %v3507_v37  ;;  %v15391_v39 = vld [vmem:[%s19178_s10 + $0x70] sm:$0xff] }
 0x3c0   : > { %v3733_v54 = vpop.permute.xlu2 %3732 }
 0x3c1   : > { %12008 = vmatmul.msk.f32.vlgmr.msrb.gmra.mxu2 %vm2084_vm15, %v15294_v58  ;;  %v3498_v19 = vsel %vm1538_vm5, %v12856_v48, %v12860_v23  ;;  %v3499_v43 = vsel %vm1538_vm5, %v12860_v23, %v12861_v50 }
 0x3c2   : > { %3620 = vmatpush.msrb.mxu1 %v3498_v19  ;;  %3643 = vmatpush.msra.mxu2 %v3499_v43 }
 0x3c3   : > { %12000 = vmatmul.msk.f32.vlgmr.msra.gmra.mxu0 %vm2084_vm15, %v15189_v17  ;;  %12003 = vmatmul.msk.f32.vlgmr.msra.gmra.mxu1 %vm2084_vm15, %v15189_v17  ;;  %v2373_v42 = vpop.f32.mrf.mxu2 }
 0x3c4   : > { %12012 = vmatmul.msk.f32.gmra.mxu3 %vm2084_vm15, %v15321_v35  ;;  %v15330_v16 = vadd.f32 %v2373_v42, %v15205_v44 }
 0x3c5   : > { %v12864_v4 = vpop.permute.xlu0 %12863 }
 0x3c6   : > { %v12866_v26 = vunpack.i.h.bf16 %v12864_v4  ;;  %v12865_v47 = vunpack.i.l.bf16 %v12864_v4  ;;  %v3494_v34 = vpop.permute.xlu1 %3493  ;;  %v15332_v20 = vpop.f32.mrf.mxu3 }
 0x3c7   : > { %v3508_v49 = vsel %vm1538_vm5, %v3492_v21, %v3494_v34  ;;  %v15335_v29 = vpop.f32.mrf.mxu0  ;;  %v15337_v25 = vpop.f32.mrf.mxu1 }
 0x3c8   : > { %12025 = vmatpush.msk.msra.mxu0 %vm2091_vm14, %v3508_v49  ;;  %v3500_v17 = vsel %vm1538_vm5, %v12861_v50, %v12865_v47  ;;  %v3501_v18 = vsel %vm1538_vm5, %v12865_v47, %v12866_v26  ;;  %v3731_v44 = vpop.permute.xlu2 %3730 }
 0x3c9   : > { %12009 = vmatmul.msk.f32.gmra.mxu2 %vm2084_vm15, %v15321_v35  ;;  %3666 = vmatpush.msrb.mxu3 %v3500_v17  ;;  %v3753_v0 = vsel %vm1658_vm6, %v3731_v44, %v3733_v54  ;;  %v12029_v17 = vld [vmem:[%s19178_s10 + $0x78] sm:$0x3f] }
 0x3ca   : > { %3689 = vmatpush.msra.mxu0 %v3501_v18  ;;  %12030 = vmatpush.msk.msra.mxu1 %vm2091_vm14, %v3753_v0 }
 0x3cb   : > { %12001 = vmatmul.msk.f32.gmra.mxu0 %vm2084_vm15, %v15222_v1  ;;  %12004 = vmatmul.msk.f32.gmra.mxu1 %vm2084_vm15, %v15222_v1  ;;  %v2376_v38 = vpop.f32.mrf.mxu2 }
 0x3cc   : > { %12023 = vmatmul.msk.f32.vlgmr.msrb.gmra.mxu3 %vm2084_vm15, %v15294_v58  ;;  %v15353_v57 = vadd.f32 %v2376_v38, %v15230_v59 }
 0x3cd   : > { %v3735_v6 = vpop.permute.xlu0 %3734 }
 0x3ce   : > { %v3754_v61 = vsel %vm1658_vm6, %v3733_v54, %v3735_v6  ;;  %v12869_v7 = vpop.permute.xlu1 %12868  ;;  %v15356_v53 = vpop.f32.mrf.mxu3 }
 0x3cf   : > { %v12871_v11 = vunpack.i.h.bf16 %v12869_v7  ;;  %v12870_v2 = vunpack.i.l.bf16 %v12869_v7  ;;  %v15358_v30 = vpop.f32.mrf.mxu0  ;;  %v15360_v1 = vpop.f32.mrf.mxu1  ;;  %12033 = vmatpush.msk.msrb.mxu2 %vm2091_vm14, %v3754_v61 }
 0x3d0   : > { %v3739_v3 = vpop.permute.xlu2 %3738 }
 0x3d1   : > { %12020 = vmatmul.msk.f32.vlgmr.msra.gmra.mxu2 %vm2084_vm15, %v15294_v58  ;;  %v3747_v59 = vsel %vm1658_vm6, %v12870_v2, %v12871_v11 }
 0x3d2   : > { %3825 = vmatpush.msrb.mxu2 %v3747_v59 }
 0x3d3   : > { %12014 = vmatmul.msk.f32.vlgmr.msrb.gmra.mxu0 %vm2084_vm15, %v15294_v58  ;;  %12017 = vmatmul.msk.f32.vlgmr.msrb.gmra.mxu1 %vm2084_vm15, %v15294_v58  ;;  %v15372_v36 = vpop.f32.mrf.mxu2 }
 0x3d4   : > { %12024 = vmatmul.msk.f32.gmra.mxu3 %vm2084_vm15, %v15321_v35 }
 0x3d5   : > { %v3737_v10 = vpop.permute.xlu0 %3736 }
 0x3d6   : > { %v3755_v31 = vsel %vm1658_vm6, %v3735_v6, %v3737_v10  ;;  %v3756_v48 = vsel %vm1658_vm6, %v3737_v10, %v3739_v3  ;;  %v12874_v28 = vpop.permute.xlu1 %12873  ;;  %v15376_v33 = vpop.f32.mrf.mxu3 }
 0x3d7   : > { %v12876_v55 = vunpack.i.h.bf16 %v12874_v28  ;;  %v12875_v32 = vunpack.i.l.bf16 %v12874_v28  ;;  %v15378_v9 = vpop.f32.mrf.mxu0  ;;  %v15380_v60 = vpop.f32.mrf.mxu1  ;;  %12036 = vmatpush.msk.msra.mxu3 %vm2091_vm14, %v3755_v31  ;;  %12039 = vmatpush.msk.msrb.mxu0 %vm2091_vm14, %v3756_v48 }
 0x3d9   : > { %12021 = vmatmul.msk.f32.gmra.mxu2 %vm2084_vm15, %v15321_v35  ;;  %v3746_v21 = vsel %vm1658_vm6, %v12875_v32, %v12870_v2  ;;  %v3748_v40 = vsel %vm1658_vm6, %v12871_v11, %v12876_v55  ;;  %v3743_v37 = vpop.permute.xlu2 %3742 }
 0x3da   : > { %3802 = vmatpush.msra.mxu1 %v3746_v21  ;;  %3848 = vmatpush.msra.mxu3 %v3748_v40 }
 0x3db   : > { %12015 = vmatmul.msk.f32.gmra.mxu0 %vm2084_vm15, %v15321_v35  ;;  %12018 = vmatmul.msk.f32.gmra.mxu1 %vm2084_vm15, %v15321_v35  ;;  %v2538_v51 = vpop.f32.mrf.mxu2 }
 0x3dc   : > { %12037 = vmatmul.msk.f32.vlgmr.msra.gmra.mxu3 %vm2084_vm15, %v15391_v39  ;;  %v15400_v50 = vadd.f32 %v2538_v51, %v15277_v62 }
 0x3dd   : > { %v12879_v23 = vpop.permute.xlu0 %12878 }
 0x3de   : > { %v12881_v19 = vunpack.i.h.bf16 %v12879_v23  ;;  %v12880_v43 = vunpack.i.l.bf16 %v12879_v23  ;;  %v3741_v54 = vpop.permute.xlu1 %3740  ;;  %v15402_v42 = vpop.f32.mrf.mxu3 }
 0x3df   : > { %v3757_v4 = vsel %vm1658_vm6, %v3739_v3, %v3741_v54  ;;  %v3758_v26 = vsel %vm1658_vm6, %v3741_v54, %v3743_v37  ;;  %v15406_v47 = vpop.f32.mrf.mxu0  ;;  %v15408_v34 = vpop.f32.mrf.mxu1 }
 0x3e0   : > { %12042 = vmatpush.msk.msrb.mxu1 %vm2091_vm14, %v3757_v4  ;;  %12045 = vmatpush.msk.msra.mxu2 %vm2091_vm14, %v3758_v26  ;;  %v3749_v62 = vsel %vm1658_vm6, %v12876_v55, %v12880_v43  ;;  %v3750_v49 = vsel %vm1658_vm6, %v12880_v43, %v12881_v19 }
 0x3e1   : > { %12034 = vmatmul.msk.f32.vlgmr.msrb.gmra.mxu2 %vm2084_vm15, %v15391_v39  ;;  %3871 = vmatpush.msrb.mxu0 %v3749_v62  ;;  %v3982_v18 = vpop.permute.xlu2 %3981 }
 0x3e2   : > { %3894 = vmatpush.msrb.mxu1 %v3750_v49 }
 0x3e3   : > { %12026 = vmatmul.msk.f32.vlgmr.msra.gmra.mxu0 %vm2084_vm15, %v15294_v58  ;;  %12031 = vmatmul.msk.f32.vlgmr.msra.gmra.mxu1 %vm2084_vm15, %v15391_v39  ;;  %v15424_v44 = vpop.f32.mrf.mxu2 }
 0x3e4   : > { %12038 = vmatmul.msk.f32.gmra.mxu3 %vm2084_vm15, %v12029_v17 }
 0x3e5   : > { %v12884_v0 = vpop.permute.xlu0 %12883 }
 0x3e6   : > { %v12886_v38 = vunpack.i.h.bf16 %v12884_v0  ;;  %v12885_v6 = vunpack.i.l.bf16 %v12884_v0  ;;  %v3745_v61 = vpop.permute.xlu1 %3744  ;;  %v15426_v7 = vpop.f32.mrf.mxu3 }
 0x3e7   : > { %v3759_v11 = vsel %vm1658_vm6, %v3743_v37, %v3745_v61  ;;  %v15429_v2 = vpop.f32.mrf.mxu0  ;;  %v15431_v59 = vpop.f32.mrf.mxu1 }
 0x3e8   : > { %12048 = vmatpush.msk.msrb.mxu3 %vm2091_vm14, %v3759_v11  ;;  %v3751_v58 = vsel %vm1658_vm6, %v12881_v19, %v12885_v6  ;;  %v3752_v3 = vsel %vm1658_vm6, %v12885_v6, %v12886_v38  ;;  %vm5125_vm6 = vcmask 1014784  }
 0x3e9   : > { %12035 = vmatmul.msk.f32.gmra.mxu2 %vm2084_vm15, %v12029_v17  ;;  %v3986_v10 = vpop.permute.xlu2 %3985 }
 0x3ea   : > { %3917 = vmatpush.msra.mxu2 %v3751_v58  ;;  %3940 = vmatpush.msrb.mxu3 %v3752_v3 }
 0x3eb   : > { %12027 = vmatmul.msk.f32.gmra.mxu0 %vm2084_vm15, %v15321_v35  ;;  %12032 = vmatmul.msk.f32.gmra.mxu1 %vm2084_vm15, %v12029_v17  ;;  %v15442_v31 = vpop.f32.mrf.mxu2 }
 0x3ec   : > { %12049 = vmatmul.msk.f32.vlgmr.msrb.gmra.mxu3 %vm2084_vm15, %v15391_v39  ;;  %19183 = vst [vmem:[#allocation8_spill] sm:$0xff] %v15442_v31 }
 0x3ed   : > { %v3984_v48 = vpop.permute.xlu0 %3983 }
 0x3ee   : > { %v4004_v28 = vsel %vm1778_vm7, %v3982_v18, %v3984_v48  ;;  %v4005_v55 = vsel %vm1778_vm7, %v3984_v48, %v3986_v10  ;;  %v12889_v32 = vpop.permute.xlu1 %12888  ;;  %v15446_v21 = vpop.f32.mrf.mxu3 }
 0x3ef   : > { %v12891_v40 = vunpack.i.h.bf16 %v12889_v32  ;;  %v12890_v37 = vunpack.i.l.bf16 %v12889_v32  ;;  %v15448_v51 = vpop.f32.mrf.mxu0  ;;  %v15450_v35 = vpop.f32.mrf.mxu1  ;;  %12053 = vmatpush.msk.msra.mxu0 %vm2091_vm14, %v4004_v28  ;;  %12056 = vmatpush.msk.msra.mxu1 %vm2091_vm14, %v4005_v55  ;;  %v12051_v32 = vld [vmem:[%s19178_s10 + $0x80] sm:$0xff] }
 0x3f0   : > { %19184 = vst [vmem:[#allocation17_spill] sm:$0xff] %v15448_v51 }
 0x3f1   : > { %12046 = vmatmul.msk.f32.vlgmr.msra.gmra.mxu2 %vm2084_vm15, %v15391_v39  ;;  %v3997_v23 = vsel %vm1778_vm7, %v12890_v37, %v12891_v40  ;;  %v3990_v19 = vpop.permute.xlu2 %3989 }
 0x3f2   : > { %4053 = vmatpush.msra.mxu0 %v3997_v23 }
 0x3f3   : > { %12040 = vmatmul.msk.f32.vlgmr.msrb.gmra.mxu0 %vm2084_vm15, %v15391_v39  ;;  %12043 = vmatmul.msk.f32.vlgmr.msrb.gmra.mxu1 %vm2084_vm15, %v15391_v39  ;;  %v15462_v43 = vpop.f32.mrf.mxu2 }
 0x3f4   : > { %12050 = vmatmul.msk.f32.gmra.mxu3 %vm2084_vm15, %v12029_v17 }
 0x3f5   : > { %v3988_v54 = vpop.permute.xlu0 %3987 }
 0x3f6   : > { %v4006_v4 = vsel %vm1778_vm7, %v3986_v10, %v3988_v54  ;;  %v4007_v26 = vsel %vm1778_vm7, %v3988_v54, %v3990_v19  ;;  %v12894_v62 = vpop.permute.xlu1 %12893  ;;  %v15466_v49 = vpop.f32.mrf.mxu3 }
 0x3f7   : > { %19185 = vst [vmem:[#allocation13_spill] sm:$0xff] %v15466_v49  ;;  %v12896_v18 = vunpack.i.h.bf16 %v12894_v62  ;;  %v12895_v0 = vunpack.i.l.bf16 %v12894_v62  ;;  %v15468_v38 = vpop.f32.mrf.mxu0  ;;  %v15470_v6 = vpop.f32.mrf.mxu1  ;;  %12059 = vmatpush.msk.msrb.mxu2 %vm2091_vm14, %v4006_v4  ;;  %12062 = vmatpush.msk.msra.mxu3 %vm2091_vm14, %v4007_v26 }
 0x3f8   : > { %19186 = vst [vmem:[#allocation12_spill] sm:$0xff] %v15468_v38 }
 0x3f9   : > { %12047 = vmatmul.msk.f32.gmra.mxu2 %vm2084_vm15, %v12029_v17  ;;  %v3998_v39 = vsel %vm1778_vm7, %v12891_v40, %v12895_v0  ;;  %v3999_v61 = vsel %vm1778_vm7, %v12895_v0, %v12896_v18  ;;  %v3994_v58 = vpop.permute.xlu2 %3993 }
 0x3fa   : > { %4076 = vmatpush.msra.mxu1 %v3998_v39  ;;  %4099 = vmatpush.msrb.mxu2 %v3999_v61 }
 0x3fb   : > { %12041 = vmatmul.msk.f32.gmra.mxu0 %vm2084_vm15, %v12029_v17  ;;  %12044 = vmatmul.msk.f32.gmra.mxu1 %vm2084_vm15, %v12029_v17  ;;  %v15479_v11 = vpop.f32.mrf.mxu2 }
 0x3fd   : > { %v12899_v3 = vpop.permute.xlu0 %12898 }
 0x3fe   : > { %v12901_v10 = vunpack.i.h.bf16 %v12899_v3  ;;  %v12900_v48 = vunpack.i.l.bf16 %v12899_v3  ;;  %v3992_v28 = vpop.permute.xlu1 %3991  ;;  %v15481_v55 = vpop.f32.mrf.mxu3 }
 0x3ff   : > { %19187 = vst [vmem:[#allocation11_spill] sm:$0xff] %v15481_v55  ;;  %v4008_v40 = vsel %vm1778_vm7, %v3990_v19, %v3992_v28  ;;  %v4009_v37 = vsel %vm1778_vm7, %v3992_v28, %v3994_v58  ;;  %v15488_v23 = vpop.f32.mrf.mxu0  ;;  %v15490_v17 = vpop.f32.mrf.mxu1 }
 0x400   : > { %19188 = vst [vmem:[#allocation10_spill] sm:$0xff] %v15490_v17  ;;  %12065 = vmatpush.msk.msrb.mxu0 %vm2091_vm14, %v4008_v40  ;;  %12068 = vmatpush.msk.msrb.mxu1 %vm2091_vm14, %v4009_v37  ;;  %v4000_v54 = vsel %vm1778_vm7, %v12896_v18, %v12900_v48  ;;  %v4001_v4 = vsel %vm1778_vm7, %v12900_v48, %v12901_v10  ;;  %v12052_v18 = vld [vmem:[%s19178_s10 + $0x88] sm:$0x3f]  ;;  %s19283_s10 = sld [smem:[#allocation73_spill]] }
 0x401   : > { %12060 = vmatmul.msk.f32.vlgmr.msrb.gmra.mxu2 %vm2084_vm15, %v12051_v32  ;;  %4122 = vmatpush.msra.mxu3 %v4000_v54 }
 0x402   : > { %4145 = vmatpush.msrb.mxu0 %v4001_v4  ;;  %12063 = vmatmul.msk.f32.vlgmr.msra.gmra.mxu3 %vm2084_vm15, %v12051_v32 }
 0x403   : > { %12054 = vmatmul.msk.f32.vlgmr.msra.gmra.mxu0 %vm2084_vm15, %v12051_v32  ;;  %12057 = vmatmul.msk.f32.vlgmr.msra.gmra.mxu1 %vm2084_vm15, %v12051_v32  ;;  %v15500_v19 = vpop.f32.mrf.mxu2 }
 0x404   : > { %19189 = vst [vmem:[#allocation19_spill] sm:$0xff] %v15500_v19 }
 0x405   : > { %v3996_v26 = vpop.permute.xlu0 %3995 }
 0x406   : > { %v4010_v62 = vsel %vm1778_vm7, %v3994_v58, %v3996_v26  ;;  %v12904_v0 = vpop.permute.xlu1 %12903  ;;  %v15503_v39 = vpop.f32.mrf.mxu3 }
 0x407   : > { %19190 = vst [vmem:[#allocation18_spill] sm:$0xff] %v15503_v39  ;;  %v12906_v61 = vunpack.i.h.bf16 %v12904_v0  ;;  %v12905_v3 = vunpack.i.l.bf16 %v12904_v0  ;;  %v15508_v48 = vpop.f32.mrf.mxu0  ;;  %v15510_v28 = vpop.f32.mrf.mxu1  ;;  %12071 = vmatpush.msk.msra.mxu2 %vm2091_vm14, %v4010_v62 }
 0x408   : > { %19191 = vst [vmem:[#allocation16_spill] sm:$0xff] %v15508_v48 }
 0x409   : > { %19192 = vst [vmem:[#allocation15_spill] sm:$0xff] %v15510_v28  ;;  %12061 = vmatmul.msk.f32.gmra.mxu2 %vm2084_vm15, %v12052_v18  ;;  %v4002_v40 = vsel %vm1778_vm7, %v12901_v10, %v12905_v3  ;;  %v4003_v58 = vsel %vm1778_vm7, %v12905_v3, %v12906_v61 }
 0x40a   : > { %4168 = vmatpush.msrb.mxu1 %v4002_v40  ;;  %4191 = vmatpush.msra.mxu2 %v4003_v58 }
 0x40b   : > { %12055 = vmatmul.msk.f32.gmra.mxu0 %vm2084_vm15, %v12052_v18  ;;  %12058 = vmatmul.msk.f32.gmra.mxu1 %vm2084_vm15, %v12052_v18  ;;  %v15519_v37 = vpop.f32.mrf.mxu2 }
 0x40c   : > { %12064 = vmatmul.msk.f32.gmra.mxu3 %vm2084_vm15, %v12052_v18  ;;  %19193 = vst [vmem:[#allocation14_spill] sm:$0xff] %v15519_v37 }
 0x40e   : > { %v15521_v54 = vpop.f32.mrf.mxu3 }
 0x40f   : > { %v15523_v4 = vpop.f32.mrf.mxu0  ;;  %v15525_v26 = vpop.f32.mrf.mxu1 }
 0x411   : > { %12072 = vmatmul.msk.f32.vlgmr.msra.gmra.mxu2 %vm2084_vm15, %v12051_v32 }
 0x413   : > { %12066 = vmatmul.msk.f32.vlgmr.msrb.gmra.mxu0 %vm2084_vm15, %v12051_v32  ;;  %12069 = vmatmul.msk.f32.vlgmr.msrb.gmra.mxu1 %vm2084_vm15, %v12051_v32  ;;  %v15530_v10 = vpop.f32.mrf.mxu2 }
 0x416   : > { %v15532_v62 = vpop.f32.mrf.mxu3 }
 0x417   : > { %19194 = vst [vmem:[#allocation28_spill] sm:$0xff] %v15532_v62  ;;  %v15534_v0 = vpop.f32.mrf.mxu0  ;;  %v15536_v61 = vpop.f32.mrf.mxu1 }
 0x419   : > { %12073 = vmatmul.msk.f32.gmra.mxu2 %vm2084_vm15, %v12052_v18 }
 0x41b   : > { %12067 = vmatmul.msk.f32.gmra.mxu0 %vm2084_vm15, %v12052_v18  ;;  %12070 = vmatmul.msk.f32.gmra.mxu1 %vm2084_vm15, %v12052_v18  ;;  %v15541_v3 = vpop.f32.mrf.mxu2 }
 0x41c   : > { %19195 = vst [vmem:[#allocation24_spill] sm:$0xff] %v15541_v3 }
 0x41e   : > { %v15543_v40 = vpop.f32.mrf.mxu3 }
 0x41f   : > { %v15545_v58 = vpop.f32.mrf.mxu0  ;;  %v15547_v32 = vpop.f32.mrf.mxu1 }
 0x420   : > { %19196 = vst [vmem:[#allocation21_spill] sm:$0xff] %v15545_v58 }
 0x421   : > { %19197 = vst [vmem:[#allocation25_spill] sm:$0xff] %v15547_v32 }
 0x423   : > { %v15549_v39 = vpop.f32.mrf.mxu2 }
 0x424   : > { %19198 = vst [vmem:[#allocation22_spill] sm:$0xff] %v15549_v39 }
 0x426   : > { %v15551_v37 = vpop.f32.mrf.mxu3 }
 0x427   : > { %19199 = vst [vmem:[#allocation29_spill] sm:$0xff] %v15551_v37  ;;  %v15553_v28 = vpop.f32.mrf.mxu0  ;;  %v15555_v19 = vpop.f32.mrf.mxu1 }
 0x428   : > { %19200 = vst [vmem:[#allocation27_spill] sm:$0xff] %v15553_v28 }
 0x429   : > { %19201 = vst [vmem:[#allocation31_spill] sm:$0xff] %v15555_v19 }
 0x42b   : > { %v15557_v55 = vpop.f32.mrf.mxu2 }
 0x42c   : > { %19202 = vst [vmem:[#allocation30_spill] sm:$0xff] %v15557_v55 }
 0x42e   : > { %v15559_v62 = vpop.f32.mrf.mxu3 }
 0x42f   : > { %19203 = vst [vmem:[#allocation39_spill] sm:$0xff] %v15559_v62  ;;  %v3293_v18 = vpop.f32.mrf.mxu0 }
 0x430   : > { %v15561_v17 = vpop.f32.mrf.mxu1 }
 0x433   : > { %v15563_v38 = vpop.f32.mrf.mxu2 }
 0x434   : > { %19204 = vst [vmem:[#allocation36_spill] sm:$0xff] %v15563_v38 }
 0x436   : > { %v15565_v58 = vpop.f32.mrf.mxu3 }
 0x437   : > { %19205 = vst [vmem:[#allocation33_spill] sm:$0xff] %v15565_v58 }
 0x438   : > { %v15567_v32 = vpop.f32.mrf.mxu0  ;;  %v15569_v39 = vpop.f32.mrf.mxu1 }
 0x439   : > { %19206 = vst [vmem:[#allocation37_spill] sm:$0xff] %v15567_v32 }
 0x43a   : > { %19207 = vst [vmem:[#allocation34_spill] sm:$0xff] %v15569_v39 }
 0x43c   : > { %v15571_v48 = vpop.f32.mrf.mxu2 }
 0x43d   : > { %19208 = vst [vmem:[#allocation41_spill] sm:$0xff] %v15571_v48 }
 0x43f   : > { %v3576_v28 = vpop.f32.mrf.mxu3 }
 0x440   : > { %v15573_v3 = vpop.f32.mrf.mxu0  ;;  %v15575_v19 = vpop.f32.mrf.mxu1 }
 0x441   : > { %19209 = vst [vmem:[#allocation45_spill] sm:$0xff] %v15573_v3 }
 0x442   : > { %19210 = vst [vmem:[#allocation42_spill] sm:$0xff] %v15575_v19 }
 0x444   : > { %v3553_v55 = vpop.f32.mrf.mxu2 }
 0x447   : > { %v15577_v62 = vpop.f32.mrf.mxu3 }
 0x448   : > { %19211 = vst [vmem:[#allocation23_spill] sm:$0xff] %v15577_v62  ;;  %v15579_v51 = vpop.f32.mrf.mxu0  ;;  %v15581_v37 = vpop.f32.mrf.mxu1 }
 0x449   : > { %19212 = vst [vmem:[#allocation26_spill] sm:$0xff] %v15579_v51 }
 0x44a   : > { %19213 = vst [vmem:[#allocation35_spill] sm:$0xff] %v15581_v37 }
 0x44c   : > { %v15583_v49 = vpop.f32.mrf.mxu2 }
 0x44d   : > { %19214 = vst [vmem:[#allocation43_spill] sm:$0xff] %v15583_v49 }
 0x44f   : > { %v15585_v58 = vpop.f32.mrf.mxu3 }
 0x450   : > { %19215 = vst [vmem:[#allocation46_spill] sm:$0xff] %v15585_v58  ;;  %v15587_v32 = vpop.f32.mrf.mxu0  ;;  %v15589_v39 = vpop.f32.mrf.mxu1 }
 0x451   : > { %19216 = vst [vmem:[#allocation32_spill] sm:$0xff] %v15587_v32 }
 0x452   : > { %19217 = vst [vmem:[#allocation7_spill] sm:$0xff] %v15589_v39 }
 0x454   : > { %v15591_v48 = vpop.f32.mrf.mxu2 }
 0x455   : > { %19218 = vst [vmem:[#allocation40_spill] sm:$0xff] %v15591_v48 }
 0x457   : > { %v15593_v3 = vpop.f32.mrf.mxu3 }
 0x458   : > { %19219 = vst [vmem:[#allocation44_spill] sm:$0xff] %v15593_v3  ;;  %v15595_v19 = vpop.f32.mrf.mxu0  ;;  %v15597_v31 = vpop.f32.mrf.mxu1 }
 0x459   : > { %19220 = vst [vmem:[#allocation48_spill] sm:$0xff] %v15595_v19 }
 0x45a   : > { %19221 = vst [vmem:[#allocation38_spill] sm:$0xff] %v15597_v31 }
 0x45c   : > { %v15599_v62 = vpop.f32.mrf.mxu2 }
 0x45d   : > { %19222 = vst [vmem:[#allocation47_spill] sm:$0xff] %v15599_v62  ;;  %v2305_v62 = vadd.f32 %v15253_v52, %v15201_v5  ;;  %v2400_v52 = vadd.f32 %v15332_v20, %v15279_v27  ;;  %v2682_v27 = vadd.f32 %v15408_v34, %v15330_v16 }
 0x45f   : > { %v15601_v51 = vpop.f32.mrf.mxu3 }
 0x460   : > { %19223 = vst [vmem:[#allocation9_spill] sm:$0xff] %v15601_v51  ;;  %v15603_v37 = vpop.f32.mrf.mxu0  ;;  %v3804_v49 = vpop.f32.mrf.mxu1 }
 0x461   : > { %19224 = vst [vmem:[#allocation20_spill] sm:$0xff] %v15603_v37  ;;  %v2328_v37 = vadd.f32 %v15308_v46, %v15234_v13  ;;  %v2351_v13 = vadd.f32 %v15310_v45, %v15217_v56 }
 0x463   : > { %v2681_v56 = vadd.f32 %v15406_v47, %v2351_v13 }
 0x464   : > { %v3827_v58 = vpop.f32.mrf.mxu2 }
 0x465   : > { %v2926_v16 = vadd.f32 %v15446_v21, %v2681_v56 }
 0x467   : > { %v15609_v39 = vpop.f32.mrf.mxu3  ;;  %v3171_v47 = vadd.f32 %v15530_v10, %v2926_v16  ;;  %v19244_v16 = vld [vmem:[#allocation16_spill] sm:$0xff] }
 0x468   : > { %v15605_v38 = vpop.f32.mrf.mxu0  ;;  %v15607_v32 = vpop.f32.mrf.mxu1  ;;  %19227 = vst [vmem:[#allocation51_spill] sm:$0xff] %v15609_v39  ;;  %v2679_v39 = vadd.f32 %v15372_v36, %v2305_v62  ;;  %v2331_v36 = vadd.f32 %v15335_v29, %v15180_v14  ;;  %v2423_v14 = vadd.f32 %v15378_v9, %v15283_v41  ;;  %v19237_v62 = vld [vmem:[#allocation7_spill] sm:$0xff] }
 0x469   : > { %19225 = vst [vmem:[#allocation49_spill] sm:$0xff] %v15605_v38  ;;  %v2680_v38 = vadd.f32 %v15356_v53, %v2328_v37  ;;  %v19233_v37 = vld [vmem:[#allocation13_spill] sm:$0xff] }
 0x46a   : > { %19226 = vst [vmem:[#allocation50_spill] sm:$0xff] %v15607_v32  ;;  %v15671_v9 = vadd.f32 %v15426_v7, %v2423_v14 }
 0x46b   : > { %v2925_v32 = vadd.f32 %v15462_v43, %v2680_v38  ;;  %v2687_v43 = vadd.f32 %v15376_v33, %v2331_v36 }
 0x46c   : > { %v15611_v48 = vpop.f32.mrf.mxu2 }
 0x46d   : > { %19228 = vst [vmem:[#allocation52_spill] sm:$0xff] %v15611_v48  ;;  %v2924_v48 = vadd.f32 %v15450_v35, %v2679_v39  ;;  %v3170_v53 = vadd.f32 %v15525_v26, %v2925_v32  ;;  %v2443_v35 = vadd.f32 %v15360_v1, %v15275_v15  ;;  %v15661_v15 = vpop.permute.xlu2 %4236  ;;  %v19235_v26 = vld [vmem:[#allocation37_spill] sm:$0xff]  ;;  %v15692_v32 = vpop.permute.xlu0 %4231 }
 0x46f   : > { %v15621_v31 = vpop.f32.mrf.mxu3  ;;  %v3169_v46 = vadd.f32 %v15523_v4, %v2924_v48  ;;  %v3415_v20 = vadd.f32 %v3293_v18, %v3170_v53  ;;  %v19239_v18 = vld [vmem:[#allocation24_spill] sm:$0xff]  ;;  %v19241_v53 = vld [vmem:[#allocation43_spill] sm:$0xff] }
 0x470   : > { %v15613_v3 = vpop.f32.mrf.mxu0  ;;  %v15615_v19 = vpop.f32.mrf.mxu1 }
 0x471   : > { %19229 = vst [vmem:[#allocation53_spill] sm:$0xff] %v15613_v3  ;;  %v3414_v45 = vadd.f32 %v15543_v40, %v3169_v46  ;;  %v19240_v46 = vld [vmem:[#allocation23_spill] sm:$0xff] }
 0x472   : > { %19230 = vst [vmem:[#allocation54_spill] sm:$0xff] %v15615_v19  ;;  %v2397_v19 = vadd.f32 %v15306_v63, %v15255_v12  ;;  %v2354_v12 = vadd.f32 %v15337_v25, %v15245_v22  ;;  %v2420_v63 = vadd.f32 %v15358_v30, %v15262_v8  ;;  %v2446_v22 = vadd.f32 %v15380_v60, %v15302_v24 }
 0x473   : > { %v2927_v25 = vadd.f32 %v15488_v23, %v2682_v27  ;;  %v3698_v30 = vadd.f32 %v3576_v28, %v3415_v20  ;;  %v3697_v1 = vadd.f32 %v3553_v55, %v3414_v45  ;;  %v2931_v24 = vadd.f32 %v15470_v6, %v15400_v50  ;;  %v19231_v6 = vld [vmem:[#allocation36_spill] sm:$0xff] }
 0x474   : > { %v15623_v51 = vpop.f32.mrf.mxu2  ;;  %v15659_v8 = vadd.f32 %v15402_v42, %v2420_v63  ;;  %v2683_v41 = vadd.f32 %v15424_v44, %v2397_v19  ;;  %v2932_v60 = vadd.f32 %v15479_v11, %v2687_v43  ;;  %v2688_v38 = vadd.f32 %v15429_v2, %v2354_v12  ;;  %v19232_v28 = vld [vmem:[#allocation8_spill] sm:$0xff]  ;;  %v19234_v2 = vld [vmem:[#allocation29_spill] sm:$0xff] }
 0x475   : > { %v3172_v42 = vadd.f32 %v15521_v54, %v2927_v25  ;;  %v3948_v34 = vadd.f32 %v3804_v49, %v3697_v1  ;;  %v3949_v21 = vadd.f32 %v3827_v58, %v3698_v30  ;;  %v2689_v55 = vadd.f32 %v15431_v59, %v15353_v57  ;;  %v19236_v59 = vld [vmem:[#allocation32_spill] sm:$0xff]  ;;  %v19238_v58 = vld [vmem:[#allocation17_spill] sm:$0xff]  ;;  %v15702_v25 = vpop.permute.xlu2 %4257  ;;  %v19245_v30 = vld [vmem:[#allocation34_spill] sm:$0xff] }
 0x476   : > { %v3176_v44 = vadd.f32 %v15534_v0, %v2931_v24  ;;  %v3177_v7 = vadd.f32 %v15536_v61, %v2932_v60  ;;  %v3416_v50 = vadd.f32 %v15561_v17, %v3171_v47  ;;  %v2690_v49 = vadd.f32 %v19232_v28, %v2400_v52  ;;  %v19242_v63 = vld [vmem:[#allocation9_spill] sm:$0xff]  ;;  %v19246_v24 = vld [vmem:[#allocation50_spill] sm:$0xff] }
 0x477   : > { %v15667_v33 = vpop.f32.mrf.mxu3  ;;  %v3417_v11 = vadd.f32 %v19231_v6, %v3172_v42  ;;  %v2933_v54 = vadd.f32 %v19233_v37, %v2688_v38  ;;  %v2685_v17 = vadd.f32 %v19238_v58, %v2443_v35  ;;  %v2934_v35 = vadd.f32 %v19244_v16, %v2689_v55  ;;  %v19247_v42 = vld [vmem:[#allocation52_spill] sm:$0xff]  ;;  %v19252_v37 = vld [vmem:[#allocation11_spill] sm:$0xff]  ;;  %v15734_v16 = vpop.permute.xlu1 %4262 }
 0x478   : > { %v15631_v3 = vpop.f32.mrf.mxu0  ;;  %v15633_v5 = vpop.f32.mrf.mxu1  ;;  %v3421_v4 = vadd.f32 %v19234_v2, %v3176_v44  ;;  %v3422_v57 = vadd.f32 %v19235_v26, %v3177_v7  ;;  %v3699_v10 = vadd.f32 %v19236_v59, %v3416_v50  ;;  %v19243_v27 = vld [vmem:[#allocation53_spill] sm:$0xff]  ;;  %v19248_v7 = vld [vmem:[#allocation12_spill] sm:$0xff] }
 0x479   : > { %v3700_v0 = vadd.f32 %v19237_v62, %v3417_v11  ;;  %v3178_v13 = vadd.f32 %v19239_v18, %v2933_v54  ;;  %v19250_v50 = vld [vmem:[#allocation28_spill] sm:$0xff]  ;;  %v2930_v54 = vadd.f32 %v19252_v37, %v2685_v17  ;;  %v19255_v62 = vld [vmem:[#allocation41_spill] sm:$0xff]  ;;  %v19258_v17 = vld [vmem:[#allocation15_spill] sm:$0xff] }
 0x47a   : > { %v3705_v52 = vadd.f32 %v19240_v46, %v3422_v57  ;;  %v3704_v36 = vadd.f32 %v19241_v53, %v3421_v4  ;;  %v3950_v56 = vadd.f32 %v19242_v63, %v3699_v10  ;;  %v3179_v6 = vadd.f32 %v19250_v50, %v2934_v35  ;;  %v19251_v11 = vld [vmem:[#allocation48_spill] sm:$0xff]  ;;  %v19253_v57 = vld [vmem:[#allocation19_spill] sm:$0xff]  ;;  %v19254_v10 = vld [vmem:[#allocation21_spill] sm:$0xff] }
 0x47b   : > { %v3951_v45 = vadd.f32 %v19243_v27, %v3700_v0  ;;  %v3423_v1 = vadd.f32 %v19245_v30, %v3178_v13  ;;  %v2929_v59 = vadd.f32 %v19253_v57, %v15659_v8  ;;  %v19256_v0 = vld [vmem:[#allocation51_spill] sm:$0xff]  ;;  %v2935_v46 = vadd.f32 %v19258_v17, %v2690_v49  ;;  %v19261_v8 = vld [vmem:[#allocation38_spill] sm:$0xff]  ;;  %v19262_v27 = vld [vmem:[#allocation25_spill] sm:$0xff] }
 0x47c   : > { %v15663_v29 = vpop.f32.mrf.mxu2  ;;  %v3955_v60 = vadd.f32 %v19246_v24, %v3704_v36  ;;  %v3956_v47 = vadd.f32 %v19247_v42, %v3705_v52  ;;  %v19259_v52 = vld [vmem:[#allocation14_spill] sm:$0xff]  ;;  %v19260_v36 = vld [vmem:[#allocation39_spill] sm:$0xff]  ;;  %v19265_v24 = vld [vmem:[#allocation40_spill] sm:$0xff] }
 0x47d   : > { %v2936_v53 = vadd.f32 %v19259_v52, %v15671_v9  ;;  %v19263_v35 = vld [vmem:[#allocation22_spill] sm:$0xff]  ;;  %v19264_v49 = vld [vmem:[#allocation27_spill] sm:$0xff] }
 0x47e   : > { %v3175_v30 = vadd.f32 %v19263_v35, %v2930_v54  ;;  %v19267_v50 = vld [vmem:[#allocation42_spill] sm:$0xff] }
 0x47f   : > { %v19269_v54 = vld [vmem:[#allocation18_spill] sm:$0xff] }
 0x480   : > { %v4055_v23 = vpop.f32.mrf.mxu0  ;;  %v4078_v19 = vpop.f32.mrf.mxu1 }
 0x481   : > { %v4199_v39 = vadd.f32 %v4055_v23, %v3948_v34  ;;  %v4200_v48 = vadd.f32 %v4078_v19, %v3949_v21  ;;  %v2692_v23 = vadd.f32 %v19248_v7, %v2446_v22  ;;  %v19249_v19 = vld [vmem:[#allocation10_spill] sm:$0xff] }
 0x482   : > { %v2928_v55 = vadd.f32 %v19249_v19, %v2683_v41  ;;  %v3424_v41 = vadd.f32 %v19255_v62, %v3179_v6  ;;  %v19266_v19 = vld [vmem:[#allocation31_spill] sm:$0xff]  ;;  %v3420_v6 = vadd.f32 %v19267_v50, %v3175_v30 }
 0x483   : > { %v4213_v61 = vmax.f32 %v4199_v39, 0.0  ;;  %v4214_v40 = vmax.f32 %v4200_v48, 0.0  ;;  %v3706_v39 = vadd.f32 %v19251_v11, %v3423_v1  ;;  %v3180_v1 = vadd.f32 %v19264_v49, %v2935_v46  ;;  %v19268_v11 = vld [vmem:[#allocation54_spill] sm:$0xff] }
 0x484   : > { %v4101_v12 = vpop.f32.mrf.mxu2  ;;  %v3173_v22 = vadd.f32 %v19254_v10, %v2928_v55  ;;  %v3707_v63 = vadd.f32 %v19261_v8, %v3424_v41  ;;  %v3181_v55 = vadd.f32 %v19266_v19, %v2936_v53  ;;  %v19273_v41 = vld [vmem:[#allocation20_spill] sm:$0xff]  ;;  %v19275_v46 = vld [vmem:[#allocation46_spill] sm:$0xff]  ;;  %v19276_v53 = vld [vmem:[#allocation47_spill] sm:$0xff] }
 0x485   : > { %v4239_v20 = vmul.f32 %v15692_v32, %v4213_v61  ;;  %v4240_v43 = vmul.f32 %v15692_v32, %v4214_v40  ;;  %v4124_v14 = vpop.f32.mrf.mxu3  ;;  %v4201_v38 = vadd.f32 %v4101_v12, %v3950_v56  ;;  %v3957_v61 = vadd.f32 %v19256_v0, %v3706_v39  ;;  %v19277_v8 = vld [vmem:[#allocation44_spill] sm:$0xff] }
 0x486   : > { %v4202_v44 = vadd.f32 %v4124_v14, %v3951_v45  ;;  %v3418_v12 = vadd.f32 %v19260_v36, %v3173_v22  ;;  %v3174_v45 = vadd.f32 %v19262_v27, %v2929_v59  ;;  %v19271_v59 = vld [vmem:[#allocation45_spill] sm:$0xff]  ;;  %v19272_v22 = vld [vmem:[#allocation26_spill] sm:$0xff]  ;;  %v3703_v0 = vadd.f32 %v19273_v41, %v3420_v6  ;;  %v19278_v27 = vld [vmem:[#allocation35_spill] sm:$0xff] }
 0x487   : > { %v15708_v34 = vadd.f32 %v15702_v25, %v4239_v20  ;;  %v15711_v21 = vadd.f32 %v15702_v25, %v4240_v43  ;;  %v4215_v40 = vmax.f32 %v4201_v38, 0.0  ;;  %v3426_v62 = vadd.f32 %v19272_v22, %v3181_v55 }
 0x488   : > { %v4058_v48 = vpop.f32.mrf.mxu0  ;;  %v4081_v28 = vpop.f32.mrf.mxu1  ;;  %v4216_v58 = vmax.f32 %v4202_v44, 0.0  ;;  %v3701_v9 = vadd.f32 %v19265_v24, %v3418_v12  ;;  %v3419_v10 = vadd.f32 %v19271_v59, %v3174_v45  ;;  %v19279_v24 = vld [vmem:[#allocation49_spill] sm:$0xff] }
 0x489   : > { %v4206_v2 = vadd.f32 %v4058_v48, %v3955_v60  ;;  %v4207_v4 = vadd.f32 %v4081_v28, %v3956_v47  ;;  %v12907_v26 = vpack.i.bf16 %v15711_v21, %v15708_v34  ;;  %v3958_v60 = vadd.f32 %v15631_v3, %v3707_v63 }
 0x48a   : > { %v4241_v42 = vmul.f32 %v15692_v32, %v4215_v40  ;;  %v4242_v47 = vmul.f32 %v15692_v32, %v4216_v58  ;;  %v3952_v39 = vadd.f32 %v19268_v11, %v3701_v9  ;;  %v2937_v3 = vadd.f32 %v19269_v54, %v2692_v23 }
 0x48b   : > { %v4220_v18 = vmax.f32 %v4206_v2, 0.0  ;;  %v4221_v13 = vmax.f32 %v4207_v4, 0.0  ;;  %12908 = vrot.lane.b32.xlu0 %v12907_v26, %s19257_s1  ;;  %v19270_v2 = vld [vmem:[#allocation33_spill] sm:$0xff]  ;;  %v3702_v52 = vadd.f32 %v19275_v46, %v3419_v10  ;;  %v3709_v63 = vadd.f32 %v19277_v8, %v3426_v62 }
 0x48c   : > { %v4104_v56 = vpop.f32.mrf.mxu2  ;;  %v3425_v4 = vadd.f32 %v19270_v2, %v3180_v1  ;;  %v15760_v40 = vadd.f32 %v15702_v25, %v4241_v42  ;;  %v15763_v23 = vadd.f32 %v15702_v25, %v4242_v47 }
 0x48d   : > { %v4246_v20 = vmul.f32 %v15661_v15, %v4220_v18  ;;  %v4247_v43 = vmul.f32 %v15661_v15, %v4221_v13  ;;  %v4208_v14 = vadd.f32 %v4104_v56, %v3957_v61  ;;  %v19274_v13 = vld [vmem:[#allocation30_spill] sm:$0xff]  ;;  %v3954_v56 = vadd.f32 %v15621_v31, %v3703_v0 }
 0x48e   : > { %v3182_v17 = vadd.f32 %v19274_v13, %v2937_v3  ;;  %v3708_v36 = vadd.f32 %v19276_v53, %v3425_v4  ;;  %v3960_v35 = vadd.f32 %v15663_v29, %v3709_v63  ;;  %v12912_v1 = vpack.i.bf16 %v15763_v23, %v15760_v40 }
 0x48f   : > { %v15743_v38 = vadd.f32 %v15734_v16, %v4247_v43  ;;  %v4222_v44 = vmax.f32 %v4208_v14, 0.0  ;;  %v4127_v7 = vpop.f32.mrf.mxu3  ;;  %v15751_v26 = vadd.f32 %v15734_v16, %v4246_v20  ;;  %v3953_v20 = vadd.f32 %v15623_v51, %v3702_v52 }
 0x490   : > { %v4209_v48 = vadd.f32 %v4127_v7, %v3958_v60  ;;  %v4147_v28 = vpop.f32.mrf.mxu0  ;;  %v4170_v37 = vpop.f32.mrf.mxu1  ;;  %v3427_v45 = vadd.f32 %v19278_v27, %v3182_v17  ;;  %v3959_v43 = vadd.f32 %v15633_v5, %v3708_v36 }
 0x491   : > { %v4248_v57 = vmul.f32 %v15661_v15, %v4222_v44  ;;  %4309 = vrot.lane.b32.xlu1 %v15743_v38, %s19257_s1  ;;  %v4203_v61 = vadd.f32 %v4147_v28, %v3952_v39  ;;  %v4204_v42 = vadd.f32 %v4170_v37, %v3953_v20 }
 0x492   : > { %v4223_v18 = vmax.f32 %v4209_v48, 0.0  ;;  %v3710_v31 = vadd.f32 %v19279_v24, %v3427_v45 }
 0x493   : > { %v15766_v58 = vadd.f32 %v15734_v16, %v4248_v57  ;;  %4307 = vrot.lane.b32.xlu0 %v15751_v26, %s19257_s1  ;;  %v4217_v14 = vmax.f32 %v4203_v61, 0.0  ;;  %v4218_v6 = vmax.f32 %v4204_v42, 0.0 }
 0x494   : > { %v4193_v12 = vpop.f32.mrf.mxu2  ;;  %v4249_v30 = vmul.f32 %v15661_v15, %v4223_v18  ;;  %v3961_v51 = vadd.f32 %v15667_v33, %v3710_v31 }
 0x495   : > { %4311 = vrot.lane.b32.xlu2 %v15766_v58, %s19257_s1  ;;  %v4205_v49 = vadd.f32 %v4193_v12, %v3954_v56  ;;  %v4243_v5 = vmul.f32 %v15692_v32, %v4217_v14  ;;  %v4244_v3 = vmul.f32 %v15692_v32, %v4218_v6  ;;  %v4675_v6 = vld [vmem:[%s19282_s11] sm:$0xff] }
 0x496   : > { %v4275_v29 = vadd.f32 %v15734_v16, %v4249_v30 }
 0x497   : > { %v4219_v7 = vmax.f32 %v4205_v49, 0.0  ;;  %v15792_v48 = vadd.f32 %v15702_v25, %v4243_v5  ;;  %v4270_v59 = vadd.f32 %v15702_v25, %v4244_v3 }
 0x498   : > { %v4150_v9 = vpop.f32.mrf.mxu0  ;;  %v4173_v60 = vpop.f32.mrf.mxu1 }
 0x499   : > { %v4210_v47 = vadd.f32 %v4150_v9, %v3959_v43  ;;  %v4211_v44 = vadd.f32 %v4173_v60, %v3960_v35  ;;  %12913 = vrot.lane.b32.xlu1 %v12912_v1, %s19257_s1  ;;  %v4245_v28 = vmul.f32 %v15692_v32, %v4219_v7 }
 0x49b   : > { %v4224_v19 = vmax.f32 %v4210_v47, 0.0  ;;  %v4225_v55 = vmax.f32 %v4211_v44, 0.0  ;;  %v15802_v2 = vadd.f32 %v15702_v25, %v4245_v28 }
 0x49c   : > { %v4196_v50 = vpop.f32.mrf.mxu2 }
 0x49d   : > { %v4250_v11 = vmul.f32 %v15661_v15, %v4224_v19  ;;  %v4212_v39 = vadd.f32 %v4196_v50, %v3961_v51  ;;  %4313 = vrot.lane.b32.xlu2 %v4275_v29, %s19257_s1  ;;  %v4251_v37 = vmul.f32 %v15661_v15, %v4225_v55  ;;  %v12917_v32 = vpack.i.bf16 %v15802_v2, %v4270_v59  ;;  %v4649_v19 = vld [vmem:[%s19281_s30] sm:$0xff]  ;;  %v4650_v55 = vld [vmem:[%s19281_s30 + $0x8] sm:$0x3] }
 0x49e   : > { %v4676_v50 = vld [vmem:[%s19282_s11 + $0x8] sm:$0x3]  ;;  %s12739_s11 = sshll.u32 %s19506_s4, 4 }
 0x49f   : > { %v4276_v33 = vadd.f32 %v15734_v16, %v4250_v11  ;;  %v4226_v54 = vmax.f32 %v4212_v39, 0.0  ;;  %v4277_v4 = vadd.f32 %v15734_v16, %v4251_v37 }
 0x4a1   : > { %4301 = vrot.lane.b32.xlu1 %v15792_v48, %s19257_s1  ;;  %4315 = vrot.lane.b32.xlu0 %v4276_v33, %s19257_s1  ;;  %v4252_v57 = vmul.f32 %v15661_v15, %v4226_v54 }
 0x4a3   : > { %v4278_v10 = vadd.f32 %v15734_v16, %v4252_v57 }
 0x4a5   : > { %4317 = vrot.lane.b32.xlu2 %v4277_v4, %s19257_s1 }
 0x4a9   : > { %12918 = vrot.lane.b32.xlu1 %v12917_v32, %s19257_s1  ;;  %4319 = vrot.lane.b32.xlu0 %v4278_v10, %s19257_s1  ;;  %s19058_s1 = smov 8  }
 0x4ef   : > { %v4312_v62 = vpop.permute.xlu2 %4311 }
 0x4f7   : > { %v4314_v16 = vpop.permute.xlu2 %4313 }
 0x4f8   : > { %v4329_v52 = vsel %vm1198_vm2, %v4312_v62, %v4314_v16 }
 0x4fd   : > { %v12909_v22 = vpop.permute.xlu0 %12908 }
 0x4fe   : > { %v12911_v13 = vunpack.i.h.bf16 %v12909_v22  ;;  %v12910_v17 = vunpack.i.l.bf16 %v12909_v22  ;;  %v4443_v22 = vld [vmem:[%s19283_s10] sm:$0xff] }
 0x4ff   : > { %v4318_v27 = vpop.permute.xlu2 %4317 }
 0x503   : > { %v4310_v41 = vpop.permute.xlu1 %4309 }
 0x504   : > { %v4328_v0 = vsel %vm1198_vm2, %v4310_v41, %v4312_v62 }
 0x505   : > { %v15814_v61 = vmax.f32 %v15743_v38, %v4328_v0  ;;  %v4308_v15 = vpop.permute.xlu0 %4307  ;;  %v4321_v38 = vsel %vm1198_vm2, %v12910_v17, %v12911_v13 }
 0x506   : > { %v4327_v25 = vsel %vm1198_vm2, %v4308_v15, %v4310_v41  ;;  %v15831_v12 = vmax.f32 %v15708_v34, %v4321_v38 }
 0x507   : > { %v15818_v18 = vmax.f32 %v15751_v26, %v4327_v25  ;;  %4391 = vrot.lane.b32.xlu0 %v15814_v61, %s19280_s2  ;;  %v15828_v26 = vmax.f32 %v15766_v58, %v4329_v52 }
 0x509   : > { %4389 = vrot.lane.b32.xlu2 %v15818_v18, %s19280_s2 }
 0x50b   : > { %v12914_v46 = vpop.permute.xlu1 %12913 }
 0x50c   : > { %v12915_v53 = vunpack.i.l.bf16 %v12914_v46  ;;  %v12916_v63 = vunpack.i.h.bf16 %v12914_v46 }
 0x50e   : > { %v4322_v36 = vsel %vm1198_vm2, %v12911_v13, %v12915_v53  ;;  %v4323_v58 = vsel %vm1198_vm2, %v12915_v53, %v12916_v63  ;;  %v4444_v53 = vld [vmem:[%s19283_s10 + $0x8] sm:$0x3] }
 0x50f   : > { %v15834_v8 = vmax.f32 %v15711_v21, %v4322_v36  ;;  %v15849_v30 = vmax.f32 %v15760_v40, %v4323_v58 }
 0x511   : > { %4393 = vrot.lane.b32.xlu2 %v15828_v26, %s19280_s2  ;;  %v12922_v56 = vpack.i.bf16 %v15834_v8, %v15831_v12 }
 0x513   : > { %v4302_v45 = vpop.permute.xlu1 %4301  ;;  %v4316_v20 = vpop.permute.xlu0 %4315  ;;  %12923 = vrot.lane.b32.xlu1 %v12922_v56, %s19280_s2 }
 0x514   : > { %v4324_v34 = vsel %vm1198_vm2, %v12916_v63, %v4302_v45  ;;  %v4330_v43 = vsel %vm1198_vm2, %v4314_v16, %v4316_v20  ;;  %v4331_v21 = vsel %vm1198_vm2, %v4316_v20, %v4318_v27 }
 0x515   : > { %v15846_v14 = vmax.f32 %v15763_v23, %v4324_v34  ;;  %v4357_v35 = vmax.f32 %v4275_v29, %v4330_v43  ;;  %v15851_v49 = vmax.f32 %v4276_v33, %v4331_v21 }
 0x517   : > { %4395 = vrot.lane.b32.xlu0 %v4357_v35, %s19280_s2  ;;  %v12927_v1 = vpack.i.bf16 %v15846_v14, %v15849_v30 }
 0x519   : > { %4397 = vrot.lane.b32.xlu2 %v15851_v49, %s19280_s2 }
 0x51b   : > { %v12919_v24 = vpop.permute.xlu1 %12918  ;;  %v4320_v31 = vpop.permute.xlu0 %4319  ;;  %12928 = vrot.lane.b32.xlu1 %v12927_v1, %s19280_s2 }
 0x51c   : > { %v12921_v23 = vunpack.i.h.bf16 %v12919_v24  ;;  %v12920_v9 = vunpack.i.l.bf16 %v12919_v24  ;;  %v4332_v60 = vsel %vm1198_vm2, %v4318_v27, %v4320_v31  ;;  %v15869_v5 = vmax.f32 %v4278_v10, %v4320_v31 }
 0x51d   : > { %v15860_v40 = vmax.f32 %v4277_v4, %v4332_v60 }
 0x51e   : > { %v4325_v42 = vsel %vm1198_vm2, %v4302_v45, %v12920_v9  ;;  %v4326_v47 = vsel %vm1198_vm2, %v12920_v9, %v12921_v23  ;;  %v15879_v7 = vmax.f32 %v15802_v2, %v12921_v23  ;;  %vm4452_vm2 = vcmask 1045504  }
 0x51f   : > { %v15865_v44 = vmax.f32 %v15792_v48, %v4325_v42  ;;  %v15867_v51 = vmax.f32 %v4270_v59, %v4326_v47  ;;  %4399 = vrot.lane.b32.xlu0 %v15860_v40, %s19280_s2 }
 0x521   : > { %4401 = vrot.lane.b32.xlu2 %v15869_v5, %s19280_s2  ;;  %v12932_v29 = vpack.i.bf16 %v15867_v51, %v15865_v44 }
 0x523   : > { %12933 = vrot.lane.b32.xlu1 %v12932_v29, %s19280_s2 }
 0x527   : > { %4387 = vrot.lane.b32.xlu0 %v15879_v7, %s19280_s2  ;;  %s19066_s2 = smov 4  }
 0x529   : > { %4653 = vperm.xlu2 %12771, %v4649_v19  }
 0x52b   : > { %4658 = vperm.xlu1 %12770, %v4650_v55  }
 0x52f   : > { %4684 = vperm.xlu0 %12769, %v4676_v50  }
 0x533   : > { %4679 = vperm.xlu1 %12770, %v4675_v6  }
 0x563   : > { %v4390_v11 = vpop.permute.xlu2 %4389 }
 0x56b   : > { %v4394_v39 = vpop.permute.xlu2 %4393 }
 0x573   : > { %v4398_v57 = vpop.permute.xlu2 %4397 }
 0x579   : > { %v4392_v48 = vpop.permute.xlu0 %4391 }
 0x57a   : > { %v4409_v28 = vsel %vm978_vm0, %v4390_v11, %v4392_v48  ;;  %v4410_v33 = vsel %vm978_vm0, %v4392_v48, %v4394_v39 }
 0x57b   : > { %v4436_v37 = vmax.f32 %v15818_v18, %v4409_v28  ;;  %v4437_v54 = vmax.f32 %v15814_v61, %v4410_v33  ;;  %v4402_v17 = vpop.permute.xlu2 %4401 }
 0x57c   : > { %v4442_v56 = vmax.f32 %v15869_v5, %v4402_v17 }
 0x57d   : > { %12074 = vmatpush.msk.msrb.mxu3 %vm4452_vm2, %v4436_v37  ;;  %12077 = vmatpush.msk.msra.mxu0 %vm4452_vm2, %v4437_v54 }
 0x583   : > { %v4654_v31 = vpop.permute.xlu2 %4653 }
 0x585   : > { %v12924_v3 = vpop.permute.xlu1 %12923 }
 0x586   : > { %v12926_v2 = vunpack.i.h.bf16 %v12924_v3  ;;  %v12925_v4 = vunpack.i.l.bf16 %v12924_v3 }
 0x588   : > { %v4403_v59 = vsel %vm978_vm0, %v12925_v4, %v12926_v2 }
 0x589   : > { %v4396_v10 = vpop.permute.xlu0 %4395  ;;  %v4429_v32 = vmax.f32 %v15831_v12, %v4403_v59 }
 0x58a   : > { %v4411_v62 = vsel %vm978_vm0, %v4394_v39, %v4396_v10  ;;  %v4412_v41 = vsel %vm978_vm0, %v4396_v10, %v4398_v57 }
 0x58b   : > { %v4438_v0 = vmax.f32 %v15828_v26, %v4411_v62  ;;  %v4439_v61 = vmax.f32 %v4357_v35, %v4412_v41  ;;  %4489 = vmatpush.msrb.mxu3 %v4429_v32 }
 0x58c   : > { %12075 = vmatmul.msk.f32.vlgmr.msrb.gmra.mxu3 %vm4445_vm3, %v4443_v22 }
 0x58d   : > { %12080 = vmatpush.msk.msra.mxu1 %vm4452_vm2, %v4438_v0  ;;  %12083 = vmatpush.msk.msrb.mxu2 %vm4452_vm2, %v4439_v61  ;;  %v12929_v15 = vpop.permute.xlu1 %12928 }
 0x58e   : > { %v12931_v25 = vunpack.i.h.bf16 %v12929_v15  ;;  %v12930_v18 = vunpack.i.l.bf16 %v12929_v15 }
 0x590   : > { %v4404_v16 = vsel %vm978_vm0, %v12926_v2, %v12930_v18  ;;  %v4405_v13 = vsel %vm978_vm0, %v12930_v18, %v12931_v25 }
 0x591   : > { %v4400_v46 = vpop.permute.xlu0 %4399  ;;  %v4430_v52 = vmax.f32 %v15834_v8, %v4404_v16  ;;  %v4431_v38 = vmax.f32 %v15849_v30, %v4405_v13 }
 0x592   : > { %v4413_v36 = vsel %vm978_vm0, %v4398_v57, %v4400_v46  ;;  %v4414_v26 = vsel %vm978_vm0, %v4400_v46, %v4402_v17 }
 0x593   : > { %v4440_v12 = vmax.f32 %v15851_v49, %v4413_v36  ;;  %v4441_v63 = vmax.f32 %v15860_v40, %v4414_v26  ;;  %4512 = vmatpush.msra.mxu0 %v4430_v52  ;;  %4535 = vmatpush.msra.mxu1 %v4431_v38 }
 0x594   : > { %12076 = vmatmul.msk.f32.gmra.mxu3 %vm4445_vm3, %v4444_v53  ;;  %12078 = vmatmul.msk.f32.vlgmr.msra.gmra.mxu0 %vm4445_vm3, %v4443_v22 }
 0x595   : > { %12081 = vmatmul.msk.f32.vlgmr.msra.gmra.mxu1 %vm4445_vm3, %v4443_v22  ;;  %v12934_v8 = vpop.permute.xlu1 %12933  ;;  %12086 = vmatpush.msk.msra.mxu3 %vm4452_vm2, %v4440_v12 }
 0x596   : > { %12092 = vmatpush.msk.msrb.mxu1 %vm4452_vm2, %v4442_v56  ;;  %v12936_v27 = vunpack.i.h.bf16 %v12934_v8  ;;  %v12935_v45 = vunpack.i.l.bf16 %v12934_v8  ;;  %12089 = vmatpush.msk.msrb.mxu0 %vm4452_vm2, %v4441_v63 }
 0x598   : > { %v4406_v20 = vsel %vm978_vm0, %v12931_v25, %v12935_v45  ;;  %v4407_v58 = vsel %vm978_vm0, %v12935_v45, %v12936_v27 }
 0x599   : > { %v4388_v34 = vpop.permute.xlu0 %4387  ;;  %v4432_v43 = vmax.f32 %v15846_v14, %v4406_v20  ;;  %v4433_v21 = vmax.f32 %v15865_v44, %v4407_v58 }
 0x59a   : > { %v4408_v35 = vsel %vm978_vm0, %v12936_v27, %v4388_v34  ;;  %v4435_v30 = vmax.f32 %v15879_v7, %v4388_v34  ;;  %vm4707_vm0 = vcmask 318464  }
 0x59b   : > { %4558 = vmatpush.msrb.mxu2 %v4432_v43  ;;  %4581 = vmatpush.msra.mxu3 %v4433_v21  ;;  %v4434_v49 = vmax.f32 %v15867_v51, %v4408_v35 }
 0x59c   : > { %12079 = vmatmul.msk.f32.gmra.mxu0 %vm4445_vm3, %v4444_v53  ;;  %12084 = vmatmul.msk.f32.vlgmr.msrb.gmra.mxu2 %vm4445_vm3, %v4443_v22 }
 0x59d   : > { %12082 = vmatmul.msk.f32.gmra.mxu1 %vm4445_vm3, %v4444_v53  ;;  %12087 = vmatmul.msk.f32.vlgmr.msra.gmra.mxu3 %vm4445_vm3, %v4443_v22  ;;  %v15947_v14 = vpop.permute.xlu1 %4658 }
 0x59e   : > { %4627 = vmatpush.msrb.mxu1 %v4435_v30  ;;  %4604 = vmatpush.msrb.mxu0 %v4434_v49 }
 0x5a1   : > { %v4685_v48 = vpop.permute.xlu0 %4684 }
 0x5a4   : > { %12085 = vmatmul.msk.f32.gmra.mxu2 %vm4445_vm3, %v4444_v53  ;;  %12090 = vmatmul.msk.f32.vlgmr.msrb.gmra.mxu0 %vm4445_vm3, %v4443_v22 }
 0x5a5   : > { %12088 = vmatmul.msk.f32.gmra.mxu3 %vm4445_vm3, %v4444_v53  ;;  %12093 = vmatmul.msk.f32.vlgmr.msrb.gmra.mxu1 %vm4445_vm3, %v4443_v22  ;;  %v4680_v42 = vpop.permute.xlu1 %4679 }
 0x5ac   : > { %12091 = vmatmul.msk.f32.gmra.mxu0 %vm4445_vm3, %v4444_v53 }
 0x5ad   : > { %12094 = vmatmul.msk.f32.gmra.mxu1 %vm4445_vm3, %v4444_v53 }
 0x60f   : > { %v4491_v1 = vpop.f32.mrf.mxu3 }
 0x610   : > { %v4635_v24 = vmax.f32 %v4491_v1, 0.0 }
 0x611   : > { %v4514_v23 = vpop.f32.mrf.mxu0 }
 0x612   : > { %v4661_v9 = vmul.f32 %v4654_v31, %v4635_v24  ;;  %v4636_v60 = vmax.f32 %v4514_v23, 0.0  ;;  %v4537_v40 = vpop.f32.mrf.mxu1 }
 0x613   : > { %v4637_v47 = vmax.f32 %v4537_v40, 0.0 }
 0x614   : > { %v15949_v44 = vadd.f32 %v4680_v42, %v4661_v9  ;;  %v4662_v51 = vmul.f32 %v4654_v31, %v4636_v60 }
 0x615   : > { %v4663_v5 = vmul.f32 %v4654_v31, %v4637_v47 }
 0x616   : > { %v15951_v29 = vadd.f32 %v4680_v42, %v4662_v51 }
 0x617   : > { %v15953_v7 = vadd.f32 %v4680_v42, %v4663_v5  ;;  %v4494_v19 = vpop.f32.mrf.mxu3 }
 0x618   : > { %v4642_v55 = vmax.f32 %v4494_v19, 0.0  ;;  %v15981_v43 = vpack.i.bf16 %v15951_v29, %v15949_v44 }
 0x619   : > { %v4517_v50 = vpop.f32.mrf.mxu0 }
 0x61a   : > { %v4668_v6 = vmul.f32 %v15947_v14, %v4642_v55  ;;  %v4643_v11 = vmax.f32 %v4517_v50, 0.0  ;;  %v4540_v39 = vpop.f32.mrf.mxu1 }
 0x61b   : > { %v4644_v28 = vmax.f32 %v4540_v39, 0.0 }
 0x61c   : > { %v4694_v33 = vadd.f32 %v4685_v48, %v4668_v6  ;;  %v4669_v37 = vmul.f32 %v15947_v14, %v4643_v11 }
 0x61d   : > { %v4670_v54 = vmul.f32 %v15947_v14, %v4644_v28  ;;  %v16091_v28 = vld [vmem:[%s19285_s28 + $0x10] sm:$0xff] }
 0x61e   : > { %4709 = vst [vmem:[#allocation3 + $0x40] sm:$0x3] %v4694_v33  ;;  %v4695_v3 = vadd.f32 %v4685_v48, %v4669_v37 }
 0x61f   : > { %v4696_v2 = vadd.f32 %v4685_v48, %v4670_v54  ;;  %v4560_v4 = vpop.f32.mrf.mxu2 }
 0x620   : > { %4710 = vst [vmem:[#allocation3 + $0x48] sm:$0x3] %v4695_v3  ;;  %v4638_v57 = vmax.f32 %v4560_v4, 0.0  ;;  %v4583_v59 = vpop.f32.mrf.mxu3 }
 0x621   : > { %4711 = vst [vmem:[#allocation3 + $0x50] sm:$0x3] %v4696_v2  ;;  %v4639_v10 = vmax.f32 %v4583_v59, 0.0  ;;  %v4606_v32 = vpop.f32.mrf.mxu0 }
 0x622   : > { %v4664_v22 = vmul.f32 %v4654_v31, %v4638_v57  ;;  %v4640_v62 = vmax.f32 %v4606_v32, 0.0  ;;  %v4629_v41 = vpop.f32.mrf.mxu1  ;;  %v16112_v57 = vld [vmem:[%s19285_s28 + $0x18] sm:$0x3f] }
 0x623   : > { %v4665_v0 = vmul.f32 %v4654_v31, %v4639_v10  ;;  %v4641_v61 = vmax.f32 %v4629_v41, 0.0 }
 0x624   : > { %v15958_v15 = vadd.f32 %v4680_v42, %v4664_v22  ;;  %v4666_v25 = vmul.f32 %v4654_v31, %v4640_v62 }
 0x625   : > { %v15960_v18 = vadd.f32 %v4680_v42, %v4665_v0  ;;  %v4667_v16 = vmul.f32 %v4654_v31, %v4641_v61  ;;  %v15962_v13 = vld [vmem:[#allocation3 + $0x40] sm:$0x3] }
 0x626   : > { %v15964_v17 = vadd.f32 %v4680_v42, %v4666_v25  ;;  %4758 = vrot.lane.b32.xlu2 %v15962_v13, %s19114_s0  ;;  %v16030_v9 = vpack.i.bf16 %v15958_v15, %v15953_v7  ;;  %v16078_v5 = vld [vmem:[#allocation3 + $0x40] sm:$0x3] }
 0x627   : > { %v4693_v46 = vadd.f32 %v4680_v42, %v4667_v16  ;;  %v4563_v52 = vpop.f32.mrf.mxu2  ;;  %v15968_v38 = vld [vmem:[#allocation3 + $0x48] sm:$0x3]  ;;  %v15988_v49 = vpack.i.bf16 %v15960_v18, %v15953_v7  ;;  %v16034_v60 = vpack.i.bf16 %v15949_v44, %v15960_v18 }
 0x628   : > { %v4645_v53 = vmax.f32 %v4563_v52, 0.0  ;;  %v4586_v36 = vpop.f32.mrf.mxu3  ;;  %v15970_v26 = vld [vmem:[#allocation3 + $0x50] sm:$0x3]  ;;  %4760 = vrot.lane.b32.xlu0 %v15968_v38, %s19114_s0  ;;  %v12977_v40 = vpack.i.bf16 %v15964_v17, %v15951_v29  ;;  %v16099_v37 = vld [vmem:[#allocation3 + $0x48] sm:$0x3] }
 0x629   : > { %4708 = vst.msk [vmem:[#allocation3 + $0x30] sm:$0xff] %vm4707_vm0, %v4693_v46  ;;  %v4646_v12 = vmax.f32 %v4586_v36, 0.0  ;;  %4762 = vrot.lane.b32.xlu1 %v15970_v26, %s19114_s0  ;;  %v4609_v63 = vpop.f32.mrf.mxu0  ;;  %v16101_v54 = vld [vmem:[#allocation3 + $0x50] sm:$0x3]  ;;  %vm8944_vm0 = vcmask 885760  }
 0x62a   : > { %v4671_v56 = vmul.f32 %v15947_v14, %v4645_v53  ;;  %v4647_v8 = vmax.f32 %v4609_v63, 0.0  ;;  %v4632_v27 = vpop.f32.mrf.mxu1 }
 0x62b   : > { %v4672_v45 = vmul.f32 %v15947_v14, %v4646_v12  ;;  %v4648_v20 = vmax.f32 %v4632_v27, 0.0 }
 0x62c   : > { %v4697_v58 = vadd.f32 %v4685_v48, %v4671_v56  ;;  %v4673_v34 = vmul.f32 %v15947_v14, %v4647_v8 }
 0x62d   : > { %v4698_v21 = vadd.f32 %v4685_v48, %v4672_v45  ;;  %v4674_v35 = vmul.f32 %v15947_v14, %v4648_v20  ;;  %v12947_v14 = vpack.i.bf16 %v15958_v15, %v15964_v17 }
 0x62e   : > { %4712 = vst [vmem:[#allocation3 + $0x58] sm:$0x3] %v4697_v58  ;;  %v4699_v30 = vadd.f32 %v4685_v48, %v4673_v34  ;;  %12938 = vrot.lane.b32.xlu2 %v15981_v43, %s19114_s0 }
 0x62f   : > { %4713 = vst [vmem:[#allocation3 + $0x60] sm:$0x3] %v4698_v21  ;;  %v4700_v1 = vadd.f32 %v4685_v48, %v4674_v35 }
 0x630   : > { %4714 = vst [vmem:[#allocation3 + $0x68] sm:$0x3] %v4699_v30  ;;  %12943 = vrot.lane.b32.xlu0 %v15988_v49, %s19114_s0  ;;  %v5953_v41 = vld [vmem:[#allocation3 + $0x30] sm:$0xff] }
 0x631   : > { %4716 = vst.msk [vmem:[#allocation3 + $0x70] sm:$0x3] %vm4715_vm4, %v4700_v1  ;;  %v16131_v25 = vpack.i.bf16 %v5953_v41, %v15964_v17  ;;  %v4717_v1 = vld [vmem:[%s19285_s28] sm:$0xff]  ;;  %vm8937_vm4 = vcmask 891904  }
 0x635   : > { %v16003_v23 = vld [vmem:[#allocation3 + $0x58] sm:$0x3] }
 0x636   : > { %v15992_v24 = vld [vmem:[#allocation3 + $0x60] sm:$0x3] }
 0x637   : > { %4766 = vrot.lane.b32.xlu1 %v15992_v24, %s19114_s0  ;;  %v15998_v31 = vld [vmem:[#allocation3 + $0x68] sm:$0x3] }
 0x638   : > { %4768 = vrot.lane.b32.xlu2 %v15998_v31, %s19114_s0  ;;  %12948 = vrot.lane.b32.xlu0 %v12947_v14, %s19114_s0  ;;  %v16144_v52 = vld [vmem:[#allocation3 + $0x68] sm:$0x3]  ;;  %v16146_v53 = vld [vmem:[#allocation3 + $0x70] sm:$0x3] }
 0x63f   : > { %4764 = vrot.lane.b32.xlu1 %v16003_v23, %s19114_s0 }
 0x640   : > { %5113 = vrot.lane.b32.xlu2 %v15962_v13, %s19064_s3  ;;  %5115 = vrot.lane.b32.xlu0 %v15968_v38, %s19064_s3 }
 0x647   : > { %5117 = vrot.lane.b32.xlu1 %v15970_v26, %s19064_s3 }
 0x648   : > { %12953 = vrot.lane.b32.xlu2 %v15981_v43, %s19064_s3  ;;  %12958 = vrot.lane.b32.xlu0 %v15988_v49, %s19064_s3 }
 0x64f   : > { %5119 = vrot.lane.b32.xlu1 %v16003_v23, %s19064_s3 }
 0x650   : > { %5123 = vrot.lane.b32.xlu2 %v15998_v31, %s19064_s3  ;;  %12963 = vrot.lane.b32.xlu0 %v12947_v14, %s19064_s3 }
 0x657   : > { %5325 = vrot.lane.b32.xlu1 %v15962_v13, %s19284_s6 }
 0x658   : > { %5329 = vrot.lane.b32.xlu2 %v15970_v26, %s19284_s6  ;;  %5331 = vrot.lane.b32.xlu0 %v16003_v23, %s19284_s6 }
 0x65f   : > { %5121 = vrot.lane.b32.xlu1 %v15992_v24, %s19064_s3  ;;  %s19347_s3 = smov 124  }
 0x660   : > { %12968 = vrot.lane.b32.xlu2 %v16030_v9, %s19284_s6  ;;  %12973 = vrot.lane.b32.xlu0 %v16034_v60, %s19284_s6 }
 0x667   : > { %5536 = vrot.lane.b32.xlu1 %v15962_v13, %s19180_s8 }
 0x668   : > { %5327 = vrot.lane.b32.xlu2 %v15968_v38, %s19284_s6  ;;  %12978 = vrot.lane.b32.xlu0 %v12977_v40, %s19284_s6 }
 0x66f   : > { %5333 = vrot.lane.b32.xlu1 %v15992_v24, %s19284_s6 }
 0x670   : > { %5538 = vrot.lane.b32.xlu2 %v15968_v38, %s19180_s8  ;;  %5540 = vrot.lane.b32.xlu0 %v15970_v26, %s19180_s8 }
 0x677   : > { %12983 = vrot.lane.b32.xlu1 %v15981_v43, %s19180_s8 }
 0x678   : > { %12988 = vrot.lane.b32.xlu2 %v15988_v49, %s19180_s8  ;;  %5335 = vrot.lane.b32.xlu0 %v15998_v31, %s19284_s6 }
 0x67f   : > { %5542 = vrot.lane.b32.xlu1 %v16003_v23, %s19180_s8 }
 0x680   : > { %v4759_v42 = vpop.permute.xlu2 %4758  ;;  %5546 = vrot.lane.b32.xlu2 %v15998_v31, %s19180_s8  ;;  %12993 = vrot.lane.b32.xlu0 %v12947_v14, %s19180_s8 }
 0x687   : > { %5747 = vrot.lane.b32.xlu1 %v15962_v13, %s19062_s5 }
 0x688   : > { %5751 = vrot.lane.b32.xlu2 %v15970_v26, %s19062_s5  ;;  %5753 = vrot.lane.b32.xlu0 %v16003_v23, %s19062_s5  ;;  %v12939_v47 = vpop.permute.xlu2 %12938 }
 0x689   : > { %v12941_v19 = vunpack.i.h.bf16 %v12939_v47  ;;  %v12940_v55 = vunpack.i.l.bf16 %v12939_v47 }
 0x68b   : > { %v4770_v33 = vsel %vm1088_vm1, %v12940_v55, %v12941_v19 }
 0x68f   : > { %5544 = vrot.lane.b32.xlu1 %v15992_v24, %s19180_s8 }
 0x690   : > { %12998 = vrot.lane.b32.xlu2 %v16030_v9, %s19062_s5  ;;  %13003 = vrot.lane.b32.xlu0 %v16034_v60, %s19062_s5 }
 0x692   : > { %v4769_v51 = vpop.permute.xlu2 %4768 }
 0x697   : > { %5989 = vrot.lane.b32.xlu1 %v16078_v5, %s19058_s1 }
 0x698   : > { %5749 = vrot.lane.b32.xlu2 %v15968_v38, %s19062_s5  ;;  %13008 = vrot.lane.b32.xlu0 %v12977_v40, %s19062_s5 }
 0x69a   : > { %v4761_v50 = vpop.permute.xlu0 %4760  ;;  %v5114_v6 = vpop.permute.xlu2 %5113 }
 0x69b   : > { %v4763_v11 = vpop.permute.xlu1 %4762  ;;  %v4775_v39 = vsel %vm1088_vm1, %v4759_v42, %v4761_v50  ;;  %v16221_v42 = vld [vmem:[%s19285_s28 + $0x8] sm:$0x3f] }
 0x69c   : > { %v4776_v48 = vsel %vm1088_vm1, %v4761_v50, %v4763_v11  ;;  %12097 = vmatpush.msk.msra.mxu2 %vm2091_vm14, %v4775_v39 }
 0x69d   : > { %12100 = vmatpush.msk.msrb.mxu3 %vm2091_vm14, %v4776_v48 }
 0x69e   : > { %4819 = vmatpush.msra.mxu2 %v4770_v33 }
 0x69f   : > { %5755 = vrot.lane.b32.xlu1 %v15992_v24, %s19062_s5  ;;  %12098 = vmatmul.msk.f32.vlgmr.msra.gmra.mxu2 %vm2084_vm15, %v16091_v28 }
 0x6a0   : > { %5991 = vrot.lane.b32.xlu2 %v16099_v37, %s19058_s1  ;;  %5993 = vrot.lane.b32.xlu0 %v16101_v54, %s19058_s1 }
 0x6a2   : > { %v16107_v3 = vpop.permute.xlu2 %12953  ;;  %v12944_v2 = vpop.permute.xlu0 %12943 }
 0x6a3   : > { %v12945_v4 = vunpack.i.l.bf16 %v12944_v2  ;;  %v12946_v0 = vunpack.i.h.bf16 %v12944_v2  ;;  %v12956_v8 = vunpack.i.h.bf16 %v16107_v3  ;;  %v12955_v27 = vunpack.i.l.bf16 %v16107_v3 }
 0x6a5   : > { %v4771_v59 = vsel %vm1088_vm1, %v12941_v19, %v12945_v4  ;;  %v5126_v34 = vsel %vm5125_vm6, %v12955_v27, %v12956_v8 }
 0x6a6   : > { %4842 = vmatpush.msrb.mxu3 %v4771_v59 }
 0x6a7   : > { %13013 = vrot.lane.b32.xlu1 %v15981_v43, %s19058_s1  ;;  %12099 = vmatmul.msk.f32.gmra.mxu2 %vm2084_vm15, %v16112_v57 }
 0x6a8   : > { %12101 = vmatmul.msk.f32.vlgmr.msrb.gmra.mxu3 %vm2084_vm15, %v16091_v28  ;;  %13018 = vrot.lane.b32.xlu2 %v15988_v49, %s19058_s1 }
 0x6a9   : > { %12112 = vmatpush.msk.msra.mxu3 %vm2091_vm14, %v4769_v51  ;;  %5757 = vrot.lane.b32.xlu0 %v15998_v31, %s19062_s5  ;;  %v4767_v10 = vpop.permute.xlu1 %4766  ;;  %s19348_s5 = smov 64  }
 0x6aa   : > { %v4779_v32 = vsel %vm1088_vm1, %v4767_v10, %v4769_v51  ;;  %v16127_v22 = vpop.permute.xlu2 %5123  ;;  %v12949_v62 = vpop.permute.xlu0 %12948 }
 0x6ab   : > { %v12950_v61 = vunpack.i.l.bf16 %v12949_v62  ;;  %12109 = vmatpush.msk.msrb.mxu2 %vm2091_vm14, %v4779_v32  ;;  %v12951_v46 = vunpack.i.h.bf16 %v12949_v62 }
 0x6ad   : > { %4934 = vmatpush.msra.mxu3 %v12950_v61  ;;  %v4774_v16 = vsel %vm1088_vm1, %v12946_v0, %v12950_v61  ;;  %v4772_v20 = vsel %vm1088_vm1, %v12945_v4, %v12951_v46  ;;  %v4773_v58 = vsel %vm1088_vm1, %v12951_v46, %v12946_v0 }
 0x6ae   : > { %4911 = vmatpush.msrb.mxu2 %v4774_v16 }
 0x6af   : > { %12124 = vmatpush.msk.msrb.mxu3 %vm2091_vm14, %v16003_v23  ;;  %13023 = vrot.lane.b32.xlu1 %v16131_v25, %s19058_s1 }
 0x6b0   : > { %12110 = vmatmul.msk.f32.vlgmr.msrb.gmra.mxu2 %vm2084_vm15, %v16091_v28  ;;  %12102 = vmatmul.msk.f32.gmra.mxu3 %vm2084_vm15, %v16112_v57 }
 0x6b1   : > { %12121 = vmatpush.msk.msra.mxu2 %vm2091_vm14, %v15970_v26  ;;  %5999 = vrot.lane.b32.xlu2 %v16144_v52, %s19058_s1  ;;  %v4765_v36 = vpop.permute.xlu1 %4764 }
 0x6b2   : > { %6001 = vrot.lane.b32.xlu0 %v16146_v53, %s19058_s1  ;;  %5044 = vmatpush.msrb.mxu3 %v15958_v15  ;;  %v4777_v12 = vsel %vm1088_vm1, %v4763_v11, %v4765_v36  ;;  %v4778_v63 = vsel %vm1088_vm1, %v4765_v36, %v4767_v10  ;;  %v16156_v26 = vpop.permute.xlu2 %5329  ;;  %v5116_v56 = vpop.permute.xlu0 %5115 }
 0x6b3   : > { %5021 = vmatpush.msra.mxu2 %v15953_v7  ;;  %v5131_v45 = vsel %vm5125_vm6, %v5114_v6, %v5116_v56  ;;  %12103 = vmatpush.msk.msra.mxu0 %vm2091_vm14, %v4777_v12 }
 0x6b4   : > { %12106 = vmatpush.msk.msra.mxu1 %vm2091_vm14, %v4778_v63 }
 0x6b5   : > { %12135 = vmatpush.msk.msrb.mxu2 %vm2091_vm14, %v5131_v45  ;;  %4865 = vmatpush.msra.mxu0 %v4772_v20 }
 0x6b6   : > { %4888 = vmatpush.msra.mxu1 %v4773_v58  ;;  %12104 = vmatmul.msk.f32.vlgmr.msra.gmra.mxu0 %vm2084_vm15, %v16091_v28 }
 0x6b7   : > { %12107 = vmatmul.msk.f32.vlgmr.msra.gmra.mxu1 %vm2084_vm15, %v16091_v28  ;;  %12115 = vmatpush.msk.msrb.mxu0 %vm2091_vm14, %v15962_v13  ;;  %v16183_v13 = vld [vmem:[#allocation3 + $0x58] sm:$0x3] }
 0x6b8   : > { %12118 = vmatpush.msk.msrb.mxu1 %vm2091_vm14, %v15968_v38  ;;  %6211 = vrot.lane.b32.xlu1 %v16101_v54, %s19060_s9 }
 0x6b9   : > { %5175 = vmatpush.msrb.mxu2 %v5126_v34  ;;  %12113 = vmatmul.msk.f32.vlgmr.msra.gmra.mxu3 %vm2084_vm15, %v16091_v28  ;;  %v5118_v21 = vpop.permute.xlu1 %5117 }
 0x6ba   : > { %12111 = vmatmul.msk.f32.gmra.mxu2 %vm2084_vm15, %v16112_v57  ;;  %4975 = vmatpush.msrb.mxu0 %v15949_v44  ;;  %v5132_v38 = vsel %vm5125_vm6, %v5116_v56, %v5118_v21  ;;  %v16186_v35 = vpop.permute.xlu2 %12968  ;;  %v12959_v30 = vpop.permute.xlu0 %12958 }
 0x6bb   : > { %4998 = vmatpush.msrb.mxu1 %v15951_v29  ;;  %5995 = vrot.lane.b32.xlu2 %v16183_v13, %s19058_s1  ;;  %v12960_v49 = vunpack.i.l.bf16 %v12959_v30  ;;  %v12961_v33 = vunpack.i.h.bf16 %v12959_v30  ;;  %v12971_v4 = vunpack.i.h.bf16 %v16186_v35  ;;  %v12153_v30 = vld [vmem:[%s19285_s28 + $0x30] sm:$0xff] }
 0x6bc   : > { %5981 = vrot.lane.b32.xlu0 %v15958_v15, %s19058_s1  ;;  %12127 = vmatpush.msk.msra.mxu0 %vm2091_vm14, %v15992_v24  ;;  %v16207_v24 = vld [vmem:[#allocation3 + $0x60] sm:$0x3] }
 0x6bd   : > { %12130 = vmatpush.msk.msra.mxu1 %vm2091_vm14, %v15998_v31  ;;  %12138 = vmatpush.msk.msra.mxu3 %vm2091_vm14, %v5132_v38  ;;  %v5127_v44 = vsel %vm5125_vm6, %v12956_v8, %v12960_v49 }
 0x6be   : > { %5067 = vmatpush.msra.mxu0 %v15960_v18 }
 0x6bf   : > { %5090 = vmatpush.msra.mxu1 %v15964_v17  ;;  %12105 = vmatmul.msk.f32.gmra.mxu0 %vm2084_vm15, %v16112_v57 }
 0x6c0   : > { %12108 = vmatmul.msk.f32.gmra.mxu1 %vm2084_vm15, %v16112_v57  ;;  %5997 = vrot.lane.b32.xlu1 %v16207_v24, %s19058_s1 }
 0x6c1   : > { %5198 = vmatpush.msra.mxu3 %v5127_v44  ;;  %v5120_v14 = vpop.permute.xlu1 %5119 }
 0x6c2   : > { %12114 = vmatmul.msk.f32.gmra.mxu3 %vm2084_vm15, %v16112_v57  ;;  %12122 = vmatmul.msk.f32.vlgmr.msra.gmra.mxu2 %vm2084_vm15, %v4717_v1  ;;  %v5328_v31 = vpop.permute.xlu2 %5327  ;;  %v12964_v23 = vpop.permute.xlu0 %12963  ;;  %v5133_v47 = vsel %vm5125_vm6, %v5118_v21, %v5120_v14  ;;  %v12970_v57 = vunpack.i.l.bf16 %v16186_v35 }
 0x6c3   : > { %6213 = vrot.lane.b32.xlu2 %v16183_v13, %s19060_s9  ;;  %v12966_v40 = vunpack.i.h.bf16 %v12964_v23  ;;  %v12965_v55 = vunpack.i.l.bf16 %v12964_v23 }
 0x6c4   : > { %6207 = vrot.lane.b32.xlu0 %v16078_v5, %s19060_s9 }
 0x6c5   : > { %v5128_v51 = vsel %vm5125_vm6, %v12960_v49, %v12966_v40  ;;  %v5129_v3 = vsel %vm5125_vm6, %v12966_v40, %v12961_v33  ;;  %v5130_v2 = vsel %vm5125_vm6, %v12961_v33, %v12965_v55 }
 0x6c7   : > { %12116 = vmatmul.msk.f32.vlgmr.msrb.gmra.mxu0 %vm2084_vm15, %v4717_v1 }
 0x6c8   : > { %12119 = vmatmul.msk.f32.vlgmr.msrb.gmra.mxu1 %vm2084_vm15, %v4717_v1  ;;  %12141 = vmatpush.msk.msrb.mxu0 %vm2091_vm14, %v5133_v47  ;;  %v12173_v47 = vld [vmem:[%s19285_s28 + $0x40] sm:$0xff] }
 0x6c9   : > { %13028 = vrot.lane.b32.xlu1 %v16030_v9, %s19060_s9  ;;  %v5326_v19 = vpop.permute.xlu1 %5325  ;;  %v16244_v9 = vld [vmem:[%s19285_s28 + $0x20] sm:$0xff] }
 0x6ca   : > { %12123 = vmatmul.msk.f32.gmra.mxu2 %vm2084_vm15, %v16221_v42  ;;  %12125 = vmatmul.msk.f32.vlgmr.msrb.gmra.mxu3 %vm2084_vm15, %v4717_v1  ;;  %v16235_v50 = vpop.permute.xlu2 %5538  ;;  %v5332_v6 = vpop.permute.xlu0 %5331  ;;  %v5342_v59 = vsel %vm1538_vm5, %v5326_v19, %v5328_v31 }
 0x6cb   : > { %5221 = vmatpush.msrb.mxu0 %v5128_v51  ;;  %12150 = vmatpush.msk.msrb.mxu3 %vm2091_vm14, %v16127_v22  ;;  %v5344_v10 = vsel %vm1538_vm5, %v16156_v26, %v5332_v6 }
 0x6cc   : > { %13033 = vrot.lane.b32.xlu2 %v16034_v60, %s19060_s9  ;;  %6215 = vrot.lane.b32.xlu0 %v16207_v24, %s19060_s9 }
 0x6cd   : > { %5290 = vmatpush.msrb.mxu3 %v12965_v55 }
 0x6cf   : > { %12117 = vmatmul.msk.f32.gmra.mxu0 %vm2084_vm15, %v16221_v42 }
 0x6d0   : > { %12120 = vmatmul.msk.f32.gmra.mxu1 %vm2084_vm15, %v16221_v42 }
 0x6d1   : > { %6209 = vrot.lane.b32.xlu1 %v16099_v37, %s19060_s9  ;;  %v5122_v60 = vpop.permute.xlu1 %5121 }
 0x6d2   : > { %12126 = vmatmul.msk.f32.gmra.mxu3 %vm2084_vm15, %v16221_v42  ;;  %12136 = vmatmul.msk.f32.vlgmr.msrb.gmra.mxu2 %vm2084_vm15, %v16244_v9  ;;  %v5134_v11 = vsel %vm5125_vm6, %v5120_v14, %v5122_v60  ;;  %v5135_v39 = vsel %vm5125_vm6, %v5122_v60, %v16127_v22  ;;  %v16259_v48 = vpop.permute.xlu2 %12988  ;;  %v16261_v28 = vpop.permute.xlu0 %12973  ;;  %v5339_v22 = vsel %vm1538_vm5, %v12970_v57, %v12971_v4  ;;  %v12154_v14 = vld [vmem:[%s19285_s28 + $0x38] sm:$0x3f] }
 0x6d3   : > { %12144 = vmatpush.msk.msrb.mxu1 %vm2091_vm14, %v5134_v11  ;;  %12147 = vmatpush.msk.msra.mxu2 %vm2091_vm14, %v5135_v39  ;;  %v12976_v0 = vunpack.i.h.bf16 %v16261_v28  ;;  %v12975_v46 = vunpack.i.l.bf16 %v16261_v28  ;;  %v12990_v56 = vunpack.i.l.bf16 %v16259_v48  ;;  %v12991_v19 = vunpack.i.h.bf16 %v16259_v48 }
 0x6d4   : > { %6195 = vrot.lane.b32.xlu2 %v15951_v29, %s19060_s9  ;;  %6425 = vrot.lane.b32.xlu0 %v16078_v5, %s19066_s2  ;;  %v5343_v29 = vsel %vm1538_vm5, %v5328_v31, %v16156_v26  ;;  %v16281_v5 = vld [vmem:[%s19285_s28 + $0x28] sm:$0x3f] }
 0x6d5   : > { %5244 = vmatpush.msrb.mxu1 %v5129_v3  ;;  %5267 = vmatpush.msra.mxu2 %v5130_v2 }
 0x6d7   : > { %12128 = vmatmul.msk.f32.vlgmr.msra.gmra.mxu0 %vm2084_vm15, %v4717_v1  ;;  %12161 = vmatpush.msk.msrb.mxu2 %vm2091_vm14, %v5344_v10 }
 0x6d8   : > { %12131 = vmatmul.msk.f32.vlgmr.msra.gmra.mxu1 %vm2084_vm15, %v4717_v1  ;;  %12155 = vmatpush.msk.msra.mxu0 %vm2091_vm14, %v5342_v59 }
 0x6d9   : > { %12158 = vmatpush.msk.msra.mxu1 %vm2091_vm14, %v5343_v29  ;;  %6427 = vrot.lane.b32.xlu1 %v16099_v37, %s19066_s2  ;;  %v5537_v32 = vpop.permute.xlu1 %5536 }
 0x6da   : > { %12137 = vmatmul.msk.f32.gmra.mxu2 %vm2084_vm15, %v16281_v5  ;;  %12139 = vmatmul.msk.f32.vlgmr.msra.gmra.mxu3 %vm2084_vm15, %v16244_v9  ;;  %v16295_v62 = vpop.permute.xlu2 %5546  ;;  %v12979_v41 = vpop.permute.xlu0 %12978 }
 0x6db   : > { %5432 = vmatpush.msrb.mxu2 %v5339_v22  ;;  %v12980_v61 = vunpack.i.l.bf16 %v12979_v41  ;;  %v12981_v34 = vunpack.i.h.bf16 %v12979_v41 }
 0x6dc   : > { %6429 = vrot.lane.b32.xlu2 %v16101_v54, %s19066_s2  ;;  %13038 = vrot.lane.b32.xlu0 %v15981_v43, %s19066_s2  ;;  %v5553_v43 = vsel %vm1778_vm7, %v5537_v32, %v16235_v50 }
 0x6dd   : > { %v5337_v37 = vsel %vm1538_vm5, %v12976_v0, %v12980_v61  ;;  %v5338_v16 = vsel %vm1538_vm5, %v12980_v61, %v12970_v57  ;;  %v5341_v35 = vsel %vm1538_vm5, %v12975_v46, %v12981_v34 }
 0x6de   : > { %5386 = vmatpush.msra.mxu0 %v5337_v37  ;;  %5409 = vmatpush.msra.mxu1 %v5338_v16 }
 0x6df   : > { %12129 = vmatmul.msk.f32.gmra.mxu0 %vm2084_vm15, %v16221_v42 }
 0x6e0   : > { %12132 = vmatmul.msk.f32.gmra.mxu1 %vm2084_vm15, %v16221_v42 }
 0x6e1   : > { %6415 = vrot.lane.b32.xlu1 %v15953_v7, %s19066_s2  ;;  %v5334_v54 = vpop.permute.xlu1 %5333  ;;  %v5340_v7 = vsel %vm1538_vm5, %v12971_v4, %v12975_v46 }
 0x6e2   : > { %12140 = vmatmul.msk.f32.gmra.mxu3 %vm2084_vm15, %v16281_v5  ;;  %12148 = vmatmul.msk.f32.vlgmr.msra.gmra.mxu2 %vm2084_vm15, %v16244_v9  ;;  %v5345_v36 = vsel %vm1538_vm5, %v5332_v6, %v5334_v54  ;;  %v16318_v12 = vpop.permute.xlu2 %5751  ;;  %v5541_v63 = vpop.permute.xlu0 %5540 }
 0x6e3   : > { %12175 = vmatpush.msk.msra.mxu2 %vm2091_vm14, %v5553_v43  ;;  %12164 = vmatpush.msk.msra.mxu3 %vm2091_vm14, %v5345_v36  ;;  %v5554_v8 = vsel %vm1778_vm7, %v16235_v50, %v5541_v63 }
 0x6e4   : > { %6217 = vrot.lane.b32.xlu2 %v16144_v52, %s19060_s9  ;;  %6219 = vrot.lane.b32.xlu0 %v16146_v53, %s19060_s9 }
 0x6e5   : > { %5455 = vmatpush.msra.mxu3 %v5340_v7 }
 0x6e7   : > { %12142 = vmatmul.msk.f32.vlgmr.msrb.gmra.mxu0 %vm2084_vm15, %v16244_v9 }
 0x6e8   : > { %12145 = vmatmul.msk.f32.vlgmr.msrb.gmra.mxu1 %vm2084_vm15, %v16244_v9 }
 0x6e9   : > { %13043 = vrot.lane.b32.xlu1 %v16131_v25, %s19060_s9  ;;  %v12984_v26 = vpop.permute.xlu1 %12983  ;;  %s19287_s9 = smov 4  }
 0x6ea   : > { %12149 = vmatmul.msk.f32.gmra.mxu2 %vm2084_vm15, %v16281_v5  ;;  %12151 = vmatmul.msk.f32.vlgmr.msrb.gmra.mxu3 %vm2084_vm15, %v16244_v9  ;;  %v12986_v27 = vunpack.i.h.bf16 %v12984_v26  ;;  %v12985_v45 = vunpack.i.l.bf16 %v12984_v26  ;;  %v16340_v20 = vpop.permute.xlu2 %12998  ;;  %v5336_v58 = vpop.permute.xlu0 %5335 }
 0x6eb   : > { %12178 = vmatpush.msk.msrb.mxu3 %vm2091_vm14, %v5554_v8  ;;  %v5346_v25 = vsel %vm1538_vm5, %v5334_v54, %v5336_v58  ;;  %12170 = vmatpush.msk.msrb.mxu1 %vm2091_vm14, %v5336_v58  ;;  %v13001_v60 = vunpack.i.h.bf16 %v16340_v20  ;;  %v13000_v11 = vunpack.i.l.bf16 %v16340_v20  ;;  %v12193_v20 = vld [vmem:[%s19285_s28 + $0x50] sm:$0xff] }
 0x6ec   : > { %6433 = vrot.lane.b32.xlu2 %v16207_v24, %s19066_s2  ;;  %6435 = vrot.lane.b32.xlu0 %v16144_v52, %s19066_s2  ;;  %v5548_v21 = vsel %vm1778_vm7, %v12985_v45, %v12986_v27  ;;  %v5549_v38 = vsel %vm1778_vm7, %v12986_v27, %v12990_v56  ;;  %v13047_v52 = vpack.i.bf16 %v15964_v17, %v15960_v18  ;;  %v6626_v17 = vld [vmem:[%s19286_s12 + $0x8] sm:$0x3f] }
 0x6ed   : > { %12167 = vmatpush.msk.msrb.mxu0 %vm2091_vm14, %v5346_v25  ;;  %5597 = vmatpush.msra.mxu2 %v5548_v21  ;;  %v5762_v2 = vsel %vm5759_vm9, %v13000_v11, %v13001_v60 }
 0x6ee   : > { %5620 = vmatpush.msrb.mxu3 %v5549_v38  ;;  %5501 = vmatpush.msrb.mxu1 %v12981_v34 }
 0x6ef   : > { %12143 = vmatmul.msk.f32.gmra.mxu0 %vm2084_vm15, %v16281_v5 }
 0x6f0   : > { %12146 = vmatmul.msk.f32.gmra.mxu1 %vm2084_vm15, %v16281_v5  ;;  %5478 = vmatpush.msrb.mxu0 %v5341_v35 }
 0x6f1   : > { %13048 = vrot.lane.b32.xlu1 %v13047_v52, %s19066_s2  ;;  %v5543_v49 = vpop.permute.xlu1 %5542  ;;  %v12194_v52 = vld [vmem:[%s19285_s28 + $0x58] sm:$0x3f] }
 0x6f2   : > { %12152 = vmatmul.msk.f32.gmra.mxu3 %vm2084_vm15, %v16281_v5  ;;  %12162 = vmatmul.msk.f32.vlgmr.msrb.gmra.mxu2 %vm2084_vm15, %v12153_v30  ;;  %v5750_v44 = vpop.permute.xlu2 %5749  ;;  %v12994_v1 = vpop.permute.xlu0 %12993  ;;  %v5555_v24 = vsel %vm1778_vm7, %v5541_v63, %v5543_v49 }
 0x6f3   : > { %v12996_v18 = vunpack.i.h.bf16 %v12994_v1  ;;  %v12995_v42 = vunpack.i.l.bf16 %v12994_v1  ;;  %v5766_v33 = vsel %vm5759_vm9, %v5750_v44, %v16318_v12 }
 0x6f4   : > { %6431 = vrot.lane.b32.xlu2 %v16183_v13, %s19066_s2  ;;  %6417 = vrot.lane.b32.xlu0 %v15958_v15, %s19066_s2  ;;  %v6625_v15 = vld [vmem:[%s19286_s12] sm:$0xff]  ;;  %s19353_s2 = smov 6  }
 0x6f5   : > { %v5550_v13 = vsel %vm1778_vm7, %v12990_v56, %v12996_v18  ;;  %v5551_v39 = vsel %vm1778_vm7, %v12996_v18, %v12991_v19  ;;  %v5552_v48 = vsel %vm1778_vm7, %v12991_v19, %v12995_v42 }
 0x6f7   : > { %12156 = vmatmul.msk.f32.vlgmr.msra.gmra.mxu0 %vm2084_vm15, %v12153_v30 }
 0x6f8   : > { %12159 = vmatmul.msk.f32.vlgmr.msra.gmra.mxu1 %vm2084_vm15, %v12153_v30  ;;  %12181 = vmatpush.msk.msra.mxu0 %vm2091_vm14, %v5555_v24 }
 0x6f9   : > { %6634 = vperm.xlu1 %12770, %v6626_v17   ;;  %v5748_v31 = vpop.permute.xlu1 %5747 }
 0x6fa   : > { %12163 = vmatmul.msk.f32.gmra.mxu2 %vm2084_vm15, %v12154_v14  ;;  %12165 = vmatmul.msk.f32.vlgmr.msra.gmra.mxu3 %vm2084_vm15, %v12153_v30  ;;  %v16386_v23 = vpop.permute.xlu2 %5991  ;;  %v5754_v40 = vpop.permute.xlu0 %5753  ;;  %v5765_v3 = vsel %vm5759_vm9, %v5748_v31, %v5750_v44 }
 0x6fb   : > { %5643 = vmatpush.msra.mxu0 %v5550_v13  ;;  %12190 = vmatpush.msk.msra.mxu3 %vm2091_vm14, %v16295_v62  ;;  %v5767_v28 = vsel %vm5759_vm9, %v16318_v12, %v5754_v40 }
 0x6fc   : > { %6629 = vperm.xlu2 %12771, %v6625_v15   ;;  %v16501_v15 = vld [vmem:[%s19285_s28 + $0x60] sm:$0xff] }
 0x6fd   : > { %5712 = vmatpush.msra.mxu3 %v12995_v42 }
 0x6ff   : > { %12157 = vmatmul.msk.f32.gmra.mxu0 %vm2084_vm15, %v12154_v14 }
 0x700   : > { %12160 = vmatmul.msk.f32.gmra.mxu1 %vm2084_vm15, %v12154_v14 }
 0x701   : > { %v5545_v51 = vpop.permute.xlu1 %5544 }
 0x702   : > { %12166 = vmatmul.msk.f32.gmra.mxu3 %vm2084_vm15, %v12154_v14  ;;  %12176 = vmatmul.msk.f32.vlgmr.msra.gmra.mxu2 %vm2084_vm15, %v12173_v47  ;;  %v5556_v55 = vsel %vm1778_vm7, %v5543_v49, %v5545_v51  ;;  %v5557_v50 = vsel %vm1778_vm7, %v5545_v51, %v16295_v62  ;;  %v16401_v6 = vpop.permute.xlu2 %13018  ;;  %v16403_v9 = vpop.permute.xlu0 %13003 }
 0x703   : > { %12184 = vmatpush.msk.msra.mxu1 %vm2091_vm14, %v5556_v55  ;;  %12187 = vmatpush.msk.msrb.mxu2 %vm2091_vm14, %v5557_v50  ;;  %v13006_v29 = vunpack.i.h.bf16 %v16403_v9  ;;  %v13005_v22 = vunpack.i.l.bf16 %v16403_v9  ;;  %v13020_v54 = vunpack.i.l.bf16 %v16401_v6 }
 0x704   : > { %6437 = vrot.lane.b32.xlu2 %v16146_v53, %s19287_s9  ;;  %v12174_v53 = vld [vmem:[%s19285_s28 + $0x48] sm:$0x3f] }
 0x705   : > { %5666 = vmatpush.msra.mxu1 %v5551_v39  ;;  %5689 = vmatpush.msrb.mxu2 %v5552_v48  ;;  %v5763_v37 = vsel %vm5759_vm9, %v13001_v60, %v13005_v22  ;;  %v16534_v39 = vld [vmem:[%s19285_s28 + $0x68] sm:$0x3f] }
 0x707   : > { %12201 = vmatpush.msk.msra.mxu2 %vm2091_vm14, %v5767_v28  ;;  %12168 = vmatmul.msk.f32.vlgmr.msrb.gmra.mxu0 %vm2084_vm15, %v12153_v30 }
 0x708   : > { %12171 = vmatmul.msk.f32.vlgmr.msrb.gmra.mxu1 %vm2084_vm15, %v12153_v30  ;;  %12195 = vmatpush.msk.msrb.mxu0 %vm2091_vm14, %v5765_v3 }
 0x709   : > { %12198 = vmatpush.msk.msrb.mxu1 %vm2091_vm14, %v5766_v33  ;;  %5855 = vmatpush.msra.mxu2 %v5762_v2  ;;  %v5990_v4 = vpop.permute.xlu1 %5989 }
 0x70a   : > { %12177 = vmatmul.msk.f32.gmra.mxu2 %vm2084_vm15, %v12174_v53  ;;  %12179 = vmatmul.msk.f32.vlgmr.msrb.gmra.mxu3 %vm2084_vm15, %v12173_v47  ;;  %v13009_v57 = vpop.permute.xlu0 %13008  ;;  %v6010_v41 = vsel %vm6003_vm10, %v5990_v4, %v16386_v23 }
 0x70b   : > { %v16430_v59 = vpop.permute.xlu2 %5999  ;;  %v13010_v5 = vunpack.i.l.bf16 %v13009_v57  ;;  %v13011_v63 = vunpack.i.h.bf16 %v13009_v57 }
 0x70d   : > { %v5760_v10 = vsel %vm5759_vm9, %v13006_v29, %v13010_v5  ;;  %v5761_v32 = vsel %vm5759_vm9, %v13010_v5, %v13000_v11  ;;  %v5764_v45 = vsel %vm5759_vm9, %v13005_v22, %v13011_v63 }
 0x70e   : > { %5809 = vmatpush.msrb.mxu0 %v5760_v10  ;;  %5832 = vmatpush.msrb.mxu1 %v5761_v32 }
 0x70f   : > { %12169 = vmatmul.msk.f32.gmra.mxu0 %vm2084_vm15, %v12154_v14 }
 0x710   : > { %12172 = vmatmul.msk.f32.gmra.mxu1 %vm2084_vm15, %v12154_v14 }
 0x711   : > { %v5756_v62 = vpop.permute.xlu1 %5755 }
 0x712   : > { %12180 = vmatmul.msk.f32.gmra.mxu3 %vm2084_vm15, %v12174_v53  ;;  %12188 = vmatmul.msk.f32.vlgmr.msrb.gmra.mxu2 %vm2084_vm15, %v12173_v47  ;;  %v5768_v0 = vsel %vm5759_vm9, %v5754_v40, %v5756_v62  ;;  %v5994_v61 = vpop.permute.xlu0 %5993 }
 0x713   : > { %12215 = vmatpush.msk.msrb.mxu2 %vm2091_vm14, %v6010_v41  ;;  %12204 = vmatpush.msk.msrb.mxu3 %vm2091_vm14, %v5768_v0  ;;  %v6011_v43 = vsel %vm6003_vm10, %v16386_v23, %v5994_v61  ;;  %v13021_v23 = vunpack.i.h.bf16 %v16401_v6 }
 0x715   : > { %v16445_v16 = vpop.permute.xlu2 %5995  ;;  %5878 = vmatpush.msrb.mxu3 %v5763_v37 }
 0x716   : > { %v6012_v38 = vsel %vm6003_vm10, %v5994_v61, %v16445_v16 }
 0x717   : > { %12182 = vmatmul.msk.f32.vlgmr.msra.gmra.mxu0 %vm2084_vm15, %v12173_v47 }
 0x718   : > { %12185 = vmatmul.msk.f32.vlgmr.msra.gmra.mxu1 %vm2084_vm15, %v12173_v47 }
 0x719   : > { %v13014_v46 = vpop.permute.xlu1 %13013 }
 0x71a   : > { %12189 = vmatmul.msk.f32.gmra.mxu2 %vm2084_vm15, %v12174_v53  ;;  %12191 = vmatmul.msk.f32.vlgmr.msra.gmra.mxu3 %vm2084_vm15, %v12173_v47  ;;  %v13016_v36 = vunpack.i.h.bf16 %v13014_v46  ;;  %v13015_v12 = vunpack.i.l.bf16 %v13014_v46 }
 0x71b   : > { %12218 = vmatpush.msk.msra.mxu3 %vm2091_vm14, %v6011_v43  ;;  %v5758_v7 = vpop.permute.xlu0 %5757 }
 0x71c   : > { %v5769_v26 = vsel %vm5759_vm9, %v5756_v62, %v5758_v7  ;;  %12210 = vmatpush.msk.msra.mxu1 %vm2091_vm14, %v5758_v7  ;;  %v6004_v56 = vsel %vm6003_vm10, %v13015_v12, %v13016_v36  ;;  %v6005_v8 = vsel %vm6003_vm10, %v13016_v36, %v13020_v54 }
 0x71d   : > { %v16459_v27 = vpop.permute.xlu2 %6213  ;;  %12207 = vmatpush.msk.msra.mxu0 %vm2091_vm14, %v5769_v26  ;;  %6055 = vmatpush.msrb.mxu2 %v6004_v56 }
 0x71e   : > { %6078 = vmatpush.msra.mxu3 %v6005_v8  ;;  %5924 = vmatpush.msra.mxu1 %v13011_v63 }
 0x71f   : > { %12183 = vmatmul.msk.f32.gmra.mxu0 %vm2084_vm15, %v12174_v53 }
 0x720   : > { %12186 = vmatmul.msk.f32.gmra.mxu1 %vm2084_vm15, %v12174_v53  ;;  %5901 = vmatpush.msra.mxu0 %v5764_v45 }
 0x721   : > { %v13024_v58 = vpop.permute.xlu1 %13023 }
 0x722   : > { %12192 = vmatmul.msk.f32.gmra.mxu3 %vm2084_vm15, %v12174_v53  ;;  %12202 = vmatmul.msk.f32.vlgmr.msra.gmra.mxu2 %vm2084_vm15, %v12193_v20  ;;  %v16470_v34 = vpop.f32.mrf.mxu2  ;;  %v13026_v35 = vunpack.i.h.bf16 %v13024_v58  ;;  %v13025_v30 = vunpack.i.l.bf16 %v13024_v58 }
 0x724   : > { %v6002_v25 = vpop.permute.xlu0 %6001  ;;  %v6009_v17 = vsel %vm6003_vm10, %v13025_v30, %v13026_v35  ;;  %v6008_v60 = vsel %vm6003_vm10, %v13021_v23, %v13025_v30  ;;  %v16616_v35 = vld [vmem:[%s19285_s28 + $0x70] sm:$0xff] }
 0x725   : > { %v6015_v49 = vsel %vm6003_vm10, %v16430_v59, %v6002_v25 }
 0x726   : > { %v16472_v21 = vpop.permute.xlu2 %13033 }
 0x727   : > { %12196 = vmatmul.msk.f32.vlgmr.msrb.gmra.mxu0 %vm2084_vm15, %v12193_v20  ;;  %v13035_v29 = vunpack.i.l.bf16 %v16472_v21  ;;  %v13036_v62 = vunpack.i.h.bf16 %v16472_v21  ;;  %v16667_v21 = vld [vmem:[%s19285_s28 + $0x80] sm:$0xff] }
 0x728   : > { %12199 = vmatmul.msk.f32.vlgmr.msrb.gmra.mxu1 %vm2084_vm15, %v12193_v20  ;;  %12221 = vmatpush.msk.msrb.mxu0 %vm2091_vm14, %v6012_v38  ;;  %19292 = vst [vmem:[#allocation37_spill] sm:$0xff] %v16667_v21 }
 0x72a   : > { %12203 = vmatmul.msk.f32.gmra.mxu2 %vm2084_vm15, %v12194_v52  ;;  %12205 = vmatmul.msk.f32.vlgmr.msrb.gmra.mxu3 %vm2084_vm15, %v12193_v20  ;;  %v16486_v44 = vpop.permute.xlu1 %6211  ;;  %v16488_v1 = vpop.f32.mrf.mxu2 }
 0x72b   : > { %12230 = vmatpush.msk.msrb.mxu3 %vm2091_vm14, %v6015_v49  ;;  %v16491_v18 = vpop.f32.mrf.mxu3  ;;  %v6230_v11 = vsel %vm6221_vm11, %v16486_v44, %v16459_v27 }
 0x72d   : > { %6170 = vmatpush.msrb.mxu3 %v6009_v17 }
 0x72e   : > { %v16494_v24 = vpop.permute.xlu2 %6195  ;;  %v5982_v14 = vpop.permute.xlu0 %5981 }
 0x72f   : > { %v6006_v13 = vsel %vm6003_vm10, %v13020_v54, %v5982_v14  ;;  %12197 = vmatmul.msk.f32.gmra.mxu0 %vm2084_vm15, %v12194_v52  ;;  %v6007_v9 = vsel %vm6003_vm10, %v5982_v14, %v13021_v23  ;;  %v6222_v54 = vsel %vm6221_vm11, %v13036_v62, %v16494_v24 }
 0x730   : > { %6101 = vmatpush.msrb.mxu0 %v6006_v13  ;;  %12200 = vmatmul.msk.f32.gmra.mxu1 %vm2084_vm15, %v12194_v52 }
 0x732   : > { %12206 = vmatmul.msk.f32.gmra.mxu3 %vm2084_vm15, %v12194_v52  ;;  %12216 = vmatmul.msk.f32.vlgmr.msrb.gmra.mxu2 %vm2084_vm15, %v16501_v15  ;;  %v5998_v31 = vpop.permute.xlu1 %5997 }
 0x733   : > { %v6013_v40 = vsel %vm6003_vm10, %v16445_v16, %v5998_v31  ;;  %v6014_v42 = vsel %vm6003_vm10, %v5998_v31, %v16430_v59  ;;  %v16512_v47 = vpop.f32.mrf.mxu3  ;;  %v16514_v51 = vpop.f32.mrf.mxu0 }
 0x734   : > { %v16516_v19 = vpop.f32.mrf.mxu1  ;;  %v16518_v55 = vpop.f32.mrf.mxu2  ;;  %12224 = vmatpush.msk.msrb.mxu1 %vm2091_vm14, %v6013_v40  ;;  %12227 = vmatpush.msk.msra.mxu2 %vm2091_vm14, %v6014_v42  ;;  %v12234_v40 = vld [vmem:[%s19285_s28 + $0x78] sm:$0x3f] }
 0x736   : > { %v16522_v50 = vpop.permute.xlu2 %6429  ;;  %v6208_v6 = vpop.permute.xlu0 %6207  ;;  %6124 = vmatpush.msrb.mxu1 %v6007_v9  ;;  %6147 = vmatpush.msra.mxu2 %v6008_v60 }
 0x737   : > { %12208 = vmatmul.msk.f32.vlgmr.msra.gmra.mxu0 %vm2084_vm15, %v12193_v20 }
 0x738   : > { %12211 = vmatmul.msk.f32.vlgmr.msra.gmra.mxu1 %vm2084_vm15, %v12193_v20  ;;  %12241 = vmatpush.msk.msrb.mxu2 %vm2091_vm14, %v6230_v11 }
 0x73a   : > { %12217 = vmatmul.msk.f32.gmra.mxu2 %vm2084_vm15, %v16534_v39  ;;  %12219 = vmatmul.msk.f32.vlgmr.msra.gmra.mxu3 %vm2084_vm15, %v16501_v15 }
 0x73b   : > { %v13029_v48 = vpop.permute.xlu1 %13028 }
 0x73c   : > { %v13031_v28 = vunpack.i.h.bf16 %v13029_v48  ;;  %v13030_v33 = vunpack.i.l.bf16 %v13029_v48  ;;  %v16541_v3 = vpop.f32.mrf.mxu3  ;;  %v16543_v53 = vpop.f32.mrf.mxu0 }
 0x73d   : > { %19288 = vst [vmem:[#allocation36_spill] sm:$0xff] %v16541_v3  ;;  %v16551_v5 = vpop.f32.mrf.mxu1  ;;  %v16553_v10 = vpop.f32.mrf.mxu2 }
 0x73e   : > { %v16545_v2 = vpop.permute.xlu2 %6217  ;;  %v6216_v4 = vpop.permute.xlu0 %6215  ;;  %v6224_v57 = vsel %vm6221_vm11, %v13030_v33, %v13031_v28  ;;  %v6225_v32 = vsel %vm6221_vm11, %v13031_v28, %v13035_v29  ;;  %v6223_v43 = vsel %vm6221_vm11, %v16494_v24, %v13030_v33 }
 0x73f   : > { %v6231_v59 = vsel %vm6221_vm11, %v16459_v27, %v6216_v4  ;;  %6319 = vmatpush.msrb.mxu2 %v6224_v57  ;;  %12209 = vmatmul.msk.f32.gmra.mxu0 %vm2084_vm15, %v12194_v52  ;;  %v6232_v63 = vsel %vm6221_vm11, %v6216_v4, %v16545_v2 }
 0x740   : > { %12244 = vmatpush.msk.msra.mxu3 %vm2091_vm14, %v6231_v59  ;;  %12212 = vmatmul.msk.f32.gmra.mxu1 %vm2084_vm15, %v12194_v52 }
 0x742   : > { %6342 = vmatpush.msra.mxu3 %v6225_v32  ;;  %12228 = vmatmul.msk.f32.vlgmr.msra.gmra.mxu2 %vm2084_vm15, %v16501_v15 }
 0x743   : > { %12220 = vmatmul.msk.f32.gmra.mxu3 %vm2084_vm15, %v16534_v39  ;;  %v6210_v22 = vpop.permute.xlu1 %6209 }
 0x744   : > { %v6228_v41 = vsel %vm6221_vm11, %v6208_v6, %v6210_v22  ;;  %v6229_v0 = vsel %vm6221_vm11, %v6210_v22, %v16486_v44  ;;  %v16571_v37 = vpop.f32.mrf.mxu0 }
 0x745   : > { %v16569_v61 = vpop.f32.mrf.mxu3  ;;  %12235 = vmatpush.msk.msra.mxu0 %vm2091_vm14, %v6228_v41  ;;  %12238 = vmatpush.msk.msra.mxu1 %vm2091_vm14, %v6229_v0  ;;  %v16581_v36 = vpop.f32.mrf.mxu1 }
 0x746   : > { %19289 = vst [vmem:[#allocation8_spill] sm:$0xff] %v16569_v61  ;;  %v16575_v16 = vpop.permute.xlu2 %6433  ;;  %v6426_v46 = vpop.permute.xlu0 %6425 }
 0x747   : > { %v16583_v12 = vpop.f32.mrf.mxu2  ;;  %6273 = vmatpush.msra.mxu0 %v6222_v54  ;;  %6296 = vmatpush.msra.mxu1 %v6223_v43 }
 0x748   : > { %12225 = vmatmul.msk.f32.vlgmr.msrb.gmra.mxu1 %vm2084_vm15, %v16501_v15  ;;  %12222 = vmatmul.msk.f32.vlgmr.msrb.gmra.mxu0 %vm2084_vm15, %v16501_v15 }
 0x749   : > { %12247 = vmatpush.msk.msrb.mxu0 %vm2091_vm14, %v6232_v63 }
 0x74a   : > { %12229 = vmatmul.msk.f32.gmra.mxu2 %vm2084_vm15, %v16534_v39 }
 0x74b   : > { %12231 = vmatmul.msk.f32.vlgmr.msrb.gmra.mxu3 %vm2084_vm15, %v16501_v15  ;;  %v6428_v7 = vpop.permute.xlu1 %6427 }
 0x74c   : > { %v6445_v26 = vsel %vm823_vm12, %v6426_v46, %v6428_v7  ;;  %v6446_v56 = vsel %vm823_vm12, %v6428_v7, %v16522_v50  ;;  %v16601_v27 = vpop.f32.mrf.mxu0 }
 0x74d   : > { %v16599_v8 = vpop.f32.mrf.mxu3  ;;  %12255 = vmatpush.msk.msra.mxu2 %vm2091_vm14, %v6445_v26  ;;  %12258 = vmatpush.msk.msrb.mxu3 %vm2091_vm14, %v6446_v56  ;;  %v16605_v58 = vpop.f32.mrf.mxu1  ;;  %v16700_v26 = vld [vmem:[%s19285_s28 + $0x88] sm:$0x3f] }
 0x74e   : > { %v6432_v45 = vpop.permute.xlu2 %6431  ;;  %v13039_v20 = vpop.permute.xlu0 %13038  ;;  %19294 = vst [vmem:[#allocation7_spill] sm:$0xff] %v16700_v26 }
 0x74f   : > { %v13041_v25 = vunpack.i.h.bf16 %v13039_v20  ;;  %v13040_v38 = vunpack.i.l.bf16 %v13039_v20  ;;  %v16607_v52 = vpop.f32.mrf.mxu2  ;;  %v6448_v32 = vsel %vm823_vm12, %v6432_v45, %v16575_v16 }
 0x750   : > { %12226 = vmatmul.msk.f32.gmra.mxu1 %vm2084_vm15, %v16534_v39  ;;  %12223 = vmatmul.msk.f32.gmra.mxu0 %vm2084_vm15, %v16534_v39 }
 0x751   : > { %v6439_v30 = vsel %vm823_vm12, %v13040_v38, %v13041_v25 }
 0x752   : > { %6490 = vmatpush.msra.mxu2 %v6439_v30 }
 0x753   : > { %12232 = vmatmul.msk.f32.gmra.mxu3 %vm2084_vm15, %v16534_v39  ;;  %12242 = vmatmul.msk.f32.vlgmr.msrb.gmra.mxu2 %vm2084_vm15, %v16616_v35  ;;  %v6416_v49 = vpop.permute.xlu1 %6415 }
 0x754   : > { %v16625_v17 = vpop.f32.mrf.mxu0  ;;  %v6440_v24 = vsel %vm823_vm12, %v13041_v25, %v6416_v49 }
 0x755   : > { %v16623_v44 = vpop.f32.mrf.mxu3  ;;  %6513 = vmatpush.msrb.mxu3 %v6440_v24  ;;  %v16632_v31 = vpop.f32.mrf.mxu1 }
 0x756   : > { %v16628_v14 = vpop.permute.xlu2 %6629  ;;  %v6220_v13 = vpop.permute.xlu0 %6219  ;;  %19290 = vst [vmem:[#allocation13_spill] sm:$0xff] %v16632_v31 }
 0x757   : > { %v6233_v15 = vsel %vm6221_vm11, %v16545_v2, %v6220_v13  ;;  %v16634_v23 = vpop.f32.mrf.mxu2 }
 0x758   : > { %12239 = vmatmul.msk.f32.vlgmr.msra.gmra.mxu1 %vm2084_vm15, %v16616_v35  ;;  %12236 = vmatmul.msk.f32.vlgmr.msra.gmra.mxu0 %vm2084_vm15, %v16616_v35 }
 0x759   : > { %12250 = vmatpush.msk.msrb.mxu1 %vm2091_vm14, %v6233_v15 }
 0x75b   : > { %12245 = vmatmul.msk.f32.vlgmr.msra.gmra.mxu3 %vm2084_vm15, %v16616_v35  ;;  %12243 = vmatmul.msk.f32.gmra.mxu2 %vm2084_vm15, %v12234_v40  ;;  %v13044_v42 = vpop.permute.xlu1 %13043 }
 0x75c   : > { %v13046_v6 = vunpack.i.h.bf16 %v13044_v42  ;;  %v13045_v9 = vunpack.i.l.bf16 %v13044_v42  ;;  %v16647_v60 = vpop.f32.mrf.mxu0 }
 0x75d   : > { %v16649_v11 = vpop.f32.mrf.mxu3  ;;  %v16658_v57 = vpop.f32.mrf.mxu1 }
 0x75e   : > { %v6438_v39 = vpop.permute.xlu2 %6437  ;;  %v6436_v48 = vpop.permute.xlu0 %6435  ;;  %v6226_v28 = vsel %vm6221_vm11, %v13035_v29, %v13045_v9  ;;  %v6227_v33 = vsel %vm6221_vm11, %v13045_v9, %v13046_v6  ;;  %19291 = vst [vmem:[#allocation29_spill] sm:$0xff] %v16658_v57  ;;  %v6447_v29 = vsel %vm823_vm12, %v16522_v50, %v6432_v45 }
 0x75f   : > { %v6449_v2 = vsel %vm823_vm12, %v16575_v16, %v6436_v48  ;;  %v6450_v4 = vsel %vm823_vm12, %v6436_v48, %v6438_v39  ;;  %v16660_v59 = vpop.f32.mrf.mxu2  ;;  %6365 = vmatpush.msrb.mxu0 %v6226_v28  ;;  %6388 = vmatpush.msrb.mxu1 %v6227_v33 }
 0x760   : > { %12267 = vmatpush.msk.msrb.mxu2 %vm2091_vm14, %v6449_v2  ;;  %12270 = vmatpush.msk.msra.mxu3 %vm2091_vm14, %v6450_v4 }
 0x761   : > { %12237 = vmatmul.msk.f32.gmra.mxu0 %vm2084_vm15, %v12234_v40  ;;  %12240 = vmatmul.msk.f32.gmra.mxu1 %vm2084_vm15, %v12234_v40 }
 0x762   : > { %12261 = vmatpush.msk.msra.mxu0 %vm2091_vm14, %v6447_v29  ;;  %12264 = vmatpush.msk.msra.mxu1 %vm2091_vm14, %v6448_v32 }
 0x763   : > { %12246 = vmatmul.msk.f32.gmra.mxu3 %vm2084_vm15, %v12234_v40  ;;  %12256 = vmatmul.msk.f32.vlgmr.msra.gmra.mxu2 %vm2084_vm15, %v16667_v21  ;;  %v16680_v22 = vpop.permute.xlu1 %13048 }
 0x764   : > { %19293 = vst [vmem:[#allocation32_spill] sm:$0xff] %v16680_v22  ;;  %v19068_v50 = vunpack.i.h.bf16 %v16680_v22  ;;  %v13050_v62 = vunpack.i.l.bf16 %v16680_v22  ;;  %v16684_v41 = vpop.f32.mrf.mxu0 }
 0x765   : > { %v16686_v0 = vpop.f32.mrf.mxu3  ;;  %v16691_v54 = vpop.f32.mrf.mxu1 }
 0x766   : > { %v6418_v16 = vpop.permute.xlu0 %6417  ;;  %v6443_v46 = vsel %vm823_vm12, %v13050_v62, %v19068_v50 }
 0x767   : > { %v16693_v43 = vpop.f32.mrf.mxu2  ;;  %v6441_v63 = vsel %vm823_vm12, %v6416_v49, %v6418_v16  ;;  %v6442_v7 = vsel %vm823_vm12, %v6418_v16, %v13050_v62  ;;  %6582 = vmatpush.msrb.mxu2 %v6443_v46 }
 0x768   : > { %6536 = vmatpush.msra.mxu0 %v6441_v63  ;;  %6559 = vmatpush.msra.mxu1 %v6442_v7 }
 0x769   : > { %12248 = vmatmul.msk.f32.vlgmr.msrb.gmra.mxu0 %vm2084_vm15, %v16616_v35  ;;  %12251 = vmatmul.msk.f32.vlgmr.msrb.gmra.mxu1 %vm2084_vm15, %v16616_v35 }
 0x76b   : > { %12257 = vmatmul.msk.f32.gmra.mxu2 %vm2084_vm15, %v16700_v26  ;;  %12259 = vmatmul.msk.f32.vlgmr.msrb.gmra.mxu3 %vm2084_vm15, %v16667_v21 }
 0x76c   : > { %v16710_v56 = vpop.f32.mrf.mxu0 }
 0x76d   : > { %v16712_v45 = vpop.f32.mrf.mxu3  ;;  %v16714_v20 = vpop.f32.mrf.mxu1 }
 0x76e   : > { %19295 = vst [vmem:[#allocation17_spill] sm:$0xff] %v16712_v45 }
 0x76f   : > { %19296 = vst [vmem:[#allocation24_spill] sm:$0xff] %v16714_v20  ;;  %v16716_v25 = vpop.f32.mrf.mxu2 }
 0x771   : > { %12249 = vmatmul.msk.f32.gmra.mxu0 %vm2084_vm15, %v12234_v40  ;;  %12252 = vmatmul.msk.f32.gmra.mxu1 %vm2084_vm15, %v12234_v40 }
 0x773   : > { %12260 = vmatmul.msk.f32.gmra.mxu3 %vm2084_vm15, %v16700_v26  ;;  %12268 = vmatmul.msk.f32.vlgmr.msrb.gmra.mxu2 %vm2084_vm15, %v16667_v21 }
 0x774   : > { %v5388_v38 = vpop.f32.mrf.mxu0 }
 0x775   : > { %v16724_v35 = vpop.f32.mrf.mxu3  ;;  %v16726_v30 = vpop.f32.mrf.mxu1 }
 0x776   : > { %19297 = vst [vmem:[#allocation23_spill] sm:$0xff] %v16724_v35 }
 0x777   : > { %v16728_v49 = vpop.f32.mrf.mxu2 }
 0x779   : > { %12262 = vmatmul.msk.f32.vlgmr.msra.gmra.mxu0 %vm2084_vm15, %v16667_v21  ;;  %12265 = vmatmul.msk.f32.vlgmr.msra.gmra.mxu1 %vm2084_vm15, %v16667_v21 }
 0x77b   : > { %12269 = vmatmul.msk.f32.gmra.mxu2 %vm2084_vm15, %v16700_v26 }
 0x77c   : > { %v16736_v24 = vpop.f32.mrf.mxu0 }
 0x77d   : > { %v16738_v13 = vpop.f32.mrf.mxu3  ;;  %v16740_v15 = vpop.f32.mrf.mxu1 }
 0x77f   : > { %v16742_v40 = vpop.f32.mrf.mxu2 }
 0x780   : > { %19298 = vst [vmem:[#allocation43_spill] sm:$0xff] %v16742_v40 }
 0x781   : > { %12263 = vmatmul.msk.f32.gmra.mxu0 %vm2084_vm15, %v16700_v26  ;;  %12266 = vmatmul.msk.f32.gmra.mxu1 %vm2084_vm15, %v16700_v26 }
 0x784   : > { %v16748_v42 = vpop.f32.mrf.mxu0 }
 0x785   : > { %v16750_v6 = vpop.f32.mrf.mxu3  ;;  %v16752_v9 = vpop.f32.mrf.mxu1 }
 0x786   : > { %19299 = vst [vmem:[#allocation9_spill] sm:$0xff] %v16750_v6 }
 0x787   : > { %19300 = vst [vmem:[#allocation53_spill] sm:$0xff] %v16752_v9  ;;  %v5599_v39 = vpop.f32.mrf.mxu2 }
 0x78c   : > { %v16754_v48 = vpop.f32.mrf.mxu0 }
 0x78d   : > { %19301 = vst [vmem:[#allocation16_spill] sm:$0xff] %v16754_v48  ;;  %v5622_v28 = vpop.f32.mrf.mxu3  ;;  %v16756_v33 = vpop.f32.mrf.mxu1 }
 0x78e   : > { %19302 = vst [vmem:[#allocation34_spill] sm:$0xff] %v16756_v33 }
 0x78f   : > { %v5602_v2 = vpop.f32.mrf.mxu2 }
 0x794   : > { %v16758_v4 = vpop.f32.mrf.mxu0 }
 0x795   : > { %v16760_v29 = vpop.f32.mrf.mxu3  ;;  %v16762_v32 = vpop.f32.mrf.mxu1 }
 0x797   : > { %v16764_v62 = vpop.f32.mrf.mxu2 }
 0x79c   : > { %v16766_v16 = vpop.f32.mrf.mxu0 }
 0x79d   : > { %19303 = vst [vmem:[#allocation50_spill] sm:$0xff] %v16766_v16  ;;  %v16768_v46 = vpop.f32.mrf.mxu3  ;;  %v16770_v63 = vpop.f32.mrf.mxu1 }
 0x79e   : > { %19304 = vst [vmem:[#allocation52_spill] sm:$0xff] %v16768_v46 }
 0x79f   : > { %19305 = vst [vmem:[#allocation12_spill] sm:$0xff] %v16770_v63  ;;  %v16772_v7 = vpop.f32.mrf.mxu2 }
 0x7a0   : > { %19306 = vst [vmem:[#allocation10_spill] sm:$0xff] %v16772_v7 }
 0x7a4   : > { %v5811_v50 = vpop.f32.mrf.mxu0 }
 0x7a5   : > { %v16774_v35 = vpop.f32.mrf.mxu3  ;;  %v5834_v33 = vpop.f32.mrf.mxu1 }
 0x7a6   : > { %19307 = vst [vmem:[#allocation28_spill] sm:$0xff] %v16774_v35 }
 0x7a7   : > { %v16776_v57 = vpop.f32.mrf.mxu2 }
 0x7ac   : > { %v5814_v61 = vpop.f32.mrf.mxu0 }
 0x7ad   : > { %v16778_v9 = vpop.f32.mrf.mxu3  ;;  %v16780_v45 = vpop.f32.mrf.mxu1 }
 0x7ae   : > { %19308 = vst [vmem:[#allocation48_spill] sm:$0xff] %v16778_v9 }
 0x7af   : > { %v16782_v31 = vpop.f32.mrf.mxu2 }
 0x7b0   : > { %19309 = vst [vmem:[#allocation11_spill] sm:$0xff] %v16782_v31 }
 0x7b4   : > { %v16786_v46 = vpop.f32.mrf.mxu0 }
 0x7b5   : > { %v16784_v3 = vpop.f32.mrf.mxu3  ;;  %19311 = vst [vmem:[#allocation21_spill] sm:$0xff] %v16786_v46  ;;  %v16788_v26 = vpop.f32.mrf.mxu1 }
 0x7b6   : > { %19310 = vst [vmem:[#allocation19_spill] sm:$0xff] %v16784_v3 }
 0x7b7   : > { %19312 = vst [vmem:[#allocation41_spill] sm:$0xff] %v16788_v26  ;;  %v6057_v21 = vpop.f32.mrf.mxu2 }
 0x7bc   : > { %v16790_v22 = vpop.f32.mrf.mxu0 }
 0x7bd   : > { %19313 = vst [vmem:[#allocation51_spill] sm:$0xff] %v16790_v22  ;;  %v6080_v35 = vpop.f32.mrf.mxu3  ;;  %v16792_v7 = vpop.f32.mrf.mxu1 }
 0x7be   : > { %19314 = vst [vmem:[#allocation15_spill] sm:$0xff] %v16792_v7 }
 0x7bf   : > { %v6060_v63 = vpop.f32.mrf.mxu2 }
 0x7c5   : > { %v16796_v48 = vpop.f32.mrf.mxu0  ;;  %v16798_v6 = vpop.f32.mrf.mxu1 }
 0x7c6   : > { %v16794_v16 = vpop.f32.mrf.mxu3  ;;  %19316 = vst [vmem:[#allocation39_spill] sm:$0xff] %v16796_v48 }
 0x7c7   : > { %19315 = vst [vmem:[#allocation14_spill] sm:$0xff] %v16794_v16  ;;  %v16800_v31 = vpop.f32.mrf.mxu2  ;;  %v4978_v16 = vadd.f32 %v16571_v37, %v16470_v34  ;;  %v5001_v34 = vadd.f32 %v16581_v36, %v16491_v18 }
 0x7c8   : > { %19317 = vst [vmem:[#allocation38_spill] sm:$0xff] %v16798_v6 }
 0x7c9   : > { %19318 = vst [vmem:[#allocation25_spill] sm:$0xff] %v16800_v31  ;;  %v5298_v6 = vadd.f32 %v16634_v23, %v4978_v16  ;;  %v5024_v23 = vadd.f32 %v16583_v12, %v16514_v51  ;;  %v5299_v16 = vadd.f32 %v16649_v11, %v5001_v34  ;;  %v19327_v34 = vld [vmem:[#allocation21_spill] sm:$0xff] }
 0x7cb   : > { %v5300_v36 = vadd.f32 %v16684_v41, %v5024_v23  ;;  %v5027_v41 = vadd.f32 %v16607_v52, %v16543_v53 }
 0x7cd   : > { %v16802_v3 = vpop.f32.mrf.mxu0  ;;  %v16806_v26 = vpop.f32.mrf.mxu1 }
 0x7ce   : > { %19319 = vst [vmem:[#allocation22_spill] sm:$0xff] %v16802_v3  ;;  %v16804_v20 = vpop.f32.mrf.mxu3  ;;  %v5509_v3 = vadd.f32 %v5388_v38, %v5298_v6 }
 0x7cf   : > { %19320 = vst [vmem:[#allocation27_spill] sm:$0xff] %v16804_v20  ;;  %v16808_v40 = vpop.f32.mrf.mxu2  ;;  %v4981_v20 = vadd.f32 %v16601_v27, %v16488_v1  ;;  %v5510_v1 = vadd.f32 %v16726_v30, %v5299_v16  ;;  %v5070_v27 = vadd.f32 %v16625_v17, %v16518_v55  ;;  %v5047_v55 = vadd.f32 %v16599_v8, %v16516_v19  ;;  %v19329_v16 = vld [vmem:[#allocation14_spill] sm:$0xff] }
 0x7d0   : > { %19321 = vst [vmem:[#allocation40_spill] sm:$0xff] %v16806_v26 }
 0x7d1   : > { %19322 = vst [vmem:[#allocation31_spill] sm:$0xff] %v16808_v40  ;;  %v5304_v37 = vadd.f32 %v16660_v59, %v4981_v20  ;;  %v5721_v59 = vadd.f32 %v5622_v28, %v5510_v1  ;;  %v5302_v17 = vadd.f32 %v16693_v43, %v5070_v27 }
 0x7d3   : > { %v5515_v38 = vadd.f32 %v16736_v24, %v5304_v37  ;;  %v5511_v24 = vadd.f32 %v16728_v49, %v5300_v36  ;;  %v5513_v53 = vadd.f32 %v16748_v42, %v5302_v17  ;;  %v16869_v42 = vpop.permute.xlu1 %6634  ;;  %v19328_v37 = vld [vmem:[#allocation43_spill] sm:$0xff]  ;;  %v19333_v36 = vld [vmem:[#allocation25_spill] sm:$0xff] }
 0x7d5   : > { %v6275_v7 = vpop.f32.mrf.mxu0  ;;  %v6298_v46 = vpop.f32.mrf.mxu1  ;;  %v5726_v12 = vadd.f32 %v5602_v2, %v5515_v38  ;;  %v5722_v28 = vadd.f32 %v16758_v4, %v5511_v24  ;;  %v19332_v38 = vld [vmem:[#allocation38_spill] sm:$0xff] }
 0x7d6   : > { %v16810_v22 = vpop.f32.mrf.mxu3 }
 0x7d7   : > { %19323 = vst [vmem:[#allocation42_spill] sm:$0xff] %v16810_v22  ;;  %v16814_v48 = vpop.f32.mrf.mxu2  ;;  %v5720_v22 = vadd.f32 %v5599_v39, %v5509_v3 }
 0x7d8   : > { %19324 = vst [vmem:[#allocation54_spill] sm:$0xff] %v16814_v48 }
 0x7d9   : > { %v5932_v48 = vadd.f32 %v5811_v50, %v5720_v22  ;;  %v5933_v50 = vadd.f32 %v5834_v33, %v5721_v59 }
 0x7db   : > { %v6179_v39 = vadd.f32 %v6080_v35, %v5933_v50  ;;  %v5306_v35 = vadd.f32 %v16710_v56, %v5027_v41  ;;  %v5934_v56 = vadd.f32 %v16776_v57, %v5722_v28  ;;  %v19331_v57 = vld [vmem:[#allocation24_spill] sm:$0xff] }
 0x7dd   : > { %v6397_v8 = vadd.f32 %v6298_v46, %v6179_v39  ;;  %v5517_v23 = vadd.f32 %v19328_v37, %v5306_v35  ;;  %v19338_v39 = vld [vmem:[#allocation50_spill] sm:$0xff] }
 0x7de   : > { %v16817_v31 = vpop.f32.mrf.mxu3  ;;  %v6278_v26 = vpop.f32.mrf.mxu0 }
 0x7df   : > { %19325 = vst [vmem:[#allocation18_spill] sm:$0xff] %v16817_v31  ;;  %v16821_v9 = vpop.f32.mrf.mxu1  ;;  %v16823_v40 = vpop.f32.mrf.mxu2  ;;  %v6178_v31 = vadd.f32 %v6057_v21, %v5932_v48  ;;  %v5004_v21 = vadd.f32 %v16605_v58, %v16512_v47  ;;  %v5301_v48 = vadd.f32 %v16691_v54, %v5047_v55  ;;  %v19336_v55 = vld [vmem:[#allocation16_spill] sm:$0xff] }
 0x7e1   : > { %v6396_v3 = vadd.f32 %v6275_v7, %v6178_v31  ;;  %v5938_v31 = vadd.f32 %v5814_v61, %v5726_v12  ;;  %v5305_v30 = vadd.f32 %v16686_v0, %v5004_v21  ;;  %v5073_v61 = vadd.f32 %v16647_v60, %v16553_v10  ;;  %v19335_v21 = vld [vmem:[#allocation9_spill] sm:$0xff] }
 0x7e2   : > { %v5512_v43 = vadd.f32 %v16738_v13, %v5301_v48  ;;  %v5724_v60 = vadd.f32 %v16764_v62, %v5513_v53  ;;  %v5728_v48 = vadd.f32 %v19338_v39, %v5517_v23 }
 0x7e3   : > { %v6184_v47 = vadd.f32 %v6060_v63, %v5938_v31  ;;  %v5516_v19 = vadd.f32 %v16740_v15, %v5305_v30  ;;  %v5308_v46 = vadd.f32 %v16716_v25, %v5073_v61  ;;  %v19326_v63 = vld [vmem:[#allocation48_spill] sm:$0xff] }
 0x7e4   : > { %v5723_v10 = vadd.f32 %v16762_v32, %v5512_v43  ;;  %v5936_v32 = vadd.f32 %v19327_v34, %v5724_v60  ;;  %v19339_v43 = vld [vmem:[#allocation12_spill] sm:$0xff]  ;;  %v19343_v60 = vld [vmem:[#allocation51_spill] sm:$0xff] }
 0x7e5   : > { %v6402_v52 = vadd.f32 %v6278_v26, %v6184_v47  ;;  %v5727_v54 = vadd.f32 %v16760_v29, %v5516_v19  ;;  %v5050_v26 = vadd.f32 %v16623_v44, %v16551_v5  ;;  %v19330_v44 = vld [vmem:[#allocation39_spill] sm:$0xff]  ;;  %v5519_v17 = vadd.f32 %v19336_v55, %v5308_v46  ;;  %v13348_v55 = vld [vmem:[#allocation3 + $0x30] sm:$0xff] }
 0x7e6   : > { %v16835_v6 = vpop.f32.mrf.mxu3  ;;  %v6367_v18 = vpop.f32.mrf.mxu0  ;;  %v5935_v7 = vadd.f32 %v19326_v63, %v5723_v10  ;;  %v6180_v1 = vadd.f32 %v19330_v44, %v5934_v56  ;;  %v6182_v25 = vadd.f32 %v19333_v36, %v5936_v32  ;;  %v19337_v31 = vld [vmem:[#allocation18_spill] sm:$0xff]  ;;  %v19346_v32 = vld [vmem:[#allocation31_spill] sm:$0xff] }
 0x7e7   : > { %v16838_v22 = vpop.f32.mrf.mxu1  ;;  %v6492_v51 = vpop.f32.mrf.mxu2  ;;  %v5939_v29 = vadd.f32 %v16780_v45, %v5727_v54  ;;  %v5307_v45 = vadd.f32 %v19331_v57, %v5050_v26  ;;  %v19341_v54 = vld [vmem:[#allocation11_spill] sm:$0xff] }
 0x7e8   : > { %v6613_v11 = vadd.f32 %v6492_v51, %v6396_v3  ;;  %v6181_v3 = vadd.f32 %v19332_v38, %v5935_v7  ;;  %v19334_v51 = vld [vmem:[#allocation54_spill] sm:$0xff]  ;;  %v6400_v41 = vadd.f32 %v6367_v18, %v6182_v25  ;;  %v5940_v28 = vadd.f32 %v19341_v54, %v5728_v48  ;;  %v19345_v7 = vld [vmem:[#allocation40_spill] sm:$0xff] }
 0x7e9   : > { %v6185_v5 = vadd.f32 %v19329_v16, %v5939_v29  ;;  %v6398_v12 = vadd.f32 %v19334_v51, %v6180_v1  ;;  %v5518_v50 = vadd.f32 %v19335_v21, %v5307_v45  ;;  %v19344_v29 = vld [vmem:[#allocation22_spill] sm:$0xff] }
 0x7ea   : > { %v6637_v20 = vadd.f32 %v16628_v14, %v6613_v11 }
 0x7eb   : > { %v6403_v11 = vadd.f32 %v16821_v9, %v6185_v5  ;;  %v5729_v53 = vadd.f32 %v19339_v43, %v5518_v50 }
 0x7ec   : > { %v16851_v58 = vmax.f32 %v6637_v20, 0.0  ;;  %v6399_v20 = vadd.f32 %v19337_v31, %v6181_v3 }
 0x7ee   : > { %v16858_v0 = vpop.f32.mrf.mxu0  ;;  %v6515_v49 = vpop.f32.mrf.mxu3 }
 0x7ef   : > { %v16863_v33 = vpop.f32.mrf.mxu1  ;;  %v6495_v15 = vpop.f32.mrf.mxu2  ;;  %v6614_v2 = vadd.f32 %v6515_v49, %v6397_v8 }
 0x7f0   : > { %v6619_v13 = vadd.f32 %v6495_v15, %v6402_v52  ;;  %v19340_v52 = vld [vmem:[#allocation10_spill] sm:$0xff] }
 0x7f1   : > { %v6638_v4 = vadd.f32 %v16628_v14, %v6614_v2  ;;  %v5730_v9 = vadd.f32 %v19340_v52, %v5519_v17  ;;  %v19342_v2 = vld [vmem:[#allocation19_spill] sm:$0xff] }
 0x7f2   : > { %v6643_v62 = vadd.f32 %v16869_v42, %v6619_v13  ;;  %v5941_v10 = vadd.f32 %v19342_v2, %v5729_v53 }
 0x7f3   : > { %v16881_v27 = vmax.f32 %v6638_v4, 0.0  ;;  %v5942_v13 = vadd.f32 %v19343_v60, %v5730_v9  ;;  %v6186_v4 = vadd.f32 %v19344_v29, %v5940_v28  ;;  %v19352_v29 = vld [vmem:[#allocation37_spill] sm:$0xff] }
 0x7f4   : > { %v6655_v59 = vmax.f32 %v6643_v62, 0.0  ;;  %v6187_v34 = vadd.f32 %v19345_v7, %v5941_v10  ;;  %v19350_v10 = vld [vmem:[#allocation32_spill] sm:$0xff] }
 0x7f5   : > { %v6188_v62 = vadd.f32 %v19346_v32, %v5942_v13  ;;  %v6404_v16 = vadd.f32 %v16823_v40, %v6186_v4  ;;  %v19351_v60 = vunpack.i.h.bf16 %v19350_v10  ;;  %v12274_v4 = vld [vmem:[%s18976_s13 + $0x20] sm:$0xff]  ;;  %v6677_v10 = vld [vmem:[%s18976_s13 + $0x10] sm:$0x3] }
 0x7f6   : > { %6668 = vst [vmem:[#allocation4 + $0x40] sm:$0x3f] %v6655_v59  ;;  %v6518_v30 = vpop.f32.mrf.mxu3  ;;  %v6538_v24 = vpop.f32.mrf.mxu0  ;;  %v6405_v44 = vadd.f32 %v16835_v6, %v6187_v34 }
 0x7f7   : > { %v6620_v47 = vadd.f32 %v6518_v30, %v6403_v11  ;;  %v6615_v19 = vadd.f32 %v6538_v24, %v6398_v12  ;;  %v6561_v8 = vpop.f32.mrf.mxu1  ;;  %v6584_v61 = vpop.f32.mrf.mxu2  ;;  %v6406_v1 = vadd.f32 %v16858_v0, %v6188_v62  ;;  %v16924_v0 = vpack.i.bf16 %v16881_v27, %v16851_v58 }
 0x7f8   : > { %v6616_v49 = vadd.f32 %v6561_v8, %v6399_v20  ;;  %v6617_v35 = vadd.f32 %v6584_v61, %v6400_v41 }
 0x7f9   : > { %v6644_v15 = vadd.f32 %v16869_v42, %v6620_v47  ;;  %v6639_v18 = vadd.f32 %v16628_v14, %v6615_v19 }
 0x7fa   : > { %v6640_v26 = vadd.f32 %v16628_v14, %v6616_v49  ;;  %v6641_v56 = vadd.f32 %v16628_v14, %v6617_v35  ;;  %v12273_v49 = vld [vmem:[%s18976_s13 + $0x18] sm:$0xff] }
 0x7fb   : > { %v6656_v46 = vmax.f32 %v6644_v15, 0.0  ;;  %v16902_v63 = vmax.f32 %v6639_v18, 0.0 }
 0x7fc   : > { %v16906_v37 = vmax.f32 %v6640_v26, 0.0  ;;  %v16908_v23 = vmax.f32 %v6641_v56, 0.0 }
 0x7fd   : > { %6669 = vst [vmem:[#allocation4 + $0x48] sm:$0x3f] %v6656_v46  ;;  %v16911_v5 = vld [vmem:[#allocation4 + $0x40] sm:$0x3f]  ;;  %v13092_v41 = vpack.i.bf16 %v16902_v63, %v16881_v27 }
 0x7fe   : > { %6712 = vrot.lane.b32.xlu0 %v16911_v5, %s19114_s0  ;;  %v6541_v57 = vpop.f32.mrf.mxu0  ;;  %v16941_v31 = vpack.i.bf16 %v16906_v37, %v16902_v63  ;;  %v13097_v30 = vpack.i.bf16 %v16851_v58, %v16906_v37  ;;  %v17013_v24 = vld [vmem:[#allocation4 + $0x40] sm:$0x3f] }
 0x7ff   : > { %v6621_v45 = vadd.f32 %v6541_v57, %v6404_v16  ;;  %v6564_v38 = vpop.f32.mrf.mxu1  ;;  %v6587_v3 = vpop.f32.mrf.mxu2  ;;  %v19354_v16 = vld [vmem:[#allocation7_spill] sm:$0xff] }
 0x800   : > { %v6622_v36 = vadd.f32 %v6564_v38, %v6405_v44  ;;  %v6623_v25 = vadd.f32 %v6587_v3, %v6406_v1 }
 0x801   : > { %v6645_v59 = vadd.f32 %v16869_v42, %v6621_v45  ;;  %v12275_v45 = vld [vmem:[%s18976_s13 + $0x28] sm:$0x3] }
 0x802   : > { %v6646_v40 = vadd.f32 %v16869_v42, %v6622_v36  ;;  %v6647_v51 = vadd.f32 %v16869_v42, %v6623_v25 }
 0x803   : > { %v6657_v12 = vmax.f32 %v6645_v59, 0.0 }
 0x804   : > { %v6658_v11 = vmax.f32 %v6646_v40, 0.0  ;;  %v6659_v6 = vmax.f32 %v6647_v51, 0.0  ;;  %v16920_v21 = vld [vmem:[#allocation4 + $0x48] sm:$0x3f] }
 0x805   : > { %6670 = vst [vmem:[#allocation4 + $0x50] sm:$0x3f] %v6657_v12  ;;  %6714 = vrot.lane.b32.xlu1 %v16920_v21, %s19114_s0  ;;  %v17021_v47 = vld [vmem:[#allocation4 + $0x48] sm:$0x3f] }
 0x806   : > { %6671 = vst [vmem:[#allocation4 + $0x58] sm:$0x3f] %v6658_v11  ;;  %13053 = vrot.lane.b32.xlu0 %v16924_v0, %s19114_s0 }
 0x807   : > { %6672 = vst [vmem:[#allocation4 + $0x60] sm:$0x3f] %v6659_v6 }
 0x80c   : > { %v16930_v50 = vld [vmem:[#allocation4 + $0x50] sm:$0x3f] }
 0x80d   : > { %6423 = vrot.lane.b32.xlu1 %v13348_v55, %s19287_s9  ;;  %v16933_v17 = vld [vmem:[#allocation4 + $0x58] sm:$0x3f]  ;;  %6716 = vrot.lane.b32.xlu2 %v16930_v50, %s19114_s0  ;;  %v17023_v19 = vld [vmem:[#allocation4 + $0x50] sm:$0x3f] }
 0x80e   : > { %6718 = vrot.lane.b32.xlu0 %v16933_v17, %s19114_s0  ;;  %v16943_v20 = vld [vmem:[#allocation4 + $0x60] sm:$0x3f]  ;;  %v17047_v15 = vld [vmem:[#allocation4 + $0x58] sm:$0x3f] }
 0x80f   : > { %v17040_v28 = vld [vmem:[#allocation4 + $0x60] sm:$0x3f] }
 0x815   : > { %13058 = vrot.lane.b32.xlu1 %v16941_v31, %s19114_s0  ;;  %6720 = vrot.lane.b32.xlu2 %v16943_v20, %s19114_s0 }
 0x816   : > { %6710 = vrot.lane.b32.xlu0 %v16908_v23, %s19114_s0 }
 0x81d   : > { %7047 = vrot.lane.b32.xlu1 %v16911_v5, %s19347_s3  ;;  %7049 = vrot.lane.b32.xlu2 %v16920_v21, %s19347_s3 }
 0x81e   : > { %13063 = vrot.lane.b32.xlu0 %v16924_v0, %s19347_s3 }
 0x825   : > { %7051 = vrot.lane.b32.xlu1 %v16930_v50, %s19347_s3  ;;  %13068 = vrot.lane.b32.xlu2 %v16941_v31, %s19347_s3 }
 0x826   : > { %7053 = vrot.lane.b32.xlu0 %v16933_v17, %s19347_s3 }
 0x82d   : > { %7055 = vrot.lane.b32.xlu1 %v16943_v20, %s19347_s3  ;;  %7045 = vrot.lane.b32.xlu2 %v16908_v23, %s19347_s3 }
 0x82e   : > { %7248 = vrot.lane.b32.xlu0 %v16911_v5, %s19284_s6 }
 0x835   : > { %7250 = vrot.lane.b32.xlu1 %v16920_v21, %s19284_s6  ;;  %13073 = vrot.lane.b32.xlu2 %v16924_v0, %s19284_s6 }
 0x836   : > { %7252 = vrot.lane.b32.xlu0 %v16930_v50, %s19284_s6 }
 0x83d   : > { %13078 = vrot.lane.b32.xlu1 %v16941_v31, %s19284_s6  ;;  %7254 = vrot.lane.b32.xlu2 %v16933_v17, %s19284_s6 }
 0x83e   : > { %7256 = vrot.lane.b32.xlu0 %v16943_v20, %s19284_s6 }
 0x845   : > { %7246 = vrot.lane.b32.xlu1 %v16908_v23, %s19284_s6  ;;  %7449 = vrot.lane.b32.xlu2 %v16911_v5, %s19180_s8 }
 0x846   : > { %7451 = vrot.lane.b32.xlu0 %v16920_v21, %s19180_s8 }
 0x84d   : > { %13083 = vrot.lane.b32.xlu1 %v16924_v0, %s19180_s8  ;;  %7453 = vrot.lane.b32.xlu2 %v16930_v50, %s19180_s8 }
 0x84e   : > { %7455 = vrot.lane.b32.xlu0 %v16933_v17, %s19180_s8 }
 0x855   : > { %13088 = vrot.lane.b32.xlu1 %v16941_v31, %s19180_s8  ;;  %7457 = vrot.lane.b32.xlu2 %v16943_v20, %s19180_s8 }
 0x856   : > { %7447 = vrot.lane.b32.xlu0 %v16908_v23, %s19180_s8  ;;  %s19349_s8 = smov 8  }
 0x85d   : > { %7652 = vrot.lane.b32.xlu1 %v16920_v21, %s19348_s5  ;;  %7654 = vrot.lane.b32.xlu2 %v16930_v50, %s19348_s5 }
 0x85e   : > { %13093 = vrot.lane.b32.xlu0 %v13092_v41, %s19348_s5  ;;  %v6675_v41 = vld [vmem:[%s18976_s13] sm:$0xff] }
 0x865   : > { %7656 = vrot.lane.b32.xlu1 %v16933_v17, %s19348_s5  ;;  %13098 = vrot.lane.b32.xlu2 %v13097_v30, %s19348_s5 }
 0x866   : > { %7650 = vrot.lane.b32.xlu0 %v16911_v5, %s19348_s5 }
 0x867   : > { %v6717_v48 = vpop.permute.xlu2 %6716 }
 0x86d   : > { %7658 = vrot.lane.b32.xlu1 %v16943_v20, %s19348_s5  ;;  %7648 = vrot.lane.b32.xlu2 %v16908_v23, %s19348_s5  ;;  %s13376_s5 = smov 16  }
 0x86e   : > { %7877 = vrot.lane.b32.xlu0 %v17013_v24, %s19349_s8 }
 0x86f   : > { %v6721_v54 = vpop.permute.xlu2 %6720 }
 0x870   : > { %v6713_v39 = vpop.permute.xlu0 %6712 }
 0x875   : > { %7879 = vrot.lane.b32.xlu1 %v17021_v47, %s19349_s8  ;;  %13103 = vrot.lane.b32.xlu2 %v16924_v0, %s19349_s8 }
 0x876   : > { %7881 = vrot.lane.b32.xlu0 %v17023_v19, %s19349_s8 }
 0x877   : > { %v6715_v8 = vpop.permute.xlu1 %6714  ;;  %v7050_v7 = vpop.permute.xlu2 %7049 }
 0x878   : > { %v6726_v61 = vsel %vm1088_vm1, %v6713_v39, %v6715_v8  ;;  %v6727_v43 = vsel %vm1088_vm1, %v6715_v8, %v6717_v48  ;;  %v13054_v53 = vpop.permute.xlu0 %13053 }
 0x879   : > { %v13056_v52 = vunpack.i.h.bf16 %v13054_v53  ;;  %v13055_v9 = vunpack.i.l.bf16 %v13054_v53  ;;  %12276 = vmatpush.msk.msrb.mxu0 %vm4452_vm2, %v6726_v61  ;;  %12280 = vmatpush.msk.msrb.mxu1 %vm4452_vm2, %v6727_v43 }
 0x87b   : > { %v6722_v35 = vsel %vm1088_vm1, %v13055_v9, %v13056_v52 }
 0x87c   : > { %6769 = vmatpush.msrb.mxu0 %v6722_v35 }
 0x87d   : > { %12277 = vmatmul.msk.f32.vlgmr.msrb.gmra.mxu0 %vm4445_vm3, %v12273_v49  ;;  %13108 = vrot.lane.b32.xlu1 %v16941_v31, %s19349_s8 }
 0x87e   : > { %12292 = vmatpush.msk.msra.mxu0 %vm4452_vm2, %v6721_v54  ;;  %7885 = vrot.lane.b32.xlu0 %v17040_v28, %s19349_s8 }
 0x87f   : > { %7883 = vrot.lane.b32.xlu2 %v17047_v15, %s19349_s8  ;;  %v6424_v18 = vpop.permute.xlu1 %6423  ;;  %v13069_v59 = vpop.permute.xlu2 %13068 }
 0x880   : > { %v6719_v2 = vpop.permute.xlu0 %6718  ;;  %v6444_v13 = vsel %vm823_vm12, %v19351_v60, %v6424_v18 }
 0x881   : > { %v6728_v26 = vsel %vm1088_vm1, %v6717_v48, %v6719_v2  ;;  %v6729_v56 = vsel %vm1088_vm1, %v6719_v2, %v6721_v54  ;;  %6605 = vmatpush.msra.mxu3 %v6444_v13 }
 0x882   : > { %12284 = vmatpush.msk.msra.mxu2 %vm4452_vm2, %v6728_v26  ;;  %12271 = vmatmul.msk.f32.vlgmr.msra.gmra.mxu3 %vm2084_vm15, %v19352_v29  ;;  %v12316_v29 = vld [vmem:[%s18976_s13 + $0x30] sm:$0xff] }
 0x883   : > { %12288 = vmatpush.msk.msrb.mxu3 %vm4452_vm2, %v6729_v56 }
 0x885   : > { %12278 = vmatmul.msk.f32.gmra.mxu0 %vm4445_vm3, %v12274_v4 }
 0x886   : > { %8084 = vrot.lane.b32.xlu0 %v17013_v24, %s19353_s2 }
 0x887   : > { %v13059_v46 = vpop.permute.xlu1 %13058  ;;  %v7046_v55 = vpop.permute.xlu2 %7045 }
 0x888   : > { %v13061_v34 = vunpack.i.h.bf16 %v13059_v46  ;;  %v13060_v32 = vunpack.i.l.bf16 %v13059_v46  ;;  %v6711_v62 = vpop.permute.xlu0 %6710 }
 0x889   : > { %6873 = vmatpush.msra.mxu0 %v6711_v62 }
 0x88a   : > { %12272 = vmatmul.msk.f32.gmra.mxu3 %vm2084_vm15, %v19354_v16  ;;  %v6723_v44 = vsel %vm1088_vm1, %v13056_v52, %v13060_v32  ;;  %v6724_v1 = vsel %vm1088_vm1, %v13060_v32, %v13061_v34  ;;  %v6725_v57 = vsel %vm1088_vm1, %v13061_v34, %v6711_v62  ;;  %v6676_v52 = vld [vmem:[%s18976_s13 + $0x8] sm:$0xff] }
 0x88b   : > { %12308 = vmatpush.msk.msrb.mxu0 %vm4452_vm2, %v16933_v17  ;;  %6795 = vmatpush.msrb.mxu1 %v6723_v44  ;;  %v12317_v44 = vld [vmem:[%s18976_s13 + $0x38] sm:$0xff] }
 0x88c   : > { %6821 = vmatpush.msra.mxu2 %v6724_v1  ;;  %6847 = vmatpush.msrb.mxu3 %v6725_v57 }
 0x88d   : > { %6996 = vmatpush.msrb.mxu0 %v16906_v37  ;;  %12281 = vmatmul.msk.f32.vlgmr.msrb.gmra.mxu1 %vm4445_vm3, %v12273_v49 }
 0x88e   : > { %12279 = vmatmul.msk.f32.gmra.mxu0 %vm4445_vm3, %v12275_v45  ;;  %12285 = vmatmul.msk.f32.vlgmr.msra.gmra.mxu2 %vm4445_vm3, %v12273_v49 }
 0x88f   : > { %12296 = vmatpush.msk.msra.mxu1 %vm4452_vm2, %v16911_v5  ;;  %12300 = vmatpush.msk.msrb.mxu2 %vm4452_vm2, %v16920_v21  ;;  %v7048_v38 = vpop.permute.xlu1 %7047  ;;  %v13074_v39 = vpop.permute.xlu2 %13073 }
 0x890   : > { %12304 = vmatpush.msk.msra.mxu3 %vm4452_vm2, %v16930_v50  ;;  %8088 = vrot.lane.b32.xlu0 %v17023_v19, %s19353_s2  ;;  %v7061_v3 = vsel %vm5125_vm6, %v7048_v38, %v7050_v7  ;;  %v13064_v36 = vpop.permute.xlu0 %13063  ;;  %v13076_v61 = vunpack.i.h.bf16 %v13074_v39  ;;  %v13075_v43 = vunpack.i.l.bf16 %v13074_v39 }
 0x891   : > { %6918 = vmatpush.msra.mxu1 %v16851_v58  ;;  %6944 = vmatpush.msrb.mxu2 %v16881_v27  ;;  %v13066_v5 = vunpack.i.h.bf16 %v13064_v36  ;;  %v13065_v25 = vunpack.i.l.bf16 %v13064_v36  ;;  %v13071_v58 = vunpack.i.h.bf16 %v13069_v59  ;;  %v13070_v27 = vunpack.i.l.bf16 %v13069_v59 }
 0x892   : > { %6970 = vmatpush.msra.mxu3 %v16902_v63 }
 0x893   : > { %12312 = vmatpush.msk.msrb.mxu1 %vm4452_vm2, %v16943_v20  ;;  %12319 = vmatpush.msk.msra.mxu2 %vm4452_vm2, %v7061_v3  ;;  %v7057_v40 = vsel %vm5125_vm6, %v13065_v25, %v13066_v5  ;;  %v7058_v21 = vsel %vm5125_vm6, %v13066_v5, %v13070_v27  ;;  %v7059_v50 = vsel %vm5125_vm6, %v13070_v27, %v13071_v58  ;;  %v12318_v3 = vld [vmem:[%s18976_s13 + $0x40] sm:$0x3] }
 0x894   : > { %12289 = vmatmul.msk.f32.vlgmr.msrb.gmra.mxu3 %vm4445_vm3, %v12273_v49  ;;  %v7060_v48 = vsel %vm5125_vm6, %v13071_v58, %v7046_v55 }
 0x895   : > { %7022 = vmatpush.msrb.mxu1 %v16908_v23  ;;  %7104 = vmatpush.msra.mxu2 %v7057_v40 }
 0x896   : > { %12282 = vmatmul.msk.f32.gmra.mxu1 %vm4445_vm3, %v12274_v4  ;;  %12293 = vmatmul.msk.f32.vlgmr.msra.gmra.mxu0 %vm4445_vm3, %v12273_v49  ;;  %v7258_v49 = vsel %vm1538_vm5, %v13075_v43, %v13076_v61 }
 0x897   : > { %12286 = vmatmul.msk.f32.gmra.mxu2 %vm4445_vm3, %v12274_v4  ;;  %v7052_v51 = vpop.permute.xlu1 %7051  ;;  %v7255_v13 = vpop.permute.xlu2 %7254 }
 0x898   : > { %8092 = vrot.lane.b32.xlu0 %v17040_v28, %s19353_s2  ;;  %v7054_v12 = vpop.permute.xlu0 %7053  ;;  %v7062_v11 = vsel %vm5125_vm6, %v7050_v7, %v7052_v51 }
 0x899   : > { %v7063_v6 = vsel %vm5125_vm6, %v7052_v51, %v7054_v12  ;;  %12323 = vmatpush.msk.msrb.mxu3 %vm4452_vm2, %v7062_v11 }
 0x89a   : > { %12327 = vmatpush.msk.msra.mxu0 %vm4452_vm2, %v7063_v6 }
 0x89b   : > { %7130 = vmatpush.msrb.mxu3 %v7058_v21  ;;  %v12339_v21 = vld [vmem:[%s18976_s13 + $0x48] sm:$0xff] }
 0x89c   : > { %12290 = vmatmul.msk.f32.gmra.mxu3 %vm4445_vm3, %v12274_v4  ;;  %7156 = vmatpush.msra.mxu0 %v7059_v50 }
 0x89e   : > { %12283 = vmatmul.msk.f32.gmra.mxu1 %vm4445_vm3, %v12275_v45  ;;  %12294 = vmatmul.msk.f32.gmra.mxu0 %vm4445_vm3, %v12274_v4 }
 0x89f   : > { %12287 = vmatmul.msk.f32.gmra.mxu2 %vm4445_vm3, %v12275_v45  ;;  %v7056_v17 = vpop.permute.xlu1 %7055  ;;  %v7450_v62 = vpop.permute.xlu2 %7449 }
 0x8a0   : > { %v7249_v20 = vpop.permute.xlu0 %7248  ;;  %v7064_v30 = vsel %vm5125_vm6, %v7054_v12, %v7056_v17 }
 0x8a4   : > { %12291 = vmatmul.msk.f32.gmra.mxu3 %vm4445_vm3, %v12275_v45 }
 0x8a6   : > { %12295 = vmatmul.msk.f32.gmra.mxu0 %vm4445_vm3, %v12275_v45  ;;  %12297 = vmatmul.msk.f32.vlgmr.msra.gmra.mxu1 %vm4445_vm3, %v6675_v41 }
 0x8a7   : > { %12301 = vmatmul.msk.f32.vlgmr.msrb.gmra.mxu2 %vm4445_vm3, %v6675_v41  ;;  %12331 = vmatpush.msk.msra.mxu1 %vm4452_vm2, %v7064_v30  ;;  %v7251_v8 = vpop.permute.xlu1 %7250  ;;  %v7454_v36 = vpop.permute.xlu2 %7453  ;;  %v12340_v30 = vld [vmem:[%s18976_s13 + $0x50] sm:$0xff] }
 0x8a8   : > { %12335 = vmatpush.msk.msrb.mxu2 %vm4452_vm2, %v7056_v17  ;;  %v7262_v53 = vsel %vm1538_vm5, %v7249_v20, %v7251_v8  ;;  %v7253_v9 = vpop.permute.xlu0 %7252 }
 0x8a9   : > { %7182 = vmatpush.msra.mxu1 %v7060_v48  ;;  %v7263_v35 = vsel %vm1538_vm5, %v7251_v8, %v7253_v9  ;;  %v7264_v4 = vsel %vm1538_vm5, %v7253_v9, %v7255_v13  ;;  %v12341_v48 = vld [vmem:[%s18976_s13 + $0x58] sm:$0x3] }
 0x8aa   : > { %7208 = vmatpush.msrb.mxu2 %v7046_v55 }
 0x8ac   : > { %12305 = vmatmul.msk.f32.vlgmr.msra.gmra.mxu3 %vm4445_vm3, %v6675_v41 }
 0x8ad   : > { %12342 = vmatpush.msk.msra.mxu3 %vm4452_vm2, %v7262_v53 }
 0x8ae   : > { %12298 = vmatmul.msk.f32.gmra.mxu1 %vm4445_vm3, %v6676_v52  ;;  %12309 = vmatmul.msk.f32.vlgmr.msrb.gmra.mxu0 %vm4445_vm3, %v6675_v41 }
 0x8af   : > { %12302 = vmatmul.msk.f32.gmra.mxu2 %vm4445_vm3, %v6676_v52  ;;  %7305 = vmatpush.msra.mxu3 %v7258_v49  ;;  %v13079_v54 = vpop.permute.xlu1 %13078  ;;  %v7458_v27 = vpop.permute.xlu2 %7457 }
 0x8b0   : > { %12346 = vmatpush.msk.msrb.mxu0 %vm4452_vm2, %v7263_v35  ;;  %v13080_v18 = vunpack.i.l.bf16 %v13079_v54  ;;  %v7257_v26 = vpop.permute.xlu0 %7256  ;;  %v13081_v56 = vunpack.i.h.bf16 %v13079_v54 }
 0x8b1   : > { %v7265_v46 = vsel %vm1538_vm5, %v7255_v13, %v7257_v26 }
 0x8b2   : > { %v7259_v2 = vsel %vm1538_vm5, %v13076_v61, %v13080_v18  ;;  %v7260_v7 = vsel %vm1538_vm5, %v13080_v18, %v13081_v56 }
 0x8b3   : > { %7331 = vmatpush.msrb.mxu0 %v7259_v2  ;;  %v17219_v2 = vld [vmem:[%s18976_s13 + $0x60] sm:$0xff] }
 0x8b4   : > { %12306 = vmatmul.msk.f32.gmra.mxu3 %vm4445_vm3, %v6676_v52 }
 0x8b6   : > { %12299 = vmatmul.msk.f32.gmra.mxu1 %vm4445_vm3, %v6677_v10  ;;  %12310 = vmatmul.msk.f32.gmra.mxu0 %vm4445_vm3, %v6676_v52 }
 0x8b7   : > { %12303 = vmatmul.msk.f32.gmra.mxu2 %vm4445_vm3, %v6677_v10  ;;  %v7247_v60 = vpop.permute.xlu1 %7246  ;;  %v7655_v20 = vpop.permute.xlu2 %7654 }
 0x8b8   : > { %v7261_v34 = vsel %vm1538_vm5, %v13081_v56, %v7247_v60  ;;  %v7452_v16 = vpop.permute.xlu0 %7451 }
 0x8b9   : > { %v7463_v45 = vsel %vm1778_vm7, %v7450_v62, %v7452_v16  ;;  %v7464_v58 = vsel %vm1778_vm7, %v7452_v16, %v7454_v36  ;;  %v17238_v62 = vld [vmem:[%s18976_s13 + $0x68] sm:$0xff]  ;;  %v19358_v16 = vld [vmem:[#allocation53_spill] sm:$0xff] }
 0x8bc   : > { %12307 = vmatmul.msk.f32.gmra.mxu3 %vm4445_vm3, %v6677_v10 }
 0x8be   : > { %12311 = vmatmul.msk.f32.gmra.mxu0 %vm4445_vm3, %v6677_v10  ;;  %12313 = vmatmul.msk.f32.vlgmr.msrb.gmra.mxu1 %vm4445_vm3, %v6675_v41 }
 0x8bf   : > { %12320 = vmatmul.msk.f32.vlgmr.msra.gmra.mxu2 %vm4445_vm3, %v12316_v29  ;;  %12350 = vmatpush.msk.msrb.mxu1 %vm4452_vm2, %v7264_v4  ;;  %v13084_v32 = vpop.permute.xlu1 %13083  ;;  %v13099_v8 = vpop.permute.xlu2 %13098  ;;  %v19356_v4 = vld [vmem:[#allocation13_spill] sm:$0xff] }
 0x8c0   : > { %12354 = vmatpush.msk.msra.mxu2 %vm4452_vm2, %v7265_v46  ;;  %v13086_v1 = vunpack.i.h.bf16 %v13084_v32  ;;  %v13085_v57 = vunpack.i.l.bf16 %v13084_v32  ;;  %v7456_v5 = vpop.permute.xlu0 %7455 }
 0x8c1   : > { %7357 = vmatpush.msrb.mxu1 %v7260_v7  ;;  %v7465_v51 = vsel %vm1778_vm7, %v7454_v36, %v7456_v5  ;;  %v7466_v50 = vsel %vm1778_vm7, %v7456_v5, %v7458_v27  ;;  %v19361_v36 = vld [vmem:[#allocation29_spill] sm:$0xff] }
 0x8c2   : > { %7383 = vmatpush.msra.mxu2 %v7261_v34  ;;  %v7459_v38 = vsel %vm1778_vm7, %v13085_v57, %v13086_v1  ;;  %v19357_v34 = vld [vmem:[#allocation17_spill] sm:$0xff]  ;;  %v19359_v57 = vld [vmem:[#allocation52_spill] sm:$0xff] }
 0x8c4   : > { %12324 = vmatmul.msk.f32.vlgmr.msrb.gmra.mxu3 %vm4445_vm3, %v12316_v29 }
 0x8c5   : > { %12358 = vmatpush.msk.msrb.mxu3 %vm4452_vm2, %v7257_v26 }
 0x8c6   : > { %12314 = vmatmul.msk.f32.gmra.mxu1 %vm4445_vm3, %v6676_v52  ;;  %12328 = vmatmul.msk.f32.vlgmr.msra.gmra.mxu0 %vm4445_vm3, %v12316_v29  ;;  %v13101_v52 = vunpack.i.h.bf16 %v13099_v8 }
 0x8c7   : > { %12321 = vmatmul.msk.f32.gmra.mxu2 %vm4445_vm3, %v12317_v44  ;;  %7409 = vmatpush.msrb.mxu3 %v7247_v60  ;;  %v13089_v25 = vpop.permute.xlu1 %13088  ;;  %v7649_v13 = vpop.permute.xlu2 %7648 }
 0x8c8   : > { %12365 = vmatpush.msk.msra.mxu0 %vm4452_vm2, %v7463_v45  ;;  %v13090_v59 = vunpack.i.l.bf16 %v13089_v25  ;;  %v13091_v40 = vunpack.i.h.bf16 %v13089_v25  ;;  %v7448_v12 = vpop.permute.xlu0 %7447  ;;  %v19362_v25 = vld [vmem:[#allocation41_spill] sm:$0xff] }
 0x8ca   : > { %7506 = vmatpush.msra.mxu0 %v7459_v38  ;;  %v7460_v11 = vsel %vm1778_vm7, %v13086_v1, %v13090_v59  ;;  %v7461_v6 = vsel %vm1778_vm7, %v13090_v59, %v13091_v40  ;;  %v7462_v55 = vsel %vm1778_vm7, %v13091_v40, %v7448_v12  ;;  %vm6666_vm7 = vcmask 351232  }
 0x8cc   : > { %12325 = vmatmul.msk.f32.gmra.mxu3 %vm4445_vm3, %v12317_v44 }
 0x8ce   : > { %12315 = vmatmul.msk.f32.gmra.mxu1 %vm4445_vm3, %v6677_v10  ;;  %12329 = vmatmul.msk.f32.gmra.mxu0 %vm4445_vm3, %v12317_v44  ;;  %v13100_v10 = vunpack.i.l.bf16 %v13099_v8 }
 0x8cf   : > { %12322 = vmatmul.msk.f32.gmra.mxu2 %vm4445_vm3, %v12318_v3  ;;  %v7653_v17 = vpop.permute.xlu1 %7652  ;;  %v13104_v40 = vpop.permute.xlu2 %13103 }
 0x8d0   : > { %v13094_v41 = vpop.permute.xlu0 %13093  ;;  %v7665_v49 = vsel %vm5759_vm9, %v7653_v17, %v7655_v20  ;;  %v7663_v7 = vsel %vm5759_vm9, %v13100_v10, %v7649_v13 }
 0x8d1   : > { %v13095_v43 = vunpack.i.l.bf16 %v13094_v41  ;;  %v13096_v53 = vunpack.i.h.bf16 %v13094_v41  ;;  %v19366_v41 = vld [vmem:[#allocation28_spill] sm:$0xff] }
 0x8d3   : > { %v7660_v35 = vsel %vm5759_vm9, %v13101_v52, %v13095_v43  ;;  %v7661_v54 = vsel %vm5759_vm9, %v13095_v43, %v13096_v53  ;;  %v7662_v26 = vsel %vm5759_vm9, %v13096_v53, %v13100_v10 }
 0x8d4   : > { %12326 = vmatmul.msk.f32.gmra.mxu3 %vm4445_vm3, %v12318_v3 }
 0x8d6   : > { %12330 = vmatmul.msk.f32.gmra.mxu0 %vm4445_vm3, %v12318_v3  ;;  %12332 = vmatmul.msk.f32.vlgmr.msra.gmra.mxu1 %vm4445_vm3, %v12316_v29 }
 0x8d7   : > { %12336 = vmatmul.msk.f32.vlgmr.msrb.gmra.mxu2 %vm4445_vm3, %v12316_v29  ;;  %12369 = vmatpush.msk.msra.mxu1 %vm4452_vm2, %v7464_v58  ;;  %v7657_v39 = vpop.permute.xlu1 %7656  ;;  %v19355_v29 = vld [vmem:[#allocation36_spill] sm:$0xff]  ;;  %v19363_v58 = vld [vmem:[#allocation23_spill] sm:$0xff] }
 0x8d8   : > { %12373 = vmatpush.msk.msrb.mxu2 %vm4452_vm2, %v7465_v51  ;;  %v7651_v61 = vpop.permute.xlu0 %7650  ;;  %v7666_v60 = vsel %vm5759_vm9, %v7655_v20, %v7657_v39  ;;  %v5093_v46 = vadd.f32 %v19356_v4, %v19355_v29  ;;  %v19364_v51 = vld [vmem:[#allocation27_spill] sm:$0xff] }
 0x8d9   : > { %7532 = vmatpush.msra.mxu1 %v7460_v11  ;;  %v7664_v9 = vsel %vm5759_vm9, %v7651_v61, %v7653_v17  ;;  %v17255_v11 = vld [vmem:[%s18976_s13 + $0x70] sm:$0x3]  ;;  %v13105_v17 = vunpack.i.l.bf16 %v13104_v40 }
 0x8da   : > { %7558 = vmatpush.msrb.mxu2 %v7461_v6  ;;  %v5303_v32 = vadd.f32 %v19357_v34, %v5093_v46  ;;  %v19365_v6 = vld [vmem:[#allocation34_spill] sm:$0xff] }
 0x8dc   : > { %12343 = vmatmul.msk.f32.vlgmr.msra.gmra.mxu3 %vm4445_vm3, %v12339_v21 }
 0x8dd   : > { %12377 = vmatpush.msk.msra.mxu3 %vm4452_vm2, %v7466_v50 }
 0x8de   : > { %12333 = vmatmul.msk.f32.gmra.mxu1 %vm4445_vm3, %v12317_v44  ;;  %12347 = vmatmul.msk.f32.vlgmr.msrb.gmra.mxu0 %vm4445_vm3, %v12339_v21 }
 0x8df   : > { %12337 = vmatmul.msk.f32.gmra.mxu2 %vm4445_vm3, %v12317_v44  ;;  %7584 = vmatpush.msra.mxu3 %v7462_v55  ;;  %v7659_v18 = vpop.permute.xlu1 %7658  ;;  %v5514_v44 = vadd.f32 %v19358_v16, %v5303_v32  ;;  %v13106_v55 = vunpack.i.h.bf16 %v13104_v40  ;;  %v12385_v32 = vld [vmem:[%s18976_s13 + $0x78] sm:$0xff]  ;;  %v17383_v40 = vld [vmem:[%s18976_s13 + $0x90] sm:$0xff] }
 0x8e0   : > { %12381 = vmatpush.msk.msrb.mxu0 %vm4452_vm2, %v7458_v27  ;;  %v7667_v56 = vsel %vm5759_vm9, %v7657_v39, %v7659_v18  ;;  %v7878_v38 = vpop.permute.xlu0 %7877  ;;  %vm9224_vm9 = vcmask 982016  }
 0x8e1   : > { %v5725_v45 = vadd.f32 %v19359_v57, %v5514_v44  ;;  %v7889_v52 = vsel %vm6003_vm10, %v13105_v17, %v13106_v55  ;;  %v12386_v57 = vld [vmem:[%s18976_s13 + $0x80] sm:$0xff] }
 0x8e2   : > { %7610 = vmatpush.msrb.mxu0 %v7448_v12 }
 0x8e3   : > { %v5937_v59 = vadd.f32 %v19362_v25, %v5725_v45  ;;  %v8498_v25 = vld [vmem:[%s18977_s14 + $0x8] sm:$0xff] }
 0x8e4   : > { %12344 = vmatmul.msk.f32.gmra.mxu3 %vm4445_vm3, %v12340_v30 }
 0x8e5   : > { %v6183_v12 = vadd.f32 %v19364_v51, %v5937_v59 }
 0x8e6   : > { %12334 = vmatmul.msk.f32.gmra.mxu1 %vm4445_vm3, %v12318_v3  ;;  %12348 = vmatmul.msk.f32.gmra.mxu0 %vm4445_vm3, %v12340_v30 }
 0x8e7   : > { %12338 = vmatmul.msk.f32.gmra.mxu2 %vm4445_vm3, %v12318_v3  ;;  %v7880_v1 = vpop.permute.xlu1 %7879  ;;  %v19360_v3 = vld [vmem:[#allocation8_spill] sm:$0xff]  ;;  %v6401_v50 = vadd.f32 %v16838_v22, %v6183_v12  ;;  %v17406_v12 = vld [vmem:[%s18976_s13 + $0x98] sm:$0xff] }
 0x8e8   : > { %v5096_v5 = vadd.f32 %v19361_v36, %v19360_v3  ;;  %v7894_v39 = vsel %vm6003_vm10, %v7878_v38, %v7880_v1  ;;  %v7882_v43 = vpop.permute.xlu0 %7881 }
 0x8ea   : > { %v5309_v27 = vadd.f32 %v19363_v58, %v5096_v5  ;;  %v8531_v58 = vld [vmem:[%s18978_s15 + $0x8] sm:$0xff] }
 0x8ec   : > { %12345 = vmatmul.msk.f32.gmra.mxu3 %vm4445_vm3, %v12341_v48 }
 0x8ee   : > { %12349 = vmatmul.msk.f32.gmra.mxu0 %vm4445_vm3, %v12341_v48  ;;  %12351 = vmatmul.msk.f32.vlgmr.msrb.gmra.mxu1 %vm4445_vm3, %v12339_v21 }
 0x8ef   : > { %12355 = vmatmul.msk.f32.vlgmr.msra.gmra.mxu2 %vm4445_vm3, %v12339_v21  ;;  %12388 = vmatpush.msk.msrb.mxu1 %vm4452_vm2, %v7664_v9  ;;  %v17266_v8 = vpop.permute.xlu1 %13108 }
 0x8f0   : > { %12392 = vmatpush.msk.msra.mxu2 %vm4452_vm2, %v7665_v49  ;;  %v13110_v9 = vunpack.i.l.bf16 %v17266_v8  ;;  %v19368_v49 = vld [vmem:[#allocation42_spill] sm:$0xff] }
 0x8f1   : > { %7707 = vmatpush.msrb.mxu1 %v7660_v35 }
 0x8f2   : > { %7733 = vmatpush.msra.mxu2 %v7661_v54 }
 0x8f4   : > { %12359 = vmatmul.msk.f32.vlgmr.msrb.gmra.mxu3 %vm4445_vm3, %v12339_v21  ;;  %v5520_v21 = vadd.f32 %v19365_v6, %v5309_v27 }
 0x8f5   : > { %12396 = vmatpush.msk.msrb.mxu3 %vm4452_vm2, %v7666_v60  ;;  %v13111_v60 = vunpack.i.h.bf16 %v17266_v8 }
 0x8f6   : > { %12352 = vmatmul.msk.f32.gmra.mxu1 %vm4445_vm3, %v12340_v30  ;;  %12366 = vmatmul.msk.f32.vlgmr.msra.gmra.mxu0 %vm4445_vm3, %v17219_v2 }
 0x8f7   : > { %12356 = vmatmul.msk.f32.gmra.mxu2 %vm4445_vm3, %v12340_v30  ;;  %7759 = vmatpush.msrb.mxu3 %v7662_v26  ;;  %v7891_v4 = vsel %vm6003_vm10, %v13110_v9, %v13111_v60 }
 0x8f8   : > { %12400 = vmatpush.msk.msra.mxu0 %vm4452_vm2, %v7667_v56 }
 0x8fa   : > { %7785 = vmatpush.msra.mxu0 %v7663_v7  ;;  %v17296_v46 = vpop.f32.mrf.mxu0 }
 0x8fc   : > { %12360 = vmatmul.msk.f32.gmra.mxu3 %vm4445_vm3, %v12340_v30  ;;  %v5731_v30 = vadd.f32 %v19366_v41, %v5520_v21 }
 0x8fe   : > { %12353 = vmatmul.msk.f32.gmra.mxu1 %vm4445_vm3, %v12341_v48  ;;  %12367 = vmatmul.msk.f32.gmra.mxu0 %vm4445_vm3, %v17238_v62 }
 0x8ff   : > { %12357 = vmatmul.msk.f32.gmra.mxu2 %vm4445_vm3, %v12341_v48 }
 0x902   : > { %v17318_v16 = vpop.f32.mrf.mxu0 }
 0x904   : > { %12361 = vmatmul.msk.f32.gmra.mxu3 %vm4445_vm3, %v12341_v48  ;;  %v19367_v48 = vld [vmem:[#allocation15_spill] sm:$0xff] }
 0x905   : > { %v6607_v20 = vpop.f32.mrf.mxu3  ;;  %v5943_v61 = vadd.f32 %v19367_v48, %v5731_v30 }
 0x906   : > { %12368 = vmatmul.msk.f32.gmra.mxu0 %vm4445_vm3, %v17255_v11  ;;  %12370 = vmatmul.msk.f32.vlgmr.msra.gmra.mxu1 %vm4445_vm3, %v17219_v2  ;;  %v6618_v22 = vadd.f32 %v6607_v20, %v6401_v50 }
 0x907   : > { %12374 = vmatmul.msk.f32.vlgmr.msrb.gmra.mxu2 %vm4445_vm3, %v17219_v2  ;;  %12404 = vmatpush.msk.msra.mxu1 %vm4452_vm2, %v7659_v18  ;;  %v6189_v35 = vadd.f32 %v19368_v49, %v5943_v61  ;;  %v7895_v18 = vsel %vm6003_vm10, %v7880_v1, %v7882_v43  ;;  %v8530_v61 = vld [vmem:[%s18978_s15] sm:$0xff] }
 0x908   : > { %12411 = vmatpush.msk.msrb.mxu2 %vm4452_vm2, %v7894_v39  ;;  %v6642_v53 = vadd.f32 %v16628_v14, %v6618_v22  ;;  %v7884_v14 = vpop.permute.xlu2 %7883  ;;  %v8532_v39 = vld [vmem:[%s18978_s15 + $0x10] sm:$0x3] }
 0x909   : > { %7811 = vmatpush.msra.mxu1 %v7649_v13  ;;  %v6407_v10 = vadd.f32 %v16863_v33, %v6189_v35  ;;  %v7890_v13 = vsel %vm6003_vm10, %v13106_v55, %v13110_v9  ;;  %v7896_v56 = vsel %vm6003_vm10, %v7882_v43, %v7884_v14 }
 0x90a   : > { %7938 = vmatpush.msrb.mxu2 %v7889_v52  ;;  %v6654_v54 = vmax.f32 %v6642_v53, 0.0  ;;  %v17330_v1 = vpop.f32.mrf.mxu1 }
 0x90b   : > { %v17344_v45 = vpop.f32.mrf.mxu0 }
 0x90c   : > { %12378 = vmatmul.msk.f32.vlgmr.msra.gmra.mxu3 %vm4445_vm3, %v17219_v2  ;;  %6667 = vst.msk [vmem:[#allocation4 + $0x28] sm:$0xff] %vm6666_vm7, %v6654_v54  ;;  %vm9977_vm7 = vcmask 97280  }
 0x90d   : > { %12415 = vmatpush.msk.msra.mxu3 %vm4452_vm2, %v7895_v18  ;;  %v6610_v26 = vpop.f32.mrf.mxu3 }
 0x90e   : > { %12371 = vmatmul.msk.f32.gmra.mxu1 %vm4445_vm3, %v17238_v62  ;;  %12382 = vmatmul.msk.f32.vlgmr.msrb.gmra.mxu0 %vm4445_vm3, %v17219_v2  ;;  %v6624_v33 = vadd.f32 %v6610_v26, %v6407_v10 }
 0x90f   : > { %12375 = vmatmul.msk.f32.gmra.mxu2 %vm4445_vm3, %v17238_v62  ;;  %7964 = vmatpush.msra.mxu3 %v7890_v13 }
 0x910   : > { %12419 = vmatpush.msk.msrb.mxu0 %vm4452_vm2, %v7896_v56  ;;  %v6648_v29 = vadd.f32 %v16869_v42, %v6624_v33  ;;  %v17313_v42 = vpop.permute.xlu0 %7885 }
 0x911   : > { %v17348_v38 = vpop.f32.mrf.mxu2 }
 0x912   : > { %7990 = vmatpush.msrb.mxu0 %v7891_v4  ;;  %v6660_v2 = vmax.f32 %v6648_v29, 0.0 }
 0x913   : > { %v17300_v7 = vld [vmem:[#allocation4 + $0x28] sm:$0xff]  ;;  %v17365_v3 = vpop.f32.mrf.mxu0 }
 0x914   : > { %12379 = vmatmul.msk.f32.gmra.mxu3 %vm4445_vm3, %v17238_v62  ;;  %6674 = vst.msk [vmem:[#allocation4 + $0x68] sm:$0x3f] %vm6673_vm13, %v6660_v2  ;;  %v13112_v34 = vpack.i.bf16 %v17300_v7, %v16908_v23  ;;  %8082 = vrot.lane.b32.xlu0 %v17300_v7, %s19353_s2  ;;  %vm10369_vm13 = vcmask 889856  }
 0x916   : > { %12372 = vmatmul.msk.f32.gmra.mxu1 %vm4445_vm3, %v17255_v11  ;;  %12383 = vmatmul.msk.f32.gmra.mxu0 %vm4445_vm3, %v17238_v62  ;;  %v7897_v62 = vsel %vm6003_vm10, %v7884_v14, %v17313_v42 }
 0x917   : > { %12376 = vmatmul.msk.f32.gmra.mxu2 %vm4445_vm3, %v17255_v11  ;;  %13113 = vrot.lane.b32.xlu2 %v13112_v34, %s19349_s8  ;;  %v17368_v36 = vpop.f32.mrf.mxu3 }
 0x918   : > { %v8085_v33 = vpop.permute.xlu0 %8084 }
 0x91a   : > { %v17370_v5 = vpop.f32.mrf.mxu2 }
 0x91b   : > { %v7852_v44 = vld [vmem:[#allocation4 + $0x68] sm:$0x3f] }
 0x91c   : > { %12380 = vmatmul.msk.f32.gmra.mxu3 %vm4445_vm3, %v17255_v11  ;;  %13128 = vrot.lane.b32.xlu0 %v16924_v0, %s19287_s9 }
 0x91d   : > { %7887 = vrot.lane.b32.xlu1 %v7852_v44, %s19349_s8 }
 0x91e   : > { %12384 = vmatmul.msk.f32.gmra.mxu0 %vm4445_vm3, %v17255_v11  ;;  %12389 = vmatmul.msk.f32.vlgmr.msrb.gmra.mxu1 %vm4445_vm3, %v12385_v32 }
 0x91f   : > { %12393 = vmatmul.msk.f32.vlgmr.msra.gmra.mxu2 %vm4445_vm3, %v12385_v32  ;;  %12423 = vmatpush.msk.msrb.mxu1 %vm4452_vm2, %v7897_v62  ;;  %v17397_v27 = vpop.f32.mrf.mxu3 }
 0x920   : > { %13118 = vrot.lane.b32.xlu2 %v16924_v0, %s19353_s2  ;;  %v17353_v0 = vpop.f32.mrf.mxu1 }
 0x922   : > { %v17399_v51 = vpop.f32.mrf.mxu2 }
 0x924   : > { %12397 = vmatmul.msk.f32.vlgmr.msrb.gmra.mxu3 %vm4445_vm3, %v12385_v32  ;;  %13133 = vrot.lane.b32.xlu0 %v16941_v31, %s19287_s9  ;;  %v12387_v31 = vld [vmem:[%s18976_s13 + $0x88] sm:$0x3] }
 0x925   : > { %8086 = vrot.lane.b32.xlu1 %v17021_v47, %s19353_s2 }
 0x926   : > { %12390 = vmatmul.msk.f32.gmra.mxu1 %vm4445_vm3, %v12386_v57  ;;  %12401 = vmatmul.msk.f32.vlgmr.msra.gmra.mxu0 %vm4445_vm3, %v12385_v32 }
 0x927   : > { %12394 = vmatmul.msk.f32.gmra.mxu2 %vm4445_vm3, %v12386_v57  ;;  %v17428_v6 = vpop.f32.mrf.mxu3 }
 0x928   : > { %8090 = vrot.lane.b32.xlu2 %v17047_v15, %s19353_s2  ;;  %v17375_v59 = vpop.f32.mrf.mxu1 }
 0x92a   : > { %v17430_v21 = vpop.f32.mrf.mxu2 }
 0x92c   : > { %12398 = vmatmul.msk.f32.gmra.mxu3 %vm4445_vm3, %v12386_v57  ;;  %8301 = vrot.lane.b32.xlu0 %v7852_v44, %s19287_s9 }
 0x92d   : > { %8076 = vrot.lane.b32.xlu1 %v16902_v63, %s19353_s2  ;;  %v13122_v63 = vpack.i.bf16 %v16908_v23, %v16906_v37  ;;  %v17392_v37 = vpop.f32.mrf.mxu0 }
 0x92e   : > { %12391 = vmatmul.msk.f32.gmra.mxu1 %vm4445_vm3, %v12387_v31  ;;  %12402 = vmatmul.msk.f32.gmra.mxu0 %vm4445_vm3, %v12386_v57 }
 0x92f   : > { %12395 = vmatmul.msk.f32.gmra.mxu2 %vm4445_vm3, %v12387_v31  ;;  %v17454_v55 = vpop.f32.mrf.mxu3 }
 0x930   : > { %8094 = vrot.lane.b32.xlu2 %v7852_v44, %s19353_s2  ;;  %v17408_v11 = vpop.f32.mrf.mxu1 }
 0x932   : > { %v17456_v17 = vpop.f32.mrf.mxu2 }
 0x934   : > { %12399 = vmatmul.msk.f32.gmra.mxu3 %vm4445_vm3, %v12387_v31  ;;  %8507 = vperm.xlu0 %12769, %v8498_v25  }
 0x935   : > { %13123 = vrot.lane.b32.xlu1 %v13122_v63, %s19353_s2  ;;  %s13377_s2 = smov 12  }
 0x936   : > { %12403 = vmatmul.msk.f32.gmra.mxu0 %vm4445_vm3, %v12387_v31  ;;  %12405 = vmatmul.msk.f32.vlgmr.msra.gmra.mxu1 %vm4445_vm3, %v12385_v32 }
 0x937   : > { %12412 = vmatmul.msk.f32.vlgmr.msrb.gmra.mxu2 %vm4445_vm3, %v17383_v40  ;;  %v17467_v41 = vpop.f32.mrf.mxu3 }
 0x938   : > { %8293 = vrot.lane.b32.xlu2 %v17021_v47, %s19287_s9  ;;  %v17419_v47 = vpop.f32.mrf.mxu0 }
 0x93a   : > { %v17469_v30 = vpop.f32.mrf.mxu2 }
 0x93c   : > { %12416 = vmatmul.msk.f32.vlgmr.msra.gmra.mxu3 %vm4445_vm3, %v17383_v40  ;;  %8540 = vperm.xlu0 %12769, %v8531_v58  }
 0x93d   : > { %8291 = vrot.lane.b32.xlu1 %v17013_v24, %s19287_s9  ;;  %v17426_v24 = vld [vmem:[%s18976_s13 + $0xa0] sm:$0x3] }
 0x93e   : > { %12406 = vmatmul.msk.f32.gmra.mxu1 %vm4445_vm3, %v12386_v57  ;;  %12420 = vmatmul.msk.f32.vlgmr.msrb.gmra.mxu0 %vm4445_vm3, %v17383_v40 }
 0x93f   : > { %12413 = vmatmul.msk.f32.gmra.mxu2 %vm4445_vm3, %v17406_v12  ;;  %v17481_v43 = vpop.f32.mrf.mxu3 }
 0x940   : > { %8297 = vrot.lane.b32.xlu2 %v17047_v15, %s19287_s9  ;;  %v17437_v15 = vpop.f32.mrf.mxu1  ;;  %v17450_v50 = vpop.f32.mrf.mxu0 }
 0x942   : > { %v17483_v53 = vpop.f32.mrf.mxu2 }
 0x944   : > { %12417 = vmatmul.msk.f32.gmra.mxu3 %vm4445_vm3, %v17406_v12 }
 0x945   : > { %8295 = vrot.lane.b32.xlu1 %v17023_v19, %s19287_s9  ;;  %v8499_v19 = vld [vmem:[%s18977_s14 + $0x10] sm:$0x3] }
 0x946   : > { %12407 = vmatmul.msk.f32.gmra.mxu1 %vm4445_vm3, %v12387_v31  ;;  %12421 = vmatmul.msk.f32.gmra.mxu0 %vm4445_vm3, %v17406_v12 }
 0x947   : > { %12414 = vmatmul.msk.f32.gmra.mxu2 %vm4445_vm3, %v17426_v24  ;;  %v17489_v49 = vpop.f32.mrf.mxu3 }
 0x948   : > { %8287 = vrot.lane.b32.xlu2 %v16908_v23, %s19287_s9  ;;  %v17458_v23 = vpop.f32.mrf.mxu1  ;;  %v17465_v20 = vpop.f32.mrf.mxu0 }
 0x94a   : > { %v17491_v35 = vpop.f32.mrf.mxu2 }
 0x94c   : > { %12418 = vmatmul.msk.f32.gmra.mxu3 %vm4445_vm3, %v17426_v24 }
 0x94d   : > { %8299 = vrot.lane.b32.xlu1 %v17040_v28, %s19287_s9  ;;  %v8497_v28 = vld [vmem:[%s18977_s14] sm:$0xff] }
 0x94e   : > { %12422 = vmatmul.msk.f32.gmra.mxu0 %vm4445_vm3, %v17426_v24 }
 0x94f   : > { %v17502_v26 = vpop.f32.mrf.mxu3 }
 0x950   : > { %8512 = vperm.xlu2 %12771, %v8499_v19   ;;  %v17474_v22 = vpop.f32.mrf.mxu1  ;;  %v17476_v48 = vpop.f32.mrf.mxu0 }
 0x952   : > { %v17504_v56 = vpop.f32.mrf.mxu2 }
 0x955   : > { %8289 = vrot.lane.b32.xlu1 %v17300_v7, %s19287_s9  ;;  %v8089_v7 = vpop.permute.xlu0 %8088 }
 0x958   : > { %8502 = vperm.xlu2 %12771, %v8497_v28   ;;  %v17485_v52 = vpop.f32.mrf.mxu1  ;;  %v17487_v9 = vpop.f32.mrf.mxu0 }
 0x95a   : > { %v17514_v2 = vpop.f32.mrf.mxu2 }
 0x95b   : > { %19370 = vst [vmem:[#allocation45_spill] sm:$0xff] %v17514_v2 }
 0x95d   : > { %8545 = vperm.xlu1 %12770, %v8532_v39   ;;  %v8093_v39 = vpop.permute.xlu0 %8092 }
 0x960   : > { %v17493_v54 = vpop.f32.mrf.mxu1  ;;  %v17498_v13 = vpop.f32.mrf.mxu0 }
 0x962   : > { %v17526_v31 = vpop.f32.mrf.mxu2 }
 0x963   : > { %19373 = vst [vmem:[#allocation30_spill] sm:$0xff] %v17526_v31 }
 0x965   : > { %8535 = vperm.xlu1 %12770, %v8530_v61  }
 0x968   : > { %v17506_v29 = vpop.f32.mrf.mxu1  ;;  %v17510_v8 = vpop.f32.mrf.mxu0 }
 0x970   : > { %v17516_v32 = vpop.f32.mrf.mxu1  ;;  %v17522_v62 = vpop.f32.mrf.mxu0 }
 0x971   : > { %v13114_v18 = vpop.permute.xlu2 %13113  ;;  %19371 = vst [vmem:[#allocation26_spill] sm:$0xff] %v17516_v32 }
 0x972   : > { %v13115_v10 = vunpack.i.l.bf16 %v13114_v18  ;;  %v13116_v63 = vunpack.i.h.bf16 %v13114_v18 }
 0x974   : > { %v7892_v14 = vsel %vm6003_vm10, %v13111_v60, %v13115_v10  ;;  %v17512_v60 = vpop.f32.mrf.mxu3  ;;  %v7893_v28 = vsel %vm6003_vm10, %v13115_v10, %v13116_v63 }
 0x975   : > { %8016 = vmatpush.msrb.mxu1 %v7892_v14  ;;  %19369 = vst [vmem:[#allocation33_spill] sm:$0xff] %v17512_v60 }
 0x976   : > { %12424 = vmatmul.msk.f32.vlgmr.msrb.gmra.mxu1 %vm4445_vm3, %v17383_v40 }
 0x978   : > { %v17528_v25 = vpop.f32.mrf.mxu1  ;;  %v17534_v61 = vpop.f32.mrf.mxu0 }
 0x979   : > { %19374 = vst [vmem:[#allocation46_spill] sm:$0xff] %v17528_v25 }
 0x97a   : > { %v13119_v4 = vpop.permute.xlu2 %13118 }
 0x97b   : > { %v13121_v18 = vunpack.i.h.bf16 %v13119_v4 }
 0x97c   : > { %v17524_v57 = vpop.f32.mrf.mxu3 }
 0x97d   : > { %19372 = vst [vmem:[#allocation20_spill] sm:$0xff] %v17524_v57 }
 0x97e   : > { %12425 = vmatmul.msk.f32.gmra.mxu1 %vm4445_vm3, %v17406_v12 }
 0x982   : > { %v8091_v34 = vpop.permute.xlu2 %8090 }
 0x983   : > { %v8103_v44 = vsel %vm6221_vm11, %v8089_v7, %v8091_v34  ;;  %v8104_v31 = vsel %vm6221_vm11, %v8091_v34, %v8093_v39 }
 0x984   : > { %12442 = vmatpush.msk.msra.mxu1 %vm4452_vm2, %v8103_v44  ;;  %v17536_v14 = vpop.f32.mrf.mxu3  ;;  %v17538_v44 = vpop.f32.mrf.mxu2 }
 0x985   : > { %19375 = vst [vmem:[#allocation47_spill] sm:$0xff] %v17538_v44 }
 0x986   : > { %12426 = vmatmul.msk.f32.gmra.mxu1 %vm4445_vm3, %v17426_v24 }
 0x98f   : > { %v7888_v58 = vpop.permute.xlu1 %7887 }
 0x990   : > { %v7898_v19 = vsel %vm6003_vm10, %v17313_v42, %v7888_v58  ;;  %v17544_v42 = vpop.f32.mrf.mxu1  ;;  %v13120_v58 = vunpack.i.l.bf16 %v13119_v4  ;;  %v17561_v4 = vpop.f32.mrf.mxu3 }
 0x991   : > { %12427 = vmatpush.msk.msra.mxu2 %vm4452_vm2, %v7898_v19 }
 0x992   : > { %v8096_v34 = vsel %vm6221_vm11, %v13120_v58, %v13121_v18 }
 0x993   : > { %8042 = vmatpush.msra.mxu2 %v7893_v28  ;;  %v8095_v28 = vpop.permute.xlu2 %8094 }
 0x994   : > { %12428 = vmatmul.msk.f32.vlgmr.msra.gmra.mxu2 %vm4445_vm3, %v17383_v40  ;;  %v12431_v40 = vld [vmem:[%s18976_s13 + $0xa8] sm:$0xff] }
 0x995   : > { %12446 = vmatpush.msk.msrb.mxu2 %vm4452_vm2, %v8104_v31  ;;  %v8105_v31 = vsel %vm6221_vm11, %v8093_v39, %v8095_v28 }
 0x997   : > { %v8087_v10 = vpop.permute.xlu1 %8086 }
 0x998   : > { %v8101_v63 = vsel %vm6221_vm11, %v8085_v33, %v8087_v10  ;;  %v8102_v19 = vsel %vm6221_vm11, %v8087_v10, %v8089_v7  ;;  %v17558_v33 = vpop.f32.mrf.mxu0  ;;  %v17563_v7 = vpop.f32.mrf.mxu2 }
 0x999   : > { %12434 = vmatpush.msk.msrb.mxu3 %vm4452_vm2, %v8101_v63  ;;  %12438 = vmatpush.msk.msra.mxu0 %vm4452_vm2, %v8102_v19  ;;  %19376 = vst [vmem:[#allocation44_spill] sm:$0xff] %v17558_v33  ;;  %v8083_v10 = vpop.permute.xlu0 %8082  ;;  %v17565_v19 = vpop.f32.mrf.mxu1 }
 0x99a   : > { %19377 = vst [vmem:[#allocation35_spill] sm:$0xff] %v17563_v7 }
 0x99b   : > { %8145 = vmatpush.msrb.mxu3 %v8096_v34  ;;  %19378 = vst [vmem:[#allocation49_spill] sm:$0xff] %v17565_v19  ;;  %v17577_v34 = vpop.f32.mrf.mxu3 }
 0x99c   : > { %12429 = vmatmul.msk.f32.gmra.mxu2 %vm4445_vm3, %v17406_v12  ;;  %12435 = vmatmul.msk.f32.vlgmr.msrb.gmra.mxu3 %vm4445_vm3, %v12431_v40  ;;  %v12432_v12 = vld [vmem:[%s18976_s13 + $0xb0] sm:$0xff]  ;;  %19380 = vst [vmem:[#allocation21_spill] sm:$0xff] %v17577_v34  ;;  %v8294_v34 = vpop.permute.xlu2 %8293 }
 0x99d   : > { %12450 = vmatpush.msk.msra.mxu3 %vm4452_vm2, %v8105_v31 }
 0x99f   : > { %v8077_v63 = vpop.permute.xlu1 %8076 }
 0x9a0   : > { %v8097_v58 = vsel %vm6221_vm11, %v13121_v18, %v8077_v63  ;;  %v17575_v28 = vpop.f32.mrf.mxu0  ;;  %v17579_v18 = vpop.f32.mrf.mxu2 }
 0x9a1   : > { %8171 = vmatpush.msra.mxu0 %v8097_v58  ;;  %19379 = vst [vmem:[#allocation48_spill] sm:$0xff] %v17575_v28  ;;  %v13129_v58 = vpop.permute.xlu0 %13128  ;;  %v17581_v44 = vpop.f32.mrf.mxu1  ;;  %v12433_v28 = vld [vmem:[%s18976_s13 + $0xb8] sm:$0x3] }
 0x9a2   : > { %12439 = vmatmul.msk.f32.vlgmr.msra.gmra.mxu0 %vm4445_vm3, %v12431_v40  ;;  %19381 = vst [vmem:[#allocation43_spill] sm:$0xff] %v17579_v18 }
 0x9a3   : > { %19382 = vst [vmem:[#allocation14_spill] sm:$0xff] %v17581_v44 }
 0x9a4   : > { %12430 = vmatmul.msk.f32.gmra.mxu2 %vm4445_vm3, %v17426_v24  ;;  %12436 = vmatmul.msk.f32.gmra.mxu3 %vm4445_vm3, %v12432_v12 }
 0x9a7   : > { %v13124_v39 = vpop.permute.xlu1 %13123 }
 0x9a8   : > { %v13126_v31 = vunpack.i.h.bf16 %v13124_v39  ;;  %v13125_v7 = vunpack.i.l.bf16 %v13124_v39  ;;  %v13131_v39 = vunpack.i.h.bf16 %v13129_v58 }
 0x9a9   : > { %v17603_v18 = vpop.f32.mrf.mxu1 }
 0x9aa   : > { %12440 = vmatmul.msk.f32.gmra.mxu0 %vm4445_vm3, %v12432_v12  ;;  %v8098_v19 = vsel %vm6221_vm11, %v8077_v63, %v13125_v7  ;;  %v8099_v24 = vsel %vm6221_vm11, %v13125_v7, %v13126_v31  ;;  %v8100_v33 = vsel %vm6221_vm11, %v13126_v31, %v8083_v10  ;;  %v13130_v63 = vunpack.i.l.bf16 %v13129_v58  ;;  %v17595_v10 = vpop.f32.mrf.mxu0  ;;  %v17597_v31 = vpop.f32.mrf.mxu3 }
 0x9ab   : > { %8197 = vmatpush.msra.mxu1 %v8098_v19  ;;  %8223 = vmatpush.msrb.mxu2 %v8099_v24  ;;  %19383 = vst [vmem:[#allocation39_spill] sm:$0xff] %v17597_v31  ;;  %v17601_v19 = vpop.f32.mrf.mxu2  ;;  %v13134_v24 = vpop.permute.xlu0 %13133  ;;  %vm9827_vm11 = vcmask 130048  }
 0x9ac   : > { %8249 = vmatpush.msra.mxu3 %v8100_v33  ;;  %12443 = vmatmul.msk.f32.vlgmr.msra.gmra.mxu1 %vm4445_vm3, %v12431_v40  ;;  %v8303_v33 = vsel %vm823_vm12, %v13130_v63, %v13131_v39  ;;  %19384 = vst [vmem:[#allocation24_spill] sm:$0xff] %v17601_v19  ;;  %v8298_v58 = vpop.permute.xlu2 %8297  ;;  %v12454_v63 = vld [vmem:[%s18976_s13 + $0xc0] sm:$0xff] }
 0x9ad   : > { %12437 = vmatmul.msk.f32.gmra.mxu3 %vm4445_vm3, %v12433_v28  ;;  %12447 = vmatmul.msk.f32.vlgmr.msrb.gmra.mxu2 %vm4445_vm3, %v12431_v40 }
 0x9af   : > { %v8292_v44 = vpop.permute.xlu1 %8291 }
 0x9b0   : > { %v8308_v7 = vsel %vm823_vm12, %v8292_v44, %v8294_v34  ;;  %v13136_v44 = vunpack.i.h.bf16 %v13134_v24 }
 0x9b1   : > { %12457 = vmatpush.msk.msrb.mxu0 %vm4452_vm2, %v8308_v7  ;;  %v13135_v7 = vunpack.i.l.bf16 %v13134_v24 }
 0x9b2   : > { %12441 = vmatmul.msk.f32.gmra.mxu0 %vm4445_vm3, %v12433_v28  ;;  %v17618_v24 = vpop.f32.mrf.mxu3  ;;  %v17621_v57 = vpop.f32.mrf.mxu0 }
 0x9b3   : > { %8352 = vmatpush.msrb.mxu0 %v8303_v33  ;;  %v8304_v25 = vsel %vm823_vm12, %v13131_v39, %v13135_v7  ;;  %19385 = vst [vmem:[#allocation38_spill] sm:$0xff] %v17618_v24 }
 0x9b4   : > { %12444 = vmatmul.msk.f32.gmra.mxu1 %vm4445_vm3, %v12432_v12  ;;  %19386 = vst [vmem:[#allocation25_spill] sm:$0xff] %v17621_v57  ;;  %v8288_v39 = vpop.permute.xlu2 %8287 }
 0x9b5   : > { %12448 = vmatmul.msk.f32.gmra.mxu2 %vm4445_vm3, %v12432_v12  ;;  %12451 = vmatmul.msk.f32.vlgmr.msra.gmra.mxu3 %vm4445_vm3, %v12431_v40  ;;  %v8305_v40 = vsel %vm823_vm12, %v13135_v7, %v13136_v44 }
 0x9b7   : > { %v8296_v31 = vpop.permute.xlu1 %8295 }
 0x9b8   : > { %v8309_v19 = vsel %vm823_vm12, %v8294_v34, %v8296_v31  ;;  %v8310_v33 = vsel %vm823_vm12, %v8296_v31, %v8298_v58  ;;  %v17623_v34 = vpop.f32.mrf.mxu2  ;;  %v17627_v31 = vpop.f32.mrf.mxu1 }
 0x9b9   : > { %12461 = vmatpush.msk.msrb.mxu1 %vm4452_vm2, %v8309_v19  ;;  %12465 = vmatpush.msk.msra.mxu2 %vm4452_vm2, %v8310_v33  ;;  %v8302_v19 = vpop.permute.xlu0 %8301 }
 0x9ba   : > { %12458 = vmatmul.msk.f32.vlgmr.msrb.gmra.mxu0 %vm4445_vm3, %v12454_v63  ;;  %v17641_v24 = vpop.f32.mrf.mxu3 }
 0x9bb   : > { %8378 = vmatpush.msrb.mxu1 %v8304_v25  ;;  %8404 = vmatpush.msra.mxu2 %v8305_v40  ;;  %v12455_v25 = vld [vmem:[%s18976_s13 + $0xc8] sm:$0xff]  ;;  %19387 = vst [vmem:[#allocation54_spill] sm:$0xff] %v17641_v24 }
 0x9bc   : > { %12445 = vmatmul.msk.f32.gmra.mxu1 %vm4445_vm3, %v12433_v28 }
 0x9bd   : > { %12449 = vmatmul.msk.f32.gmra.mxu2 %vm4445_vm3, %v12433_v28  ;;  %12452 = vmatmul.msk.f32.gmra.mxu3 %vm4445_vm3, %v12432_v12  ;;  %v8306_v12 = vsel %vm823_vm12, %v13136_v44, %v8288_v39 }
 0x9bf   : > { %v8300_v33 = vpop.permute.xlu1 %8299 }
 0x9c0   : > { %v8311_v7 = vsel %vm823_vm12, %v8298_v58, %v8300_v33  ;;  %v8312_v40 = vsel %vm823_vm12, %v8300_v33, %v8302_v19  ;;  %v12456_v19 = vld [vmem:[%s18976_s13 + $0xd0] sm:$0x3]  ;;  %v17646_v33 = vpop.f32.mrf.mxu0  ;;  %v17651_v44 = vpop.f32.mrf.mxu1 }
 0x9c1   : > { %12469 = vmatpush.msk.msrb.mxu3 %vm4452_vm2, %v8311_v7  ;;  %12473 = vmatpush.msk.msra.mxu0 %vm4452_vm2, %v8312_v40  ;;  %19388 = vst [vmem:[#allocation9_spill] sm:$0xff] %v17646_v33  ;;  %v17649_v40 = vpop.f32.mrf.mxu2 }
 0x9c2   : > { %12459 = vmatmul.msk.f32.gmra.mxu0 %vm4445_vm3, %v12455_v25  ;;  %19389 = vst [vmem:[#allocation16_spill] sm:$0xff] %v17649_v40 }
 0x9c3   : > { %8430 = vmatpush.msrb.mxu3 %v8306_v12  ;;  %19390 = vst [vmem:[#allocation18_spill] sm:$0xff] %v17651_v44 }
 0x9c4   : > { %12462 = vmatmul.msk.f32.vlgmr.msrb.gmra.mxu1 %vm4445_vm3, %v12454_v63 }
 0x9c5   : > { %12453 = vmatmul.msk.f32.gmra.mxu3 %vm4445_vm3, %v12433_v28  ;;  %12466 = vmatmul.msk.f32.vlgmr.msra.gmra.mxu2 %vm4445_vm3, %v12454_v63  ;;  %v17657_v28 = vpop.f32.mrf.mxu3 }
 0x9c6   : > { %19391 = vst [vmem:[#allocation50_spill] sm:$0xff] %v17657_v28 }
 0x9c7   : > { %v8290_v58 = vpop.permute.xlu1 %8289 }
 0x9c8   : > { %v8307_v7 = vsel %vm823_vm12, %v8288_v39, %v8290_v58  ;;  %v17659_v12 = vpop.f32.mrf.mxu0  ;;  %v17664_v58 = vpop.f32.mrf.mxu1 }
 0x9c9   : > { %8456 = vmatpush.msra.mxu0 %v8307_v7  ;;  %19392 = vst [vmem:[#allocation12_spill] sm:$0xff] %v17659_v12  ;;  %v17662_v39 = vpop.f32.mrf.mxu2 }
 0x9ca   : > { %12460 = vmatmul.msk.f32.gmra.mxu0 %vm4445_vm3, %v12456_v19  ;;  %19393 = vst [vmem:[#allocation10_spill] sm:$0xff] %v17662_v39 }
 0x9cb   : > { %19394 = vst [vmem:[#allocation11_spill] sm:$0xff] %v17664_v58 }
 0x9cc   : > { %12463 = vmatmul.msk.f32.gmra.mxu1 %vm4445_vm3, %v12455_v25 }
 0x9cd   : > { %12467 = vmatmul.msk.f32.gmra.mxu2 %vm4445_vm3, %v12455_v25  ;;  %12470 = vmatmul.msk.f32.vlgmr.msrb.gmra.mxu3 %vm4445_vm3, %v12454_v63  ;;  %v17669_v7 = vpop.f32.mrf.mxu3 }
 0x9ce   : > { %19395 = vst [vmem:[#allocation19_spill] sm:$0xff] %v17669_v7 }
 0x9d0   : > { %v17672_v24 = vpop.f32.mrf.mxu0  ;;  %v7712_v28 = vpop.f32.mrf.mxu1 }
 0x9d1   : > { %19396 = vst [vmem:[#allocation51_spill] sm:$0xff] %v17672_v24  ;;  %v7735_v33 = vpop.f32.mrf.mxu2 }
 0x9d2   : > { %12474 = vmatmul.msk.f32.vlgmr.msra.gmra.mxu0 %vm4445_vm3, %v12454_v63 }
 0x9d4   : > { %12464 = vmatmul.msk.f32.gmra.mxu1 %vm4445_vm3, %v12456_v19 }
 0x9d5   : > { %12468 = vmatmul.msk.f32.gmra.mxu2 %vm4445_vm3, %v12456_v19  ;;  %12471 = vmatmul.msk.f32.gmra.mxu3 %vm4445_vm3, %v12455_v25  ;;  %v17676_v63 = vpop.f32.mrf.mxu3 }
 0x9d6   : > { %19397 = vst [vmem:[#allocation22_spill] sm:$0xff] %v17676_v63 }
 0x9d8   : > { %v17678_v39 = vpop.f32.mrf.mxu0  ;;  %v17682_v58 = vpop.f32.mrf.mxu1 }
 0x9d9   : > { %19398 = vst [vmem:[#allocation40_spill] sm:$0xff] %v17678_v39  ;;  %v17680_v12 = vpop.f32.mrf.mxu2 }
 0x9da   : > { %12475 = vmatmul.msk.f32.gmra.mxu0 %vm4445_vm3, %v12455_v25  ;;  %19399 = vst [vmem:[#allocation31_spill] sm:$0xff] %v17680_v12 }
 0x9db   : > { %19400 = vst [vmem:[#allocation32_spill] sm:$0xff] %v17682_v58 }
 0x9dd   : > { %12472 = vmatmul.msk.f32.gmra.mxu3 %vm4445_vm3, %v12456_v19  ;;  %v17684_v44 = vpop.f32.mrf.mxu3 }
 0x9de   : > { %19401 = vst [vmem:[#allocation37_spill] sm:$0xff] %v17684_v44 }
 0x9e0   : > { %v17686_v7 = vpop.f32.mrf.mxu0  ;;  %v17690_v24 = vpop.f32.mrf.mxu1 }
 0x9e1   : > { %19402 = vst [vmem:[#allocation7_spill] sm:$0xff] %v17686_v7  ;;  %v17688_v25 = vpop.f32.mrf.mxu2 }
 0x9e2   : > { %12476 = vmatmul.msk.f32.gmra.mxu0 %vm4445_vm3, %v12456_v19  ;;  %19403 = vst [vmem:[#allocation36_spill] sm:$0xff] %v17688_v25 }
 0x9e3   : > { %19404 = vst [vmem:[#allocation13_spill] sm:$0xff] %v17690_v24 }
 0x9e5   : > { %v17692_v40 = vpop.f32.mrf.mxu3 }
 0x9e6   : > { %19405 = vst [vmem:[#allocation17_spill] sm:$0xff] %v17692_v40 }
 0x9e8   : > { %v17694_v57 = vpop.f32.mrf.mxu0  ;;  %v17698_v32 = vpop.f32.mrf.mxu1 }
 0x9e9   : > { %19406 = vst [vmem:[#allocation53_spill] sm:$0xff] %v17694_v57  ;;  %v17696_v19 = vpop.f32.mrf.mxu2 }
 0x9ea   : > { %19407 = vst [vmem:[#allocation52_spill] sm:$0xff] %v17696_v19 }
 0x9eb   : > { %19408 = vst [vmem:[#allocation8_spill] sm:$0xff] %v17698_v32 }
 0x9ed   : > { %v7966_v39 = vpop.f32.mrf.mxu3 }
 0x9f0   : > { %v17700_v2 = vpop.f32.mrf.mxu0  ;;  %v17702_v60 = vpop.f32.mrf.mxu1 }
 0x9f1   : > { %19409 = vst [vmem:[#allocation29_spill] sm:$0xff] %v17700_v2  ;;  %v7943_v58 = vpop.f32.mrf.mxu2 }
 0x9f2   : > { %19410 = vst [vmem:[#allocation41_spill] sm:$0xff] %v17702_v60 }
 0x9f5   : > { %v17704_v44 = vpop.f32.mrf.mxu3 }
 0x9f6   : > { %19411 = vst [vmem:[#allocation23_spill] sm:$0xff] %v17704_v44 }
 0x9f8   : > { %v17706_v7 = vpop.f32.mrf.mxu1  ;;  %v17708_v25 = vpop.f32.mrf.mxu0 }
 0x9f9   : > { %19412 = vst [vmem:[#allocation27_spill] sm:$0xff] %v17706_v7  ;;  %v17710_v24 = vpop.f32.mrf.mxu2 }
 0x9fa   : > { %19413 = vst [vmem:[#allocation34_spill] sm:$0xff] %v17708_v25 }
 0x9fb   : > { %19414 = vst [vmem:[#allocation28_spill] sm:$0xff] %v17710_v24 }
 0x9fd   : > { %v17712_v40 = vpop.f32.mrf.mxu3 }
 0x9fe   : > { %19415 = vst [vmem:[#allocation15_spill] sm:$0xff] %v17712_v40 }
 0xa00   : > { %v17714_v57 = vpop.f32.mrf.mxu1  ;;  %v17718_v32 = vpop.f32.mrf.mxu0 }
 0xa01   : > { %19416 = vst [vmem:[#allocation42_spill] sm:$0xff] %v17714_v57 }
 0xa02   : > { %19418 = vst [vmem:[#allocation56_spill] sm:$0xff] %v17718_v32 }
 0xa08   : > { %v17724_v44 = vpop.f32.mrf.mxu1 }
 0xa09   : > { %19421 = vst [vmem:[#allocation59_spill] sm:$0xff] %v17724_v44  ;;  %v6924_v44 = vadd.f32 %v17437_v15, %v17318_v16  ;;  %v6921_v15 = vadd.f32 %v17408_v11, %v17296_v46 }
 0xa17   : > { %v17716_v19 = vpop.f32.mrf.mxu2 }
 0xa18   : > { %19417 = vst [vmem:[#allocation55_spill] sm:$0xff] %v17716_v19 }
 0xa1f   : > { %v17720_v2 = vpop.f32.mrf.mxu2  ;;  %v17722_v12 = vpop.f32.mrf.mxu3 }
 0xa20   : > { %19419 = vst [vmem:[#allocation57_spill] sm:$0xff] %v17720_v2  ;;  %v8173_v60 = vpop.f32.mrf.mxu0  ;;  %v6947_v2 = vadd.f32 %v17430_v21, %v17330_v1  ;;  %v6950_v1 = vadd.f32 %v17456_v17, %v17353_v0  ;;  %v7002_v0 = vadd.f32 %v17465_v20, %v17397_v27  ;;  %v6979_v27 = vadd.f32 %v17481_v43, %v17399_v51 }
 0xa21   : > { %19420 = vst [vmem:[#allocation58_spill] sm:$0xff] %v17722_v12  ;;  %v7224_v12 = vadd.f32 %v17491_v35, %v6924_v44 }
 0xa22   : > { %v7225_v46 = vadd.f32 %v17502_v26, %v6950_v1  ;;  %v19436_v1 = vld [vmem:[#allocation29_spill] sm:$0xff] }
 0xa23   : > { %v7425_v21 = vadd.f32 %v17536_v14, %v7224_v12  ;;  %v6953_v14 = vadd.f32 %v17469_v30, %v17375_v59  ;;  %v7219_v30 = vadd.f32 %v17483_v53, %v6921_v15  ;;  %v7231_v53 = vadd.f32 %v17510_v8, %v6979_v27 }
 0xa27   : > { %v17726_v7 = vpop.f32.mrf.mxu2  ;;  %v8150_v25 = vpop.f32.mrf.mxu3 }
 0xa28   : > { %19422 = vst [vmem:[#allocation60_spill] sm:$0xff] %v17726_v7  ;;  %v17728_v63 = vpop.f32.mrf.mxu0  ;;  %v7220_v7 = vadd.f32 %v17489_v49, %v6947_v2  ;;  %v7626_v49 = vadd.f32 %v17595_v10, %v7425_v21  ;;  %v6999_v2 = vadd.f32 %v17450_v50, %v17368_v36  ;;  %v7005_v36 = vadd.f32 %v17476_v48, %v17428_v6  ;;  %v17782_v50 = vpop.permute.xlu2 %8512  ;;  %v19429_v10 = vld [vmem:[#allocation31_spill] sm:$0xff] }
 0xa29   : > { %19423 = vst [vmem:[#allocation61_spill] sm:$0xff] %v17728_v63  ;;  %v17730_v24 = vpop.f32.mrf.mxu1  ;;  %v7028_v6 = vadd.f32 %v17485_v52, %v17392_v37  ;;  %v19437_v21 = vld [vmem:[#allocation23_spill] sm:$0xff] }
 0xa2a   : > { %19424 = vst [vmem:[#allocation62_spill] sm:$0xff] %v17730_v24  ;;  %v7421_v16 = vadd.f32 %v17522_v62, %v7220_v7  ;;  %v7827_v62 = vadd.f32 %v7712_v28, %v7626_v49  ;;  %v17801_v37 = vadd.f32 %v17506_v29, %v6999_v2  ;;  %v19430_v28 = vld [vmem:[#allocation33_spill] sm:$0xff]  ;;  %v17814_v29 = vpop.permute.xlu1 %8545  ;;  %v19438_v49 = vld [vmem:[#allocation46_spill] sm:$0xff]  ;;  %v19439_v2 = vld [vmem:[#allocation44_spill] sm:$0xff] }
 0xa2c   : > { %v7622_v35 = vadd.f32 %v17603_v18, %v7421_v16  ;;  %v7031_v18 = vadd.f32 %v17493_v54, %v17419_v47  ;;  %v19433_v54 = vld [vmem:[#allocation25_spill] sm:$0xff] }
 0xa2e   : > { %v7823_v11 = vadd.f32 %v7735_v33, %v7622_v35  ;;  %v17821_v35 = vadd.f32 %v19438_v49, %v7005_v36 }
 0xa30   : > { %v17732_v40 = vpop.f32.mrf.mxu3  ;;  %v17734_v57 = vpop.f32.mrf.mxu0  ;;  %v8054_v20 = vadd.f32 %v7966_v39, %v7823_v11  ;;  %v19432_v39 = vld [vmem:[#allocation26_spill] sm:$0xff]  ;;  %v19442_v11 = vld [vmem:[#allocation61_spill] sm:$0xff] }
 0xa31   : > { %19425 = vst [vmem:[#allocation63_spill] sm:$0xff] %v17732_v40  ;;  %v17736_v19 = vpop.f32.mrf.mxu2  ;;  %v17738_v32 = vpop.f32.mrf.mxu1  ;;  %v7227_v47 = vadd.f32 %v19432_v39, %v7002_v0  ;;  %v19440_v0 = vld [vmem:[#allocation49_spill] sm:$0xff] }
 0xa32   : > { %19426 = vst [vmem:[#allocation64_spill] sm:$0xff] %v17734_v57  ;;  %v17839_v39 = vpop.permute.xlu2 %8502 }
 0xa33   : > { %19427 = vst [vmem:[#allocation65_spill] sm:$0xff] %v17736_v19  ;;  %v6973_v19 = vadd.f32 %v17454_v55, %v17348_v38  ;;  %v6927_v38 = vadd.f32 %v17458_v23, %v17344_v45  ;;  %v6976_v55 = vadd.f32 %v17467_v41, %v17370_v5  ;;  %v7025_v45 = vadd.f32 %v17474_v22, %v17365_v3 }
 0xa34   : > { %v7426_v5 = vadd.f32 %v17534_v61, %v7225_v46  ;;  %v8058_v41 = vadd.f32 %v7943_v58, %v7827_v62  ;;  %v8261_v61 = vadd.f32 %v8173_v60, %v8054_v20  ;;  %v19431_v60 = vld [vmem:[#allocation45_spill] sm:$0xff]  ;;  %v17812_v58 = vpop.permute.xlu0 %8507 }
 0xa35   : > { %v7221_v17 = vadd.f32 %v17487_v9, %v6973_v19  ;;  %v7226_v3 = vadd.f32 %v17498_v13, %v6976_v55  ;;  %v7229_v51 = vadd.f32 %v17504_v56, %v6927_v38  ;;  %v19428_v13 = vld [vmem:[#allocation22_spill] sm:$0xff]  ;;  %v17808_v12 = vadd.f32 %v19431_v60, %v7025_v45 }
 0xa36   : > { %v7627_v26 = vadd.f32 %v17627_v31, %v7426_v5  ;;  %v7230_v31 = vadd.f32 %v19430_v28, %v6953_v14  ;;  %v19443_v14 = vld [vmem:[#allocation62_spill] sm:$0xff] }
 0xa37   : > { %v7422_v23 = vadd.f32 %v17544_v42, %v7221_v17  ;;  %v8265_v42 = vadd.f32 %v8150_v25, %v8058_v41  ;;  %v7430_v52 = vadd.f32 %v17561_v4, %v7229_v51  ;;  %v19434_v4 = vld [vmem:[#allocation20_spill] sm:$0xff]  ;;  %v19435_v25 = vld [vmem:[#allocation30_spill] sm:$0xff]  ;;  %v7427_v55 = vadd.f32 %v19440_v0, %v7226_v3 }
 0xa38   : > { %v17746_v63 = vpop.f32.mrf.mxu3  ;;  %v17748_v24 = vpop.f32.mrf.mxu0  ;;  %v7828_v33 = vadd.f32 %v19429_v10, %v7627_v26  ;;  %v7420_v7 = vadd.f32 %v19434_v4, %v7219_v30  ;;  %v7228_v19 = vadd.f32 %v19435_v25, %v7028_v6  ;;  %v7431_v38 = vadd.f32 %v19439_v2, %v7230_v31  ;;  %v19441_v17 = vld [vmem:[#allocation32_spill] sm:$0xff]  ;;  %v19446_v6 = vld [vmem:[#allocation18_spill] sm:$0xff] }
 0xa39   : > { %v17750_v40 = vpop.f32.mrf.mxu2  ;;  %v17752_v57 = vpop.f32.mrf.mxu1  ;;  %v7623_v43 = vadd.f32 %v17623_v34, %v7422_v23  ;;  %v7631_v8 = vadd.f32 %v19433_v54, %v7430_v52  ;;  %v19444_v41 = vld [vmem:[#allocation48_spill] sm:$0xff]  ;;  %v19449_v52 = vld [vmem:[#allocation39_spill] sm:$0xff] }
 0xa3a   : > { %v8059_v15 = vadd.f32 %v19437_v21, %v7828_v33  ;;  %v19445_v30 = vld [vmem:[#allocation16_spill] sm:$0xff]  ;;  %v7632_v51 = vadd.f32 %v19446_v6, %v7431_v38  ;;  %v19450_v33 = vld [vmem:[#allocation11_spill] sm:$0xff] }
 0xa3b   : > { %v7824_v56 = vadd.f32 %v19428_v13, %v7623_v43  ;;  %v7832_v46 = vadd.f32 %v19441_v17, %v7631_v8  ;;  %v7628_v36 = vadd.f32 %v19445_v30, %v7427_v55  ;;  %v7429_v13 = vadd.f32 %v19449_v52, %v7228_v19  ;;  %v19452_v31 = vld [vmem:[#allocation36_spill] sm:$0xff]  ;;  %v19453_v54 = vld [vmem:[#allocation63_spill] sm:$0xff]  ;;  %v19458_v55 = vld [vmem:[#allocation14_spill] sm:$0xff] }
 0xa3c   : > { %v8266_v62 = vadd.f32 %v19442_v11, %v8059_v15  ;;  %v7833_v60 = vadd.f32 %v19452_v31, %v7632_v51  ;;  %v19456_v15 = vld [vmem:[#allocation15_spill] sm:$0xff]  ;;  %v7432_v17 = vadd.f32 %v19458_v55, %v7231_v53 }
 0xa3d   : > { %v8055_v16 = vadd.f32 %v19436_v1, %v7824_v56  ;;  %v19454_v1 = vld [vmem:[#allocation52_spill] sm:$0xff]  ;;  %v19457_v38 = vld [vmem:[#allocation43_spill] sm:$0xff] }
 0xa3e   : > { %v8064_v49 = vadd.f32 %v19456_v15, %v7833_v60  ;;  %v7428_v0 = vadd.f32 %v19457_v38, %v7227_v47  ;;  %v19465_v60 = vld [vmem:[#allocation21_spill] sm:$0xff]  ;;  %v19470_v15 = vld [vmem:[#allocation38_spill] sm:$0xff] }
 0xa3f   : > { %v8262_v45 = vadd.f32 %v19443_v14, %v8055_v16  ;;  %v19455_v16 = vld [vmem:[#allocation34_spill] sm:$0xff] }
 0xa40   : > { %v17786_v9 = vpop.f32.mrf.mxu3  ;;  %v8357_v59 = vpop.f32.mrf.mxu0 }
 0xa41   : > { %v17793_v22 = vpop.f32.mrf.mxu2  ;;  %v8380_v48 = vpop.f32.mrf.mxu1  ;;  %v8472_v44 = vadd.f32 %v8357_v59, %v8265_v42  ;;  %v7621_v59 = vadd.f32 %v19444_v41, %v7420_v7 }
 0xa42   : > { %v8468_v34 = vadd.f32 %v8380_v48, %v8261_v61  ;;  %v19447_v48 = vld [vmem:[#allocation28_spill] sm:$0xff]  ;;  %v19448_v61 = vld [vmem:[#allocation47_spill] sm:$0xff] }
 0xa43   : > { %v8487_v27 = vmax.f32 %v8472_v44, 0.0  ;;  %v8063_v43 = vadd.f32 %v19447_v48, %v7832_v46  ;;  %v7233_v42 = vadd.f32 %v19448_v61, %v7031_v18  ;;  %v7822_v44 = vadd.f32 %v19450_v33, %v7621_v59  ;;  %v19461_v59 = vld [vmem:[#allocation64_spill] sm:$0xff] }
 0xa44   : > { %v8483_v5 = vmax.f32 %v8468_v34, 0.0  ;;  %v19451_v34 = vld [vmem:[#allocation37_spill] sm:$0xff]  ;;  %v8271_v30 = vadd.f32 %v19461_v59, %v8064_v49 }
 0xa45   : > { %v7829_v28 = vadd.f32 %v19451_v34, %v7628_v36  ;;  %v8270_v8 = vadd.f32 %v19453_v54, %v8063_v43  ;;  %v8520_v4 = vmul.f32 %v17812_v58, %v8487_v27  ;;  %v8053_v19 = vadd.f32 %v19454_v1, %v7822_v44  ;;  %v17854_v27 = vpop.permute.xlu1 %8535  ;;  %v19462_v43 = vld [vmem:[#allocation50_spill] sm:$0xff]  ;;  %v19469_v1 = vld [vmem:[#allocation17_spill] sm:$0xff] }
 0xa46   : > { %v8516_v7 = vmul.f32 %v17839_v39, %v8483_v5  ;;  %v19460_v5 = vld [vmem:[#allocation58_spill] sm:$0xff]  ;;  %v7424_v54 = vadd.f32 %v19465_v60, %v17808_v12  ;;  %v19471_v49 = vld [vmem:[#allocation9_spill] sm:$0xff] }
 0xa47   : > { %v8060_v21 = vadd.f32 %v19455_v16, %v7829_v28  ;;  %v8260_v41 = vadd.f32 %v19460_v5, %v8053_v19  ;;  %v19464_v28 = vld [vmem:[#allocation35_spill] sm:$0xff]  ;;  %v19472_v12 = vld [vmem:[#allocation42_spill] sm:$0xff] }
 0xa48   : > { %v17828_v23 = vpop.f32.mrf.mxu3  ;;  %v8360_v20 = vpop.f32.mrf.mxu0  ;;  %v17863_v53 = vadd.f32 %v17854_v27, %v8516_v7  ;;  %v7423_v31 = vadd.f32 %v19464_v28, %v17801_v37  ;;  %v7434_v37 = vadd.f32 %v19470_v15, %v7233_v42 }
 0xa49   : > { %v8406_v3 = vpop.f32.mrf.mxu2  ;;  %v8383_v26 = vpop.f32.mrf.mxu1  ;;  %v8477_v2 = vadd.f32 %v8360_v20, %v8270_v8  ;;  %v8267_v20 = vadd.f32 %v17738_v32, %v8060_v21  ;;  %v8467_v61 = vadd.f32 %v17748_v24, %v8260_v41  ;;  %v19466_v8 = vld [vmem:[#allocation7_spill] sm:$0xff]  ;;  %v19467_v24 = vld [vmem:[#allocation8_spill] sm:$0xff] }
 0xa4a   : > { %v8469_v56 = vadd.f32 %v8406_v3, %v8262_v45  ;;  %v8473_v10 = vadd.f32 %v8383_v26, %v8266_v62  ;;  %v19459_v62 = vld [vmem:[#allocation12_spill] sm:$0xff]  ;;  %v17852_v45 = vpop.permute.xlu0 %8540  ;;  %v7629_v3 = vadd.f32 %v19462_v43, %v7428_v0  ;;  %v19463_v26 = vld [vmem:[#allocation10_spill] sm:$0xff]  ;;  %v19473_v0 = vld [vmem:[#allocation57_spill] sm:$0xff] }
 0xa4b   : > { %v7630_v14 = vadd.f32 %v19459_v62, %v7429_v13  ;;  %v17860_v47 = vadd.f32 %v17852_v45, %v8520_v4  ;;  %v7633_v32 = vadd.f32 %v19463_v26, %v7432_v17  ;;  %v8492_v52 = vmax.f32 %v8477_v2, 0.0  ;;  %v19474_v17 = vld [vmem:[#allocation56_spill] sm:$0xff]  ;;  %v19476_v41 = vld [vmem:[#allocation51_spill] sm:$0xff] }
 0xa4c   : > { %v8484_v25 = vmax.f32 %v8469_v56, 0.0  ;;  %v8488_v18 = vmax.f32 %v8473_v10, 0.0  ;;  %v7830_v4 = vadd.f32 %v19466_v8, %v7629_v3  ;;  %v7625_v2 = vadd.f32 %v19471_v49, %v7424_v54  ;;  %v19481_v54 = vld [vmem:[#allocation41_spill] sm:$0xff] }
 0xa4d   : > { %v7831_v7 = vadd.f32 %v19467_v24, %v7630_v14  ;;  %v7834_v19 = vadd.f32 %v19469_v1, %v7633_v32  ;;  %v19475_v14 = vld [vmem:[#allocation54_spill] sm:$0xff]  ;;  %v7635_v59 = vadd.f32 %v19476_v41, %v7434_v37  ;;  %v19485_v37 = vld [vmem:[#allocation60_spill] sm:$0xff] }
 0xa4e   : > { %v8517_v46 = vmul.f32 %v17839_v39, %v8484_v25  ;;  %v8521_v11 = vmul.f32 %v17812_v58, %v8488_v18  ;;  %v19468_v25 = vld [vmem:[#allocation24_spill] sm:$0xff]  ;;  %v8061_v38 = vadd.f32 %v19472_v12, %v7830_v4  ;;  %v7624_v5 = vadd.f32 %v19475_v14, %v7423_v31  ;;  %v19482_v4 = vld [vmem:[#allocation27_spill] sm:$0xff] }
 0xa4f   : > { %v7433_v18 = vadd.f32 %v19468_v25, %v17821_v35  ;;  %v8062_v55 = vadd.f32 %v19473_v0, %v7831_v7  ;;  %v8525_v35 = vmul.f32 %v17782_v50, %v8492_v52  ;;  %v7836_v8 = vadd.f32 %v19481_v54, %v7635_v59  ;;  %v19483_v7 = vld [vmem:[#allocation55_spill] sm:$0xff] }
 0xa50   : > { %v17866_v36 = vadd.f32 %v17854_v27, %v8517_v46  ;;  %v17869_v6 = vadd.f32 %v17852_v45, %v8521_v11  ;;  %v17871_v51 = vpop.f32.mrf.mxu3  ;;  %v17873_v48 = vpop.f32.mrf.mxu0  ;;  %v8065_v46 = vadd.f32 %v19474_v17, %v7834_v19  ;;  %v8482_v11 = vmax.f32 %v8467_v61, 0.0 }
 0xa51   : > { %v8409_v13 = vpop.f32.mrf.mxu2  ;;  %v8386_v56 = vpop.f32.mrf.mxu1  ;;  %v8269_v42 = vadd.f32 %v17786_v9, %v8062_v55  ;;  %v8558_v28 = vadd.f32 %v17814_v29, %v8525_v35  ;;  %v8067_v49 = vadd.f32 %v19485_v37, %v7836_v8 }
 0xa52   : > { %v8474_v10 = vadd.f32 %v8409_v13, %v8267_v20  ;;  %v8478_v33 = vadd.f32 %v8386_v56, %v8271_v30  ;;  %v13142_v44 = vpack.i.bf16 %v17866_v36, %v17863_v53  ;;  %v13137_v34 = vpack.i.bf16 %v17869_v6, %v17860_v47  ;;  %v19477_v20 = vld [vmem:[#allocation19_spill] sm:$0xff]  ;;  %v19478_v13 = vld [vmem:[#allocation40_spill] sm:$0xff] }
 0xa53   : > { %v8268_v30 = vadd.f32 %v17750_v40, %v8061_v38  ;;  %v7634_v43 = vadd.f32 %v19477_v20, %v7433_v18  ;;  %v8272_v3 = vadd.f32 %v17752_v57, %v8065_v46  ;;  %v7825_v56 = vadd.f32 %v19478_v13, %v7624_v5  ;;  %v19480_v57 = vld [vmem:[#allocation53_spill] sm:$0xff] }
 0xa54   : > { %v8489_v16 = vmax.f32 %v8474_v10, 0.0  ;;  %v8493_v21 = vmax.f32 %v8478_v33, 0.0  ;;  %13143 = vrot.lane.b32.xlu1 %v13142_v44, %s19284_s6  ;;  %13138 = vrot.lane.b32.xlu2 %v13137_v34, %s19284_s6  ;;  %v19479_v10 = vld [vmem:[#allocation13_spill] sm:$0xff]  ;;  %v8515_v9 = vmul.f32 %v17839_v39, %v8482_v11  ;;  %v8274_v46 = vadd.f32 %v17828_v23, %v8067_v49 }
 0xa55   : > { %v7826_v33 = vadd.f32 %v19479_v10, %v7625_v2  ;;  %v7835_v60 = vadd.f32 %v19480_v57, %v7634_v43  ;;  %v8056_v24 = vadd.f32 %v19482_v4, %v7825_v56  ;;  %v19486_v2 = vld [vmem:[#allocation65_spill] sm:$0xff] }
 0xa56   : > { %v8526_v62 = vmul.f32 %v17782_v50, %v8493_v21  ;;  %v8522_v26 = vmul.f32 %v17812_v58, %v8489_v16  ;;  %v19484_v21 = vld [vmem:[#allocation59_spill] sm:$0xff]  ;;  %v8548_v0 = vadd.f32 %v17854_v27, %v8515_v9 }
 0xa57   : > { %v8057_v25 = vadd.f32 %v19483_v7, %v7826_v33  ;;  %v8066_v15 = vadd.f32 %v19484_v21, %v7835_v60  ;;  %v8263_v12 = vadd.f32 %v19486_v2, %v8056_v24 }
 0xa58   : > { %v17908_v32 = vadd.f32 %v17814_v29, %v8526_v62  ;;  %v8435_v61 = vpop.f32.mrf.mxu3  ;;  %v8461_v52 = vpop.f32.mrf.mxu0  ;;  %v17921_v18 = vadd.f32 %v17852_v45, %v8522_v26 }
 0xa59   : > { %v8412_v44 = vpop.f32.mrf.mxu2  ;;  %v8475_v34 = vadd.f32 %v8435_v61, %v8268_v30  ;;  %v8476_v40 = vadd.f32 %v8461_v52, %v8269_v42  ;;  %v8264_v38 = vadd.f32 %v17746_v63, %v8057_v25  ;;  %v8273_v17 = vadd.f32 %v17793_v22, %v8066_v15 }
 0xa5a   : > { %v8479_v31 = vadd.f32 %v8412_v44, %v8272_v3  ;;  %8600 = vrot.lane.b32.xlu0 %v17908_v32, %s19284_s6  ;;  %v8470_v11 = vadd.f32 %v17871_v51, %v8263_v12  ;;  %v13147_v59 = vpack.i.bf16 %v8548_v0, %v17921_v18 }
 0xa5b   : > { %v8490_v19 = vmax.f32 %v8475_v34, 0.0  ;;  %v8491_v16 = vmax.f32 %v8476_v40, 0.0  ;;  %v8471_v35 = vadd.f32 %v17873_v48, %v8264_v38 }
 0xa5c   : > { %v8494_v1 = vmax.f32 %v8479_v31, 0.0  ;;  %8598 = vrot.lane.b32.xlu2 %v8558_v28, %s19284_s6  ;;  %v8485_v22 = vmax.f32 %v8470_v11, 0.0 }
 0xa5d   : > { %v8523_v14 = vmul.f32 %v17812_v58, %v8490_v19  ;;  %v8524_v5 = vmul.f32 %v17812_v58, %v8491_v16  ;;  %v8486_v23 = vmax.f32 %v8471_v35, 0.0 }
 0xa5e   : > { %v8527_v55 = vmul.f32 %v17782_v50, %v8494_v1  ;;  %v8518_v26 = vmul.f32 %v17839_v39, %v8485_v22 }
 0xa5f   : > { %v8556_v20 = vadd.f32 %v17852_v45, %v8523_v14  ;;  %v8557_v43 = vadd.f32 %v17852_v45, %v8524_v5  ;;  %v8519_v61 = vmul.f32 %v17839_v39, %v8486_v23 }
 0xa60   : > { %v17935_v62 = vadd.f32 %v17814_v29, %v8527_v55  ;;  %v8438_v63 = vpop.f32.mrf.mxu3  ;;  %v8464_v41 = vpop.f32.mrf.mxu0  ;;  %v8551_v45 = vadd.f32 %v17854_v27, %v8518_v26 }
 0xa61   : > { %v8480_v30 = vadd.f32 %v8438_v63, %v8273_v17  ;;  %v8481_v42 = vadd.f32 %v8464_v41, %v8274_v46  ;;  %v13152_v56 = vpack.i.bf16 %v8557_v43, %v8556_v20  ;;  %v8552_v10 = vadd.f32 %v17854_v27, %v8519_v61 }
 0xa62   : > { %8602 = vrot.lane.b32.xlu1 %v17935_v62, %s19284_s6  ;;  %13148 = vrot.lane.b32.xlu0 %v13147_v59, %s19284_s6 }
 0xa63   : > { %v8495_v51 = vmax.f32 %v8480_v30, 0.0  ;;  %v8496_v48 = vmax.f32 %v8481_v42, 0.0 }
 0xa65   : > { %v8528_v58 = vmul.f32 %v17782_v50, %v8495_v51  ;;  %v8529_v3 = vmul.f32 %v17782_v50, %v8496_v48  ;;  %v13157_v50 = vpack.i.bf16 %v8552_v10, %v8551_v45  ;;  %v8855_v51 = vld [vmem:[%s18981_s18 + $0x8] sm:$0x3]  ;;  %v8854_v48 = vld [vmem:[%s18981_s18] sm:$0xff] }
 0xa67   : > { %v8561_v52 = vadd.f32 %v17814_v29, %v8528_v58  ;;  %v8562_v13 = vadd.f32 %v17814_v29, %v8529_v3 }
 0xa69   : > { %8604 = vrot.lane.b32.xlu2 %v8561_v52, %s19284_s6 }
 0xa6a   : > { %13153 = vrot.lane.b32.xlu1 %v13152_v56, %s19284_s6  ;;  %8606 = vrot.lane.b32.xlu0 %v8562_v13, %s19284_s6 }
 0xa71   : > { %13158 = vrot.lane.b32.xlu2 %v13157_v50, %s19284_s6 }
 0xaae   : > { %v13139_v33 = vpop.permute.xlu2 %13138 }
 0xaaf   : > { %v13141_v31 = vunpack.i.h.bf16 %v13139_v33  ;;  %v13140_v57 = vunpack.i.l.bf16 %v13139_v33 }
 0xab1   : > { %v8612_v27 = vsel %vm1538_vm5, %v13140_v57, %v13141_v31 }
 0xab2   : > { %v8636_v15 = vmax.f32 %v17860_v47, %v8612_v27 }
 0xab6   : > { %v8599_v39 = vpop.permute.xlu2 %8598 }
 0xac3   : > { %v8605_v40 = vpop.permute.xlu2 %8604 }
 0xac6   : > { %v13144_v44 = vpop.permute.xlu1 %13143 }
 0xac7   : > { %v13146_v60 = vunpack.i.h.bf16 %v13144_v44  ;;  %v13145_v54 = vunpack.i.l.bf16 %v13144_v44 }
 0xac9   : > { %v8609_v24 = vsel %vm1538_vm5, %v13145_v54, %v13146_v60 }
 0xaca   : > { %v17972_v37 = vmax.f32 %v17863_v53, %v8609_v24 }
 0xacb   : > { %v13159_v19 = vpop.permute.xlu2 %13158 }
 0xacc   : > { %v8601_v34 = vpop.permute.xlu0 %8600  ;;  %v13161_v55 = vunpack.i.h.bf16 %v13159_v19 }
 0xacd   : > { %v8616_v29 = vsel %vm1538_vm5, %v8599_v39, %v8601_v34 }
 0xace   : > { %v17958_v9 = vmax.f32 %v8558_v28, %v8616_v29 }
 0xad0   : > { %8672 = vrot.lane.b32.xlu0 %v17958_v9, %s19114_s0 }
 0xad4   : > { %v8603_v8 = vpop.permute.xlu1 %8602  ;;  %v13149_v4 = vpop.permute.xlu0 %13148 }
 0xad5   : > { %v8617_v7 = vsel %vm1538_vm5, %v8601_v34, %v8603_v8  ;;  %v13151_v25 = vunpack.i.h.bf16 %v13149_v4  ;;  %v13150_v1 = vunpack.i.l.bf16 %v13149_v4  ;;  %v8618_v47 = vsel %vm1538_vm5, %v8603_v8, %v8605_v40 }
 0xad6   : > { %v17966_v28 = vmax.f32 %v17908_v32, %v8617_v7  ;;  %v13160_v32 = vunpack.i.l.bf16 %v13159_v19  ;;  %v8642_v11 = vmax.f32 %v17935_v62, %v8618_v47  ;;  %v8714_v19 = vld [vmem:[%s18979_s16 + $0x8] sm:$0x3] }
 0xad7   : > { %v8608_v16 = vsel %vm1538_vm5, %v13151_v25, %v13145_v54  ;;  %v8613_v21 = vsel %vm1538_vm5, %v13141_v31, %v13150_v1 }
 0xad8   : > { %v17974_v49 = vmax.f32 %v8548_v0, %v8608_v16  ;;  %v17977_v2 = vmax.f32 %v17869_v6, %v8613_v21  ;;  %8674 = vrot.lane.b32.xlu1 %v17966_v28, %s19114_s0  ;;  %v8610_v46 = vsel %vm1538_vm5, %v13146_v60, %v13160_v32  ;;  %v8611_v35 = vsel %vm1538_vm5, %v13160_v32, %v13161_v55 }
 0xad9   : > { %v17998_v30 = vmax.f32 %v17866_v36, %v8610_v46  ;;  %v8635_v42 = vmax.f32 %v8551_v45, %v8611_v35  ;;  %v8835_v36 = vld [vmem:[%s18980_s17 + $0x8] sm:$0x3] }
 0xada   : > { %v13162_v12 = vpack.i.bf16 %v17972_v37, %v17974_v49  ;;  %v13167_v38 = vpack.i.bf16 %v17977_v2, %v8636_v15 }
 0xadb   : > { %v13177_v23 = vpack.i.bf16 %v8635_v42, %v17998_v30 }
 0xadc   : > { %v13154_v17 = vpop.permute.xlu1 %13153  ;;  %13163 = vrot.lane.b32.xlu0 %v13162_v12, %s19114_s0  ;;  %v8607_v53 = vpop.permute.xlu0 %8606  ;;  %13168 = vrot.lane.b32.xlu2 %v13167_v38, %s19114_s0 }
 0xadd   : > { %v13156_v6 = vunpack.i.h.bf16 %v13154_v17  ;;  %v13155_v0 = vunpack.i.l.bf16 %v13154_v17  ;;  %v8619_v63 = vsel %vm1538_vm5, %v8605_v40, %v8607_v53  ;;  %v8713_v40 = vld [vmem:[%s18979_s16] sm:$0xff] }
 0xade   : > { %v8643_v22 = vmax.f32 %v8561_v52, %v8619_v63 }
 0xadf   : > { %v8614_v14 = vsel %vm1538_vm5, %v13150_v1, %v13155_v0  ;;  %v8615_v5 = vsel %vm1538_vm5, %v13155_v0, %v13156_v6  ;;  %vm8715_vm5 = vcmask 146432  }
 0xae0   : > { %v17994_v41 = vmax.f32 %v17921_v18, %v8614_v14  ;;  %v8639_v59 = vmax.f32 %v8556_v20, %v8615_v5  ;;  %8676 = vrot.lane.b32.xlu1 %v8642_v11, %s19114_s0  ;;  %v8834_v18 = vld [vmem:[%s18980_s17] sm:$0xff] }
 0xae2   : > { %v13172_v62 = vpack.i.bf16 %v8639_v59, %v17994_v41 }
 0xae4   : > { %13173 = vrot.lane.b32.xlu0 %v13172_v62, %s19114_s0  ;;  %8678 = vrot.lane.b32.xlu2 %v8643_v22, %s19114_s0 }
 0xae8   : > { %13178 = vrot.lane.b32.xlu1 %v13177_v23, %s19114_s0 }
 0xaec   : > { %8838 = vperm.xlu0 %12769, %v8834_v18   ;;  %8843 = vperm.xlu2 %12771, %v8835_v36  }
 0xaf0   : > { %8863 = vperm.xlu1 %12770, %v8855_v51  }
 0xaf4   : > { %8858 = vperm.xlu2 %12771, %v8854_v48  }
 0xb36   : > { %v13169_v20 = vpop.permute.xlu2 %13168 }
 0xb37   : > { %v13171_v58 = vunpack.i.h.bf16 %v13169_v20  ;;  %v13170_v3 = vunpack.i.l.bf16 %v13169_v20 }
 0xb39   : > { %v8683_v52 = vsel %vm1088_vm1, %v13170_v3, %v13171_v58 }
 0xb3a   : > { %v8705_v45 = vmax.f32 %v8636_v15, %v8683_v52 }
 0xb3e   : > { %v8679_v39 = vpop.permute.xlu2 %8678 }
 0xb3f   : > { %v8712_v60 = vmax.f32 %v8643_v22, %v8679_v39 }
 0xb42   : > { %v8673_v43 = vpop.permute.xlu0 %8672 }
 0xb46   : > { %v8844_v38 = vpop.permute.xlu2 %8843 }
 0xb4a   : > { %v8675_v26 = vpop.permute.xlu1 %8674 }
 0xb4b   : > { %v8686_v61 = vsel %vm1088_vm1, %v8673_v43, %v8675_v26 }
 0xb4c   : > { %v8709_v13 = vmax.f32 %v17958_v9, %v8686_v61 }
 0xb4e   : > { %12477 = vmatpush.msk.msra.mxu1 %vm2091_vm14, %v8709_v13  ;;  %v13164_v56 = vpop.permute.xlu0 %13163  ;;  %v8859_v0 = vpop.permute.xlu2 %8858 }
 0xb4f   : > { %v13166_v10 = vunpack.i.h.bf16 %v13164_v56  ;;  %v13165_v50 = vunpack.i.l.bf16 %v13164_v56 }
 0xb50   : > { %8748 = vmatpush.msra.mxu1 %v8705_v45 }
 0xb51   : > { %v8680_v33 = vsel %vm1088_vm1, %v13165_v50, %v13166_v10 }
 0xb52   : > { %v8677_v44 = vpop.permute.xlu1 %8676  ;;  %v8701_v34 = vmax.f32 %v17974_v49, %v8680_v33 }
 0xb53   : > { %v8687_v29 = vsel %vm1088_vm1, %v8675_v26, %v8677_v44  ;;  %v8688_v9 = vsel %vm1088_vm1, %v8677_v44, %v8679_v39 }
 0xb54   : > { %v8710_v31 = vmax.f32 %v17966_v28, %v8687_v29  ;;  %v8711_v57 = vmax.f32 %v8642_v11, %v8688_v9  ;;  %8749 = vmatpush.msra.mxu1 %v8701_v34 }
 0xb55   : > { %12478 = vmatmul.msk.f32.vlgmr.msra.gmra.mxu1 %vm8715_vm5, %v8713_v40 }
 0xb56   : > { %12480 = vmatpush.msk.msrb.mxu2 %vm2091_vm14, %v8710_v31  ;;  %12483 = vmatpush.msk.msra.mxu3 %vm2091_vm14, %v8711_v57  ;;  %v13174_v54 = vpop.permute.xlu0 %13173 }
 0xb57   : > { %12486 = vmatpush.msk.msrb.mxu1 %vm2091_vm14, %v8712_v60  ;;  %v13176_v27 = vunpack.i.h.bf16 %v13174_v54  ;;  %v13175_v8 = vunpack.i.l.bf16 %v13174_v54 }
 0xb59   : > { %v8708_v4 = vmax.f32 %v8639_v59, %v13176_v27  ;;  %v8684_v24 = vsel %vm1088_vm1, %v13171_v58, %v13175_v8  ;;  %v8685_v7 = vsel %vm1088_vm1, %v13175_v8, %v13176_v27 }
 0xb5a   : > { %v13179_v25 = vpop.permute.xlu1 %13178  ;;  %v8706_v1 = vmax.f32 %v17977_v2, %v8684_v24  ;;  %v8707_v28 = vmax.f32 %v17994_v41, %v8685_v7 }
 0xb5b   : > { %v13181_v16 = vunpack.i.h.bf16 %v13179_v25  ;;  %v13180_v21 = vunpack.i.l.bf16 %v13179_v25  ;;  %8817 = vmatpush.msrb.mxu1 %v8708_v4 }
 0xb5c   : > { %8771 = vmatpush.msrb.mxu2 %v8706_v1  ;;  %8794 = vmatpush.msra.mxu3 %v8707_v28 }
 0xb5d   : > { %v8704_v15 = vmax.f32 %v8635_v42, %v13181_v16  ;;  %12479 = vmatmul.msk.f32.gmra.mxu1 %vm8715_vm5, %v8714_v19  ;;  %v8681_v49 = vsel %vm1088_vm1, %v13166_v10, %v13180_v21  ;;  %v8682_v32 = vsel %vm1088_vm1, %v13180_v21, %v13181_v16  ;;  %vm8932_vm1 = vcmask 1048544  }
 0xb5e   : > { %v8702_v2 = vmax.f32 %v17972_v37, %v8681_v49  ;;  %v8703_v12 = vmax.f32 %v17998_v30, %v8682_v32  ;;  %v8874_v37 = vld [vmem:[%s18989_s26] sm:$0xf]  ;;  %v8839_v17 = vpop.permute.xlu0 %8838 }
 0xb5f   : > { %8818 = vmatpush.msrb.mxu1 %v8704_v15  ;;  %v8876_v6 = vperm.slane %v8874_v37, 0  ;;  %v8877_v18 = vperm.slane %v8874_v37, 1  ;;  %v8879_v13 = vperm.slane %v8874_v37, 3  ;;  %v8878_v34 = vperm.slane %v8874_v37, 2 }
 0xb60   : > { %8772 = vmatpush.msrb.mxu2 %v8702_v2  ;;  %8795 = vmatpush.msra.mxu3 %v8703_v12 }
 0xb61   : > { %12481 = vmatmul.msk.f32.vlgmr.msrb.gmra.mxu2 %vm8715_vm5, %v8713_v40  ;;  %12484 = vmatmul.msk.f32.vlgmr.msra.gmra.mxu3 %vm8715_vm5, %v8713_v40 }
 0xb62   : > { %v8864_v63 = vpop.permute.xlu1 %8863 }
 0xb65   : > { %12487 = vmatmul.msk.f32.vlgmr.msrb.gmra.mxu1 %vm8715_vm5, %v8713_v40 }
 0xb69   : > { %12482 = vmatmul.msk.f32.gmra.mxu2 %vm8715_vm5, %v8714_v19  ;;  %12485 = vmatmul.msk.f32.gmra.mxu3 %vm8715_vm5, %v8714_v19 }
 0xb6d   : > { %12488 = vmatmul.msk.f32.gmra.mxu1 %vm8715_vm5, %v8714_v19 }
 0xbd2   : > { %v8751_v55 = vpop.f32.mrf.mxu1 }
 0xbd3   : > { %v8826_v47 = vmax.f32 %v8751_v55, 0.0 }
 0xbd5   : > { %v8846_v53 = vmul.f32 %v8839_v17, %v8826_v47 }
 0xbd7   : > { %v8866_v46 = vadd.f32 %v8859_v0, %v8846_v53 }
 0xbd9   : > { %v8884_v11 = vmul.f32 %v8876_v6, %v8866_v46 }
 0xbda   : > { %v8754_v35 = vpop.f32.mrf.mxu1 }
 0xbdb   : > { %v8830_v14 = vmax.f32 %v8754_v35, 0.0  ;;  %8900 = vrot.lane.b32.xlu0 %v8884_v11, %s19347_s3 }
 0xbdd   : > { %v8850_v5 = vmul.f32 %v8844_v38, %v8830_v14 }
 0xbdf   : > { %v8870_v41 = vadd.f32 %v8864_v63, %v8850_v5 }
 0xbe1   : > { %v8888_v59 = vmul.f32 %v8876_v6, %v8870_v41 }
 0xbe2   : > { %v8820_v30 = vpop.f32.mrf.mxu1 }
 0xbe3   : > { %8908 = vrot.lane.b32.xlu0 %v8888_v59, %s19347_s3  ;;  %v8829_v52 = vmax.f32 %v8820_v30, 0.0 }
 0xbe4   : > { %v8774_v42 = vpop.f32.mrf.mxu2  ;;  %v8797_v22 = vpop.f32.mrf.mxu3 }
 0xbe5   : > { %v8827_v62 = vmax.f32 %v8774_v42, 0.0  ;;  %v8828_v56 = vmax.f32 %v8797_v22, 0.0  ;;  %v8849_v29 = vmul.f32 %v8839_v17, %v8829_v52 }
 0xbe7   : > { %v8847_v23 = vmul.f32 %v8839_v17, %v8827_v62  ;;  %v8848_v40 = vmul.f32 %v8839_v17, %v8828_v56  ;;  %v8869_v60 = vadd.f32 %v8859_v0, %v8849_v29  ;;  %v9796_v62 = vld [vmem:[#allocation5 + $0x68] sm:$0x3]  ;;  %v12489_v56 = vld [vmem:[%s18982_s19 + $0x10] sm:$0xff] }
 0xbe9   : > { %v8867_v36 = vadd.f32 %v8859_v0, %v8847_v23  ;;  %v8868_v57 = vadd.f32 %v8859_v0, %v8848_v40  ;;  %v8887_v27 = vmul.f32 %v8879_v13, %v8869_v60  ;;  %v12490_v40 = vld [vmem:[%s18982_s19 + $0x18] sm:$0x3f] }
 0xbea   : > { %v8823_v51 = vpop.f32.mrf.mxu1 }
 0xbeb   : > { %v8833_v48 = vmax.f32 %v8823_v51, 0.0  ;;  %v8885_v20 = vmul.f32 %v8877_v18, %v8867_v36  ;;  %v8886_v54 = vmul.f32 %v8878_v34, %v8868_v57 }
 0xbec   : > { %v8777_v43 = vpop.f32.mrf.mxu2  ;;  %v8800_v58 = vpop.f32.mrf.mxu3 }
 0xbed   : > { %v8831_v3 = vmax.f32 %v8777_v43, 0.0  ;;  %v8832_v26 = vmax.f32 %v8800_v58, 0.0  ;;  %v8853_v61 = vmul.f32 %v8844_v38, %v8833_v48  ;;  %8902 = vrot.lane.b32.xlu1 %v8885_v20, %s19347_s3 }
 0xbef   : > { %v8851_v45 = vmul.f32 %v8844_v38, %v8831_v3  ;;  %v8852_v10 = vmul.f32 %v8844_v38, %v8832_v26  ;;  %v8873_v50 = vadd.f32 %v8864_v63, %v8853_v61  ;;  %v10261_v26 = vld [vmem:[%s18983_s20] sm:$0xff] }
 0xbf1   : > { %v8871_v33 = vadd.f32 %v8864_v63, %v8851_v45  ;;  %v8872_v39 = vadd.f32 %v8864_v63, %v8852_v10  ;;  %v8891_v44 = vmul.f32 %v8879_v13, %v8873_v50 }
 0xbf3   : > { %8914 = vrot.lane.b32.xlu0 %v8891_v44, %s19347_s3  ;;  %v8890_v9 = vmul.f32 %v8878_v34, %v8872_v39  ;;  %v8889_v31 = vmul.f32 %v8877_v18, %v8871_v33  ;;  %v13349_v18 = vld [vmem:[#allocation5 + $0x28] sm:$0xff] }
 0xbf4   : > { %v13232_v36 = vpack.i.bf16 %v13349_v18, %v9796_v62 }
 0xbf5   : > { %8912 = vrot.lane.b32.xlu2 %v8890_v9, %s19347_s3  ;;  %8910 = vrot.lane.b32.xlu1 %v8889_v31, %s19347_s3  ;;  %v10262_v31 = vld [vmem:[%s18983_s20 + $0x8] sm:$0x3f] }
 0xbfd   : > { %8904 = vrot.lane.b32.xlu2 %v8886_v54, %s19347_s3  ;;  %8906 = vrot.lane.b32.xlu1 %v8887_v27, %s19347_s3 }
 0xc4d   : > { %v8901_v8 = vpop.permute.xlu0 %8900 }
 0xc4e   : > { %8933 = vst.msk [vmem:[#allocation5] sm:$0xff] %vm8932_vm1, %v8901_v8 }
 0xc4f   : > { %v8913_v4 = vpop.permute.xlu2 %8912 }
 0xc55   : > { %v8909_v24 = vpop.permute.xlu0 %8908  ;;  %v18073_v16 = vld [vmem:[#allocation5] sm:$0xff] }
 0xc56   : > { %8940 = vst.msk [vmem:[#allocation5 + $0x40] sm:$0x3] %vm8939_vm8, %v8909_v24 }
 0xc57   : > { %v8905_v25 = vpop.permute.xlu2 %8904 }
 0xc5d   : > { %v18063_v7 = vld [vmem:[#allocation5 + $0x40] sm:$0x3] }
 0xc5e   : > { %8975 = vrot.lane.b32.xlu2 %v18063_v7, %s19347_s3  ;;  %v9357_v6 = vld [vmem:[#allocation5 + $0x40] sm:$0x3] }
 0xc5f   : > { %v8903_v1 = vpop.permute.xlu1 %8902 }
 0xc60   : > { %v18068_v28 = vsel %vm5125_vm6, %v8901_v8, %v8903_v1  ;;  %v18071_v19 = vsel %vm5125_vm6, %v8903_v1, %v8905_v25 }
 0xc61   : > { %v13182_v21 = vpack.i.bf16 %v18068_v28, %v18073_v16  ;;  %v13222_v42 = vpack.i.bf16 %v18071_v19, %v18068_v28 }
 0xc65   : > { %v8915_v15 = vpop.permute.xlu0 %8914 }
 0xc66   : > { %v8921_v49 = vsel %vm5125_vm6, %v8913_v4, %v8915_v15  ;;  %8945 = vst.msk [vmem:[#allocation5 + $0x60] sm:$0x3] %vm8944_vm0, %v8915_v15  ;;  %13183 = vrot.lane.b32.xlu2 %v13182_v21, %s19347_s3 }
 0xc67   : > { %8943 = vst [vmem:[#allocation5 + $0x58] sm:$0x3] %v8921_v49  ;;  %v8911_v32 = vpop.permute.xlu1 %8910 }
 0xc68   : > { %v8919_v2 = vsel %vm5125_vm6, %v8909_v24, %v8911_v32  ;;  %v8920_v12 = vsel %vm5125_vm6, %v8911_v32, %v8913_v4 }
 0xc69   : > { %8941 = vst [vmem:[#allocation5 + $0x48] sm:$0x3] %v8919_v2 }
 0xc6a   : > { %8942 = vst [vmem:[#allocation5 + $0x50] sm:$0x3] %v8920_v12  ;;  %v8947_v12 = vld [vmem:[%s18982_s19 + $0x8] sm:$0x3f] }
 0xc6d   : > { %v18112_v0 = vld [vmem:[#allocation5 + $0x60] sm:$0x3] }
 0xc6e   : > { %9216 = vrot.lane.b32.xlu2 %v18063_v7, %s13375_s25  ;;  %v18098_v53 = vld [vmem:[#allocation5 + $0x58] sm:$0x3]  ;;  %v9795_v5 = vld [vmem:[#allocation5 + $0x60] sm:$0x3] }
 0xc6f   : > { %v8907_v38 = vpop.permute.xlu1 %8906  ;;  %v18126_v35 = vld [vmem:[#allocation5 + $0x58] sm:$0x3] }
 0xc70   : > { %v18084_v55 = vsel %vm5125_vm6, %v8905_v25, %v8907_v38  ;;  %8938 = vst.msk [vmem:[#allocation5 + $0x20] sm:$0xff] %vm8937_vm4, %v8907_v38  ;;  %v18087_v37 = vld [vmem:[#allocation5 + $0x48] sm:$0x3]  ;;  %v9794_v63 = vld [vmem:[#allocation5 + $0x58] sm:$0x3]  ;;  %v10281_v25 = vld [vmem:[%s18984_s21] sm:$0xff] }
 0xc71   : > { %v18089_v47 = vld [vmem:[#allocation5 + $0x50] sm:$0x3]  ;;  %8977 = vrot.lane.b32.xlu0 %v18087_v37, %s19347_s3  ;;  %v13187_v17 = vpack.i.bf16 %v18084_v55, %v18071_v19  ;;  %v18116_v46 = vld [vmem:[#allocation5 + $0x48] sm:$0x3] }
 0xc72   : > { %8979 = vrot.lane.b32.xlu1 %v18089_v47, %s19347_s3  ;;  %v18118_v11 = vld [vmem:[#allocation5 + $0x50] sm:$0x3]  ;;  %v9792_v41 = vld [vmem:[#allocation5 + $0x48] sm:$0x3] }
 0xc73   : > { %v9793_v59 = vld [vmem:[#allocation5 + $0x50] sm:$0x3] }
 0xc76   : > { %13193 = vrot.lane.b32.xlu2 %v13182_v21, %s13375_s25 }
 0xc77   : > { %v18132_v14 = vld [vmem:[#allocation5 + $0x20] sm:$0xff] }
 0xc78   : > { %v13227_v22 = vpack.i.bf16 %v18132_v14, %v18084_v55 }
 0xc79   : > { %13188 = vrot.lane.b32.xlu0 %v13187_v17, %s19347_s3 }
 0xc7a   : > { %8981 = vrot.lane.b32.xlu1 %v18098_v53, %s19347_s3 }
 0xc7e   : > { %9382 = vrot.lane.b32.xlu2 %v9357_v6, %s19349_s8 }
 0xc81   : > { %9218 = vrot.lane.b32.xlu0 %v18087_v37, %s13375_s25 }
 0xc82   : > { %9220 = vrot.lane.b32.xlu1 %v18089_v47, %s13375_s25 }
 0xc86   : > { %13203 = vrot.lane.b32.xlu2 %v13182_v21, %s19349_s8 }
 0xc89   : > { %13198 = vrot.lane.b32.xlu0 %v13187_v17, %s13375_s25 }
 0xc8a   : > { %9222 = vrot.lane.b32.xlu1 %v18098_v53, %s13375_s25 }
 0xc8e   : > { %9390 = vrot.lane.b32.xlu2 %v18112_v0, %s19349_s8 }
 0xc91   : > { %9384 = vrot.lane.b32.xlu0 %v18116_v46, %s19349_s8 }
 0xc92   : > { %9386 = vrot.lane.b32.xlu1 %v18118_v11, %s19349_s8 }
 0xc96   : > { %9533 = vrot.lane.b32.xlu2 %v18116_v46, %s19287_s9 }
 0xc99   : > { %13208 = vrot.lane.b32.xlu0 %v13187_v17, %s19349_s8 }
 0xc9a   : > { %9388 = vrot.lane.b32.xlu1 %v18126_v35, %s19349_s8 }
 0xc9e   : > { %13218 = vrot.lane.b32.xlu2 %v13187_v17, %s19287_s9 }
 0xca1   : > { %9380 = vrot.lane.b32.xlu0 %v18132_v14, %s19349_s8 }
 0xca2   : > { %9531 = vrot.lane.b32.xlu1 %v9357_v6, %s19287_s9 }
 0xca6   : > { %9529 = vrot.lane.b32.xlu2 %v18132_v14, %s19287_s9 }
 0xca9   : > { %9535 = vrot.lane.b32.xlu0 %v18118_v11, %s19287_s9 }
 0xcaa   : > { %13213 = vrot.lane.b32.xlu1 %v13182_v21, %s19287_s9 }
 0xcae   : > { %9823 = vrot.lane.b32.xlu2 %v9795_v5, %s13376_s5 }
 0xcb1   : > { %9537 = vrot.lane.b32.xlu0 %v18126_v35, %s19287_s9 }
 0xcb2   : > { %9539 = vrot.lane.b32.xlu1 %v18112_v0, %s19287_s9 }
 0xcb6   : > { %9821 = vrot.lane.b32.xlu2 %v9794_v63, %s13376_s5 }
 0xcb8   : > { %v8976_v30 = vpop.permute.xlu2 %8975 }
 0xcb9   : > { %9817 = vrot.lane.b32.xlu0 %v9792_v41, %s13376_s5 }
 0xcba   : > { %9819 = vrot.lane.b32.xlu1 %v9793_v59, %s13376_s5 }
 0xcbe   : > { %9969 = vrot.lane.b32.xlu2 %v9793_v59, %s13377_s2 }
 0xcc0   : > { %v13184_v23 = vpop.permute.xlu2 %13183 }
 0xcc1   : > { %13223 = vrot.lane.b32.xlu0 %v13222_v42, %s13376_s5  ;;  %v13186_v43 = vunpack.i.h.bf16 %v13184_v23  ;;  %v13185_v58 = vunpack.i.l.bf16 %v13184_v23 }
 0xcc2   : > { %13228 = vrot.lane.b32.xlu1 %v13227_v22, %s13376_s5 }
 0xcc3   : > { %v8983_v45 = vsel %vm5125_vm6, %v13185_v58, %v13186_v43 }
 0xcc6   : > { %13243 = vrot.lane.b32.xlu2 %v13227_v22, %s13377_s2 }
 0xcc8   : > { %v9217_v51 = vpop.permute.xlu2 %9216 }
 0xcc9   : > { %13233 = vrot.lane.b32.xlu0 %v13232_v36, %s13376_s5 }
 0xcca   : > { %9967 = vrot.lane.b32.xlu1 %v9792_v41, %s13377_s2 }
 0xcce   : > { %10117 = vrot.lane.b32.xlu2 %v9792_v41, %s19349_s8 }
 0xcd0   : > { %v18164_v48 = vpop.permute.xlu2 %13193 }
 0xcd1   : > { %9971 = vrot.lane.b32.xlu0 %v9794_v63, %s13377_s2  ;;  %v13196_v60 = vunpack.i.h.bf16 %v18164_v48  ;;  %v13195_v54 = vunpack.i.l.bf16 %v18164_v48  ;;  %v12516_v48 = vld [vmem:[%s18982_s19 + $0x28] sm:$0x3f] }
 0xcd2   : > { %13238 = vrot.lane.b32.xlu1 %v13222_v42, %s13377_s2 }
 0xcd3   : > { %v9225_v1 = vsel %vm9224_vm9, %v13195_v54, %v13196_v60 }
 0xcd6   : > { %13253 = vrot.lane.b32.xlu2 %v13222_v42, %s19349_s8 }
 0xcd8   : > { %v18170_v20 = vpop.permute.xlu2 %9382 }
 0xcd9   : > { %9973 = vrot.lane.b32.xlu0 %v9795_v5, %s13377_s2 }
 0xcda   : > { %13248 = vrot.lane.b32.xlu1 %v13232_v36, %s13377_s2 }
 0xcde   : > { %10113 = vrot.lane.b32.xlu2 %v18132_v14, %s19349_s8 }
 0xce0   : > { %v18191_v10 = vpop.permute.xlu2 %13203 }
 0xce1   : > { %10119 = vrot.lane.b32.xlu0 %v9793_v59, %s19349_s8  ;;  %v13206_v17 = vunpack.i.h.bf16 %v18191_v10  ;;  %v12515_v59 = vld [vmem:[%s18982_s19 + $0x20] sm:$0xff] }
 0xce2   : > { %10121 = vrot.lane.b32.xlu1 %v9794_v63, %s19349_s8 }
 0xce3   : > { %v8978_v3 = vpop.permute.xlu0 %8977 }
 0xce4   : > { %v8986_v61 = vsel %vm5125_vm6, %v8976_v30, %v8978_v3  ;;  %v8980_v52 = vpop.permute.xlu1 %8979 }
 0xce5   : > { %v8987_v13 = vsel %vm5125_vm6, %v8978_v3, %v8980_v52  ;;  %12491 = vmatpush.msk.msra.mxu2 %vm2091_vm14, %v8986_v61 }
 0xce6   : > { %12494 = vmatpush.msk.msrb.mxu3 %vm2091_vm14, %v8987_v13  ;;  %10265 = vperm.xlu2 %12771, %v10261_v26   ;;  %v12529_v13 = vld [vmem:[%s18982_s19 + $0x30] sm:$0xff] }
 0xce7   : > { %9022 = vmatpush.msra.mxu2 %v8983_v45 }
 0xce8   : > { %12492 = vmatmul.msk.f32.vlgmr.msra.gmra.mxu2 %vm2084_vm15, %v12489_v56  ;;  %v9391_v4 = vpop.permute.xlu2 %9390 }
 0xce9   : > { %12503 = vmatpush.msk.msrb.mxu2 %vm2091_vm14, %v18063_v7  ;;  %10111 = vrot.lane.b32.xlu0 %v18084_v55, %s19349_s8  ;;  %v8946_v7 = vld [vmem:[%s18982_s19] sm:$0xff] }
 0xcea   : > { %10123 = vrot.lane.b32.xlu1 %v9795_v5, %s19349_s8 }
 0xceb   : > { %9128 = vmatpush.msrb.mxu2 %v18073_v16  ;;  %v13189_v50 = vpop.permute.xlu0 %13188  ;;  %v10282_v16 = vld [vmem:[%s18984_s21 + $0x8] sm:$0x3f] }
 0xcec   : > { %v8982_v33 = vpop.permute.xlu1 %8981  ;;  %v13191_v39 = vunpack.i.h.bf16 %v13189_v50  ;;  %v13190_v44 = vunpack.i.l.bf16 %v13189_v50 }
 0xced   : > { %v8988_v34 = vsel %vm5125_vm6, %v8980_v52, %v8982_v33  ;;  %12500 = vmatpush.msk.msra.mxu1 %vm2091_vm14, %v8982_v33 }
 0xcee   : > { %12497 = vmatpush.msk.msrb.mxu0 %vm2091_vm14, %v8988_v34  ;;  %v8984_v29 = vsel %vm5125_vm6, %v13186_v43, %v13190_v44  ;;  %v8985_v9 = vsel %vm5125_vm6, %v13190_v44, %v13191_v39  ;;  %v12530_v34 = vld [vmem:[%s18982_s19 + $0x38] sm:$0x3f] }
 0xcef   : > { %9091 = vmatpush.msra.mxu1 %v13191_v39  ;;  %9045 = vmatpush.msrb.mxu3 %v8984_v29 }
 0xcf0   : > { %12493 = vmatmul.msk.f32.gmra.mxu2 %vm2084_vm15, %v12490_v40  ;;  %9068 = vmatpush.msrb.mxu0 %v8985_v9 }
 0xcf1   : > { %12501 = vmatmul.msk.f32.vlgmr.msra.gmra.mxu1 %vm2084_vm15, %v12489_v56  ;;  %12495 = vmatmul.msk.f32.vlgmr.msrb.gmra.mxu3 %vm2084_vm15, %v12489_v56 }
 0xcf2   : > { %10270 = vperm.xlu1 %12770, %v10262_v31   ;;  %12512 = vmatpush.msk.msrb.mxu1 %vm2091_vm14, %v18098_v53  ;;  %v13205_v53 = vunpack.i.l.bf16 %v18191_v10 }
 0xcf3   : > { %12498 = vmatmul.msk.f32.vlgmr.msrb.gmra.mxu0 %vm2084_vm15, %v12489_v56  ;;  %12506 = vmatpush.msk.msra.mxu3 %vm2091_vm14, %v18087_v37  ;;  %v9219_v57 = vpop.permute.xlu0 %9218 }
 0xcf4   : > { %12509 = vmatpush.msk.msra.mxu0 %vm2091_vm14, %v18089_v47  ;;  %13258 = vrot.lane.b32.xlu0 %v13232_v36, %s19349_s8  ;;  %v9221_v27 = vpop.permute.xlu1 %9220  ;;  %v9228_v8 = vsel %vm9224_vm9, %v9217_v51, %v9219_v57  ;;  %v9534_v47 = vpop.permute.xlu2 %9533  ;;  %v9392_v30 = vsel %vm6003_vm10, %v13205_v53, %v13206_v17 }
 0xcf5   : > { %9197 = vmatpush.msrb.mxu1 %v18084_v55  ;;  %9151 = vmatpush.msra.mxu3 %v18068_v28  ;;  %v9229_v24 = vsel %vm9224_vm9, %v9219_v57, %v9221_v27 }
 0xcf6   : > { %9174 = vmatpush.msra.mxu0 %v18071_v19  ;;  %12517 = vmatpush.msk.msra.mxu2 %vm2091_vm14, %v9228_v8 }
 0xcf7   : > { %12520 = vmatpush.msk.msrb.mxu3 %vm2091_vm14, %v9229_v24 }
 0xcf8   : > { %12504 = vmatmul.msk.f32.vlgmr.msrb.gmra.mxu2 %vm2084_vm15, %v8946_v7 }
 0xcf9   : > { %12502 = vmatmul.msk.f32.gmra.mxu1 %vm2084_vm15, %v12490_v40  ;;  %9264 = vmatpush.msra.mxu2 %v9225_v1 }
 0xcfa   : > { %10285 = vperm.xlu1 %12770, %v10281_v25   ;;  %12496 = vmatmul.msk.f32.gmra.mxu3 %vm2084_vm15, %v12490_v40 }
 0xcfb   : > { %12499 = vmatmul.msk.f32.gmra.mxu0 %vm2084_vm15, %v12490_v40  ;;  %v13199_v21 = vpop.permute.xlu0 %13198 }
 0xcfc   : > { %10290 = vperm.xlu0 %12769, %v10282_v16   ;;  %v9223_v15 = vpop.permute.xlu1 %9222  ;;  %v13201_v49 = vunpack.i.h.bf16 %v13199_v21  ;;  %v13200_v32 = vunpack.i.l.bf16 %v13199_v21  ;;  %v18263_v42 = vpop.permute.xlu2 %13218 }
 0xcfd   : > { %v9230_v2 = vsel %vm9224_vm9, %v9221_v27, %v9223_v15  ;;  %12526 = vmatpush.msk.msra.mxu1 %vm2091_vm14, %v9223_v15  ;;  %v13220_v50 = vunpack.i.l.bf16 %v18263_v42  ;;  %v13221_v9 = vunpack.i.h.bf16 %v18263_v42  ;;  %v12557_v15 = vld [vmem:[%s18982_s19 + $0x50] sm:$0xff] }
 0xcfe   : > { %12523 = vmatpush.msk.msrb.mxu0 %vm2091_vm14, %v9230_v2  ;;  %v9226_v38 = vsel %vm9224_vm9, %v13196_v60, %v13200_v32  ;;  %v9227_v37 = vsel %vm9224_vm9, %v13200_v32, %v13201_v49 }
 0xcff   : > { %9333 = vmatpush.msra.mxu1 %v13201_v49  ;;  %9287 = vmatpush.msrb.mxu3 %v9226_v38 }
 0xd00   : > { %12505 = vmatmul.msk.f32.gmra.mxu2 %vm2084_vm15, %v8947_v12  ;;  %9310 = vmatpush.msrb.mxu0 %v9227_v37 }
 0xd01   : > { %12513 = vmatmul.msk.f32.vlgmr.msrb.gmra.mxu1 %vm2084_vm15, %v8946_v7 }
 0xd02   : > { %12507 = vmatmul.msk.f32.vlgmr.msra.gmra.mxu3 %vm2084_vm15, %v8946_v7 }
 0xd03   : > { %12510 = vmatmul.msk.f32.vlgmr.msra.gmra.mxu0 %vm2084_vm15, %v8946_v7  ;;  %v9385_v6 = vpop.permute.xlu0 %9384 }
 0xd04   : > { %v9387_v5 = vpop.permute.xlu1 %9386  ;;  %v9396_v63 = vsel %vm6003_vm10, %v18170_v20, %v9385_v6  ;;  %v9530_v58 = vpop.permute.xlu2 %9529 }
 0xd05   : > { %v9397_v41 = vsel %vm6003_vm10, %v9385_v6, %v9387_v5  ;;  %12531 = vmatpush.msk.msrb.mxu2 %vm2091_vm14, %v9396_v63  ;;  %v12558_v6 = vld [vmem:[%s18982_s19 + $0x58] sm:$0x3f] }
 0xd06   : > { %12534 = vmatpush.msk.msra.mxu3 %vm2091_vm14, %v9397_v41 }
 0xd07   : > { %9433 = vmatpush.msrb.mxu2 %v9392_v30 }
 0xd08   : > { %12518 = vmatmul.msk.f32.vlgmr.msra.gmra.mxu2 %vm2084_vm15, %v12515_v59 }
 0xd09   : > { %12514 = vmatmul.msk.f32.gmra.mxu1 %vm2084_vm15, %v8947_v12 }
 0xd0a   : > { %12508 = vmatmul.msk.f32.gmra.mxu3 %vm2084_vm15, %v8947_v12 }
 0xd0b   : > { %12511 = vmatmul.msk.f32.gmra.mxu0 %vm2084_vm15, %v8947_v12  ;;  %v13209_v22 = vpop.permute.xlu0 %13208 }
 0xd0c   : > { %v9389_v62 = vpop.permute.xlu1 %9388  ;;  %v13211_v23 = vunpack.i.h.bf16 %v13209_v22  ;;  %v13210_v18 = vunpack.i.l.bf16 %v13209_v22  ;;  %v18293_v33 = vpop.permute.xlu2 %9823 }
 0xd0d   : > { %v9398_v36 = vsel %vm6003_vm10, %v9387_v5, %v9389_v62  ;;  %v9399_v51 = vsel %vm6003_vm10, %v9389_v62, %v9391_v4  ;;  %v12544_v4 = vld [vmem:[%s18982_s19 + $0x48] sm:$0x3f] }
 0xd0e   : > { %12537 = vmatpush.msk.msra.mxu0 %vm2091_vm14, %v9398_v36  ;;  %12540 = vmatpush.msk.msrb.mxu1 %vm2091_vm14, %v9399_v51  ;;  %v9393_v20 = vsel %vm6003_vm10, %v13206_v17, %v13210_v18  ;;  %v9394_v43 = vsel %vm6003_vm10, %v13210_v18, %v13211_v23  ;;  %v12571_v18 = vld [vmem:[%s18982_s19 + $0x60] sm:$0xff] }
 0xd0f   : > { %9456 = vmatpush.msra.mxu3 %v9393_v20 }
 0xd10   : > { %12519 = vmatmul.msk.f32.gmra.mxu2 %vm2084_vm15, %v12516_v48  ;;  %9479 = vmatpush.msra.mxu0 %v9394_v43 }
 0xd11   : > { %12527 = vmatmul.msk.f32.vlgmr.msra.gmra.mxu1 %vm2084_vm15, %v12515_v59 }
 0xd12   : > { %12521 = vmatmul.msk.f32.vlgmr.msrb.gmra.mxu3 %vm2084_vm15, %v12515_v59 }
 0xd13   : > { %12524 = vmatmul.msk.f32.vlgmr.msrb.gmra.mxu0 %vm2084_vm15, %v12515_v59  ;;  %v9381_v3 = vpop.permute.xlu0 %9380 }
 0xd14   : > { %v9532_v26 = vpop.permute.xlu1 %9531  ;;  %v9395_v61 = vsel %vm6003_vm10, %v13211_v23, %v9381_v3  ;;  %v9822_v27 = vpop.permute.xlu2 %9821 }
 0xd15   : > { %v9545_v52 = vsel %vm823_vm12, %v9532_v26, %v9534_v47  ;;  %9502 = vmatpush.msrb.mxu1 %v9395_v61  ;;  %v12572_v61 = vld [vmem:[%s18982_s19 + $0x68] sm:$0x3f] }
 0xd16   : > { %12545 = vmatpush.msk.msra.mxu2 %vm2091_vm14, %v9545_v52 }
 0xd18   : > { %12532 = vmatmul.msk.f32.vlgmr.msrb.gmra.mxu2 %vm2084_vm15, %v12529_v13 }
 0xd19   : > { %12528 = vmatmul.msk.f32.gmra.mxu1 %vm2084_vm15, %v12516_v48 }
 0xd1a   : > { %12522 = vmatmul.msk.f32.gmra.mxu3 %vm2084_vm15, %v12516_v48 }
 0xd1b   : > { %12525 = vmatmul.msk.f32.gmra.mxu0 %vm2084_vm15, %v12516_v48  ;;  %v9536_v56 = vpop.permute.xlu0 %9535 }
 0xd1c   : > { %v13214_v45 = vpop.permute.xlu1 %13213  ;;  %v9546_v10 = vsel %vm823_vm12, %v9534_v47, %v9536_v56  ;;  %v9970_v24 = vpop.permute.xlu2 %9969 }
 0xd1d   : > { %v13216_v39 = vunpack.i.h.bf16 %v13214_v45  ;;  %v13215_v44 = vunpack.i.l.bf16 %v13214_v45  ;;  %12548 = vmatpush.msk.msrb.mxu3 %vm2091_vm14, %v9546_v10 }
 0xd1f   : > { %v9541_v40 = vsel %vm823_vm12, %v13215_v44, %v13216_v39  ;;  %v9542_v29 = vsel %vm823_vm12, %v13216_v39, %v13220_v50 }
 0xd20   : > { %9582 = vmatpush.msra.mxu2 %v9541_v40  ;;  %9605 = vmatpush.msrb.mxu3 %v9542_v29  ;;  %v12585_v40 = vld [vmem:[%s18982_s19 + $0x70] sm:$0xff] }
 0xd21   : > { %12533 = vmatmul.msk.f32.gmra.mxu2 %vm2084_vm15, %v12530_v34  ;;  %12541 = vmatmul.msk.f32.vlgmr.msrb.gmra.mxu1 %vm2084_vm15, %v12529_v13 }
 0xd22   : > { %12559 = vmatpush.msk.msrb.mxu2 %vm2091_vm14, %v18116_v46  ;;  %12535 = vmatmul.msk.f32.vlgmr.msra.gmra.mxu3 %vm2084_vm15, %v12529_v13  ;;  %v12543_v46 = vld [vmem:[%s18982_s19 + $0x40] sm:$0xff] }
 0xd23   : > { %12538 = vmatmul.msk.f32.vlgmr.msra.gmra.mxu0 %vm2084_vm15, %v12529_v13  ;;  %12562 = vmatpush.msk.msra.mxu3 %vm2091_vm14, %v18118_v11  ;;  %v9538_v31 = vpop.permute.xlu0 %9537  ;;  %v9543_v11 = vsel %vm823_vm12, %v13220_v50, %v13221_v9 }
 0xd24   : > { %9699 = vmatpush.msrb.mxu2 %v18068_v28  ;;  %v9540_v57 = vpop.permute.xlu1 %9539  ;;  %v9547_v60 = vsel %vm823_vm12, %v9536_v56, %v9538_v31  ;;  %v9544_v28 = vsel %vm823_vm12, %v13221_v9, %v9530_v58  ;;  %v13244_v12 = vpop.permute.xlu2 %13243 }
 0xd25   : > { %9722 = vmatpush.msra.mxu3 %v18071_v19  ;;  %v9548_v54 = vsel %vm823_vm12, %v9538_v31, %v9540_v57  ;;  %12551 = vmatpush.msk.msrb.mxu0 %vm2091_vm14, %v9547_v60  ;;  %v13245_v42 = vunpack.i.l.bf16 %v13244_v12  ;;  %v13246_v48 = vunpack.i.h.bf16 %v13244_v12 }
 0xd26   : > { %12554 = vmatpush.msk.msra.mxu1 %vm2091_vm14, %v9548_v54 }
 0xd27   : > { %9628 = vmatpush.msrb.mxu0 %v9543_v11  ;;  %v9980_v52 = vsel %vm9977_vm7, %v13245_v42, %v13246_v48 }
 0xd28   : > { %9651 = vmatpush.msra.mxu1 %v9544_v28  ;;  %v12599_v28 = vld [vmem:[%s18982_s19 + $0x80] sm:$0xff] }
 0xd29   : > { %12565 = vmatpush.msk.msra.mxu0 %vm2091_vm14, %v18126_v35  ;;  %12546 = vmatmul.msk.f32.vlgmr.msra.gmra.mxu2 %vm2084_vm15, %v12543_v46 }
 0xd2a   : > { %12542 = vmatmul.msk.f32.gmra.mxu1 %vm2084_vm15, %v12530_v34  ;;  %12536 = vmatmul.msk.f32.gmra.mxu3 %vm2084_vm15, %v12530_v34 }
 0xd2b   : > { %12568 = vmatpush.msk.msrb.mxu1 %vm2091_vm14, %v18112_v0  ;;  %12539 = vmatmul.msk.f32.gmra.mxu0 %vm2084_vm15, %v12530_v34  ;;  %v9818_v19 = vpop.permute.xlu0 %9817 }
 0xd2c   : > { %v9820_v8 = vpop.permute.xlu1 %9819  ;;  %9745 = vmatpush.msra.mxu0 %v18084_v55  ;;  %v9834_v55 = vsel %vm9827_vm11, %v9822_v27, %v18293_v33  ;;  %v10118_v22 = vpop.permute.xlu2 %10117 }
 0xd2d   : > { %9768 = vmatpush.msrb.mxu1 %v18132_v14  ;;  %v9832_v35 = vsel %vm9827_vm11, %v9818_v19, %v9820_v8  ;;  %v9833_v0 = vsel %vm9827_vm11, %v9820_v8, %v9822_v27 }
 0xd2e   : > { %12573 = vmatpush.msk.msra.mxu2 %vm2091_vm14, %v9832_v35 }
 0xd31   : > { %12547 = vmatmul.msk.f32.gmra.mxu2 %vm2084_vm15, %v12544_v4 }
 0xd32   : > { %12555 = vmatmul.msk.f32.vlgmr.msra.gmra.mxu1 %vm2084_vm15, %v12543_v46  ;;  %12549 = vmatmul.msk.f32.vlgmr.msrb.gmra.mxu3 %vm2084_vm15, %v12543_v46 }
 0xd33   : > { %12552 = vmatmul.msk.f32.vlgmr.msrb.gmra.mxu0 %vm2084_vm15, %v12543_v46  ;;  %12576 = vmatpush.msk.msrb.mxu3 %vm2091_vm14, %v9833_v0  ;;  %v13224_v14 = vpop.permute.xlu0 %13223  ;;  %v12586_v46 = vld [vmem:[%s18982_s19 + $0x78] sm:$0x3f] }
 0xd34   : > { %12579 = vmatpush.msk.msrb.mxu0 %vm2091_vm14, %v9834_v55  ;;  %v13229_v7 = vpop.permute.xlu1 %13228  ;;  %v13226_v25 = vunpack.i.h.bf16 %v13224_v14  ;;  %v13225_v1 = vunpack.i.l.bf16 %v13224_v14  ;;  %v13254_v13 = vpop.permute.xlu2 %13253  ;;  %v12600_v55 = vld [vmem:[%s18982_s19 + $0x88] sm:$0x3f] }
 0xd35   : > { %v13231_v16 = vunpack.i.h.bf16 %v13229_v7  ;;  %v13230_v21 = vunpack.i.l.bf16 %v13229_v7  ;;  %v13256_v10 = vunpack.i.h.bf16 %v13254_v13  ;;  %v13255_v50 = vunpack.i.l.bf16 %v13254_v13 }
 0xd36   : > { %v9828_v49 = vsel %vm9827_vm11, %v13225_v1, %v13226_v25 }
 0xd37   : > { %v9830_v32 = vsel %vm9827_vm11, %v13230_v21, %v13231_v16  ;;  %9869 = vmatpush.msra.mxu2 %v9828_v49  ;;  %v9829_v2 = vsel %vm9827_vm11, %v13226_v25, %v13230_v21  ;;  %v10127_v29 = vsel %vm6003_vm10, %v13255_v50, %v13256_v10 }
 0xd38   : > { %9915 = vmatpush.msrb.mxu0 %v9830_v32  ;;  %9892 = vmatpush.msrb.mxu3 %v9829_v2 }
 0xd39   : > { %12560 = vmatmul.msk.f32.vlgmr.msrb.gmra.mxu2 %vm2084_vm15, %v12557_v15 }
 0xd3a   : > { %12556 = vmatmul.msk.f32.gmra.mxu1 %vm2084_vm15, %v12544_v4  ;;  %12550 = vmatmul.msk.f32.gmra.mxu3 %vm2084_vm15, %v12544_v4 }
 0xd3b   : > { %12553 = vmatmul.msk.f32.gmra.mxu0 %vm2084_vm15, %v12544_v4  ;;  %v13234_v38 = vpop.permute.xlu0 %13233 }
 0xd3c   : > { %v9968_v37 = vpop.permute.xlu1 %9967  ;;  %v13235_v47 = vunpack.i.l.bf16 %v13234_v38  ;;  %v13236_v53 = vunpack.i.h.bf16 %v13234_v38  ;;  %v10114_v54 = vpop.permute.xlu2 %10113 }
 0xd3d   : > { %v9982_v17 = vsel %vm9977_vm7, %v9968_v37, %v9970_v24 }
 0xd3e   : > { %12587 = vmatpush.msk.msrb.mxu2 %vm2091_vm14, %v9982_v17  ;;  %v9835_v5 = vsel %vm9827_vm11, %v18293_v33, %v13235_v47  ;;  %v9831_v63 = vsel %vm9827_vm11, %v13231_v16, %v13236_v53 }
 0xd3f   : > { %12582 = vmatpush.msk.msra.mxu1 %vm2091_vm14, %v9835_v5 }
 0xd41   : > { %12561 = vmatmul.msk.f32.gmra.mxu2 %vm2084_vm15, %v12558_v6  ;;  %9938 = vmatpush.msra.mxu1 %v9831_v63 }
 0xd42   : > { %12569 = vmatmul.msk.f32.vlgmr.msrb.gmra.mxu1 %vm2084_vm15, %v12557_v15  ;;  %12563 = vmatmul.msk.f32.vlgmr.msra.gmra.mxu3 %vm2084_vm15, %v12557_v15 }
 0xd43   : > { %12566 = vmatmul.msk.f32.vlgmr.msra.gmra.mxu0 %vm2084_vm15, %v12557_v15  ;;  %v9972_v41 = vpop.permute.xlu0 %9971 }
 0xd44   : > { %v13239_v59 = vpop.permute.xlu1 %13238  ;;  %v9983_v30 = vsel %vm9977_vm7, %v9970_v24, %v9972_v41 }
 0xd45   : > { %v13241_v62 = vunpack.i.h.bf16 %v13239_v59  ;;  %v13240_v23 = vunpack.i.l.bf16 %v13239_v59  ;;  %12590 = vmatpush.msk.msra.mxu3 %vm2091_vm14, %v9983_v30 }
 0xd47   : > { %v9978_v36 = vsel %vm9977_vm7, %v13240_v23, %v13241_v62  ;;  %v9979_v51 = vsel %vm9977_vm7, %v13241_v62, %v13245_v42 }
 0xd48   : > { %10019 = vmatpush.msrb.mxu2 %v9978_v36  ;;  %10042 = vmatpush.msra.mxu3 %v9979_v51 }
 0xd49   : > { %12574 = vmatmul.msk.f32.vlgmr.msra.gmra.mxu2 %vm2084_vm15, %v12571_v18 }
 0xd4a   : > { %12570 = vmatmul.msk.f32.gmra.mxu1 %vm2084_vm15, %v12558_v6  ;;  %12564 = vmatmul.msk.f32.gmra.mxu3 %vm2084_vm15, %v12558_v6 }
 0xd4b   : > { %12567 = vmatmul.msk.f32.gmra.mxu0 %vm2084_vm15, %v12558_v6  ;;  %v9974_v20 = vpop.permute.xlu0 %9973 }
 0xd4c   : > { %v13249_v43 = vpop.permute.xlu1 %13248  ;;  %v9984_v58 = vsel %vm9977_vm7, %v9972_v41, %v9974_v20 }
 0xd4d   : > { %v13251_v3 = vunpack.i.h.bf16 %v13249_v43  ;;  %v13250_v26 = vunpack.i.l.bf16 %v13249_v43  ;;  %12593 = vmatpush.msk.msra.mxu0 %vm2091_vm14, %v9984_v58 }
 0xd4f   : > { %v9985_v56 = vsel %vm9977_vm7, %v9974_v20, %v13250_v26  ;;  %10065 = vmatpush.msra.mxu0 %v9980_v52  ;;  %v9981_v45 = vsel %vm9977_vm7, %v13246_v48, %v13251_v3 }
 0xd50   : > { %12596 = vmatpush.msk.msrb.mxu1 %vm2091_vm14, %v9985_v56 }
 0xd51   : > { %12575 = vmatmul.msk.f32.gmra.mxu2 %vm2084_vm15, %v12572_v61 }
 0xd52   : > { %12583 = vmatmul.msk.f32.vlgmr.msra.gmra.mxu1 %vm2084_vm15, %v12571_v18  ;;  %12577 = vmatmul.msk.f32.vlgmr.msrb.gmra.mxu3 %vm2084_vm15, %v12571_v18 }
 0xd53   : > { %10088 = vmatpush.msrb.mxu1 %v9981_v45  ;;  %12580 = vmatmul.msk.f32.vlgmr.msrb.gmra.mxu0 %vm2084_vm15, %v12571_v18  ;;  %v10120_v33 = vpop.permute.xlu0 %10119 }
 0xd54   : > { %v10122_v39 = vpop.permute.xlu1 %10121  ;;  %v10131_v44 = vsel %vm6003_vm10, %v10118_v22, %v10120_v33 }
 0xd55   : > { %v10132_v34 = vsel %vm6003_vm10, %v10120_v33, %v10122_v39  ;;  %12601 = vmatpush.msk.msra.mxu2 %vm2091_vm14, %v10131_v44 }
 0xd56   : > { %12604 = vmatpush.msk.msrb.mxu3 %vm2091_vm14, %v10132_v34 }
 0xd57   : > { %10168 = vmatpush.msra.mxu2 %v10127_v29 }
 0xd59   : > { %12588 = vmatmul.msk.f32.vlgmr.msrb.gmra.mxu2 %vm2084_vm15, %v12585_v40 }
 0xd5a   : > { %12584 = vmatmul.msk.f32.gmra.mxu1 %vm2084_vm15, %v12572_v61  ;;  %12578 = vmatmul.msk.f32.gmra.mxu3 %vm2084_vm15, %v12572_v61 }
 0xd5b   : > { %12581 = vmatmul.msk.f32.gmra.mxu0 %vm2084_vm15, %v12572_v61  ;;  %v10112_v9 = vpop.permute.xlu0 %10111 }
 0xd5c   : > { %v10124_v31 = vpop.permute.xlu1 %10123  ;;  %v10128_v57 = vsel %vm6003_vm10, %v13256_v10, %v10112_v9  ;;  %v10129_v11 = vsel %vm6003_vm10, %v10112_v9, %v10114_v54 }
 0xd5d   : > { %v10133_v60 = vsel %vm6003_vm10, %v10122_v39, %v10124_v31  ;;  %10191 = vmatpush.msrb.mxu3 %v10128_v57 }
 0xd5e   : > { %12607 = vmatpush.msk.msrb.mxu0 %vm2091_vm14, %v10133_v60 }
 0xd60   : > { %10214 = vmatpush.msrb.mxu0 %v10129_v11 }
 0xd61   : > { %12589 = vmatmul.msk.f32.gmra.mxu2 %vm2084_vm15, %v12586_v46 }
 0xd62   : > { %12597 = vmatmul.msk.f32.vlgmr.msrb.gmra.mxu1 %vm2084_vm15, %v12585_v40  ;;  %12591 = vmatmul.msk.f32.vlgmr.msra.gmra.mxu3 %vm2084_vm15, %v12585_v40 }
 0xd63   : > { %12594 = vmatmul.msk.f32.vlgmr.msra.gmra.mxu0 %vm2084_vm15, %v12585_v40 }
 0xd66   : > { %v13259_v27 = vpop.permute.xlu0 %13258 }
 0xd67   : > { %v13261_v19 = vunpack.i.h.bf16 %v13259_v27  ;;  %v13260_v8 = vunpack.i.l.bf16 %v13259_v27 }
 0xd69   : > { %12602 = vmatmul.msk.f32.vlgmr.msra.gmra.mxu2 %vm2084_vm15, %v12599_v28  ;;  %v10134_v35 = vsel %vm6003_vm10, %v10124_v31, %v13260_v8  ;;  %v10130_v24 = vsel %vm6003_vm10, %v10114_v54, %v13261_v19 }
 0xd6a   : > { %12598 = vmatmul.msk.f32.gmra.mxu1 %vm2084_vm15, %v12586_v46  ;;  %12592 = vmatmul.msk.f32.gmra.mxu3 %vm2084_vm15, %v12586_v46 }
 0xd6b   : > { %12610 = vmatpush.msk.msra.mxu1 %vm2091_vm14, %v10134_v35  ;;  %12595 = vmatmul.msk.f32.gmra.mxu0 %vm2084_vm15, %v12586_v46  ;;  %v18424_v4 = vpop.f32.mrf.mxu2 }
 0xd6d   : > { %10237 = vmatpush.msra.mxu1 %v10130_v24 }
 0xd6e   : > { %v18427_v0 = vpop.f32.mrf.mxu1 }
 0xd70   : > { %v18432_v14 = vpop.f32.mrf.mxu0 }
 0xd71   : > { %12603 = vmatmul.msk.f32.gmra.mxu2 %vm2084_vm15, %v12600_v55 }
 0xd72   : > { %12611 = vmatmul.msk.f32.vlgmr.msra.gmra.mxu1 %vm2084_vm15, %v12599_v28  ;;  %12605 = vmatmul.msk.f32.vlgmr.msrb.gmra.mxu3 %vm2084_vm15, %v12599_v28 }
 0xd73   : > { %12608 = vmatmul.msk.f32.vlgmr.msrb.gmra.mxu0 %vm2084_vm15, %v12599_v28  ;;  %v18438_v7 = vpop.f32.mrf.mxu2 }
 0xd74   : > { %v18440_v25 = vpop.f32.mrf.mxu3 }
 0xd76   : > { %v18442_v1 = vpop.f32.mrf.mxu1 }
 0xd78   : > { %v18444_v16 = vpop.f32.mrf.mxu0 }
 0xd7a   : > { %12612 = vmatmul.msk.f32.gmra.mxu1 %vm2084_vm15, %v12600_v55  ;;  %12606 = vmatmul.msk.f32.gmra.mxu3 %vm2084_vm15, %v12600_v55 }
 0xd7b   : > { %12609 = vmatmul.msk.f32.gmra.mxu0 %vm2084_vm15, %v12600_v55  ;;  %v9130_v21 = vpop.f32.mrf.mxu2  ;;  %vm10364_vm15 = vcmask 1046496  }
 0xd7c   : > { %v9131_v28 = vadd.f32 %v9130_v21, %v18424_v4 }
 0xd7d   : > { %v18449_v15 = vpop.f32.mrf.mxu3 }
 0xd7e   : > { %v18451_v49 = vpop.f32.mrf.mxu1 }
 0xd80   : > { %v18453_v32 = vpop.f32.mrf.mxu0 }
 0xd81   : > { %v9177_v4 = vadd.f32 %v18453_v32, %v18432_v14 }
 0xd83   : > { %v9133_v2 = vpop.f32.mrf.mxu2 }
 0xd85   : > { %v18455_v12 = vpop.f32.mrf.mxu3 }
 0xd86   : > { %v9202_v38 = vpop.f32.mrf.mxu1 }
 0xd88   : > { %v9179_v37 = vpop.f32.mrf.mxu0 }
 0xd89   : > { %v9180_v21 = vadd.f32 %v9179_v37, %v18444_v16 }
 0xd8b   : > { %v9266_v47 = vpop.f32.mrf.mxu2 }
 0xd8c   : > { %v9341_v8 = vadd.f32 %v9266_v47, %v9131_v28 }
 0xd8d   : > { %v18457_v17 = vpop.f32.mrf.mxu3 }
 0xd8e   : > { %v18459_v53 = vpop.f32.mrf.mxu1 }
 0xd8f   : > { %19487 = vst [vmem:[#allocation22_spill] sm:$0xff] %v18459_v53  ;;  %v18500_v53 = vpop.permute.xlu1 %10270 }
 0xd90   : > { %v9312_v6 = vpop.f32.mrf.mxu0 }
 0xd91   : > { %v9343_v28 = vadd.f32 %v9312_v6, %v9177_v4  ;;  %v9154_v6 = vadd.f32 %v18455_v12, %v18440_v25 }
 0xd93   : > { %v9269_v5 = vpop.f32.mrf.mxu2 }
 0xd95   : > { %v18461_v63 = vpop.f32.mrf.mxu3 }
 0xd96   : > { %v9338_v41 = vpop.f32.mrf.mxu1 }
 0xd98   : > { %v9315_v59 = vpop.f32.mrf.mxu0 }
 0xd9b   : > { %v9435_v30 = vpop.f32.mrf.mxu2 }
 0xd9c   : > { %v9510_v35 = vadd.f32 %v9435_v30, %v9341_v8  ;;  %v9347_v8 = vadd.f32 %v9315_v59, %v9180_v21  ;;  %v9157_v59 = vadd.f32 %v18457_v17, %v18449_v15 }
 0xd9d   : > { %v18463_v42 = vpop.f32.mrf.mxu3 }
 0xd9e   : > { %v18465_v22 = vpop.f32.mrf.mxu1 }
 0xd9f   : > { %19488 = vst [vmem:[#allocation31_spill] sm:$0xff] %v18465_v22  ;;  %v9203_v22 = vadd.f32 %v9202_v38, %v18442_v1 }
 0xda0   : > { %v9481_v62 = vpop.f32.mrf.mxu0 }
 0xda1   : > { %v9348_v47 = vadd.f32 %v9338_v41, %v9203_v22  ;;  %v18512_v41 = vpop.permute.xlu2 %10265 }
 0xda4   : > { %v9438_v23 = vpop.f32.mrf.mxu2 }
 0xda5   : > { %v18467_v18 = vpop.f32.mrf.mxu3 }
 0xda7   : > { %v9507_v36 = vpop.f32.mrf.mxu1 }
 0xda8   : > { %v9484_v51 = vpop.f32.mrf.mxu0 }
 0xdac   : > { %v9584_v48 = vpop.f32.mrf.mxu2 }
 0xdad   : > { %v18469_v20 = vpop.f32.mrf.mxu3  ;;  %v9659_v55 = vadd.f32 %v9584_v48, %v9510_v35 }
 0xdaf   : > { %v18471_v43 = vpop.f32.mrf.mxu1 }
 0xdb0   : > { %19489 = vst [vmem:[#allocation33_spill] sm:$0xff] %v18471_v43  ;;  %v9630_v58 = vpop.f32.mrf.mxu0  ;;  %v9134_v43 = vadd.f32 %v9133_v2, %v18438_v7  ;;  %v9517_v7 = vadd.f32 %v9507_v36, %v9348_v47 }
 0xdb4   : > { %v9587_v3 = vpop.f32.mrf.mxu2 }
 0xdb5   : > { %v18473_v26 = vpop.f32.mrf.mxu3 }
 0xdb7   : > { %v9656_v61 = vpop.f32.mrf.mxu1 }
 0xdb8   : > { %v9633_v52 = vpop.f32.mrf.mxu0  ;;  %v9666_v16 = vadd.f32 %v9656_v61, %v9517_v7  ;;  %v18520_v61 = vpop.permute.xlu1 %10285 }
 0xdbc   : > { %v9701_v13 = vpop.f32.mrf.mxu2 }
 0xdbd   : > { %v18475_v56 = vpop.f32.mrf.mxu3 }
 0xdbf   : > { %v18477_v45 = vpop.f32.mrf.mxu1 }
 0xdc0   : > { %19490 = vst [vmem:[#allocation45_spill] sm:$0xff] %v18477_v45  ;;  %v18479_v10 = vpop.f32.mrf.mxu0 }
 0xdc4   : > { %v9704_v50 = vpop.f32.mrf.mxu2 }
 0xdc5   : > { %v18481_v33 = vpop.f32.mrf.mxu3 }
 0xdc7   : > { %v9773_v39 = vpop.f32.mrf.mxu1 }
 0xdc8   : > { %v9750_v44 = vpop.f32.mrf.mxu0  ;;  %v9783_v36 = vadd.f32 %v9773_v39, %v9666_v16 }
 0xdcc   : > { %v9871_v34 = vpop.f32.mrf.mxu2 }
 0xdcd   : > { %v18483_v40 = vpop.f32.mrf.mxu3 }
 0xdce   : > { %19491 = vst [vmem:[#allocation26_spill] sm:$0xff] %v18483_v40 }
 0xdcf   : > { %v18485_v29 = vpop.f32.mrf.mxu1 }
 0xdd0   : > { %19492 = vst [vmem:[#allocation25_spill] sm:$0xff] %v18485_v29  ;;  %v9917_v9 = vpop.f32.mrf.mxu0 }
 0xdd4   : > { %v9874_v31 = vpop.f32.mrf.mxu2 }
 0xdd5   : > { %v18487_v57 = vpop.f32.mrf.mxu3 }
 0xdd6   : > { %19493 = vst [vmem:[#allocation20_spill] sm:$0xff] %v18487_v57  ;;  %v9776_v57 = vadd.f32 %v9701_v13, %v9659_v55  ;;  %v9512_v13 = vadd.f32 %v9481_v62, %v9343_v28  ;;  %v9516_v55 = vadd.f32 %v9484_v51, %v9347_v8 }
 0xdd7   : > { %v9943_v60 = vpop.f32.mrf.mxu1 }
 0xdd8   : > { %v9920_v54 = vpop.f32.mrf.mxu0  ;;  %v9946_v40 = vadd.f32 %v9871_v34, %v9776_v57  ;;  %v9661_v22 = vadd.f32 %v9630_v58, %v9512_v13  ;;  %v9665_v62 = vadd.f32 %v9633_v52, %v9516_v55  ;;  %v9346_v34 = vadd.f32 %v18463_v42, %v9157_v59 }
 0xdd9   : > { %v9200_v42 = vadd.f32 %v18451_v49, %v18427_v0 }
 0xdda   : > { %v9778_v25 = vadd.f32 %v18479_v10, %v9661_v22  ;;  %v9782_v12 = vadd.f32 %v9750_v44, %v9665_v62  ;;  %v9515_v52 = vadd.f32 %v18469_v20, %v9346_v34  ;;  %v19501_v22 = vld [vmem:[#allocation33_spill] sm:$0xff] }
 0xddc   : > { %v10021_v46 = vpop.f32.mrf.mxu2  ;;  %v9948_v39 = vadd.f32 %v9917_v9, %v9778_v25  ;;  %v9952_v57 = vadd.f32 %v9920_v54, %v9782_v12  ;;  %v9664_v44 = vadd.f32 %v18475_v56, %v9515_v52  ;;  %v19496_v9 = vld [vmem:[#allocation26_spill] sm:$0xff]  ;;  %v19503_v12 = vld [vmem:[#allocation25_spill] sm:$0xff] }
 0xddd   : > { %v18489_v11 = vpop.f32.mrf.mxu3  ;;  %v10096_v48 = vadd.f32 %v10021_v46, %v9946_v40  ;;  %v9953_v40 = vadd.f32 %v9943_v60, %v9783_v36  ;;  %v19497_v56 = vld [vmem:[#allocation22_spill] sm:$0xff]  ;;  %v19498_v8 = vld [vmem:[#allocation20_spill] sm:$0xff] }
 0xdde   : > { %19494 = vst [vmem:[#allocation30_spill] sm:$0xff] %v18489_v11  ;;  %v9781_v54 = vadd.f32 %v19496_v9, %v9664_v44  ;;  %v9344_v28 = vadd.f32 %v19497_v56, %v9200_v42 }
 0xddf   : > { %v18491_v27 = vpop.f32.mrf.mxu1 }
 0xde0   : > { %19495 = vst [vmem:[#allocation29_spill] sm:$0xff] %v18491_v27  ;;  %v18494_v19 = vpop.f32.mrf.mxu0  ;;  %v9345_v27 = vadd.f32 %v9269_v5, %v9134_v43  ;;  %v18508_v5 = vld [vmem:[%s18989_s26] sm:$0xf] }
 0xde2   : > { %v9514_v30 = vadd.f32 %v9438_v23, %v9345_v27 }
 0xde4   : > { %v10024_v24 = vpop.f32.mrf.mxu2  ;;  %v9663_v2 = vadd.f32 %v9587_v3, %v9514_v30  ;;  %v10303_v3 = vperm.slane %v18508_v5, 0 }
 0xde5   : > { %v18496_v29 = vpop.f32.mrf.mxu3 }
 0xde6   : > { %v9780_v32 = vadd.f32 %v9704_v50, %v9663_v2  ;;  %v9342_v50 = vadd.f32 %v18461_v63, %v9154_v6 }
 0xde7   : > { %v10093_v45 = vpop.f32.mrf.mxu1  ;;  %v19504_v52 = vld [vmem:[#allocation29_spill] sm:$0xff] }
 0xde8   : > { %v10070_v11 = vpop.f32.mrf.mxu0  ;;  %v9950_v51 = vadd.f32 %v9874_v31, %v9780_v32  ;;  %v9511_v58 = vadd.f32 %v18467_v18, %v9342_v50  ;;  %v10103_v46 = vadd.f32 %v10093_v45, %v9953_v40  ;;  %v19502_v50 = vld [vmem:[#allocation45_spill] sm:$0xff] }
 0xde9   : > { %v10102_v18 = vadd.f32 %v10070_v11, %v9952_v57  ;;  %v19499_v11 = vld [vmem:[#allocation30_spill] sm:$0xff] }
 0xdea   : > { %v10100_v15 = vadd.f32 %v10024_v24, %v9950_v51  ;;  %v9660_v10 = vadd.f32 %v18473_v26, %v9511_v58  ;;  %v10098_v24 = vadd.f32 %v18494_v19, %v9948_v39  ;;  %v10305_v51 = vperm.slane %v18508_v5, 2 }
 0xdeb   : > { %v10306_v58 = vperm.slane %v18508_v5, 3 }
 0xdec   : > { %v10170_v35 = vpop.f32.mrf.mxu2  ;;  %v9777_v45 = vadd.f32 %v18481_v33, %v9660_v10 }
 0xded   : > { %v10245_v1 = vadd.f32 %v10170_v35, %v10096_v48  ;;  %v10047_v38 = vpop.f32.mrf.mxu3  ;;  %v10291_v48 = vpop.permute.xlu0 %10290  ;;  %v9951_v35 = vadd.f32 %v19499_v11, %v9781_v54 }
 0xdee   : > { %v9947_v19 = vadd.f32 %v19498_v8, %v9777_v45 }
 0xdef   : > { %v18510_v14 = vpop.f32.mrf.mxu1  ;;  %v10253_v37 = vmax.f32 %v10245_v1, 0.0  ;;  %v19500_v1 = vld [vmem:[#allocation31_spill] sm:$0xff]  ;;  %v10101_v55 = vadd.f32 %v10047_v38, %v9951_v35 }
 0xdf0   : > { %v10216_v23 = vpop.f32.mrf.mxu0  ;;  %v9513_v13 = vadd.f32 %v19500_v1, %v9344_v28  ;;  %v10097_v33 = vadd.f32 %v18496_v29, %v9947_v19 }
 0xdf1   : > { %v10273_v43 = vmul.f32 %v18512_v41, %v10253_v37  ;;  %v10247_v30 = vadd.f32 %v10216_v23, %v10098_v24 }
 0xdf2   : > { %v9662_v62 = vadd.f32 %v19501_v22, %v9513_v13 }
 0xdf3   : > { %v10293_v17 = vadd.f32 %v18520_v61, %v10273_v43  ;;  %v10255_v16 = vmax.f32 %v10247_v30, 0.0 }
 0xdf4   : > { %v10173_v31 = vpop.f32.mrf.mxu2  ;;  %v9779_v34 = vadd.f32 %v19502_v50, %v9662_v62 }
 0xdf5   : > { %v10311_v27 = vmul.f32 %v10303_v3, %v10293_v17  ;;  %v10249_v4 = vadd.f32 %v10173_v31, %v10100_v15  ;;  %v10193_v63 = vpop.f32.mrf.mxu3  ;;  %v10275_v38 = vmul.f32 %v18512_v41, %v10255_v16  ;;  %v10304_v31 = vperm.slane %v18508_v5, 1 }
 0xdf6   : > { %v10246_v23 = vadd.f32 %v10193_v63, %v10097_v33  ;;  %v9949_v40 = vadd.f32 %v19503_v12, %v9779_v34 }
 0xdf7   : > { %v10242_v60 = vpop.f32.mrf.mxu1  ;;  %v10257_v21 = vmax.f32 %v10249_v4, 0.0  ;;  %10327 = vrot.lane.b32.xlu2 %v10311_v27, %s19347_s3 }
 0xdf8   : > { %v10252_v20 = vadd.f32 %v10242_v60, %v10103_v46  ;;  %v10219_v47 = vpop.f32.mrf.mxu0  ;;  %v10254_v15 = vmax.f32 %v10246_v23, 0.0  ;;  %v10099_v39 = vadd.f32 %v19504_v52, %v9949_v40  ;;  %v10295_v46 = vadd.f32 %v18520_v61, %v10275_v38  ;;  %v11220_v23 = vld [vmem:[#allocation6 + $0x68] sm:$0x3f]  ;;  %v12613_v52 = vld [vmem:[%s18985_s22 + $0x10] sm:$0xff] }
 0xdf9   : > { %v10277_v0 = vmul.f32 %v18500_v53, %v10257_v21  ;;  %v10251_v26 = vadd.f32 %v10219_v47, %v10102_v18 }
 0xdfa   : > { %v10260_v49 = vmax.f32 %v10252_v20, 0.0  ;;  %v10248_v4 = vadd.f32 %v18510_v14, %v10099_v39  ;;  %v10274_v63 = vmul.f32 %v18512_v41, %v10254_v15 }
 0xdfb   : > { %v10297_v7 = vadd.f32 %v10291_v48, %v10277_v0  ;;  %v10259_v2 = vmax.f32 %v10251_v26, 0.0 }
 0xdfc   : > { %v10280_v37 = vmul.f32 %v18500_v53, %v10260_v49  ;;  %v10256_v10 = vmax.f32 %v10248_v4, 0.0  ;;  %v10294_v44 = vadd.f32 %v18520_v61, %v10274_v63 }
 0xdfd   : > { %v10315_v32 = vmul.f32 %v10303_v3, %v10297_v7  ;;  %v10279_v6 = vmul.f32 %v18500_v53, %v10259_v2  ;;  %v10196_v59 = vpop.f32.mrf.mxu3 }
 0xdfe   : > { %v10250_v36 = vadd.f32 %v10196_v59, %v10101_v55  ;;  %v10300_v3 = vadd.f32 %v10291_v48, %v10280_v37  ;;  %v10276_v5 = vmul.f32 %v18512_v41, %v10256_v10  ;;  %v10312_v60 = vmul.f32 %v10304_v31, %v10294_v44  ;;  %v11684_v10 = vld [vmem:[%s18986_s23 + $0x8] sm:$0x3] }
 0xdff   : > { %v10299_v43 = vadd.f32 %v10291_v48, %v10279_v6  ;;  %10335 = vrot.lane.b32.xlu2 %v10315_v32, %s19347_s3 }
 0xe00   : > { %v10258_v29 = vmax.f32 %v10250_v36, 0.0  ;;  %v10318_v27 = vmul.f32 %v10306_v58, %v10300_v3  ;;  %v10296_v14 = vadd.f32 %v18520_v61, %v10276_v5  ;;  %v18660_v36 = vld [vmem:[#allocation5 + $0x28] sm:$0xff]  ;;  %v12614_v5 = vld [vmem:[%s18985_s22 + $0x18] sm:$0x3] }
 0xe01   : > { %v10317_v25 = vmul.f32 %v10305_v51, %v10299_v43 }
 0xe02   : > { %v10278_v17 = vmul.f32 %v18500_v53, %v10258_v29  ;;  %v10313_v53 = vmul.f32 %v10305_v51, %v10295_v46  ;;  %v10314_v24 = vmul.f32 %v10306_v58, %v10296_v14  ;;  %v13312_v51 = vpack.i.bf16 %v18660_v36, %v11220_v23 }
 0xe03   : > { %10339 = vrot.lane.b32.xlu1 %v10317_v25, %s19347_s3 }
 0xe04   : > { %v10298_v57 = vadd.f32 %v10291_v48, %v10278_v17 }
 0xe06   : > { %v10316_v42 = vmul.f32 %v10304_v31, %v10298_v57 }
 0xe07   : > { %10341 = vrot.lane.b32.xlu2 %v10318_v27, %s19347_s3 }
 0xe08   : > { %10337 = vrot.lane.b32.xlu0 %v10316_v42, %s19347_s3 }
 0xe0b   : > { %10331 = vrot.lane.b32.xlu1 %v10313_v53, %s19347_s3 }
 0xe10   : > { %10329 = vrot.lane.b32.xlu0 %v10312_v60, %s19347_s3  ;;  %v11683_v60 = vld [vmem:[%s18986_s23] sm:$0xff] }
 0xe18   : > { %10333 = vrot.lane.b32.xlu0 %v10314_v24, %s19347_s3 }
 0xe51   : > { %v10328_v18 = vpop.permute.xlu2 %10327 }
 0xe52   : > { %10359 = vst.msk [vmem:[#allocation6] sm:$0xff] %vm8932_vm1, %v10328_v18 }
 0xe59   : > { %v10336_v21 = vpop.permute.xlu2 %10335  ;;  %v18582_v56 = vld [vmem:[#allocation6] sm:$0xff] }
 0xe5a   : > { %10365 = vst.msk [vmem:[#allocation6 + $0x40] sm:$0x3f] %vm10364_vm15, %v10336_v21 }
 0xe61   : > { %v10342_v20 = vpop.permute.xlu2 %10341  ;;  %v18567_v45 = vld [vmem:[#allocation6 + $0x40] sm:$0x3f] }
 0xe62   : > { %10370 = vst.msk [vmem:[#allocation6 + $0x60] sm:$0x3f] %vm10369_vm13, %v10342_v20  ;;  %10400 = vrot.lane.b32.xlu1 %v18567_v45, %s19347_s3  ;;  %v10781_v2 = vld [vmem:[#allocation6 + $0x40] sm:$0x3f] }
 0xe69   : > { %v18627_v55 = vld [vmem:[#allocation6 + $0x60] sm:$0x3f] }
 0xe6a   : > { %v11219_v22 = vld [vmem:[#allocation6 + $0x60] sm:$0x3f] }
 0xe75   : > { %v10340_v41 = vpop.permute.xlu1 %10339 }
 0xe76   : > { %v10348_v61 = vsel %vm5125_vm6, %v10340_v41, %v10342_v20 }
 0xe77   : > { %10368 = vst [vmem:[#allocation6 + $0x58] sm:$0x3f] %v10348_v61  ;;  %v11703_v61 = vld [vmem:[%s18987_s24] sm:$0xff] }
 0xe7a   : > { %v10338_v9 = vpop.permute.xlu0 %10337 }
 0xe7b   : > { %v10346_v54 = vsel %vm5125_vm6, %v10336_v21, %v10338_v9  ;;  %v10347_v47 = vsel %vm5125_vm6, %v10338_v9, %v10340_v41 }
 0xe7c   : > { %10366 = vst [vmem:[#allocation6 + $0x48] sm:$0x3f] %v10346_v54 }
 0xe7d   : > { %10367 = vst [vmem:[#allocation6 + $0x50] sm:$0x3f] %v10347_v47  ;;  %v10332_v30 = vpop.permute.xlu1 %10331  ;;  %v10371_v47 = vld [vmem:[%s18985_s22] sm:$0xff] }
 0xe7e   : > { %v18597_v35 = vld [vmem:[#allocation6 + $0x58] sm:$0x3f] }
 0xe7f   : > { %v18621_v13 = vld [vmem:[#allocation6 + $0x58] sm:$0x3f] }
 0xe80   : > { %v11218_v6 = vld [vmem:[#allocation6 + $0x58] sm:$0x3f] }
 0xe82   : > { %v10330_v0 = vpop.permute.xlu0 %10329 }
 0xe83   : > { %v18575_v49 = vsel %vm5125_vm6, %v10328_v18, %v10330_v0  ;;  %v18578_v26 = vsel %vm5125_vm6, %v10330_v0, %v10332_v30  ;;  %v18580_v48 = vld [vmem:[#allocation6 + $0x48] sm:$0x3f] }
 0xe84   : > { %v18584_v28 = vld [vmem:[#allocation6 + $0x50] sm:$0x3f]  ;;  %10402 = vrot.lane.b32.xlu2 %v18580_v48, %s19347_s3  ;;  %v13262_v8 = vpack.i.bf16 %v18575_v49, %v18582_v56  ;;  %v18625_v33 = vld [vmem:[#allocation6 + $0x48] sm:$0x3f]  ;;  %v13302_v37 = vpack.i.bf16 %v18578_v26, %v18575_v49 }
 0xe85   : > { %10404 = vrot.lane.b32.xlu0 %v18584_v28, %s19347_s3  ;;  %v18615_v1 = vld [vmem:[#allocation6 + $0x50] sm:$0x3f]  ;;  %v11216_v62 = vld [vmem:[#allocation6 + $0x48] sm:$0x3f] }
 0xe86   : > { %13263 = vrot.lane.b32.xlu1 %v13262_v8, %s19347_s3  ;;  %v11217_v59 = vld [vmem:[#allocation6 + $0x50] sm:$0x3f]  ;;  %v11704_v0 = vld [vmem:[%s18987_s24 + $0x8] sm:$0x3] }
 0xe8a   : > { %v10334_v19 = vpop.permute.xlu0 %10333 }
 0xe8b   : > { %v18594_v11 = vsel %vm5125_vm6, %v10332_v30, %v10334_v19  ;;  %10363 = vst.msk [vmem:[#allocation6 + $0x20] sm:$0xff] %vm8937_vm4, %v10334_v19 }
 0xe8c   : > { %v13267_v7 = vpack.i.bf16 %v18594_v11, %v18578_v26 }
 0xe8d   : > { %10406 = vrot.lane.b32.xlu0 %v18597_v35, %s19347_s3 }
 0xe8e   : > { %10641 = vrot.lane.b32.xlu1 %v18567_v45, %s13375_s25  ;;  %13268 = vrot.lane.b32.xlu2 %v13267_v7, %s19347_s3  ;;  %s815_s3 = scalar_lea.vmem %s18990_s27, %s12739_s11 }
 0xe92   : > { %v18634_v16 = vld [vmem:[#allocation6 + $0x20] sm:$0xff] }
 0xe93   : > { %v13307_v32 = vpack.i.bf16 %v18634_v16, %v18594_v11  ;;  %v13337_v57 = vpack.i.bf16 %v11220_v23, %v18634_v16 }
 0xe95   : > { %10645 = vrot.lane.b32.xlu0 %v18584_v28, %s13375_s25 }
 0xe96   : > { %13273 = vrot.lane.b32.xlu1 %v13262_v8, %s13375_s25  ;;  %13278 = vrot.lane.b32.xlu2 %v13267_v7, %s13375_s25 }
 0xe9d   : > { %10647 = vrot.lane.b32.xlu0 %v18597_v35, %s13375_s25 }
 0xe9e   : > { %10806 = vrot.lane.b32.xlu1 %v10781_v2, %s19349_s8  ;;  %10643 = vrot.lane.b32.xlu2 %v18580_v48, %s13375_s25 }
 0xea5   : > { %10810 = vrot.lane.b32.xlu0 %v18615_v1, %s19349_s8 }
 0xea6   : > { %13283 = vrot.lane.b32.xlu1 %v13262_v8, %s19349_s8  ;;  %13288 = vrot.lane.b32.xlu2 %v13267_v7, %s19349_s8 }
 0xead   : > { %10812 = vrot.lane.b32.xlu0 %v18621_v13, %s19349_s8 }
 0xeae   : > { %10808 = vrot.lane.b32.xlu2 %v18625_v33, %s19349_s8  ;;  %10814 = vrot.lane.b32.xlu1 %v18627_v55, %s19349_s8 }
 0xeb5   : > { %10955 = vrot.lane.b32.xlu0 %v10781_v2, %s19287_s9 }
 0xeb6   : > { %10804 = vrot.lane.b32.xlu2 %v18634_v16, %s19349_s8  ;;  %10957 = vrot.lane.b32.xlu1 %v18625_v33, %s19287_s9 }
 0xebd   : > { %13293 = vrot.lane.b32.xlu0 %v13262_v8, %s19287_s9 }
 0xebe   : > { %10959 = vrot.lane.b32.xlu2 %v18615_v1, %s19287_s9  ;;  %13298 = vrot.lane.b32.xlu1 %v13267_v7, %s19287_s9  ;;  %v10372_v7 = vld [vmem:[%s18985_s22 + $0x8] sm:$0x3] }
 0xec5   : > { %10963 = vrot.lane.b32.xlu0 %v18627_v55, %s19287_s9 }
 0xec6   : > { %10953 = vrot.lane.b32.xlu1 %v18634_v16, %s19287_s9  ;;  %10961 = vrot.lane.b32.xlu2 %v18621_v13, %s19287_s9 }
 0xecd   : > { %13308 = vrot.lane.b32.xlu0 %v13307_v32, %s13376_s5 }
 0xece   : > { %11245 = vrot.lane.b32.xlu1 %v11218_v6, %s13376_s5  ;;  %13303 = vrot.lane.b32.xlu2 %v13302_v37, %s13376_s5 }
 0xed4   : > { %v10401_v43 = vpop.permute.xlu1 %10400 }
 0xed5   : > { %11243 = vrot.lane.b32.xlu0 %v11217_v59, %s13376_s5 }
 0xed6   : > { %11247 = vrot.lane.b32.xlu1 %v11219_v22, %s13376_s5  ;;  %11241 = vrot.lane.b32.xlu2 %v11216_v62, %s13376_s5 }
 0xedd   : > { %13318 = vrot.lane.b32.xlu0 %v13302_v37, %s13377_s2 }
 0xede   : > { %v10403_v50 = vpop.permute.xlu2 %10402  ;;  %11392 = vrot.lane.b32.xlu1 %v11217_v59, %s13377_s2  ;;  %13313 = vrot.lane.b32.xlu2 %v13312_v51, %s13376_s5 }
 0xedf   : > { %v10411_v34 = vsel %vm5125_vm6, %v10401_v43, %v10403_v50 }
 0xee0   : > { %12615 = vmatpush.msk.msrb.mxu2 %vm4452_vm2, %v10411_v34 }
 0xee5   : > { %11390 = vrot.lane.b32.xlu0 %v11216_v62, %s13377_s2 }
 0xee6   : > { %13323 = vrot.lane.b32.xlu1 %v13307_v32, %s13377_s2  ;;  %11394 = vrot.lane.b32.xlu2 %v11218_v6, %s13377_s2 }
 0xee8   : > { %v13269_v29 = vpop.permute.xlu2 %13268 }
 0xee9   : > { %v13270_v15 = vunpack.i.l.bf16 %v13269_v29  ;;  %v13271_v46 = vunpack.i.h.bf16 %v13269_v29 }
 0xeeb   : > { %v10410_v53 = vsel %vm5125_vm6, %v13270_v15, %v13271_v46 }
 0xeed   : > { %13328 = vrot.lane.b32.xlu0 %v13312_v51, %s13377_s2  ;;  %v12639_v51 = vld [vmem:[%s18985_s22 + $0x20] sm:$0xff] }
 0xeee   : > { %11539 = vrot.lane.b32.xlu1 %v11216_v62, %s19349_s8  ;;  %11396 = vrot.lane.b32.xlu2 %v11219_v22, %s13377_s2 }
 0xef0   : > { %v18674_v38 = vpop.permute.xlu2 %13278 }
 0xef1   : > { %v13280_v20 = vunpack.i.l.bf16 %v18674_v38  ;;  %v13281_v30 = vunpack.i.h.bf16 %v18674_v38 }
 0xef5   : > { %11543 = vrot.lane.b32.xlu0 %v11218_v6, %s19349_s8 }
 0xef6   : > { %13333 = vrot.lane.b32.xlu1 %v13302_v37, %s19349_s8  ;;  %11541 = vrot.lane.b32.xlu2 %v11217_v59, %s19349_s8 }
 0xef7   : > { %v10405_v3 = vpop.permute.xlu0 %10404 }
 0xef8   : > { %v10412_v25 = vsel %vm5125_vm6, %v10403_v50, %v10405_v3  ;;  %v13264_v12 = vpop.permute.xlu1 %13263  ;;  %v10644_v40 = vpop.permute.xlu2 %10643 }
 0xef9   : > { %12618 = vmatpush.msk.msra.mxu3 %vm4452_vm2, %v10412_v25  ;;  %v13266_v17 = vunpack.i.h.bf16 %v13264_v12  ;;  %v13265_v58 = vunpack.i.l.bf16 %v13264_v12 }
 0xefb   : > { %v10408_v39 = vsel %vm5125_vm6, %v13265_v58, %v13266_v17  ;;  %v10409_v31 = vsel %vm5125_vm6, %v13266_v17, %v13270_v15  ;;  %v12640_v15 = vld [vmem:[%s18985_s22 + $0x28] sm:$0x3] }
 0xefc   : > { %10447 = vmatpush.msrb.mxu2 %v10408_v39  ;;  %10470 = vmatpush.msra.mxu3 %v10409_v31 }
 0xefd   : > { %11545 = vrot.lane.b32.xlu0 %v11219_v22, %s19349_s8  ;;  %12616 = vmatmul.msk.f32.vlgmr.msrb.gmra.mxu2 %vm4445_vm3, %v12613_v52 }
 0xefe   : > { %12619 = vmatmul.msk.f32.vlgmr.msra.gmra.mxu3 %vm4445_vm3, %v12613_v52  ;;  %12627 = vmatpush.msk.msra.mxu2 %vm4452_vm2, %v18567_v45 }
 0xeff   : > { %v10407_v27 = vpop.permute.xlu0 %10406  ;;  %12630 = vmatpush.msk.msrb.mxu3 %vm4452_vm2, %v18580_v48  ;;  %13338 = vrot.lane.b32.xlu1 %v13337_v57, %s19349_s8  ;;  %v12653_v57 = vld [vmem:[%s18985_s22 + $0x30] sm:$0xff] }
 0xf00   : > { %v10413_v4 = vsel %vm5125_vm6, %v10405_v3, %v10407_v27  ;;  %12624 = vmatpush.msk.msrb.mxu1 %vm4452_vm2, %v10407_v27  ;;  %11533 = vrot.lane.b32.xlu2 %v18594_v11, %s19349_s8  ;;  %v10642_v63 = vpop.permute.xlu1 %10641  ;;  %v18699_v42 = vpop.permute.xlu2 %13288  ;;  %vm11788_vm6 = vcmask 1024  }
 0xf01   : > { %12621 = vmatpush.msk.msra.mxu0 %vm4452_vm2, %v10413_v4  ;;  %10553 = vmatpush.msra.mxu2 %v18582_v56  ;;  %v10652_v44 = vsel %vm9224_vm9, %v10642_v63, %v10644_v40  ;;  %v13290_v59 = vunpack.i.l.bf16 %v18699_v42  ;;  %v13291_v43 = vunpack.i.h.bf16 %v18699_v42 }
 0xf02   : > { %10516 = vmatpush.msrb.mxu1 %v13271_v46  ;;  %10576 = vmatpush.msrb.mxu3 %v18575_v49 }
 0xf03   : > { %10493 = vmatpush.msra.mxu0 %v10410_v53  ;;  %12625 = vmatmul.msk.f32.vlgmr.msrb.gmra.mxu1 %vm4445_vm3, %v12613_v52  ;;  %v10818_v25 = vsel %vm6003_vm10, %v13290_v59, %v13291_v43 }
 0xf04   : > { %12636 = vmatpush.msk.msra.mxu1 %vm4452_vm2, %v18597_v35  ;;  %12622 = vmatmul.msk.f32.vlgmr.msra.gmra.mxu0 %vm4445_vm3, %v12613_v52  ;;  %v10651_v35 = vsel %vm9224_vm9, %v13280_v20, %v13281_v30 }
 0xf05   : > { %12633 = vmatpush.msk.msrb.mxu0 %vm4452_vm2, %v18584_v28  ;;  %11692 = vperm.xlu0 %12769, %v11684_v10  }
 0xf06   : > { %10622 = vmatpush.msra.mxu1 %v18594_v11  ;;  %12641 = vmatpush.msk.msrb.mxu2 %vm4452_vm2, %v10652_v44 }
 0xf07   : > { %10599 = vmatpush.msrb.mxu0 %v18578_v26  ;;  %v10646_v14 = vpop.permute.xlu0 %10645  ;;  %12617 = vmatmul.msk.f32.gmra.mxu2 %vm4445_vm3, %v12614_v5 }
 0xf08   : > { %v10653_v24 = vsel %vm9224_vm9, %v10644_v40, %v10646_v14  ;;  %12620 = vmatmul.msk.f32.gmra.mxu3 %vm4445_vm3, %v12614_v5  ;;  %11687 = vperm.xlu1 %12770, %v11683_v60   ;;  %v13274_v18 = vpop.permute.xlu1 %13273  ;;  %v10809_v21 = vpop.permute.xlu2 %10808 }
 0xf09   : > { %12644 = vmatpush.msk.msra.mxu3 %vm4452_vm2, %v10653_v24  ;;  %11537 = vrot.lane.b32.xlu2 %v18660_v36, %s19349_s8  ;;  %v13276_v45 = vunpack.i.h.bf16 %v13274_v18  ;;  %v13275_v41 = vunpack.i.l.bf16 %v13274_v18 }
 0xf0b   : > { %12626 = vmatmul.msk.f32.gmra.mxu1 %vm4445_vm3, %v12614_v5  ;;  %v10649_v9 = vsel %vm9224_vm9, %v13275_v41, %v13276_v45  ;;  %v10650_v54 = vsel %vm9224_vm9, %v13276_v45, %v13280_v20 }
 0xf0c   : > { %12623 = vmatmul.msk.f32.gmra.mxu0 %vm4445_vm3, %v12614_v5  ;;  %10688 = vmatpush.msrb.mxu2 %v10649_v9 }
 0xf0d   : > { %11707 = vperm.xlu0 %12769, %v11703_v61   ;;  %10711 = vmatpush.msra.mxu3 %v10650_v54 }
 0xf0f   : > { %v10648_v48 = vpop.permute.xlu0 %10647  ;;  %12628 = vmatmul.msk.f32.vlgmr.msra.gmra.mxu2 %vm4445_vm3, %v10371_v47 }
 0xf10   : > { %v10654_v56 = vsel %vm9224_vm9, %v10646_v14, %v10648_v48  ;;  %12650 = vmatpush.msk.msrb.mxu1 %vm4452_vm2, %v10648_v48  ;;  %12631 = vmatmul.msk.f32.vlgmr.msrb.gmra.mxu3 %vm4445_vm3, %v10371_v47  ;;  %v10807_v28 = vpop.permute.xlu1 %10806  ;;  %v10805_v8 = vpop.permute.xlu2 %10804  ;;  %v12654_v14 = vld [vmem:[%s18985_s22 + $0x38] sm:$0x3] }
 0xf11   : > { %12647 = vmatpush.msk.msra.mxu0 %vm4452_vm2, %v10654_v56  ;;  %11712 = vperm.xlu2 %12771, %v11704_v0   ;;  %v10820_v19 = vsel %vm6003_vm10, %v10807_v28, %v10809_v21  ;;  %v10819_v40 = vsel %vm6003_vm10, %v13291_v43, %v10805_v8 }
 0xf12   : > { %10757 = vmatpush.msrb.mxu1 %v13281_v30  ;;  %12655 = vmatpush.msk.msra.mxu2 %vm4452_vm2, %v10820_v19  ;;  %v12681_v19 = vld [vmem:[%s18985_s22 + $0x50] sm:$0xff] }
 0xf13   : > { %12637 = vmatmul.msk.f32.vlgmr.msra.gmra.mxu1 %vm4445_vm3, %v10371_v47  ;;  %10734 = vmatpush.msra.mxu0 %v10651_v35 }
 0xf14   : > { %12634 = vmatmul.msk.f32.vlgmr.msrb.gmra.mxu0 %vm4445_vm3, %v10371_v47 }
 0xf17   : > { %v10811_v2 = vpop.permute.xlu0 %10810  ;;  %12629 = vmatmul.msk.f32.gmra.mxu2 %vm4445_vm3, %v10372_v7 }
 0xf18   : > { %v10821_v32 = vsel %vm6003_vm10, %v10809_v21, %v10811_v2  ;;  %12632 = vmatmul.msk.f32.gmra.mxu3 %vm4445_vm3, %v10372_v7  ;;  %v13284_v37 = vpop.permute.xlu1 %13283  ;;  %v10960_v6 = vpop.permute.xlu2 %10959 }
 0xf19   : > { %12658 = vmatpush.msk.msrb.mxu3 %vm4452_vm2, %v10821_v32  ;;  %v13286_v22 = vunpack.i.h.bf16 %v13284_v37  ;;  %v13285_v62 = vunpack.i.l.bf16 %v13284_v37 }
 0xf1b   : > { %12638 = vmatmul.msk.f32.gmra.mxu1 %vm4445_vm3, %v10372_v7  ;;  %v10816_v23 = vsel %vm6003_vm10, %v13285_v62, %v13286_v22  ;;  %v10817_v36 = vsel %vm6003_vm10, %v13286_v22, %v13290_v59  ;;  %v12682_v22 = vld [vmem:[%s18985_s22 + $0x58] sm:$0x3] }
 0xf1c   : > { %12635 = vmatmul.msk.f32.gmra.mxu0 %vm4445_vm3, %v10372_v7  ;;  %10857 = vmatpush.msra.mxu2 %v10816_v23 }
 0xf1d   : > { %10880 = vmatpush.msrb.mxu3 %v10817_v36 }
 0xf1f   : > { %v10813_v50 = vpop.permute.xlu0 %10812  ;;  %12642 = vmatmul.msk.f32.vlgmr.msrb.gmra.mxu2 %vm4445_vm3, %v12639_v51 }
 0xf20   : > { %v10822_v34 = vsel %vm6003_vm10, %v10811_v2, %v10813_v50  ;;  %12645 = vmatmul.msk.f32.vlgmr.msra.gmra.mxu3 %vm4445_vm3, %v12639_v51  ;;  %v10815_v29 = vpop.permute.xlu1 %10814  ;;  %v10962_v38 = vpop.permute.xlu2 %10961 }
 0xf21   : > { %12661 = vmatpush.msk.msrb.mxu0 %vm4452_vm2, %v10822_v34  ;;  %v10823_v3 = vsel %vm6003_vm10, %v10813_v50, %v10815_v29  ;;  %v10971_v12 = vsel %vm823_vm12, %v10960_v6, %v10962_v38 }
 0xf22   : > { %12664 = vmatpush.msk.msra.mxu1 %vm4452_vm2, %v10823_v3 }
 0xf23   : > { %12651 = vmatmul.msk.f32.vlgmr.msrb.gmra.mxu1 %vm4445_vm3, %v12639_v51  ;;  %10903 = vmatpush.msrb.mxu0 %v10818_v25  ;;  %v12695_v25 = vld [vmem:[%s18985_s22 + $0x60] sm:$0xff] }
 0xf24   : > { %12648 = vmatmul.msk.f32.vlgmr.msra.gmra.mxu0 %vm4445_vm3, %v12639_v51  ;;  %10926 = vmatpush.msra.mxu1 %v10819_v40 }
 0xf25   : > { %12675 = vmatpush.msk.msra.mxu0 %vm4452_vm2, %v10971_v12 }
 0xf27   : > { %v10956_v17 = vpop.permute.xlu0 %10955  ;;  %12643 = vmatmul.msk.f32.gmra.mxu2 %vm4445_vm3, %v12640_v15 }
 0xf28   : > { %12646 = vmatmul.msk.f32.gmra.mxu3 %vm4445_vm3, %v12640_v15  ;;  %v10958_v58 = vpop.permute.xlu1 %10957  ;;  %v18790_v31 = vpop.permute.xlu2 %13303 }
 0xf29   : > { %v10969_v52 = vsel %vm823_vm12, %v10956_v17, %v10958_v58  ;;  %v10970_v39 = vsel %vm823_vm12, %v10958_v58, %v10960_v6  ;;  %v13306_v45 = vunpack.i.h.bf16 %v18790_v31 }
 0xf2a   : > { %12669 = vmatpush.msk.msrb.mxu2 %vm4452_vm2, %v10969_v52  ;;  %12672 = vmatpush.msk.msra.mxu3 %vm4452_vm2, %v10970_v39 }
 0xf2b   : > { %12652 = vmatmul.msk.f32.gmra.mxu1 %vm4445_vm3, %v12640_v15 }
 0xf2c   : > { %12649 = vmatmul.msk.f32.gmra.mxu0 %vm4445_vm3, %v12640_v15 }
 0xf2f   : > { %v13294_v46 = vpop.permute.xlu0 %13293  ;;  %12656 = vmatmul.msk.f32.vlgmr.msra.gmra.mxu2 %vm4445_vm3, %v12653_v57 }
 0xf30   : > { %v13296_v27 = vunpack.i.h.bf16 %v13294_v46  ;;  %v13295_v4 = vunpack.i.l.bf16 %v13294_v46  ;;  %12659 = vmatmul.msk.f32.vlgmr.msrb.gmra.mxu3 %vm4445_vm3, %v12653_v57  ;;  %v13299_v63 = vpop.permute.xlu1 %13298  ;;  %v11242_v44 = vpop.permute.xlu2 %11241 }
 0xf31   : > { %v13301_v42 = vunpack.i.h.bf16 %v13299_v63  ;;  %v13300_v53 = vunpack.i.l.bf16 %v13299_v63 }
 0xf32   : > { %v10965_v10 = vsel %vm823_vm12, %v13295_v4, %v13296_v27 }
 0xf33   : > { %12665 = vmatmul.msk.f32.vlgmr.msra.gmra.mxu1 %vm4445_vm3, %v12653_v57  ;;  %11006 = vmatpush.msrb.mxu2 %v10965_v10  ;;  %v10966_v5 = vsel %vm823_vm12, %v13296_v27, %v13300_v53  ;;  %v10967_v60 = vsel %vm823_vm12, %v13300_v53, %v13301_v42 }
 0xf34   : > { %12662 = vmatmul.msk.f32.vlgmr.msrb.gmra.mxu0 %vm4445_vm3, %v12653_v57  ;;  %11029 = vmatpush.msra.mxu3 %v10966_v5  ;;  %v12696_v57 = vld [vmem:[%s18985_s22 + $0x68] sm:$0x3]  ;;  %v12709_v5 = vld [vmem:[%s18985_s22 + $0x70] sm:$0xff] }
 0xf35   : > { %12683 = vmatpush.msk.msra.mxu2 %vm4452_vm2, %v18625_v33  ;;  %11052 = vmatpush.msra.mxu0 %v10967_v60 }
 0xf36   : > { %12686 = vmatpush.msk.msrb.mxu3 %vm4452_vm2, %v18615_v1  ;;  %v12667_v1 = vld [vmem:[%s18985_s22 + $0x40] sm:$0xff] }
 0xf37   : > { %11123 = vmatpush.msra.mxu2 %v18575_v49  ;;  %v10964_v24 = vpop.permute.xlu0 %10963  ;;  %12689 = vmatpush.msk.msrb.mxu0 %vm4452_vm2, %v18621_v13 }
 0xf38   : > { %12657 = vmatmul.msk.f32.gmra.mxu2 %vm4445_vm3, %v12654_v14  ;;  %v10972_v18 = vsel %vm823_vm12, %v10962_v38, %v10964_v24  ;;  %12660 = vmatmul.msk.f32.gmra.mxu3 %vm4445_vm3, %v12654_v14  ;;  %v10954_v33 = vpop.permute.xlu1 %10953  ;;  %v13314_v13 = vpop.permute.xlu2 %13313 }
 0xf39   : > { %12678 = vmatpush.msk.msrb.mxu1 %vm4452_vm2, %v10972_v18  ;;  %11146 = vmatpush.msrb.mxu3 %v18578_v26  ;;  %v10968_v49 = vsel %vm823_vm12, %v13301_v42, %v10954_v33  ;;  %v13315_v20 = vunpack.i.l.bf16 %v13314_v13  ;;  %v13316_v54 = vunpack.i.h.bf16 %v13314_v13  ;;  %vm11743_vm12 = vcmask 924672  }
 0xf3a   : > { %11169 = vmatpush.msrb.mxu0 %v18594_v11  ;;  %v12668_v11 = vld [vmem:[%s18985_s22 + $0x48] sm:$0x3] }
 0xf3b   : > { %12666 = vmatmul.msk.f32.gmra.mxu1 %vm4445_vm3, %v12654_v14 }
 0xf3c   : > { %12663 = vmatmul.msk.f32.gmra.mxu0 %vm4445_vm3, %v12654_v14  ;;  %11075 = vmatpush.msrb.mxu1 %v10968_v49  ;;  %v12710_v49 = vld [vmem:[%s18985_s22 + $0x78] sm:$0x3] }
 0xf3e   : > { %12692 = vmatpush.msk.msra.mxu1 %vm4452_vm2, %v18627_v55  ;;  %v13305_v55 = vunpack.i.l.bf16 %v18790_v31 }
 0xf3f   : > { %v13309_v21 = vpop.permute.xlu0 %13308 }
 0xf40   : > { %12670 = vmatmul.msk.f32.vlgmr.msrb.gmra.mxu2 %vm4445_vm3, %v12667_v1  ;;  %11192 = vmatpush.msra.mxu1 %v18634_v16  ;;  %v11246_v26 = vpop.permute.xlu1 %11245  ;;  %v13310_v41 = vunpack.i.l.bf16 %v13309_v21  ;;  %v11395_v9 = vpop.permute.xlu2 %11394  ;;  %v13311_v16 = vunpack.i.h.bf16 %v13309_v21  ;;  %v11251_v28 = vsel %vm9827_vm11, %v13305_v55, %v13306_v45 }
 0xf41   : > { %12673 = vmatmul.msk.f32.vlgmr.msra.gmra.mxu3 %vm4445_vm3, %v12667_v1 }
 0xf42   : > { %v11252_v8 = vsel %vm9827_vm11, %v13306_v45, %v13310_v41  ;;  %v11253_v35 = vsel %vm9827_vm11, %v13310_v41, %v13311_v16  ;;  %v11254_v7 = vsel %vm9827_vm11, %v13311_v16, %v13316_v54 }
 0xf43   : > { %12679 = vmatmul.msk.f32.vlgmr.msrb.gmra.mxu1 %vm4445_vm3, %v12667_v1 }
 0xf44   : > { %12676 = vmatmul.msk.f32.vlgmr.msra.gmra.mxu0 %vm4445_vm3, %v12667_v1 }
 0xf47   : > { %v11244_v61 = vpop.permute.xlu0 %11243 }
 0xf48   : > { %12671 = vmatmul.msk.f32.gmra.mxu2 %vm4445_vm3, %v12668_v11  ;;  %v11255_v47 = vsel %vm9827_vm11, %v11242_v44, %v11244_v61  ;;  %v11256_v30 = vsel %vm9827_vm11, %v11244_v61, %v11246_v26  ;;  %v11248_v0 = vpop.permute.xlu1 %11247  ;;  %v11397_v37 = vpop.permute.xlu2 %11396  ;;  %v12724_v61 = vld [vmem:[%s18985_s22 + $0x88] sm:$0x3] }
 0xf49   : > { %12674 = vmatmul.msk.f32.gmra.mxu3 %vm4445_vm3, %v12668_v11  ;;  %12697 = vmatpush.msk.msrb.mxu2 %vm4452_vm2, %v11255_v47  ;;  %v11257_v48 = vsel %vm9827_vm11, %v11246_v26, %v11248_v0  ;;  %v11258_v56 = vsel %vm9827_vm11, %v11248_v0, %v13315_v20  ;;  %v11406_v59 = vsel %vm9977_vm7, %v11395_v9, %v11397_v37 }
 0xf4a   : > { %12700 = vmatpush.msk.msra.mxu3 %vm4452_vm2, %v11256_v30  ;;  %12703 = vmatpush.msk.msra.mxu0 %vm4452_vm2, %v11257_v48 }
 0xf4b   : > { %12706 = vmatpush.msk.msrb.mxu1 %vm4452_vm2, %v11258_v56  ;;  %11292 = vmatpush.msrb.mxu2 %v11251_v28 }
 0xf4c   : > { %12680 = vmatmul.msk.f32.gmra.mxu1 %vm4445_vm3, %v12668_v11  ;;  %12677 = vmatmul.msk.f32.gmra.mxu0 %vm4445_vm3, %v12668_v11  ;;  %v12723_v11 = vld [vmem:[%s18985_s22 + $0x80] sm:$0xff] }
 0xf4d   : > { %11315 = vmatpush.msra.mxu3 %v11252_v8  ;;  %11338 = vmatpush.msra.mxu0 %v11253_v35 }
 0xf4e   : > { %11361 = vmatpush.msrb.mxu1 %v11254_v7 }
 0xf4f   : > { %v13319_v2 = vpop.permute.xlu0 %13318 }
 0xf50   : > { %12684 = vmatmul.msk.f32.vlgmr.msra.gmra.mxu2 %vm4445_vm3, %v12681_v19  ;;  %v11393_v32 = vpop.permute.xlu1 %11392  ;;  %v13321_v62 = vunpack.i.h.bf16 %v13319_v2  ;;  %v13320_v23 = vunpack.i.l.bf16 %v13319_v2  ;;  %v11542_v40 = vpop.permute.xlu2 %11541 }
 0xf51   : > { %12687 = vmatmul.msk.f32.vlgmr.msrb.gmra.mxu3 %vm4445_vm3, %v12681_v19  ;;  %v11405_v6 = vsel %vm9977_vm7, %v11393_v32, %v11395_v9 }
 0xf52   : > { %12714 = vmatpush.msk.msrb.mxu3 %vm4452_vm2, %v11405_v6  ;;  %v11400_v29 = vsel %vm9977_vm7, %v13320_v23, %v13321_v62 }
 0xf54   : > { %12693 = vmatmul.msk.f32.vlgmr.msra.gmra.mxu1 %vm4445_vm3, %v12681_v19  ;;  %12690 = vmatmul.msk.f32.vlgmr.msrb.gmra.mxu0 %vm4445_vm3, %v12681_v19 }
 0xf55   : > { %12717 = vmatpush.msk.msrb.mxu0 %vm4452_vm2, %v11406_v59 }
 0xf57   : > { %v11391_v36 = vpop.permute.xlu0 %11390 }
 0xf58   : > { %12685 = vmatmul.msk.f32.gmra.mxu2 %vm4445_vm3, %v12682_v22  ;;  %v11404_v51 = vsel %vm9977_vm7, %v11391_v36, %v11393_v32  ;;  %v13324_v43 = vpop.permute.xlu1 %13323 }
 0xf59   : > { %12688 = vmatmul.msk.f32.gmra.mxu3 %vm4445_vm3, %v12682_v22  ;;  %12711 = vmatpush.msk.msra.mxu2 %vm4452_vm2, %v11404_v51  ;;  %v13326_v50 = vunpack.i.h.bf16 %v13324_v43  ;;  %v13325_v34 = vunpack.i.l.bf16 %v13324_v43 }
 0xf5a   : > { %v11534_v53 = vpop.permute.xlu2 %11533 }
 0xf5b   : > { %11441 = vmatpush.msra.mxu2 %v11400_v29  ;;  %v11401_v38 = vsel %vm9977_vm7, %v13321_v62, %v13325_v34  ;;  %v11402_v3 = vsel %vm9977_vm7, %v13325_v34, %v13326_v50 }
 0xf5c   : > { %12694 = vmatmul.msk.f32.gmra.mxu1 %vm4445_vm3, %v12682_v22  ;;  %12691 = vmatmul.msk.f32.gmra.mxu0 %vm4445_vm3, %v12682_v22 }
 0xf5d   : > { %11464 = vmatpush.msrb.mxu3 %v11401_v38  ;;  %11487 = vmatpush.msrb.mxu0 %v11402_v3 }
 0xf5f   : > { %v13329_v12 = vpop.permute.xlu0 %13328 }
 0xf60   : > { %12698 = vmatmul.msk.f32.vlgmr.msrb.gmra.mxu2 %vm4445_vm3, %v12695_v25  ;;  %v13331_v15 = vunpack.i.h.bf16 %v13329_v12  ;;  %v13330_v17 = vunpack.i.l.bf16 %v13329_v12  ;;  %v11540_v58 = vpop.permute.xlu1 %11539 }
 0xf61   : > { %12701 = vmatmul.msk.f32.vlgmr.msra.gmra.mxu3 %vm4445_vm3, %v12695_v25  ;;  %v11553_v52 = vsel %vm6003_vm10, %v11540_v58, %v11542_v40 }
 0xf62   : > { %v11407_v39 = vsel %vm9977_vm7, %v11397_v37, %v13330_v17  ;;  %12725 = vmatpush.msk.msrb.mxu2 %vm4452_vm2, %v11553_v52  ;;  %v11403_v31 = vsel %vm9977_vm7, %v13326_v50, %v13331_v15 }
 0xf63   : > { %12720 = vmatpush.msk.msra.mxu1 %vm4452_vm2, %v11407_v39  ;;  %v11538_v21 = vpop.permute.xlu2 %11537 }
 0xf64   : > { %12704 = vmatmul.msk.f32.vlgmr.msra.gmra.mxu0 %vm4445_vm3, %v12695_v25  ;;  %12707 = vmatmul.msk.f32.vlgmr.msrb.gmra.mxu1 %vm4445_vm3, %v12695_v25 }
 0xf65   : > { %11510 = vmatpush.msra.mxu1 %v11403_v31 }
 0xf67   : > { %v11544_v46 = vpop.permute.xlu0 %11543 }
 0xf68   : > { %12699 = vmatmul.msk.f32.gmra.mxu2 %vm4445_vm3, %v12696_v57  ;;  %v11554_v27 = vsel %vm6003_vm10, %v11542_v40, %v11544_v46  ;;  %v13334_v4 = vpop.permute.xlu1 %13333 }
 0xf69   : > { %12702 = vmatmul.msk.f32.gmra.mxu3 %vm4445_vm3, %v12696_v57  ;;  %v13336_v63 = vunpack.i.h.bf16 %v13334_v4  ;;  %v13335_v42 = vunpack.i.l.bf16 %v13334_v4 }
 0xf6a   : > { %12728 = vmatpush.msk.msra.mxu3 %vm4452_vm2, %v11554_v27 }
 0xf6b   : > { %v11549_v10 = vsel %vm6003_vm10, %v13335_v42, %v13336_v63  ;;  %v11550_v44 = vsel %vm6003_vm10, %v13336_v63, %v11534_v53 }
 0xf6c   : > { %12705 = vmatmul.msk.f32.gmra.mxu0 %vm4445_vm3, %v12696_v57  ;;  %12708 = vmatmul.msk.f32.gmra.mxu1 %vm4445_vm3, %v12696_v57 }
 0xf6d   : > { %11590 = vmatpush.msrb.mxu2 %v11549_v10  ;;  %11613 = vmatpush.msra.mxu3 %v11550_v44 }
 0xf6f   : > { %v11546_v60 = vpop.permute.xlu0 %11545 }
 0xf70   : > { %12712 = vmatmul.msk.f32.vlgmr.msra.gmra.mxu2 %vm4445_vm3, %v12709_v5  ;;  %v11555_v14 = vsel %vm6003_vm10, %v11544_v46, %v11546_v60 }
 0xf71   : > { %12715 = vmatmul.msk.f32.vlgmr.msrb.gmra.mxu3 %vm4445_vm3, %v12709_v5  ;;  %12731 = vmatpush.msk.msra.mxu0 %vm4452_vm2, %v11555_v14  ;;  %v13339_v24 = vpop.permute.xlu1 %13338 }
 0xf72   : > { %v13341_v18 = vunpack.i.h.bf16 %v13339_v24  ;;  %v13340_v33 = vunpack.i.l.bf16 %v13339_v24 }
 0xf74   : > { %12718 = vmatmul.msk.f32.vlgmr.msrb.gmra.mxu0 %vm4445_vm3, %v12709_v5  ;;  %12721 = vmatmul.msk.f32.vlgmr.msra.gmra.mxu1 %vm4445_vm3, %v12709_v5  ;;  %v11551_v1 = vsel %vm6003_vm10, %v11534_v53, %v13340_v33  ;;  %v11556_v13 = vsel %vm6003_vm10, %v11546_v60, %v13341_v18  ;;  %v11552_v26 = vsel %vm6003_vm10, %v13340_v33, %v11538_v21 }
 0xf75   : > { %11636 = vmatpush.msra.mxu0 %v11551_v1  ;;  %12734 = vmatpush.msk.msrb.mxu1 %vm4452_vm2, %v11556_v13  ;;  %vm11753_vm2 = vcmask 918528  }
 0xf77   : > { %11659 = vmatpush.msrb.mxu1 %v11552_v26 }
 0xf78   : > { %12713 = vmatmul.msk.f32.gmra.mxu2 %vm4445_vm3, %v12710_v49 }
 0xf79   : > { %12716 = vmatmul.msk.f32.gmra.mxu3 %vm4445_vm3, %v12710_v49 }
 0xf7c   : > { %12719 = vmatmul.msk.f32.gmra.mxu0 %vm4445_vm3, %v12710_v49  ;;  %12722 = vmatmul.msk.f32.gmra.mxu1 %vm4445_vm3, %v12710_v49 }
 0xf80   : > { %12726 = vmatmul.msk.f32.vlgmr.msrb.gmra.mxu2 %vm4445_vm3, %v12723_v11  ;;  %v10518_v20 = vpop.f32.mrf.mxu1  ;;  %v10449_v45 = vpop.f32.mrf.mxu2 }
 0xf81   : > { %12729 = vmatmul.msk.f32.vlgmr.msra.gmra.mxu3 %vm4445_vm3, %v12723_v11  ;;  %v10495_v55 = vpop.f32.mrf.mxu0  ;;  %v10472_v41 = vpop.f32.mrf.mxu3 }
 0xf84   : > { %12732 = vmatmul.msk.f32.vlgmr.msra.gmra.mxu0 %vm4445_vm3, %v12723_v11  ;;  %12735 = vmatmul.msk.f32.vlgmr.msrb.gmra.mxu1 %vm4445_vm3, %v12723_v11 }
 0xf88   : > { %12727 = vmatmul.msk.f32.gmra.mxu2 %vm4445_vm3, %v12724_v61  ;;  %v10521_v9 = vpop.f32.mrf.mxu1 }
 0xf89   : > { %12730 = vmatmul.msk.f32.gmra.mxu3 %vm4445_vm3, %v12724_v61  ;;  %v10498_v16 = vpop.f32.mrf.mxu0 }
 0xf8a   : > { %v10452_v54 = vpop.f32.mrf.mxu2 }
 0xf8b   : > { %v10475_v47 = vpop.f32.mrf.mxu3 }
 0xf8c   : > { %12733 = vmatmul.msk.f32.gmra.mxu0 %vm4445_vm3, %v12724_v61  ;;  %12736 = vmatmul.msk.f32.gmra.mxu1 %vm4445_vm3, %v12724_v61  ;;  %vm11786_vm3 = vcmask 7168  }
 0xf90   : > { %v10624_v30 = vpop.f32.mrf.mxu1 }
 0xf91   : > { %v10625_v0 = vadd.f32 %v10624_v30, %v10518_v20  ;;  %v10601_v48 = vpop.f32.mrf.mxu0 }
 0xf92   : > { %v10602_v56 = vadd.f32 %v10601_v48, %v10495_v55  ;;  %v10555_v28 = vpop.f32.mrf.mxu2 }
 0xf93   : > { %v10556_v8 = vadd.f32 %v10555_v28, %v10449_v45  ;;  %v10578_v19 = vpop.f32.mrf.mxu3 }
 0xf94   : > { %v10579_v35 = vadd.f32 %v10578_v19, %v10472_v41 }
 0xf98   : > { %v10627_v7 = vpop.f32.mrf.mxu1 }
 0xf99   : > { %v10628_v2 = vadd.f32 %v10627_v7, %v10521_v9  ;;  %v10604_v32 = vpop.f32.mrf.mxu0 }
 0xf9a   : > { %v10605_v37 = vadd.f32 %v10604_v32, %v10498_v16  ;;  %v10558_v6 = vpop.f32.mrf.mxu2 }
 0xf9b   : > { %v10559_v59 = vadd.f32 %v10558_v6, %v10452_v54  ;;  %v10581_v22 = vpop.f32.mrf.mxu3 }
 0xf9c   : > { %v10582_v62 = vadd.f32 %v10581_v22, %v10475_v47 }
 0xfa0   : > { %v10759_v23 = vpop.f32.mrf.mxu1 }
 0xfa1   : > { %v10768_v36 = vadd.f32 %v10759_v23, %v10625_v0  ;;  %v10736_v51 = vpop.f32.mrf.mxu0 }
 0xfa2   : > { %v10767_v43 = vadd.f32 %v10736_v51, %v10602_v56  ;;  %v10690_v50 = vpop.f32.mrf.mxu2 }
 0xfa3   : > { %v10765_v34 = vadd.f32 %v10690_v50, %v10556_v8  ;;  %v10713_v29 = vpop.f32.mrf.mxu3 }
 0xfa4   : > { %v10766_v38 = vadd.f32 %v10713_v29, %v10579_v35 }
 0xfa8   : > { %v10762_v3 = vpop.f32.mrf.mxu1 }
 0xfa9   : > { %v10772_v25 = vadd.f32 %v10762_v3, %v10628_v2  ;;  %v10739_v12 = vpop.f32.mrf.mxu0 }
 0xfaa   : > { %v10771_v40 = vadd.f32 %v10739_v12, %v10605_v37  ;;  %v10693_v15 = vpop.f32.mrf.mxu2 }
 0xfab   : > { %v10769_v17 = vadd.f32 %v10693_v15, %v10559_v59  ;;  %v10716_v58 = vpop.f32.mrf.mxu3 }
 0xfac   : > { %v10770_v52 = vadd.f32 %v10716_v58, %v10582_v62 }
 0xfb0   : > { %v10928_v39 = vpop.f32.mrf.mxu1 }
 0xfb1   : > { %v10937_v31 = vadd.f32 %v10928_v39, %v10768_v36  ;;  %v10905_v57 = vpop.f32.mrf.mxu0 }
 0xfb2   : > { %v10936_v46 = vadd.f32 %v10905_v57, %v10767_v43  ;;  %v10859_v27 = vpop.f32.mrf.mxu2 }
 0xfb3   : > { %v10934_v4 = vadd.f32 %v10859_v27, %v10765_v34  ;;  %v10882_v63 = vpop.f32.mrf.mxu3 }
 0xfb4   : > { %v10935_v42 = vadd.f32 %v10882_v63, %v10766_v38  ;;  %v18936_v38 = vpop.permute.xlu0 %11692 }
 0xfb8   : > { %v10931_v53 = vpop.f32.mrf.mxu1 }
 0xfb9   : > { %v10941_v10 = vadd.f32 %v10931_v53, %v10772_v25  ;;  %v10908_v44 = vpop.f32.mrf.mxu0  ;;  %v18941_v53 = vld [vmem:[%s18989_s26] sm:$0xf] }
 0xfba   : > { %v10940_v5 = vadd.f32 %v10908_v44, %v10771_v40 }
 0xfbb   : > { %v10862_v60 = vpop.f32.mrf.mxu2  ;;  %v10885_v24 = vpop.f32.mrf.mxu3 }
 0xfbc   : > { %v10938_v14 = vadd.f32 %v10862_v60, %v10769_v17  ;;  %v10939_v18 = vadd.f32 %v10885_v24, %v10770_v52 }
 0xfc0   : > { %v11077_v33 = vpop.f32.mrf.mxu1 }
 0xfc1   : > { %v11054_v49 = vpop.f32.mrf.mxu0  ;;  %v11086_v62 = vadd.f32 %v11077_v33, %v10937_v31 }
 0xfc2   : > { %v11085_v22 = vadd.f32 %v11054_v49, %v10936_v46 }
 0xfc3   : > { %v11008_v1 = vpop.f32.mrf.mxu2 }
 0xfc4   : > { %v11031_v13 = vpop.f32.mrf.mxu3  ;;  %v11083_v36 = vadd.f32 %v11008_v1, %v10934_v4 }
 0xfc5   : > { %v11084_v43 = vadd.f32 %v11031_v13, %v10935_v42 }
 0xfc9   : > { %v11080_v21 = vpop.f32.mrf.mxu1  ;;  %v11057_v26 = vpop.f32.mrf.mxu0 }
 0xfca   : > { %v11089_v52 = vadd.f32 %v11057_v26, %v10940_v5  ;;  %v11090_v39 = vadd.f32 %v11080_v21, %v10941_v10  ;;  %v11688_v26 = vpop.permute.xlu1 %11687 }
 0xfcb   : > { %v11011_v11 = vpop.f32.mrf.mxu2 }
 0xfcc   : > { %v11034_v20 = vpop.f32.mrf.mxu3  ;;  %v11087_v57 = vadd.f32 %v11011_v11, %v10938_v14 }
 0xfcd   : > { %v11088_v4 = vadd.f32 %v11034_v20, %v10939_v18  ;;  %v11727_v20 = vperm.slane %v18941_v53, 2 }
 0xfd1   : > { %v11194_v45 = vpop.f32.mrf.mxu1  ;;  %v11171_v55 = vpop.f32.mrf.mxu0 }
 0xfd2   : > { %v11202_v50 = vadd.f32 %v11171_v55, %v11085_v22  ;;  %v11203_v34 = vadd.f32 %v11194_v45, %v11086_v62 }
 0xfd3   : > { %v11125_v41 = vpop.f32.mrf.mxu2 }
 0xfd4   : > { %v11148_v61 = vpop.f32.mrf.mxu3  ;;  %v11200_v29 = vadd.f32 %v11125_v41, %v11083_v36 }
 0xfd5   : > { %v11201_v3 = vadd.f32 %v11148_v61, %v11084_v43  ;;  %v11725_v61 = vperm.slane %v18941_v53, 0 }
 0xfd9   : > { %v11197_v9 = vpop.f32.mrf.mxu1  ;;  %v11174_v16 = vpop.f32.mrf.mxu0 }
 0xfda   : > { %v11206_v24 = vadd.f32 %v11174_v16, %v11089_v52  ;;  %v11207_v33 = vadd.f32 %v11197_v9, %v11090_v39  ;;  %v11713_v39 = vpop.permute.xlu2 %11712 }
 0xfdb   : > { %v11128_v54 = vpop.f32.mrf.mxu2 }
 0xfdc   : > { %v11151_v47 = vpop.f32.mrf.mxu3  ;;  %v11204_v49 = vadd.f32 %v11128_v54, %v11087_v57  ;;  %v11726_v54 = vperm.slane %v18941_v53, 1 }
 0xfdd   : > { %v11205_v10 = vadd.f32 %v11151_v47, %v11088_v4  ;;  %v11728_v47 = vperm.slane %v18941_v53, 3 }
 0xfe1   : > { %v11340_v30 = vpop.f32.mrf.mxu0  ;;  %v11363_v0 = vpop.f32.mrf.mxu1 }
 0xfe2   : > { %v11371_v25 = vadd.f32 %v11340_v30, %v11202_v50  ;;  %v11372_v12 = vadd.f32 %v11363_v0, %v11203_v34  ;;  %v11708_v0 = vpop.permute.xlu0 %11707 }
 0xfe3   : > { %v11294_v48 = vpop.f32.mrf.mxu2 }
 0xfe4   : > { %v11317_v56 = vpop.f32.mrf.mxu3  ;;  %v11369_v40 = vadd.f32 %v11294_v48, %v11200_v29 }
 0xfe5   : > { %v11370_v15 = vadd.f32 %v11317_v56, %v11201_v3 }
 0xfe9   : > { %v11343_v28 = vpop.f32.mrf.mxu0  ;;  %v11366_v8 = vpop.f32.mrf.mxu1 }
 0xfea   : > { %v11375_v18 = vadd.f32 %v11343_v28, %v11206_v24  ;;  %v11376_v11 = vadd.f32 %v11366_v8, %v11207_v33 }
 0xfeb   : > { %v11297_v19 = vpop.f32.mrf.mxu2 }
 0xfec   : > { %v11320_v35 = vpop.f32.mrf.mxu3  ;;  %v11373_v16 = vadd.f32 %v11297_v19, %v11204_v49 }
 0xfed   : > { %v11374_v48 = vadd.f32 %v11320_v35, %v11205_v10 }
 0xff1   : > { %v11489_v7 = vpop.f32.mrf.mxu0  ;;  %v11512_v2 = vpop.f32.mrf.mxu1 }
 0xff2   : > { %v11520_v17 = vadd.f32 %v11489_v7, %v11371_v25  ;;  %v11521_v58 = vadd.f32 %v11512_v2, %v11372_v12 }
 0xff3   : > { %v11443_v32 = vpop.f32.mrf.mxu2 }
 0xff4   : > { %v11466_v37 = vpop.f32.mrf.mxu3  ;;  %v11518_v31 = vadd.f32 %v11443_v32, %v11369_v40 }
 0xff5   : > { %v11519_v63 = vadd.f32 %v11466_v37, %v11370_v15 }
 0xff9   : > { %v11492_v6 = vpop.f32.mrf.mxu0  ;;  %v11515_v59 = vpop.f32.mrf.mxu1 }
 0xffa   : > { %v11524_v56 = vadd.f32 %v11492_v6, %v11375_v18  ;;  %v11525_v7 = vadd.f32 %v11515_v59, %v11376_v11 }
 0xffb   : > { %v11446_v23 = vpop.f32.mrf.mxu2 }
 0xffc   : > { %v11469_v51 = vpop.f32.mrf.mxu3  ;;  %v11522_v8 = vadd.f32 %v11446_v23, %v11373_v16 }
 0xffd   : > { %v11523_v36 = vadd.f32 %v11469_v51, %v11374_v48 }
0x1001   : > { %v11638_v46 = vpop.f32.mrf.mxu0  ;;  %v11661_v27 = vpop.f32.mrf.mxu1 }
0x1002   : > { %v11669_v42 = vadd.f32 %v11638_v46, %v11520_v17  ;;  %v11670_v44 = vadd.f32 %v11661_v27, %v11521_v58 }
0x1003   : > { %v11592_v60 = vpop.f32.mrf.mxu2 }
0x1004   : > { %v11667_v1 = vadd.f32 %v11592_v60, %v11518_v31  ;;  %v11615_v5 = vpop.f32.mrf.mxu3  ;;  %v11677_v14 = vmax.f32 %v11669_v42, 0.0  ;;  %v11678_v13 = vmax.f32 %v11670_v44, 0.0 }
0x1005   : > { %v11668_v21 = vadd.f32 %v11615_v5, %v11519_v63 }
0x1006   : > { %v11675_v45 = vmax.f32 %v11667_v1, 0.0  ;;  %v11697_v55 = vmul.f32 %v11688_v26, %v11677_v14  ;;  %v11698_v41 = vmul.f32 %v11688_v26, %v11678_v13 }
0x1007   : > { %v11676_v30 = vmax.f32 %v11668_v21, 0.0 }
0x1008   : > { %v11695_v9 = vmul.f32 %v11688_v26, %v11675_v45  ;;  %v11717_v2 = vadd.f32 %v11708_v0, %v11697_v55  ;;  %v11718_v32 = vadd.f32 %v11708_v0, %v11698_v41 }
0x1009   : > { %v11696_v28 = vmul.f32 %v11688_v26, %v11676_v30  ;;  %v11641_v22 = vpop.f32.mrf.mxu0  ;;  %v11664_v62 = vpop.f32.mrf.mxu1 }
0x100a   : > { %v11715_v37 = vadd.f32 %v11708_v0, %v11695_v9  ;;  %v11673_v50 = vadd.f32 %v11641_v22, %v11524_v56  ;;  %v11674_v19 = vadd.f32 %v11664_v62, %v11525_v7  ;;  %v11735_v59 = vmul.f32 %v11727_v20, %v11717_v2 }
0x100b   : > { %v11716_v43 = vadd.f32 %v11708_v0, %v11696_v28  ;;  %v11595_v34 = vpop.f32.mrf.mxu2  ;;  %v11736_v23 = vmul.f32 %v11728_v47, %v11718_v32 }
0x100c   : > { %v11733_v29 = vmul.f32 %v11725_v61, %v11715_v37  ;;  %v11671_v3 = vadd.f32 %v11595_v34, %v11522_v8  ;;  %v11618_v25 = vpop.f32.mrf.mxu3  ;;  %v11681_v40 = vmax.f32 %v11673_v50, 0.0  ;;  %v11682_v35 = vmax.f32 %v11674_v19, 0.0 }
0x100d   : > { %v11734_v12 = vmul.f32 %v11726_v54, %v11716_v43  ;;  %v11672_v6 = vadd.f32 %v11618_v25, %v11523_v36  ;;  %v11744_v63 = vsel %vm11743_vm12, %v11736_v23, 0.0 }
0x100e   : > { %v11679_v15 = vmax.f32 %v11671_v3, 0.0  ;;  %v11701_v17 = vmul.f32 %v18936_v38, %v11681_v40  ;;  %v11702_v58 = vmul.f32 %v18936_v38, %v11682_v35 }
0x100f   : > { %v11680_v51 = vmax.f32 %v11672_v6, 0.0  ;;  %v11741_v52 = vadd.f32 %v11734_v12, %v11733_v29 }
0x1010   : > { %v11699_v57 = vmul.f32 %v18936_v38, %v11679_v15  ;;  %v11721_v31 = vadd.f32 %v11713_v39, %v11701_v17  ;;  %v11722_v42 = vadd.f32 %v11713_v39, %v11702_v58 }
0x1011   : > { %v11700_v46 = vmul.f32 %v18936_v38, %v11680_v51  ;;  %v11742_v27 = vadd.f32 %v11741_v52, %v11735_v59 }
0x1012   : > { %v11719_v4 = vadd.f32 %v11713_v39, %v11699_v57  ;;  %v11739_v24 = vmul.f32 %v11727_v20, %v11721_v31  ;;  %v11740_v1 = vmul.f32 %v11728_v47, %v11722_v42 }
0x1013   : > { %v11720_v53 = vadd.f32 %v11713_v39, %v11700_v46  ;;  %v11745_v44 = vadd.f32 %v11744_v63, %v11742_v27 }
0x1014   : > { %v11737_v60 = vmul.f32 %v11725_v61, %v11719_v4  ;;  %v11751_v14 = vsel %vm2091_vm14, %v11739_v24, 0.0  ;;  %v11754_v13 = vsel %vm11753_vm2, %v11740_v1, 0.0 }
0x1015   : > { %v11738_v33 = vmul.f32 %v11726_v54, %v11720_v53  ;;  %11746 = vadd.xlane.f32.xlu2 %v11745_v44 }
0x1016   : > { %v11748_v49 = vsel %vm2091_vm14, %v11737_v60, 0.0 }
0x1017   : > { %v11749_v5 = vsel %vm2091_vm14, %v11738_v33, 0.0 }
0x1018   : > { %v11750_v10 = vadd.f32 %v11749_v5, %v11748_v49 }
0x101a   : > { %v11752_v38 = vadd.f32 %v11751_v14, %v11750_v10 }
0x101c   : > { %v11755_v21 = vadd.f32 %v11754_v13, %v11752_v38 }
0x101e   : > { %11756 = vadd.xlane.f32.xlu1 %v11755_v21 }
0x1088   : > { %v11747_v26 = vpop.xlane.xlu2 %11746 }
0x1089   : > { %v11758_v45 = vmul.f32 0.04, %v11747_v26 }
0x1091   : > { %v11757_v18 = vpop.xlane.xlu1 %11756 }
0x1092   : > { %v11759_v11 = vmul.f32 0.04, %v11757_v18 }
0x1094   : > { %v11760_v20 = vsel %vm2091_vm14, %v11759_v11, -inf }
0x1095   : > { %v11761_v55 = vmax.f32 %v11758_v45, %v11760_v20 }
0x1097   : > { %v11762_v41 = vrot.slane %v11761_v55, 4 }
0x1099   : > { %v11763_v61 = vmax.f32 %v11761_v55, %v11762_v41 }
0x109b   : > { %v11764_v30 = vrot.slane %v11763_v61, 2 }
0x109d   : > { %v11765_v16 = vmax.f32 %v11763_v61, %v11764_v30 }
0x109f   : > { %v11766_v9 = vrot.slane %v11765_v16, 1 }
0x10a1   : > { %v11767_v54 = vmax.f32 %v11765_v16, %v11766_v9 }
0x10a3   : > { %v11768_v47 = vsub.f32 %v11758_v45, %v11767_v54  ;;  %v11769_v0 = vsub.f32 %v11759_v11, %v11767_v54 }
0x10a5   : > { %v11770_v48 = vmul.f32 1.442695, %v11768_v47  ;;  %v11772_v56 = vmul.f32 1.442695, %v11769_v0 }
0x10a7   : > { %13342 = vpow2.f32 %v11770_v48 }
0x10a8   : > { %13344 = vpow2.f32 %v11772_v56 }
0x10ad   : > { %v13343_v7 = vpop.eup %13342 }
0x10ae   : > { %v13345_v28 = vpop.eup %13344 }
0x10af   : > { %v11774_v8 = vsel %vm2091_vm14, %v13345_v28, 0.0 }
0x10b0   : > { %v11775_v2 = vadd.f32 %v13343_v7, %v11774_v8 }
0x10b2   : > { %v11776_v32 = vrot.slane %v11775_v2, 4 }
0x10b4   : > { %v11777_v37 = vadd.f32 %v11776_v32, %v11775_v2 }
0x10b6   : > { %v11778_v22 = vrot.slane %v11777_v37, 2 }
0x10b8   : > { %v11779_v62 = vadd.f32 %v11778_v22, %v11777_v37 }
0x10ba   : > { %v11780_v36 = vrot.slane %v11779_v62, 1 }
0x10bc   : > { %v11781_v43 = vadd.f32 %v11780_v36, %v11779_v62 }
0x10be   : > { %13346 = vlog2.f32 %v11781_v43 }
0x10c4   : > { %v13347_v50 = vpop.eup %13346 }
0x10c5   : > { %v11783_v19 = vmul.f32 0.6931472, %v13347_v50 }
0x10c7   : > { %v11784_v34 = vsub.f32 %v11768_v47, %v11783_v19  ;;  %v11785_v29 = vsub.f32 %v11769_v0, %v11783_v19 }
0x10c9   : > { %11787 = vst.msk [vmem:[%s815_s3] sm:$0xff] %vm11786_vm3, %v11784_v34 }
0x10ca   : > { %11789 = vst.msk [vmem:[%s815_s3 + $0x8] sm:$0x3] %vm11788_vm6, %v11785_v29 }
0x10cb PF: > { %s37_s7 = sadd.s32 1, %s13357_s7  }
0x10cc   : > { %p34_p4 = scmp.ge.s32.totalorder %s37_s7, 4  }
0x10ce   :  { %36 = sbr.rel (!%p34_p4) target bundleno = 14 (0xe), region = 206 }

</bundles_post_ra>
